<compile_context>
chip_gen: v7x
topology: tpu7x:2x2x1
jax: 0.10.0
libtpu: 0.0.40
codegen_flags: <defaults>
</compile_context>

<pallas_src>
import functools

import jax
import jax.numpy as jnp
from jax import lax
from jax.experimental import pallas as pl
from jax.experimental.pallas import tpu as pltpu

H = 128            # LSTM hidden size (per direction)
D_IN = 768         # encoder hidden size
NUM_LABELS = 8     # num_labels
LANE = 128         # lane padding for the classification-head output (dense vst)


def _ceil_to(x, m):
    return -(-x // m) * m


# --------------------------------- kernel ----------------------------------

def _bilstm_heads_kernel(*refs, compute_ner, fused_hh):
    if compute_ner:
        (cls_x_ref, ner_x_ref,
         wih_ref, bias_ref, whh_ref,
         w_lin_ref, b_lin_ref, w_ner_ref, b_ner_ref,
         logits_ref, ner_logits_ref,
         xg_ref, seq_ref) = refs
    else:
        (cls_x_ref,
         wih_ref, bias_ref, whh_ref,
         w_lin_ref, b_lin_ref,
         logits_ref,
         xg_ref) = refs

    T, BB, D = cls_x_ref.shape
    BT = xg_ref.shape[1]              # BB (cls only) or 2*BB (cls + ner)
    f32 = jnp.float32
    bf16 = jnp.bfloat16

    # ----- fused input projection: bf16 MXU, f32 acc, bf16 gate scratch -----
    bias = bias_ref[...]              # [1, 8H] f32 (per-direction order i,f,o,g)

    def project(x_ref, row0):
        x_flat = x_ref[...].reshape(T * BB, D)                       # bf16
        g = jnp.dot(x_flat, wih_ref[...], preferred_element_type=f32) + bias
        xg_ref[:, row0:row0 + BB, :] = g.reshape(T, BB, 8 * H).astype(bf16)

    project(cls_x_ref, 0)
    if compute_ner:
        project(ner_x_ref, BB)

    # recurrent weight: [2H, 8H] bf16 block-diagonal (fwd rows -> fwd cols,
    # bwd rows -> bwd cols). Fused path uses it whole (K=256, fills the v6e/v7x
    # 256-wide MXU); dual path (v5*) uses the two compact K=128 diagonal blocks.
    if fused_hh:
        whh = whh_ref[...]
    else:
        whh_f = whh_ref[0:H, 0:4 * H]
        whh_b = whh_ref[H:2 * H, 4 * H:8 * H]

    # ----- shared LSTM cell math (gate order per direction: i, f, o, g) -----
    def cell(gates, c):
        sig = jax.nn.sigmoid(gates[:, 0:3 * H])      # one EUP push for i, f, o
        g = jnp.tanh(gates[:, 3 * H:4 * H])
        i = sig[:, 0:H]
        f = sig[:, H:2 * H]
        o = sig[:, 2 * H:3 * H]
        c_new = f * c + i * g
        h_new = o * jnp.tanh(c_new)
        return h_new, c_new

    h0 = jnp.zeros((BT, H), f32)

    def step(t, hf, cf, hb, cb):
        s = T - 1 - t
        gx_f = xg_ref[t, :, 0:4 * H].astype(f32)
        gx_b = xg_ref[s, :, 4 * H:8 * H].astype(f32)
        if fused_hh:
            h_cat = jnp.concatenate([hf, hb], axis=1).astype(bf16)   # [BT, 2H]
            hh = jnp.dot(h_cat, whh, preferred_element_type=f32)     # [BT, 8H]
            hf, cf = cell(gx_f + hh[:, 0:4 * H], cf)
            hb, cb = cell(gx_b + hh[:, 4 * H:8 * H], cb)
        else:
            hh_f = jnp.dot(hf.astype(bf16), whh_f, preferred_element_type=f32)
            hh_b = jnp.dot(hb.astype(bf16), whh_b, preferred_element_type=f32)
            hf, cf = cell(gx_f + hh_f, cf)
            hb, cb = cell(gx_b + hh_b, cb)
        if compute_ner:
            # only the NER stream rows need per-step outputs
            seq_ref[t, :, 0:H] = hf[BB:BT, :].astype(seq_ref.dtype)
            seq_ref[s, :, H:2 * H] = hb[BB:BT, :].astype(seq_ref.dtype)
        return hf, cf, hb, cb

    # fwd/bwd recurrences fused in one loop, manually unrolled for LLO visibility
    U = 4 if T % 4 == 0 else (2 if T % 2 == 0 else 1)

    def outer_step(it, carry):
        hf, cf, hb, cb = carry
        t0 = it * U
        for j in range(U):
            hf, cf, hb, cb = step(t0 + j, hf, cf, hb, cb)
        return hf, cf, hb, cb

    hf, cf, hb, cb = lax.fori_loop(0, T // U, outer_step, (h0, h0, h0, h0))
    del cf, cb

    # ----- classification head (lane-padded to 128 output columns) -----
    hn = jnp.concatenate([hf[0:BB, :], hb[0:BB, :]], axis=1).astype(bf16)
    logits_ref[...] = (jnp.dot(hn, w_lin_ref[...], preferred_element_type=f32)
                       + b_lin_ref[...])

    # ----- NER head: narrow [T, BB, 2] output (tiny HBM writeback) -----
    if compute_ner:
        ner_seq = seq_ref[...].reshape(T * BB, 2 * H)                 # bf16
        z = (jnp.dot(ner_seq, w_ner_ref[...], preferred_element_type=f32)
             + b_ner_ref[...])
        ner_logits_ref[...] = z[:, 0:2].reshape(T, BB, 2)


# ------------------------------ param packing ------------------------------

def _reorder_ifog(w):
    """Torch LSTM gate blocks (i, f, g, o) along axis 0 -> (i, f, o, g)."""
    return jnp.concatenate([w[0:H], w[H:2 * H], w[3 * H:4 * H], w[2 * H:3 * H]],
                           axis=0)


def pack_params(raw):
    """Torch-layout LSTM / head weights -> fused, reordered kernel layout."""
    f32 = jnp.float32
    bf16 = jnp.bfloat16

    wih_all = jnp.concatenate([_reorder_ifog(raw["wih_f"]).T,
                               _reorder_ifog(raw["wih_b"]).T],
                              axis=1).astype(bf16)                    # [768, 8H]
    b_all = jnp.concatenate([_reorder_ifog(raw["bih_f"] + raw["bhh_f"]),
                             _reorder_ifog(raw["bih_b"] + raw["bhh_b"])]
                            ).reshape(1, 8 * H).astype(f32)

    whh_blk = jnp.zeros((2 * H, 8 * H), f32)
    whh_blk = whh_blk.at[0:H, 0:4 * H].set(_reorder_ifog(raw["whh_f"]).T)
    whh_blk = whh_blk.at[H:2 * H, 4 * H:8 * H].set(_reorder_ifog(raw["whh_b"]).T)
    whh_blk = whh_blk.astype(bf16)                                    # [2H, 8H]

    def pad_head(w_t, b_v):
        out = w_t.shape[1]
        w_p = jnp.zeros((2 * H, LANE), bf16).at[:, :out].set(w_t.astype(bf16))
        b_p = jnp.zeros((1, LANE), f32).at[:, :out].set(b_v.astype(f32))
        return w_p, b_p

    w_lin_p, b_lin_p = pad_head(raw["w_lin"].T, raw["b_lin_v"])
    w_ner_p, b_ner_p = pad_head(raw["w_ner"].T, raw["b_ner_v"])
    return {
        "wih_all": wih_all, "b_all": b_all, "whh_blk": whh_blk,
        "w_lin": w_lin_p, "b_lin": b_lin_p,
        "w_ner": w_ner_p, "b_ner": b_ner_p,
    }


# --------------------------------- wrapper ---------------------------------

def _default_hh_fused():
    # v5e/v5p MXUs are 128 wide -> keep the dual K=128 dots; v6e/v7x (256-wide)
    # prefer the single block-diagonal K=256 dot.
    try:
        kind = jax.devices()[0].device_kind.lower()
    except Exception:
        return True
    return "v5" not in kind


def _vmem_capacity_bytes():
    try:
        cap = getattr(pltpu.get_tpu_info(), "vmem_capacity_bytes", None)
        if cap:
            return int(cap)
    except Exception:
        pass
    return 64 * 1024 * 1024        # conservative (v7x physical VMEM)


def _vmem_need_bytes(T, BB, BT, compute_ner):
    bt_phys = _ceil_to(BT, 16)                         # bf16 sublane packing
    n_streams = 2 if compute_ner else 1
    need = 2 * n_streams * T * BB * D_IN * 2           # double-buffered bf16 x blocks
    need += 2 * (D_IN * 8 * H) * 2                     # wih_all bf16 (x2 buffers)
    need += 2 * (8 * H) * 4                            # fused bias f32
    need += 2 * (2 * H * 8 * H) * 2                    # whh_blk bf16
    need += 2 * 2 * (2 * H * LANE * 2 + LANE * 4)      # head weights bf16 + biases f32
    need += T * bt_phys * 8 * H * 2                    # xg scratch bf16
    need += 2 * BB * LANE * 4                          # logits out blocks
    if compute_ner:
        need += T * _ceil_to(BB, 16) * 2 * H * 2       # seq scratch bf16
        need += 2 * T * BB * LANE * 4                  # ner out blocks (lane-padded in VMEM)
    return need


def lstm_multitask_forward(cls_hidden, ner_hidden, params, *,
                           compute_ner=False, block_b=32, hh_fused=None):
    """cls_hidden / ner_hidden: [B, T, 768] float32 (encoder outputs).

    compute_ner=False (the labels=None return path of the module) returns only
    `logits` [B, num_labels] and skips the NER head entirely.
    compute_ner=True also returns ner_logits [B, T, 2].
    """
    B, T, D = cls_hidden.shape
    assert D == D_IN
    if hh_fused is None:
        hh_fused = _default_hh_fused()

    # batch block: multiple of 8 sublanes; prefer >=2 grid steps (v7x has 2 TCs)
    B8 = _ceil_to(B, 8)
    BB = min(_ceil_to(max(block_b, 8), 8), B8)
    if B8 >= 16:
        BB = min(BB, max(8, (B8 // 2) // 8 * 8))
    B_pad = _ceil_to(B, BB)
    nb = B_pad // BB
    BT = 2 * BB if compute_ner else BB

    def prep(x):
        # TODO(synk): this bf16 cast + time-major transpose is an extra HBM pass;
        # in the full model the encoder should emit time-major bf16 directly.
        x = x.astype(jnp.bfloat16)
        if B_pad != B:
            x = jnp.pad(x, ((0, B_pad - B), (0, 0), (0, 0)))
        return jnp.transpose(x, (1, 0, 2))     # time-major [T, B_pad, D]

    cls_tm = prep(cls_hidden)

    x_spec = pl.BlockSpec((T, BB, D_IN), lambda b: (0, b, 0))

    def full_spec(shape):
        nd = len(shape)
        return pl.BlockSpec(shape, lambda b, _nd=nd: (0,) * _nd)

    w_specs = [
        full_spec((D_IN, 8 * H)),              # wih_all (bf16)
        full_spec((1, 8 * H)),                 # b_all (f32)
        full_spec((2 * H, 8 * H)),             # whh_blk (bf16, block-diagonal)
        full_spec((2 * H, LANE)),              # w_lin (bf16, lane-padded)
        full_spec((1, LANE)),                  # b_lin
    ]
    w_args = [params["wih_all"], params["b_all"], params["whh_blk"],
              params["w_lin"], params["b_lin"]]

    logits_shape = jax.ShapeDtypeStruct((B_pad, LANE), jnp.float32)
    logits_spec = pl.BlockSpec((BB, LANE), lambda b: (b, 0))

    scratch = [pltpu.VMEM((T, BT, 8 * H), jnp.bfloat16)]   # fused fwd|bwd input gates

    if compute_ner:
        ner_tm = prep(ner_hidden)
        inputs = [cls_tm, ner_tm] + w_args + [params["w_ner"], params["b_ner"]]
        in_specs = [x_spec, x_spec] + w_specs + [full_spec((2 * H, LANE)),
                                                 full_spec((1, LANE))]
        out_shape = (logits_shape,
                     jax.ShapeDtypeStruct((T, B_pad, 2), jnp.float32))
        out_specs = (logits_spec,
                     pl.BlockSpec((T, BB, 2), lambda b: (0, b, 0)))
        scratch.append(pltpu.VMEM((T, BB, 2 * H), jnp.bfloat16))   # NER-stream seq
    else:
        inputs = [cls_tm] + w_args
        in_specs = [x_spec] + w_specs
        out_shape = logits_shape
        out_specs = logits_spec

    # VMEM budget: generation-aware cap (v7x has only 64 MiB physical).
    need = _vmem_need_bytes(T, BB, BT, compute_ner)
    cap = _vmem_capacity_bytes()
    vmem_limit = max(32 * 1024 * 1024, need + max(need // 4, 4 * 1024 * 1024))
    vmem_limit = min(vmem_limit, cap - 8 * 1024 * 1024)
    vmem_limit = int(max(vmem_limit, 16 * 1024 * 1024))

    kernel = functools.partial(_bilstm_heads_kernel,
                               compute_ner=compute_ner, fused_hh=hh_fused)

    out = pl.pallas_call(
        kernel,
        grid=(nb,),
        out_shape=out_shape,
        in_specs=in_specs,
        out_specs=out_specs,
        scratch_shapes=scratch,
        compiler_params=pltpu.CompilerParams(
            dimension_semantics=("parallel",),      # batch blocks -> both v7x TCs
            vmem_limit_bytes=vmem_limit),
    )(*inputs)

    if compute_ner:
        logits_p, ner_p = out
        logits = logits_p[:B, :NUM_LABELS]
        ner_logits = jnp.transpose(ner_p[:, :B, :], (1, 0, 2))   # [B, T, 2] batch_first
        return logits, ner_logits
    return out[:B, :NUM_LABELS]


# ----------------------- pure-JAX reference (for checking) -----------------------

def _lstm_dir_ref(x, w_ih, w_hh, b, reverse):
    # x: [B, T, D]; w_ih: [4H, D]; w_hh: [4H, H]; b: [4H] (torch i,f,g,o order)
    Bb, T, _ = x.shape

    def step(carry, xt):
        h, c = carry
        gates = xt @ w_ih.T + h @ w_hh.T + b
        i, f, g, o = jnp.split(gates, 4, axis=1)
        c = jax.nn.sigmoid(f) * c + jax.nn.sigmoid(i) * jnp.tanh(g)
        h = jax.nn.sigmoid(o) * jnp.tanh(c)
        return (h, c), h

    xs = jnp.transpose(x, (1, 0, 2))
    if reverse:
        xs = xs[::-1]
    (hT, _), hs = lax.scan(step, (jnp.zeros((Bb, H)), jnp.zeros((Bb, H))), xs)
    if reverse:
        hs = hs[::-1]
    return jnp.transpose(hs, (1, 0, 2)), hT


def reference_forward(cls_hidden, ner_hidden, raw):
    _, hT_f = _lstm_dir_ref(cls_hidden, raw["wih_f"], raw["whh_f"], raw["bsum_f"], False)
    _, hT_b = _lstm_dir_ref(cls_hidden, raw["wih_b"], raw["whh_b"], raw["bsum_b"], True)
    hn = jnp.concatenate([hT_f, hT_b], axis=1)
    logits = hn @ raw["w_lin"].T + raw["b_lin_v"]

    seq_f, _ = _lstm_dir_ref(ner_hidden, raw["wih_f"], raw["whh_f"], raw["bsum_f"], False)
    seq_b, _ = _lstm_dir_ref(ner_hidden, raw["wih_b"], raw["whh_b"], raw["bsum_b"], True)
    ner_seq = jnp.concatenate([seq_f, seq_b], axis=-1)              # [B, T, 2H]
    ner_logits = ner_seq @ raw["w_ner"].T + raw["b_ner_v"]
    return logits, ner_logits


# ------------------------------------ main ---------------------------------------

if __name__ == "__main__":
    B, T = 2, 8
    key = jax.random.PRNGKey(0)
    ks = jax.random.split(key, 16)

    # Synthetic encoder outputs standing in for the pretrained ELECTRA models.
    cls_hidden = jax.random.normal(ks[0], (B, T, D_IN), jnp.float32)
    ner_hidden = jax.random.normal(ks[1], (B, T, D_IN), jnp.float32)

    s = 0.05
    raw = {
        "wih_f":   s * jax.random.normal(ks[2],  (4 * H, D_IN), jnp.float32),
        "whh_f":   s * jax.random.normal(ks[3],  (4 * H, H),    jnp.float32),
        "bih_f":   s * jax.random.normal(ks[4],  (4 * H,),      jnp.float32),
        "bhh_f":   s * jax.random.normal(ks[5],  (4 * H,),      jnp.float32),
        "wih_b":   s * jax.random.normal(ks[6],  (4 * H, D_IN), jnp.float32),
        "whh_b":   s * jax.random.normal(ks[7],  (4 * H, H),    jnp.float32),
        "bih_b":   s * jax.random.normal(ks[8],  (4 * H,),      jnp.float32),
        "bhh_b":   s * jax.random.normal(ks[9],  (4 * H,),      jnp.float32),
        "w_lin":   s * jax.random.normal(ks[10], (NUM_LABELS, 2 * H), jnp.float32),
        "b_lin_v": s * jax.random.normal(ks[11], (NUM_LABELS,), jnp.float32),
        "w_ner":   s * jax.random.normal(ks[12], (2, 2 * H), jnp.float32),
        "b_ner_v": s * jax.random.normal(ks[13], (2,), jnp.float32),
    }
    raw["bsum_f"] = raw["bih_f"] + raw["bhh_f"]
    raw["bsum_b"] = raw["bih_b"] + raw["bhh_b"]

    params = pack_params(raw)

    auto_fused = _default_hh_fused()
    fwd_full = jax.jit(lambda c, n, p: lstm_multitask_forward(c, n, p, compute_ner=True))
    fwd_cls = jax.jit(lambda c, n, p: lstm_multitask_forward(c, n, p, compute_ner=False))
    # Exercise the other recurrent-matmul path too (block-diag K=256 vs dual K=128).
    fwd_alt = jax.jit(lambda c, n, p: lstm_multitask_forward(
        c, n, p, compute_ner=True, hh_fused=not auto_fused))

    logits, ner_logits = jax.block_until_ready(fwd_full(cls_hidden, ner_hidden, params))
    logits_only = jax.block_until_ready(fwd_cls(cls_hidden, ner_hidden, params))
    logits_alt, ner_alt = jax.block_until_ready(fwd_alt(cls_hidden, ner_hidden, params))

    logits_ref, ner_ref = reference_forward(cls_hidden, ner_hidden, raw)

    assert logits.shape == (B, NUM_LABELS)
    assert logits_only.shape == (B, NUM_LABELS)
    assert ner_logits.shape == (B, T, 2)
    # bf16 operands in projection / recurrence vs f32 reference -> relaxed tolerance.
    tol = dict(rtol=3e-2, atol=3e-2)
    assert bool(jnp.allclose(logits, logits_ref, **tol)), "logits mismatch"
    assert bool(jnp.allclose(logits_only, logits_ref, **tol)), "labels=None path logits mismatch"
    assert bool(jnp.allclose(ner_logits, ner_ref, **tol)), "ner_logits mismatch"
    assert bool(jnp.allclose(logits_alt, logits_ref, **tol)), "alt-path logits mismatch"
    assert bool(jnp.allclose(ner_alt, ner_ref, **tol)), "alt-path ner_logits mismatch"

    print("KERNEL_OK")
</pallas_src>

<mosaic_0001>
module attributes {stable_mosaic.version = 11 : i64} {
  func.func @_bilstm_heads_kernel(%arg0: i32, %arg1: memref<8x8x768xbf16, #tpu.memory_space<vmem>>, %arg2: memref<8x8x768xbf16, #tpu.memory_space<vmem>>, %arg3: memref<768x1024xbf16, #tpu.memory_space<vmem>>, %arg4: memref<1x1024xf32, #tpu.memory_space<vmem>>, %arg5: memref<256x1024xbf16, #tpu.memory_space<vmem>>, %arg6: memref<256x128xbf16, #tpu.memory_space<vmem>>, %arg7: memref<1x128xf32, #tpu.memory_space<vmem>>, %arg8: memref<256x128xbf16, #tpu.memory_space<vmem>>, %arg9: memref<1x128xf32, #tpu.memory_space<vmem>>, %arg10: memref<8x128xf32, #tpu.memory_space<vmem>>, %arg11: memref<8x8x2xf32, #tpu.memory_space<vmem>>, %arg12: memref<8x16x1024xbf16, #tpu.memory_space<vmem>>, %arg13: memref<8x8x256xbf16, #tpu.memory_space<vmem>>) attributes {dimension_semantics = [#tpu.dimension_semantics<parallel>], iteration_bounds = array<i64: 1>, scalar_prefetch = 0 : i64, scratch_operands = 2 : i64, tpu.core_type = #tpu.core_type<tc>, window_params = [{transform_indices = @transform_0, window_bounds = array<i64: 8, 8, 768>}, {transform_indices = @transform_1, window_bounds = array<i64: 8, 8, 768>}, {pipeline_mode = #tpu.pipeline_mode<synchronous>, transform_indices = @transform_2, window_bounds = array<i64: 768, 1024>}, {pipeline_mode = #tpu.pipeline_mode<synchronous>, transform_indices = @transform_3, window_bounds = array<i64: 1, 1024>}, {pipeline_mode = #tpu.pipeline_mode<synchronous>, transform_indices = @transform_4, window_bounds = array<i64: 256, 1024>}, {pipeline_mode = #tpu.pipeline_mode<synchronous>, transform_indices = @transform_5, window_bounds = array<i64: 256, 128>}, {pipeline_mode = #tpu.pipeline_mode<synchronous>, transform_indices = @transform_6, window_bounds = array<i64: 1, 128>}, {pipeline_mode = #tpu.pipeline_mode<synchronous>, transform_indices = @transform_7, window_bounds = array<i64: 256, 128>}, {pipeline_mode = #tpu.pipeline_mode<synchronous>, transform_indices = @transform_8, window_bounds = array<i64: 1, 128>}, {transform_indices = @transform_9, window_bounds = array<i64: 8, 128>}, {transform_indices = @transform_10, window_bounds = array<i64: 8, 8, 2>}]} {
    %c0 = arith.constant 0 : index
    %c0_0 = arith.constant 0 : index
    %0 = vector.load %arg4[%c0, %c0_0] : memref<1x1024xf32, #tpu.memory_space<vmem>>, vector<1x1024xf32>
    %c0_1 = arith.constant 0 : index
    %c0_2 = arith.constant 0 : index
    %c0_3 = arith.constant 0 : index
    %1 = vector.load %arg1[%c0_1, %c0_2, %c0_3] : memref<8x8x768xbf16, #tpu.memory_space<vmem>>, vector<8x8x768xbf16>
    %2 = vector.shape_cast %1 : vector<8x8x768xbf16> to vector<64x768xbf16>
    %c0_4 = arith.constant 0 : index
    %c0_5 = arith.constant 0 : index
    %3 = vector.load %arg3[%c0_4, %c0_5] : memref<768x1024xbf16, #tpu.memory_space<vmem>>, vector<768x1024xbf16>
    %cst = arith.constant dense<0.000000e+00> : vector<64x1024xf32>
    %4 = tpu.matmul %2, %3, %cst {dimension_numbers = #tpu.dot_dimension_numbers<[1], [0], [0], [1], [0, 0, 1, 1], [], []>} : vector<64x768xbf16>, vector<768x1024xbf16>, vector<64x1024xf32> -> vector<64x1024xf32>
    %5 = vector.broadcast %0 : vector<1x1024xf32> to vector<64x1024xf32>
    %6 = arith.addf %4, %5 : vector<64x1024xf32>
    %7 = vector.shape_cast %6 : vector<64x1024xf32> to vector<8x8x1024xf32>
    %8 = arith.truncf %7 : vector<8x8x1024xf32> to vector<8x8x1024xbf16>
    %c0_6 = arith.constant 0 : index
    %c0_7 = arith.constant 0 : index
    %c0_8 = arith.constant 0 : index
    %9 = vector.load %arg12[%c0_6, %c0_7, %c0_8] : memref<8x16x1024xbf16, #tpu.memory_space<vmem>>, vector<8x8x1024xbf16>
    tpu.vector_store %arg12[%c0_6, %c0_7, %c0_8], %8 {strides = array<i32>} : memref<8x16x1024xbf16, #tpu.memory_space<vmem>>, vector<8x8x1024xbf16>,
    %c0_9 = arith.constant 0 : index
    %c0_10 = arith.constant 0 : index
    %c0_11 = arith.constant 0 : index
    %10 = vector.load %arg2[%c0_9, %c0_10, %c0_11] : memref<8x8x768xbf16, #tpu.memory_space<vmem>>, vector<8x8x768xbf16>
    %11 = vector.shape_cast %10 : vector<8x8x768xbf16> to vector<64x768xbf16>
    %c0_12 = arith.constant 0 : index
    %c0_13 = arith.constant 0 : index
    %12 = vector.load %arg3[%c0_12, %c0_13] : memref<768x1024xbf16, #tpu.memory_space<vmem>>, vector<768x1024xbf16>
    %cst_14 = arith.constant dense<0.000000e+00> : vector<64x1024xf32>
    %13 = tpu.matmul %11, %12, %cst_14 {dimension_numbers = #tpu.dot_dimension_numbers<[1], [0], [0], [1], [0, 0, 1, 1], [], []>} : vector<64x768xbf16>, vector<768x1024xbf16>, vector<64x1024xf32> -> vector<64x1024xf32>
    %14 = vector.broadcast %0 : vector<1x1024xf32> to vector<64x1024xf32>
    %15 = arith.addf %13, %14 : vector<64x1024xf32>
    %16 = vector.shape_cast %15 : vector<64x1024xf32> to vector<8x8x1024xf32>
    %17 = arith.truncf %16 : vector<8x8x1024xf32> to vector<8x8x1024xbf16>
    %c0_15 = arith.constant 0 : index
    %c8 = arith.constant 8 : index
    %c0_16 = arith.constant 0 : index
    %18 = vector.load %arg12[%c0_15, %c8, %c0_16] : memref<8x16x1024xbf16, #tpu.memory_space<vmem>>, vector<8x8x1024xbf16>
    tpu.vector_store %arg12[%c0_15, %c8, %c0_16], %17 {strides = array<i32>} : memref<8x16x1024xbf16, #tpu.memory_space<vmem>>, vector<8x8x1024xbf16>,
    %c0_17 = arith.constant 0 : index
    %c0_18 = arith.constant 0 : index
    %19 = vector.load %arg5[%c0_17, %c0_18] : memref<256x1024xbf16, #tpu.memory_space<vmem>>, vector<256x1024xbf16>
    %cst_19 = arith.constant 0.000000e+00 : f32
    %20 = vector.broadcast %cst_19 : f32 to vector<16x128xf32>
    %c0_i32 = arith.constant 0 : i32
    %c2_i32 = arith.constant 2 : i32
    %21 = arith.addi %c0_i32, %c2_i32 : i32
    %c1_i32 = arith.constant 1 : i32
    %22:4 = scf.for %arg14 = %c0_i32 to %21 step %c1_i32 iter_args(%arg15 = %20, %arg16 = %20, %arg17 = %20, %arg18 = %20) -> (vector<16x128xf32>, vector<16x128xf32>, vector<16x128xf32>, vector<16x128xf32>)  : i32 {
      %c4_i32 = arith.constant 4 : i32
      %43 = arith.muli %arg14, %c4_i32 : i32
      %c0_i32_39 = arith.constant 0 : i32
      %44 = arith.addi %43, %c0_i32_39 : i32
      %c7_i32 = arith.constant 7 : i32
      %45 = arith.subi %c7_i32, %44 : i32
      %46 = arith.index_cast %44 : i32 to index
      %c0_40 = arith.constant 0 : index
      %c0_41 = arith.constant 0 : index
      %47 = vector.load %arg12[%46, %c0_40, %c0_41] : memref<8x16x1024xbf16, #tpu.memory_space<vmem>>, vector<1x16x512xbf16>
      %48 = vector.shape_cast %47 : vector<1x16x512xbf16> to vector<16x512xbf16>
      %49 = arith.extf %48 : vector<16x512xbf16> to vector<16x512xf32>
      %50 = arith.index_cast %45 : i32 to index
      %c0_42 = arith.constant 0 : index
      %c512 = arith.constant 512 : index
      %51 = vector.load %arg12[%50, %c0_42, %c512] : memref<8x16x1024xbf16, #tpu.memory_space<vmem>>, vector<1x16x512xbf16>
      %52 = vector.shape_cast %51 : vector<1x16x512xbf16> to vector<16x512xbf16>
      %53 = arith.extf %52 : vector<16x512xbf16> to vector<16x512xf32>
      %54 = tpu.concatenate %arg15, %arg17 in 1 : vector<16x128xf32>, vector<16x128xf32> -> vector<16x256xf32>
      %55 = arith.truncf %54 : vector<16x256xf32> to vector<16x256xbf16>
      %cst_43 = arith.constant dense<0.000000e+00> : vector<16x1024xf32>
      %56 = tpu.matmul %55, %19, %cst_43 {dimension_numbers = #tpu.dot_dimension_numbers<[1], [0], [0], [1], [0, 0, 1, 1], [], []>} : vector<16x256xbf16>, vector<256x1024xbf16>, vector<16x1024xf32> -> vector<16x1024xf32>
      %57 = vector.extract_strided_slice %56 {offsets = [0, 0], sizes = [16, 512], strides = [1, 1]} : vector<16x1024xf32> to vector<16x512xf32>
      %58 = arith.addf %49, %57 : vector<16x512xf32>
      %59 = vector.extract_strided_slice %58 {offsets = [0, 0], sizes = [16, 384], strides = [1, 1]} : vector<16x512xf32> to vector<16x384xf32>
      %60 = arith.negf %59 : vector<16x384xf32>
      %61 = math.exp %60 : vector<16x384xf32>
      %cst_44 = arith.constant 1.000000e+00 : f32
      %62 = vector.broadcast %cst_44 : f32 to vector<16x384xf32>
      %63 = arith.addf %62, %61 : vector<16x384xf32>
      %64 = arith.divf %62, %63 : vector<16x384xf32>
      %65 = vector.extract_strided_slice %58 {offsets = [0, 384], sizes = [16, 128], strides = [1, 1]} : vector<16x512xf32> to vector<16x128xf32>
      %66 = math.tanh %65 : vector<16x128xf32>
      %67 = vector.extract_strided_slice %64 {offsets = [0, 0], sizes = [16, 128], strides = [1, 1]} : vector<16x384xf32> to vector<16x128xf32>
      %68 = vector.extract_strided_slice %64 {offsets = [0, 128], sizes = [16, 128], strides = [1, 1]} : vector<16x384xf32> to vector<16x128xf32>
      %69 = vector.extract_strided_slice %64 {offsets = [0, 256], sizes = [16, 128], strides = [1, 1]} : vector<16x384xf32> to vector<16x128xf32>
      %70 = arith.mulf %68, %arg16 : vector<16x128xf32>
      %71 = arith.mulf %67, %66 : vector<16x128xf32>
      %72 = arith.addf %70, %71 : vector<16x128xf32>
      %73 = math.tanh %72 : vector<16x128xf32>
      %74 = arith.mulf %69, %73 : vector<16x128xf32>
      %75 = vector.extract_strided_slice %56 {offsets = [0, 512], sizes = [16, 512], strides = [1, 1]} : vector<16x1024xf32> to vector<16x512xf32>
      %76 = arith.addf %53, %75 : vector<16x512xf32>
      %77 = vector.extract_strided_slice %76 {offsets = [0, 0], sizes = [16, 384], strides = [1, 1]} : vector<16x512xf32> to vector<16x384xf32>
      %78 = arith.negf %77 : vector<16x384xf32>
      %79 = math.exp %78 : vector<16x384xf32>
      %cst_45 = arith.constant 1.000000e+00 : f32
      %80 = vector.broadcast %cst_45 : f32 to vector<16x384xf32>
      %81 = arith.addf %80, %79 : vector<16x384xf32>
      %82 = arith.divf %80, %81 : vector<16x384xf32>
      %83 = vector.extract_strided_slice %76 {offsets = [0, 384], sizes = [16, 128], strides = [1, 1]} : vector<16x512xf32> to vector<16x128xf32>
      %84 = math.tanh %83 : vector<16x128xf32>
      %85 = vector.extract_strided_slice %82 {offsets = [0, 0], sizes = [16, 128], strides = [1, 1]} : vector<16x384xf32> to vector<16x128xf32>
      %86 = vector.extract_strided_slice %82 {offsets = [0, 128], sizes = [16, 128], strides = [1, 1]} : vector<16x384xf32> to vector<16x128xf32>
      %87 = vector.extract_strided_slice %82 {offsets = [0, 256], sizes = [16, 128], strides = [1, 1]} : vector<16x384xf32> to vector<16x128xf32>
      %88 = arith.mulf %86, %arg18 : vector<16x128xf32>
      %89 = arith.mulf %85, %84 : vector<16x128xf32>
      %90 = arith.addf %88, %89 : vector<16x128xf32>
      %91 = math.tanh %90 : vector<16x128xf32>
      %92 = arith.mulf %87, %91 : vector<16x128xf32>
      %93 = vector.extract_strided_slice %74 {offsets = [8, 0], sizes = [8, 128], strides = [1, 1]} : vector<16x128xf32> to vector<8x128xf32>
      %94 = arith.truncf %93 : vector<8x128xf32> to vector<8x128xbf16>
      %95 = arith.index_cast %44 : i32 to index
      %c0_46 = arith.constant 0 : index
      %c0_47 = arith.constant 0 : index
      %96 = vector.load %arg13[%95, %c0_46, %c0_47] : memref<8x8x256xbf16, #tpu.memory_space<vmem>>, vector<1x8x128xbf16>
      %97 = vector.shape_cast %96 : vector<1x8x128xbf16> to vector<8x128xbf16>
      %98 = vector.shape_cast %94 : vector<8x128xbf16> to vector<1x8x128xbf16>
      tpu.vector_store %arg13[%95, %c0_46, %c0_47], %98 {strides = array<i32>} : memref<8x8x256xbf16, #tpu.memory_space<vmem>>, vector<1x8x128xbf16>,
      %99 = vector.extract_strided_slice %92 {offsets = [8, 0], sizes = [8, 128], strides = [1, 1]} : vector<16x128xf32> to vector<8x128xf32>
      %100 = arith.truncf %99 : vector<8x128xf32> to vector<8x128xbf16>
      %101 = arith.index_cast %45 : i32 to index
      %c0_48 = arith.constant 0 : index
      %c128 = arith.constant 128 : index
      %102 = vector.load %arg13[%101, %c0_48, %c128] : memref<8x8x256xbf16, #tpu.memory_space<vmem>>, vector<1x8x128xbf16>
      %103 = vector.shape_cast %102 : vector<1x8x128xbf16> to vector<8x128xbf16>
      %104 = vector.shape_cast %100 : vector<8x128xbf16> to vector<1x8x128xbf16>
      tpu.vector_store %arg13[%101, %c0_48, %c128], %104 {strides = array<i32>} : memref<8x8x256xbf16, #tpu.memory_space<vmem>>, vector<1x8x128xbf16>,
      %c1_i32_49 = arith.constant 1 : i32
      %105 = arith.addi %43, %c1_i32_49 : i32
      %c7_i32_50 = arith.constant 7 : i32
      %106 = arith.subi %c7_i32_50, %105 : i32
      %107 = arith.index_cast %105 : i32 to index
      %c0_51 = arith.constant 0 : index
      %c0_52 = arith.constant 0 : index
      %108 = vector.load %arg12[%107, %c0_51, %c0_52] : memref<8x16x1024xbf16, #tpu.memory_space<vmem>>, vector<1x16x512xbf16>
      %109 = vector.shape_cast %108 : vector<1x16x512xbf16> to vector<16x512xbf16>
      %110 = arith.extf %109 : vector<16x512xbf16> to vector<16x512xf32>
      %111 = arith.index_cast %106 : i32 to index
      %c0_53 = arith.constant 0 : index
      %c512_54 = arith.constant 512 : index
      %112 = vector.load %arg12[%111, %c0_53, %c512_54] : memref<8x16x1024xbf16, #tpu.memory_space<vmem>>, vector<1x16x512xbf16>
      %113 = vector.shape_cast %112 : vector<1x16x512xbf16> to vector<16x512xbf16>
      %114 = arith.extf %113 : vector<16x512xbf16> to vector<16x512xf32>
      %115 = tpu.concatenate %74, %92 in 1 : vector<16x128xf32>, vector<16x128xf32> -> vector<16x256xf32>
      %116 = arith.truncf %115 : vector<16x256xf32> to vector<16x256xbf16>
      %cst_55 = arith.constant dense<0.000000e+00> : vector<16x1024xf32>
      %117 = tpu.matmul %116, %19, %cst_55 {dimension_numbers = #tpu.dot_dimension_numbers<[1], [0], [0], [1], [0, 0, 1, 1], [], []>} : vector<16x256xbf16>, vector<256x1024xbf16>, vector<16x1024xf32> -> vector<16x1024xf32>
      %118 = vector.extract_strided_slice %117 {offsets = [0, 0], sizes = [16, 512], strides = [1, 1]} : vector<16x1024xf32> to vector<16x512xf32>
      %119 = arith.addf %110, %118 : vector<16x512xf32>
      %120 = vector.extract_strided_slice %119 {offsets = [0, 0], sizes = [16, 384], strides = [1, 1]} : vector<16x512xf32> to vector<16x384xf32>
      %121 = arith.negf %120 : vector<16x384xf32>
      %122 = math.exp %121 : vector<16x384xf32>
      %cst_56 = arith.constant 1.000000e+00 : f32
      %123 = vector.broadcast %cst_56 : f32 to vector<16x384xf32>
      %124 = arith.addf %123, %122 : vector<16x384xf32>
      %125 = arith.divf %123, %124 : vector<16x384xf32>
      %126 = vector.extract_strided_slice %119 {offsets = [0, 384], sizes = [16, 128], strides = [1, 1]} : vector<16x512xf32> to vector<16x128xf32>
      %127 = math.tanh %126 : vector<16x128xf32>
      %128 = vector.extract_strided_slice %125 {offsets = [0, 0], sizes = [16, 128], strides = [1, 1]} : vector<16x384xf32> to vector<16x128xf32>
      %129 = vector.extract_strided_slice %125 {offsets = [0, 128], sizes = [16, 128], strides = [1, 1]} : vector<16x384xf32> to vector<16x128xf32>
      %130 = vector.extract_strided_slice %125 {offsets = [0, 256], sizes = [16, 128], strides = [1, 1]} : vector<16x384xf32> to vector<16x128xf32>
      %131 = arith.mulf %129, %72 : vector<16x128xf32>
      %132 = arith.mulf %128, %127 : vector<16x128xf32>
      %133 = arith.addf %131, %132 : vector<16x128xf32>
      %134 = math.tanh %133 : vector<16x128xf32>
      %135 = arith.mulf %130, %134 : vector<16x128xf32>
      %136 = vector.extract_strided_slice %117 {offsets = [0, 512], sizes = [16, 512], strides = [1, 1]} : vector<16x1024xf32> to vector<16x512xf32>
      %137 = arith.addf %114, %136 : vector<16x512xf32>
      %138 = vector.extract_strided_slice %137 {offsets = [0, 0], sizes = [16, 384], strides = [1, 1]} : vector<16x512xf32> to vector<16x384xf32>
      %139 = arith.negf %138 : vector<16x384xf32>
      %140 = math.exp %139 : vector<16x384xf32>
      %cst_57 = arith.constant 1.000000e+00 : f32
      %141 = vector.broadcast %cst_57 : f32 to vector<16x384xf32>
      %142 = arith.addf %141, %140 : vector<16x384xf32>
      %143 = arith.divf %141, %142 : vector<16x384xf32>
      %144 = vector.extract_strided_slice %137 {offsets = [0, 384], sizes = [16, 128], strides = [1, 1]} : vector<16x512xf32> to vector<16x128xf32>
      %145 = math.tanh %144 : vector<16x128xf32>
      %146 = vector.extract_strided_slice %143 {offsets = [0, 0], sizes = [16, 128], strides = [1, 1]} : vector<16x384xf32> to vector<16x128xf32>
      %147 = vector.extract_strided_slice %143 {offsets = [0, 128], sizes = [16, 128], strides = [1, 1]} : vector<16x384xf32> to vector<16x128xf32>
      %148 = vector.extract_strided_slice %143 {offsets = [0, 256], sizes = [16, 128], strides = [1, 1]} : vector<16x384xf32> to vector<16x128xf32>
      %149 = arith.mulf %147, %90 : vector<16x128xf32>
      %150 = arith.mulf %146, %145 : vector<16x128xf32>
      %151 = arith.addf %149, %150 : vector<16x128xf32>
      %152 = math.tanh %151 : vector<16x128xf32>
      %153 = arith.mulf %148, %152 : vector<16x128xf32>
      %154 = vector.extract_strided_slice %135 {offsets = [8, 0], sizes = [8, 128], strides = [1, 1]} : vector<16x128xf32> to vector<8x128xf32>
      %155 = arith.truncf %154 : vector<8x128xf32> to vector<8x128xbf16>
      %156 = arith.index_cast %105 : i32 to index
      %c0_58 = arith.constant 0 : index
      %c0_59 = arith.constant 0 : index
      %157 = vector.load %arg13[%156, %c0_58, %c0_59] : memref<8x8x256xbf16, #tpu.memory_space<vmem>>, vector<1x8x128xbf16>
      %158 = vector.shape_cast %157 : vector<1x8x128xbf16> to vector<8x128xbf16>
      %159 = vector.shape_cast %155 : vector<8x128xbf16> to vector<1x8x128xbf16>
      tpu.vector_store %arg13[%156, %c0_58, %c0_59], %159 {strides = array<i32>} : memref<8x8x256xbf16, #tpu.memory_space<vmem>>, vector<1x8x128xbf16>,
      %160 = vector.extract_strided_slice %153 {offsets = [8, 0], sizes = [8, 128], strides = [1, 1]} : vector<16x128xf32> to vector<8x128xf32>
      %161 = arith.truncf %160 : vector<8x128xf32> to vector<8x128xbf16>
      %162 = arith.index_cast %106 : i32 to index
      %c0_60 = arith.constant 0 : index
      %c128_61 = arith.constant 128 : index
      %163 = vector.load %arg13[%162, %c0_60, %c128_61] : memref<8x8x256xbf16, #tpu.memory_space<vmem>>, vector<1x8x128xbf16>
      %164 = vector.shape_cast %163 : vector<1x8x128xbf16> to vector<8x128xbf16>
      %165 = vector.shape_cast %161 : vector<8x128xbf16> to vector<1x8x128xbf16>
      tpu.vector_store %arg13[%162, %c0_60, %c128_61], %165 {strides = array<i32>} : memref<8x8x256xbf16, #tpu.memory_space<vmem>>, vector<1x8x128xbf16>,
      %c2_i32_62 = arith.constant 2 : i32
      %166 = arith.addi %43, %c2_i32_62 : i32
      %c7_i32_63 = arith.constant 7 : i32
      %167 = arith.subi %c7_i32_63, %166 : i32
      %168 = arith.index_cast %166 : i32 to index
      %c0_64 = arith.constant 0 : index
      %c0_65 = arith.constant 0 : index
      %169 = vector.load %arg12[%168, %c0_64, %c0_65] : memref<8x16x1024xbf16, #tpu.memory_space<vmem>>, vector<1x16x512xbf16>
      %170 = vector.shape_cast %169 : vector<1x16x512xbf16> to vector<16x512xbf16>
      %171 = arith.extf %170 : vector<16x512xbf16> to vector<16x512xf32>
      %172 = arith.index_cast %167 : i32 to index
      %c0_66 = arith.constant 0 : index
      %c512_67 = arith.constant 512 : index
      %173 = vector.load %arg12[%172, %c0_66, %c512_67] : memref<8x16x1024xbf16, #tpu.memory_space<vmem>>, vector<1x16x512xbf16>
      %174 = vector.shape_cast %173 : vector<1x16x512xbf16> to vector<16x512xbf16>
      %175 = arith.extf %174 : vector<16x512xbf16> to vector<16x512xf32>
      %176 = tpu.concatenate %135, %153 in 1 : vector<16x128xf32>, vector<16x128xf32> -> vector<16x256xf32>
      %177 = arith.truncf %176 : vector<16x256xf32> to vector<16x256xbf16>
      %cst_68 = arith.constant dense<0.000000e+00> : vector<16x1024xf32>
      %178 = tpu.matmul %177, %19, %cst_68 {dimension_numbers = #tpu.dot_dimension_numbers<[1], [0], [0], [1], [0, 0, 1, 1], [], []>} : vector<16x256xbf16>, vector<256x1024xbf16>, vector<16x1024xf32> -> vector<16x1024xf32>
      %179 = vector.extract_strided_slice %178 {offsets = [0, 0], sizes = [16, 512], strides = [1, 1]} : vector<16x1024xf32> to vector<16x512xf32>
      %180 = arith.addf %171, %179 : vector<16x512xf32>
      %181 = vector.extract_strided_slice %180 {offsets = [0, 0], sizes = [16, 384], strides = [1, 1]} : vector<16x512xf32> to vector<16x384xf32>
      %182 = arith.negf %181 : vector<16x384xf32>
      %183 = math.exp %182 : vector<16x384xf32>
      %cst_69 = arith.constant 1.000000e+00 : f32
      %184 = vector.broadcast %cst_69 : f32 to vector<16x384xf32>
      %185 = arith.addf %184, %183 : vector<16x384xf32>
      %186 = arith.divf %184, %185 : vector<16x384xf32>
      %187 = vector.extract_strided_slice %180 {offsets = [0, 384], sizes = [16, 128], strides = [1, 1]} : vector<16x512xf32> to vector<16x128xf32>
      %188 = math.tanh %187 : vector<16x128xf32>
      %189 = vector.extract_strided_slice %186 {offsets = [0, 0], sizes = [16, 128], strides = [1, 1]} : vector<16x384xf32> to vector<16x128xf32>
      %190 = vector.extract_strided_slice %186 {offsets = [0, 128], sizes = [16, 128], strides = [1, 1]} : vector<16x384xf32> to vector<16x128xf32>
      %191 = vector.extract_strided_slice %186 {offsets = [0, 256], sizes = [16, 128], strides = [1, 1]} : vector<16x384xf32> to vector<16x128xf32>
      %192 = arith.mulf %190, %133 : vector<16x128xf32>
      %193 = arith.mulf %189, %188 : vector<16x128xf32>
      %194 = arith.addf %192, %193 : vector<16x128xf32>
      %195 = math.tanh %194 : vector<16x128xf32>
      %196 = arith.mulf %191, %195 : vector<16x128xf32>
      %197 = vector.extract_strided_slice %178 {offsets = [0, 512], sizes = [16, 512], strides = [1, 1]} : vector<16x1024xf32> to vector<16x512xf32>
      %198 = arith.addf %175, %197 : vector<16x512xf32>
      %199 = vector.extract_strided_slice %198 {offsets = [0, 0], sizes = [16, 384], strides = [1, 1]} : vector<16x512xf32> to vector<16x384xf32>
      %200 = arith.negf %199 : vector<16x384xf32>
      %201 = math.exp %200 : vector<16x384xf32>
      %cst_70 = arith.constant 1.000000e+00 : f32
      %202 = vector.broadcast %cst_70 : f32 to vector<16x384xf32>
      %203 = arith.addf %202, %201 : vector<16x384xf32>
      %204 = arith.divf %202, %203 : vector<16x384xf32>
      %205 = vector.extract_strided_slice %198 {offsets = [0, 384], sizes = [16, 128], strides = [1, 1]} : vector<16x512xf32> to vector<16x128xf32>
      %206 = math.tanh %205 : vector<16x128xf32>
      %207 = vector.extract_strided_slice %204 {offsets = [0, 0], sizes = [16, 128], strides = [1, 1]} : vector<16x384xf32> to vector<16x128xf32>
      %208 = vector.extract_strided_slice %204 {offsets = [0, 128], sizes = [16, 128], strides = [1, 1]} : vector<16x384xf32> to vector<16x128xf32>
      %209 = vector.extract_strided_slice %204 {offsets = [0, 256], sizes = [16, 128], strides = [1, 1]} : vector<16x384xf32> to vector<16x128xf32>
      %210 = arith.mulf %208, %151 : vector<16x128xf32>
      %211 = arith.mulf %207, %206 : vector<16x128xf32>
      %212 = arith.addf %210, %211 : vector<16x128xf32>
      %213 = math.tanh %212 : vector<16x128xf32>
      %214 = arith.mulf %209, %213 : vector<16x128xf32>
      %215 = vector.extract_strided_slice %196 {offsets = [8, 0], sizes = [8, 128], strides = [1, 1]} : vector<16x128xf32> to vector<8x128xf32>
      %216 = arith.truncf %215 : vector<8x128xf32> to vector<8x128xbf16>
      %217 = arith.index_cast %166 : i32 to index
      %c0_71 = arith.constant 0 : index
      %c0_72 = arith.constant 0 : index
      %218 = vector.load %arg13[%217, %c0_71, %c0_72] : memref<8x8x256xbf16, #tpu.memory_space<vmem>>, vector<1x8x128xbf16>
      %219 = vector.shape_cast %218 : vector<1x8x128xbf16> to vector<8x128xbf16>
      %220 = vector.shape_cast %216 : vector<8x128xbf16> to vector<1x8x128xbf16>
      tpu.vector_store %arg13[%217, %c0_71, %c0_72], %220 {strides = array<i32>} : memref<8x8x256xbf16, #tpu.memory_space<vmem>>, vector<1x8x128xbf16>,
      %221 = vector.extract_strided_slice %214 {offsets = [8, 0], sizes = [8, 128], strides = [1, 1]} : vector<16x128xf32> to vector<8x128xf32>
      %222 = arith.truncf %221 : vector<8x128xf32> to vector<8x128xbf16>
      %223 = arith.index_cast %167 : i32 to index
      %c0_73 = arith.constant 0 : index
      %c128_74 = arith.constant 128 : index
      %224 = vector.load %arg13[%223, %c0_73, %c128_74] : memref<8x8x256xbf16, #tpu.memory_space<vmem>>, vector<1x8x128xbf16>
      %225 = vector.shape_cast %224 : vector<1x8x128xbf16> to vector<8x128xbf16>
      %226 = vector.shape_cast %222 : vector<8x128xbf16> to vector<1x8x128xbf16>
      tpu.vector_store %arg13[%223, %c0_73, %c128_74], %226 {strides = array<i32>} : memref<8x8x256xbf16, #tpu.memory_space<vmem>>, vector<1x8x128xbf16>,
      %c3_i32 = arith.constant 3 : i32
      %227 = arith.addi %43, %c3_i32 : i32
      %c7_i32_75 = arith.constant 7 : i32
      %228 = arith.subi %c7_i32_75, %227 : i32
      %229 = arith.index_cast %227 : i32 to index
      %c0_76 = arith.constant 0 : index
      %c0_77 = arith.constant 0 : index
      %230 = vector.load %arg12[%229, %c0_76, %c0_77] : memref<8x16x1024xbf16, #tpu.memory_space<vmem>>, vector<1x16x512xbf16>
      %231 = vector.shape_cast %230 : vector<1x16x512xbf16> to vector<16x512xbf16>
      %232 = arith.extf %231 : vector<16x512xbf16> to vector<16x512xf32>
      %233 = arith.index_cast %228 : i32 to index
      %c0_78 = arith.constant 0 : index
      %c512_79 = arith.constant 512 : index
      %234 = vector.load %arg12[%233, %c0_78, %c512_79] : memref<8x16x1024xbf16, #tpu.memory_space<vmem>>, vector<1x16x512xbf16>
      %235 = vector.shape_cast %234 : vector<1x16x512xbf16> to vector<16x512xbf16>
      %236 = arith.extf %235 : vector<16x512xbf16> to vector<16x512xf32>
      %237 = tpu.concatenate %196, %214 in 1 : vector<16x128xf32>, vector<16x128xf32> -> vector<16x256xf32>
      %238 = arith.truncf %237 : vector<16x256xf32> to vector<16x256xbf16>
      %cst_80 = arith.constant dense<0.000000e+00> : vector<16x1024xf32>
      %239 = tpu.matmul %238, %19, %cst_80 {dimension_numbers = #tpu.dot_dimension_numbers<[1], [0], [0], [1], [0, 0, 1, 1], [], []>} : vector<16x256xbf16>, vector<256x1024xbf16>, vector<16x1024xf32> -> vector<16x1024xf32>
      %240 = vector.extract_strided_slice %239 {offsets = [0, 0], sizes = [16, 512], strides = [1, 1]} : vector<16x1024xf32> to vector<16x512xf32>
      %241 = arith.addf %232, %240 : vector<16x512xf32>
      %242 = vector.extract_strided_slice %241 {offsets = [0, 0], sizes = [16, 384], strides = [1, 1]} : vector<16x512xf32> to vector<16x384xf32>
      %243 = arith.negf %242 : vector<16x384xf32>
      %244 = math.exp %243 : vector<16x384xf32>
      %cst_81 = arith.constant 1.000000e+00 : f32
      %245 = vector.broadcast %cst_81 : f32 to vector<16x384xf32>
      %246 = arith.addf %245, %244 : vector<16x384xf32>
      %247 = arith.divf %245, %246 : vector<16x384xf32>
      %248 = vector.extract_strided_slice %241 {offsets = [0, 384], sizes = [16, 128], strides = [1, 1]} : vector<16x512xf32> to vector<16x128xf32>
      %249 = math.tanh %248 : vector<16x128xf32>
      %250 = vector.extract_strided_slice %247 {offsets = [0, 0], sizes = [16, 128], strides = [1, 1]} : vector<16x384xf32> to vector<16x128xf32>
      %251 = vector.extract_strided_slice %247 {offsets = [0, 128], sizes = [16, 128], strides = [1, 1]} : vector<16x384xf32> to vector<16x128xf32>
      %252 = vector.extract_strided_slice %247 {offsets = [0, 256], sizes = [16, 128], strides = [1, 1]} : vector<16x384xf32> to vector<16x128xf32>
      %253 = arith.mulf %251, %194 : vector<16x128xf32>
      %254 = arith.mulf %250, %249 : vector<16x128xf32>
      %255 = arith.addf %253, %254 : vector<16x128xf32>
      %256 = math.tanh %255 : vector<16x128xf32>
      %257 = arith.mulf %252, %256 : vector<16x128xf32>
      %258 = vector.extract_strided_slice %239 {offsets = [0, 512], sizes = [16, 512], strides = [1, 1]} : vector<16x1024xf32> to vector<16x512xf32>
      %259 = arith.addf %236, %258 : vector<16x512xf32>
      %260 = vector.extract_strided_slice %259 {offsets = [0, 0], sizes = [16, 384], strides = [1, 1]} : vector<16x512xf32> to vector<16x384xf32>
      %261 = arith.negf %260 : vector<16x384xf32>
      %262 = math.exp %261 : vector<16x384xf32>
      %cst_82 = arith.constant 1.000000e+00 : f32
      %263 = vector.broadcast %cst_82 : f32 to vector<16x384xf32>
      %264 = arith.addf %263, %262 : vector<16x384xf32>
      %265 = arith.divf %263, %264 : vector<16x384xf32>
      %266 = vector.extract_strided_slice %259 {offsets = [0, 384], sizes = [16, 128], strides = [1, 1]} : vector<16x512xf32> to vector<16x128xf32>
      %267 = math.tanh %266 : vector<16x128xf32>
      %268 = vector.extract_strided_slice %265 {offsets = [0, 0], sizes = [16, 128], strides = [1, 1]} : vector<16x384xf32> to vector<16x128xf32>
      %269 = vector.extract_strided_slice %265 {offsets = [0, 128], sizes = [16, 128], strides = [1, 1]} : vector<16x384xf32> to vector<16x128xf32>
      %270 = vector.extract_strided_slice %265 {offsets = [0, 256], sizes = [16, 128], strides = [1, 1]} : vector<16x384xf32> to vector<16x128xf32>
      %271 = arith.mulf %269, %212 : vector<16x128xf32>
      %272 = arith.mulf %268, %267 : vector<16x128xf32>
      %273 = arith.addf %271, %272 : vector<16x128xf32>
      %274 = math.tanh %273 : vector<16x128xf32>
      %275 = arith.mulf %270, %274 : vector<16x128xf32>
      %276 = vector.extract_strided_slice %257 {offsets = [8, 0], sizes = [8, 128], strides = [1, 1]} : vector<16x128xf32> to vector<8x128xf32>
      %277 = arith.truncf %276 : vector<8x128xf32> to vector<8x128xbf16>
      %278 = arith.index_cast %227 : i32 to index
      %c0_83 = arith.constant 0 : index
      %c0_84 = arith.constant 0 : index
      %279 = vector.load %arg13[%278, %c0_83, %c0_84] : memref<8x8x256xbf16, #tpu.memory_space<vmem>>, vector<1x8x128xbf16>
      %280 = vector.shape_cast %279 : vector<1x8x128xbf16> to vector<8x128xbf16>
      %281 = vector.shape_cast %277 : vector<8x128xbf16> to vector<1x8x128xbf16>
      tpu.vector_store %arg13[%278, %c0_83, %c0_84], %281 {strides = array<i32>} : memref<8x8x256xbf16, #tpu.memory_space<vmem>>, vector<1x8x128xbf16>,
      %282 = vector.extract_strided_slice %275 {offsets = [8, 0], sizes = [8, 128], strides = [1, 1]} : vector<16x128xf32> to vector<8x128xf32>
      %283 = arith.truncf %282 : vector<8x128xf32> to vector<8x128xbf16>
      %284 = arith.index_cast %228 : i32 to index
      %c0_85 = arith.constant 0 : index
      %c128_86 = arith.constant 128 : index
      %285 = vector.load %arg13[%284, %c0_85, %c128_86] : memref<8x8x256xbf16, #tpu.memory_space<vmem>>, vector<1x8x128xbf16>
      %286 = vector.shape_cast %285 : vector<1x8x128xbf16> to vector<8x128xbf16>
      %287 = vector.shape_cast %283 : vector<8x128xbf16> to vector<1x8x128xbf16>
      tpu.vector_store %arg13[%284, %c0_85, %c128_86], %287 {strides = array<i32>} : memref<8x8x256xbf16, #tpu.memory_space<vmem>>, vector<1x8x128xbf16>,
      scf.yield %257, %255, %275, %273 : vector<16x128xf32>, vector<16x128xf32>, vector<16x128xf32>, vector<16x128xf32>
    }
    %c2_i32_20 = arith.constant 2 : i32
    %23 = vector.extract_strided_slice %22#0 {offsets = [0, 0], sizes = [8, 128], strides = [1, 1]} : vector<16x128xf32> to vector<8x128xf32>
    %24 = vector.extract_strided_slice %22#2 {offsets = [0, 0], sizes = [8, 128], strides = [1, 1]} : vector<16x128xf32> to vector<8x128xf32>
    %25 = tpu.concatenate %23, %24 in 1 : vector<8x128xf32>, vector<8x128xf32> -> vector<8x256xf32>
    %26 = arith.truncf %25 : vector<8x256xf32> to vector<8x256xbf16>
    %c0_21 = arith.constant 0 : index
    %c0_22 = arith.constant 0 : index
    %27 = vector.load %arg6[%c0_21, %c0_22] : memref<256x128xbf16, #tpu.memory_space<vmem>>, vector<256x128xbf16>
    %cst_23 = arith.constant dense<0.000000e+00> : vector<8x128xf32>
    %28 = tpu.matmul %26, %27, %cst_23 {dimension_numbers = #tpu.dot_dimension_numbers<[1], [0], [0], [1], [0, 0, 1, 1], [], []>} : vector<8x256xbf16>, vector<256x128xbf16>, vector<8x128xf32> -> vector<8x128xf32>
    %c0_24 = arith.constant 0 : index
    %c0_25 = arith.constant 0 : index
    %29 = vector.load %arg7[%c0_24, %c0_25] : memref<1x128xf32, #tpu.memory_space<vmem>>, vector<1x128xf32>
    %30 = vector.broadcast %29 : vector<1x128xf32> to vector<8x128xf32>
    %31 = arith.addf %28, %30 : vector<8x128xf32>
    %c0_26 = arith.constant 0 : index
    %c0_27 = arith.constant 0 : index
    %32 = vector.load %arg10[%c0_26, %c0_27] : memref<8x128xf32, #tpu.memory_space<vmem>>, vector<8x128xf32>
    tpu.vector_store %arg10[%c0_26, %c0_27], %31 {strides = array<i32>} : memref<8x128xf32, #tpu.memory_space<vmem>>, vector<8x128xf32>,
    %c0_28 = arith.constant 0 : index
    %c0_29 = arith.constant 0 : index
    %c0_30 = arith.constant 0 : index
    %33 = vector.load %arg13[%c0_28, %c0_29, %c0_30] : memref<8x8x256xbf16, #tpu.memory_space<vmem>>, vector<8x8x256xbf16>
    %34 = vector.shape_cast %33 : vector<8x8x256xbf16> to vector<64x256xbf16>
    %c0_31 = arith.constant 0 : index
    %c0_32 = arith.constant 0 : index
    %35 = vector.load %arg8[%c0_31, %c0_32] : memref<256x128xbf16, #tpu.memory_space<vmem>>, vector<256x128xbf16>
    %cst_33 = arith.constant dense<0.000000e+00> : vector<64x128xf32>
    %36 = tpu.matmul %34, %35, %cst_33 {dimension_numbers = #tpu.dot_dimension_numbers<[1], [0], [0], [1], [0, 0, 1, 1], [], []>} : vector<64x256xbf16>, vector<256x128xbf16>, vector<64x128xf32> -> vector<64x128xf32>
    %c0_34 = arith.constant 0 : index
    %c0_35 = arith.constant 0 : index
    %37 = vector.load %arg9[%c0_34, %c0_35] : memref<1x128xf32, #tpu.memory_space<vmem>>, vector<1x128xf32>
    %38 = vector.broadcast %37 : vector<1x128xf32> to vector<64x128xf32>
    %39 = arith.addf %36, %38 : vector<64x128xf32>
    %40 = vector.extract_strided_slice %39 {offsets = [0, 0], sizes = [64, 2], strides = [1, 1]} : vector<64x128xf32> to vector<64x2xf32>
    %41 = vector.shape_cast %40 : vector<64x2xf32> to vector<8x8x2xf32>
    %c0_36 = arith.constant 0 : index
    %c0_37 = arith.constant 0 : index
    %c0_38 = arith.constant 0 : index
    %42 = vector.load %arg11[%c0_36, %c0_37, %c0_38] : memref<8x8x2xf32, #tpu.memory_space<vmem>>, vector<8x8x2xf32>
    tpu.vector_store %arg11[%c0_36, %c0_37, %c0_38], %41 {strides = array<i32>} : memref<8x8x2xf32, #tpu.memory_space<vmem>>, vector<8x8x2xf32>,
    return
  }
  func.func @transform_0(%arg0: i32) -> (i32, i32, i32) {
    %c0_i32 = arith.constant 0 : i32
    %c0_i32_0 = arith.constant 0 : i32
    %c0_i32_1 = arith.constant 0 : i32
    return %c0_i32, %arg0, %c0_i32_0 : i32, i32, i32
  }
  func.func @transform_1(%arg0: i32) -> (i32, i32, i32) {
    %c0_i32 = arith.constant 0 : i32
    %c0_i32_0 = arith.constant 0 : i32
    %c0_i32_1 = arith.constant 0 : i32
    return %c0_i32, %arg0, %c0_i32_0 : i32, i32, i32
  }
  func.func @transform_2(%arg0: i32) -> (i32, i32) {
    %c0_i32 = arith.constant 0 : i32
    %c0_i32_0 = arith.constant 0 : i32
    %c0_i32_1 = arith.constant 0 : i32
    return %c0_i32, %c0_i32_0 : i32, i32
  }
  func.func @transform_3(%arg0: i32) -> (i32, i32) {
    %c0_i32 = arith.constant 0 : i32
    %c0_i32_0 = arith.constant 0 : i32
    %c0_i32_1 = arith.constant 0 : i32
    return %c0_i32, %c0_i32_0 : i32, i32
  }
  func.func @transform_4(%arg0: i32) -> (i32, i32) {
    %c0_i32 = arith.constant 0 : i32
    %c0_i32_0 = arith.constant 0 : i32
    %c0_i32_1 = arith.constant 0 : i32
    return %c0_i32, %c0_i32_0 : i32, i32
  }
  func.func @transform_5(%arg0: i32) -> (i32, i32) {
    %c0_i32 = arith.constant 0 : i32
    %c0_i32_0 = arith.constant 0 : i32
    %c0_i32_1 = arith.constant 0 : i32
    return %c0_i32, %c0_i32_0 : i32, i32
  }
  func.func @transform_6(%arg0: i32) -> (i32, i32) {
    %c0_i32 = arith.constant 0 : i32
    %c0_i32_0 = arith.constant 0 : i32
    %c0_i32_1 = arith.constant 0 : i32
    return %c0_i32, %c0_i32_0 : i32, i32
  }
  func.func @transform_7(%arg0: i32) -> (i32, i32) {
    %c0_i32 = arith.constant 0 : i32
    %c0_i32_0 = arith.constant 0 : i32
    %c0_i32_1 = arith.constant 0 : i32
    return %c0_i32, %c0_i32_0 : i32, i32
  }
  func.func @transform_8(%arg0: i32) -> (i32, i32) {
    %c0_i32 = arith.constant 0 : i32
    %c0_i32_0 = arith.constant 0 : i32
    %c0_i32_1 = arith.constant 0 : i32
    return %c0_i32, %c0_i32_0 : i32, i32
  }
  func.func @transform_9(%arg0: i32) -> (i32, i32) {
    %c0_i32 = arith.constant 0 : i32
    %c0_i32_0 = arith.constant 0 : i32
    return %arg0, %c0_i32 : i32, i32
  }
  func.func @transform_10(%arg0: i32) -> (i32, i32, i32) {
    %c0_i32 = arith.constant 0 : i32
    %c0_i32_0 = arith.constant 0 : i32
    %c0_i32_1 = arith.constant 0 : i32
    return %c0_i32, %arg0, %c0_i32_0 : i32, i32, i32
  }
}

</mosaic_0001>

<bundles_post_ra>
// kernel: _lambda_.1
= control target key start
LH: loop header
LB: loop body
LE: loop exit
PB: predicated region body
PF: predicated region fallthrough
CT: control target
= control target key end

     0   :  { %16 = vsyncpa [#allocation5], 0  ;;  %s14508_s0 = inlined_call_operand.vmem [shape: bf16[8,8,768], index: 0, kind: input, shape index: {}]   ;;  %s14509_s1 = inlined_call_operand.vmem [shape: bf16[8,8,768], index: 1, kind: input, shape index: {}]   ;;  %s14510_s2 = inlined_call_operand.hbm [shape: bf16[768,1024], index: 2, kind: input, shape index: {}]   ;;  %s14511_s3 = inlined_call_operand.hbm [shape: f32[1,1024], index: 3, kind: input, shape index: {}]   ;;  %s14512_s4 = inlined_call_operand.hbm [shape: bf16[256,1024], index: 4, kind: input, shape index: {}]   ;;  %s14513_s5 = inlined_call_operand.hbm [shape: bf16[256,128], index: 5, kind: input, shape index: {}]   ;;  %s14514_s6 = inlined_call_operand.hbm [shape: f32[1,128], index: 6, kind: input, shape index: {}]   ;;  %s14515_s7 = inlined_call_operand.hbm [shape: bf16[256,128], index: 7, kind: input, shape index: {}]   ;;  %s14516_s8 = inlined_call_operand.hbm [shape: f32[1,128], index: 8, kind: input, shape index: {}]   ;;  %s14517_s9 = inlined_call_operand.vmem [shape: f32[8,128], index: 9, kind: output, shape index: {0}]   ;;  %s14518_s10 = inlined_call_operand.vmem [shape: f32[8,8,2], index: 10, kind: output, shape index: {1}]  }
   0x1   :  { %17 = vsyncpa [#allocation7], 0 }
   0x2   :  { %18 = vsyncpa [#allocation10], 0 }
   0x3   :  { %19 = vsyncpa [#allocation13], 0  ;;  %s12160_s13 = smov [#allocation6]   ;;  %s12161_s15 = smov [#allocation9]  }
   0x4   :  { %s42_s14 = sshll.u32 %s12160_s13, 4  ;;  %s63_s16 = sshll.u32 %s12161_s15, 4  ;;  %s43_s14 = int_to_ptr.vmem [resolvable:$true] %s42_s14  ;;  %s12226_s16 = int_to_ptr.vmem [resolvable:$true] %s63_s16 }
   0x5   :  { %s11926_s19 = scalar_lea.hbm %s14511_s3, 128 }
   0x6   :  { %p11927_p0 = scmp.ne.s32.totalorder %s14511_s3, %s11926_s19  ;;  %p11930_p1 = scmp.lt.u32.totalorder %s11926_s19, %s14511_s3 }
   0x8   :  { %p11932_p2 = pnand %p11930_p1, %p11927_p0 }
   0xa   :  { %11935 = shalt.err (!%p11932_p2)
}
   0xb   :  { %s11936_s24 = scalar_lea.vmem %s43_s14, 128  ;;  %p11941_p4 = scmp.lt.s32.totalorder %s43_s14, %s43_s14 }
   0xc   :  { %p11937_p3 = scmp.ne.s32.totalorder %s43_s14, %s11936_s24  ;;  %p11942_p5 = scmp.lt.s32.totalorder %s11936_s24, %s11936_s24 }
   0xe   :  { %p11943_p6 = por %p11942_p5, %p11941_p4 }
  0x10   :  { %p11944_p7 = pnand %p11943_p6, %p11937_p3 }
  0x12   :  { %11947 = shalt.err (!%p11944_p7)
}
  0x13   :  { %45 = dma.hbm_to_vmem [thread:$0]  %s14511_s3, 128, %s43_s14, [#allocation7]  }
  0x14   :  { %s11948_s29 = scalar_lea.hbm %s14513_s5, 2048 }
  0x15   :  { %p11949_p8 = scmp.ne.s32.totalorder %s14513_s5, %s11948_s29  ;;  %p11952_p9 = scmp.lt.u32.totalorder %s11948_s29, %s14513_s5 }
  0x17   :  { %p11954_p10 = pnand %p11952_p9, %p11949_p8 }
  0x19   :  { %11957 = shalt.err (!%p11954_p10)
}
  0x1a   :  { %s11958_s15 = scalar_lea.vmem %s12226_s16, 2048  ;;  %p11963_p12 = scmp.lt.s32.totalorder %s12226_s16, %s12226_s16 }
  0x1b   :  { %p11959_p11 = scmp.ne.s32.totalorder %s12226_s16, %s11958_s15  ;;  %p11964_p13 = scmp.lt.s32.totalorder %s11958_s15, %s11958_s15 }
  0x1d   :  { %p11965_p0 = por %p11964_p13, %p11963_p12 }
  0x1f   :  { %p11966_p1 = pnand %p11965_p0, %p11959_p11 }
  0x21   :  { %11969 = shalt.err (!%p11966_p1)
}
  0x22   :  { %s12162_s3 = smov 64   ;;  %s12163_s14 = smov 4  }
  0x23   :  { %69 = dma.hbm_to_vmem [thread:$0]  %s14513_s5, 2048, %s12226_s16, [#allocation10], %s12162_s3, %s12162_s3, %s12163_s14  }
  0x24   :  { %s12164_s19 = smov [#allocation12]   ;;  %s12165_s21 = smov [#allocation4]  }
  0x25   :  { %s85_s20 = sshll.u32 %s12164_s19, 4  ;;  %s29_s22 = sshll.u32 %s12165_s21, 4  ;;  %s86_s20 = int_to_ptr.vmem [resolvable:$true] %s85_s20  ;;  %s12257_s22 = int_to_ptr.vmem [resolvable:$true] %s29_s22 }
  0x26   :  { %s11970_s25 = scalar_lea.hbm %s14515_s7, 2048 }
  0x27   :  { %p11971_p2 = scmp.ne.s32.totalorder %s14515_s7, %s11970_s25  ;;  %p11974_p3 = scmp.lt.u32.totalorder %s11970_s25, %s14515_s7 }
  0x29   :  { %p11976_p4 = pnand %p11974_p3, %p11971_p2 }
  0x2b   :  { %11979 = shalt.err (!%p11976_p4)
}
  0x2c   :  { %s11980_s5 = scalar_lea.vmem %s86_s20, 2048  ;;  %p11985_p6 = scmp.lt.s32.totalorder %s86_s20, %s86_s20 }
  0x2d   :  { %p11981_p5 = scmp.ne.s32.totalorder %s86_s20, %s11980_s5  ;;  %p11986_p7 = scmp.lt.s32.totalorder %s11980_s5, %s11980_s5 }
  0x2f   :  { %p11987_p8 = por %p11986_p7, %p11985_p6 }
  0x31   :  { %p11988_p9 = pnand %p11987_p8, %p11981_p5 }
  0x33   :  { %11991 = shalt.err (!%p11988_p9)
}
  0x34   :  { %91 = dma.hbm_to_vmem [thread:$0]  %s14515_s7, 2048, %s86_s20, [#allocation13], %s12162_s3, %s12162_s3, %s12163_s14  }
  0x35   :  { %s11992_s13 = scalar_lea.hbm %s14510_s2, 49152 }
  0x36   :  { %p11993_p10 = scmp.ne.s32.totalorder %s14510_s2, %s11992_s13  ;;  %p11996_p11 = scmp.lt.u32.totalorder %s11992_s13, %s14510_s2 }
  0x38   :  { %p11998_p12 = pnand %p11996_p11, %p11993_p10 }
  0x3a   :  { %12001 = shalt.err (!%p11998_p12)
}
  0x3b   :  { %s12002_s21 = scalar_lea.vmem %s12257_s22, 49152  ;;  %p12007_p0 = scmp.lt.s32.totalorder %s12257_s22, %s12257_s22 }
  0x3c   :  { %p12003_p13 = scmp.ne.s32.totalorder %s12257_s22, %s12002_s21  ;;  %p12008_p1 = scmp.lt.s32.totalorder %s12002_s21, %s12002_s21 }
  0x3e   :  { %p12009_p2 = por %p12008_p1, %p12007_p0 }
  0x40   :  { %p12010_p3 = pnand %p12009_p2, %p12003_p13 }
  0x42   :  { %12013 = shalt.err (!%p12010_p3)
}
  0x43   :  { %s12166_s7 = smov 512   ;;  %s12167_s3 = smov 32  }
  0x44   :  { %35 = dma.hbm_to_vmem [thread:$0]  %s14510_s2, 49152, %s12257_s22, [#allocation5], %s12166_s7, %s12166_s7, %s12167_s3  }
  0x45   :  { %s12168_s23 = smov [#allocation8]   ;;  %s12169_s25 = smov [#allocation11]  }
  0x46   :  { %s51_s24 = sshll.u32 %s12168_s23, 4  ;;  %s76_s26 = sshll.u32 %s12169_s25, 4  ;;  %s52_s24 = int_to_ptr.vmem [resolvable:$true] %s51_s24  ;;  %s77_s26 = int_to_ptr.vmem [resolvable:$true] %s76_s26 }
  0x47   :  { %s12014_s29 = scalar_lea.hbm %s14512_s4, 16384 }
  0x48   :  { %p12015_p4 = scmp.ne.s32.totalorder %s14512_s4, %s12014_s29  ;;  %p12018_p5 = scmp.lt.u32.totalorder %s12014_s29, %s14512_s4 }
  0x4a   :  { %p12020_p6 = pnand %p12018_p5, %p12015_p4 }
  0x4c   :  { %12023 = shalt.err (!%p12020_p6)
}
  0x4d   :  { %s12024_s2 = scalar_lea.vmem %s52_s24, 16384  ;;  %p12029_p8 = scmp.lt.s32.totalorder %s52_s24, %s52_s24 }
  0x4e   :  { %p12025_p7 = scmp.ne.s32.totalorder %s52_s24, %s12024_s2  ;;  %p12030_p9 = scmp.lt.s32.totalorder %s12024_s2, %s12024_s2 }
  0x50   :  { %p12031_p10 = por %p12030_p9, %p12029_p8 }
  0x52   :  { %p12032_p11 = pnand %p12031_p10, %p12025_p7 }
  0x54   :  { %12035 = shalt.err (!%p12032_p11)
}
  0x55   :  { %57 = dma.hbm_to_vmem [thread:$0]  %s14512_s4, 16384, %s52_s24, [#allocation7], %s12166_s7, %s12166_s7, %s12167_s3  }
  0x56   :  { %s12036_s17 = scalar_lea.hbm %s14514_s6, 16 }
  0x57   :  { %p12037_p12 = scmp.ne.s32.totalorder %s14514_s6, %s12036_s17  ;;  %p12040_p13 = scmp.lt.u32.totalorder %s12036_s17, %s14514_s6 }
  0x59   :  { %p12042_p0 = pnand %p12040_p13, %p12037_p12 }
  0x5b   :  { %12045 = shalt.err (!%p12042_p0)
}
  0x5c   :  { %s12046_s20 = scalar_lea.vmem %s77_s26, 16  ;;  %s12050_s23 = scalar_lea.vmem %s77_s26, 32 }
  0x5d   :  { %p12047_p1 = scmp.ne.s32.totalorder %s77_s26, %s12046_s20  ;;  %p12051_p2 = scmp.lt.s32.totalorder %s77_s26, %s77_s26 }
  0x5e   :  { %p12052_p3 = scmp.lt.s32.totalorder %s12050_s23, %s12046_s20 }
  0x60   :  { %p12053_p4 = por %p12052_p3, %p12051_p2 }
  0x62   :  { %p12054_p5 = pnand %p12053_p4, %p12047_p1 }
  0x64   :  { %12057 = shalt.err (!%p12054_p5)
}
  0x65   :  { %79 = dma.hbm_to_vmem [thread:$0]  %s14514_s6, 16, %s77_s26, [#allocation10]  }
  0x66   :  { %s12170_s3 = smov [#allocation14]   ;;  %s12058_s28 = scalar_lea.hbm %s14516_s8, 16 }
  0x67   :  { %s98_s24 = sshll.u32 %s12170_s3, 4  ;;  %p12059_p6 = scmp.ne.s32.totalorder %s14516_s8, %s12058_s28  ;;  %s99_s24 = int_to_ptr.vmem [resolvable:$true] %s98_s24 }
  0x68   :  { %p12062_p7 = scmp.lt.u32.totalorder %s12058_s28, %s14516_s8 }
  0x6a   :  { %p12064_p8 = pnand %p12062_p7, %p12059_p6 }
  0x6c   :  { %12067 = shalt.err (!%p12064_p8)
}
  0x6d   :  { %s12068_s11 = scalar_lea.vmem %s99_s24, 16  ;;  %s12072_s6 = scalar_lea.vmem %s99_s24, 32 }
  0x6e   :  { %p12069_p9 = scmp.ne.s32.totalorder %s99_s24, %s12068_s11  ;;  %p12073_p10 = scmp.lt.s32.totalorder %s99_s24, %s99_s24 }
  0x6f   :  { %p12074_p11 = scmp.lt.s32.totalorder %s12072_s6, %s12068_s11 }
  0x71   :  { %p12075_p12 = por %p12074_p11, %p12073_p10 }
  0x73   :  { %p12076_p13 = pnand %p12075_p12, %p12069_p9 }
  0x75   :  { %12079 = shalt.err (!%p12076_p13)
}
  0x76   :  { %101 = dma.hbm_to_vmem [thread:$0]  %s14516_s8, 16, %s99_s24, [#allocation13]  }
  0x77   :  { %12116 = dma.done.wait [#allocation5], 49152  }
  0x78   :  { %12117 = vsyncadd [#allocation5], 4294918144 }
  0x79   :  { %12118 = dma.done.wait [#allocation7], 16512  }
  0x7a   :  { %12119 = vsyncadd [#allocation7], 4294950784 }
  0x7b   :  { %12120 = dma.done.wait [#allocation10], 2064  }
  0x7c   :  { %12121 = vsyncadd [#allocation10], 4294965232 }
  0x7d   :  { %12122 = dma.done.wait [#allocation13], 2064  }
  0x7e   :  { %12123 = vsyncadd [#allocation13], 4294965232  ;;  %v12324_v0 = vld [vmem:[#allocation8] sm:$0xff]  ;;  %v12326_v1 = vld [vmem:[#allocation8 + $0x8] sm:$0xff] }
  0x7f   :  { %14979 = vst [vmem:[#allocation19_spill] sm:$0xff] %v12324_v0  ;;  %14980 = vst [vmem:[#allocation20_spill] sm:$0xff] %v12326_v1  ;;  %v12328_v2 = vld [vmem:[#allocation8 + $0x10] sm:$0xff]  ;;  %v12330_v3 = vld [vmem:[#allocation8 + $0x18] sm:$0xff] }
  0x80   :  { %14981 = vst [vmem:[#allocation21_spill] sm:$0xff] %v12328_v2  ;;  %14982 = vst [vmem:[#allocation22_spill] sm:$0xff] %v12330_v3  ;;  %v12332_v4 = vld [vmem:[#allocation8 + $0x20] sm:$0xff]  ;;  %v12334_v5 = vld [vmem:[#allocation8 + $0x28] sm:$0xff] }
  0x81   :  { %14983 = vst [vmem:[#allocation23_spill] sm:$0xff] %v12332_v4  ;;  %14984 = vst [vmem:[#allocation24_spill] sm:$0xff] %v12334_v5  ;;  %v12336_v6 = vld [vmem:[#allocation8 + $0x30] sm:$0xff]  ;;  %v12338_v7 = vld [vmem:[#allocation8 + $0x38] sm:$0xff] }
  0x82   :  { %14985 = vst [vmem:[#allocation25_spill] sm:$0xff] %v12336_v6  ;;  %14986 = vst [vmem:[#allocation26_spill] sm:$0xff] %v12338_v7  ;;  %v12340_v8 = vld [vmem:[#allocation8 + $0x40] sm:$0xff]  ;;  %v12342_v9 = vld [vmem:[#allocation8 + $0x48] sm:$0xff] }
  0x83   :  { %14987 = vst [vmem:[#allocation27_spill] sm:$0xff] %v12340_v8  ;;  %14988 = vst [vmem:[#allocation28_spill] sm:$0xff] %v12342_v9  ;;  %v12344_v10 = vld [vmem:[#allocation8 + $0x50] sm:$0xff]  ;;  %v12346_v11 = vld [vmem:[#allocation8 + $0x58] sm:$0xff] }
  0x84   :  { %14989 = vst [vmem:[#allocation29_spill] sm:$0xff] %v12344_v10  ;;  %14990 = vst [vmem:[#allocation30_spill] sm:$0xff] %v12346_v11  ;;  %v12348_v12 = vld [vmem:[#allocation8 + $0x60] sm:$0xff]  ;;  %v12350_v13 = vld [vmem:[#allocation8 + $0x68] sm:$0xff] }
  0x85   :  { %14991 = vst [vmem:[#allocation31_spill] sm:$0xff] %v12348_v12  ;;  %14992 = vst [vmem:[#allocation32_spill] sm:$0xff] %v12350_v13  ;;  %v12352_v14 = vld [vmem:[#allocation8 + $0x70] sm:$0xff]  ;;  %v12354_v15 = vld [vmem:[#allocation8 + $0x78] sm:$0xff] }
  0x86   :  { %14993 = vst [vmem:[#allocation33_spill] sm:$0xff] %v12352_v14  ;;  %14994 = vst [vmem:[#allocation34_spill] sm:$0xff] %v12354_v15  ;;  %v12356_v16 = vld [vmem:[#allocation8 + $0x80] sm:$0xff]  ;;  %v12358_v17 = vld [vmem:[#allocation8 + $0x88] sm:$0xff] }
  0x87   :  { %14995 = vst [vmem:[#allocation35_spill] sm:$0xff] %v12356_v16  ;;  %14996 = vst [vmem:[#allocation36_spill] sm:$0xff] %v12358_v17  ;;  %v12360_v18 = vld [vmem:[#allocation8 + $0x90] sm:$0xff]  ;;  %v12362_v19 = vld [vmem:[#allocation8 + $0x98] sm:$0xff] }
  0x88   :  { %14997 = vst [vmem:[#allocation37_spill] sm:$0xff] %v12360_v18  ;;  %14998 = vst [vmem:[#allocation38_spill] sm:$0xff] %v12362_v19  ;;  %v12364_v20 = vld [vmem:[#allocation8 + $0xa0] sm:$0xff]  ;;  %v12366_v21 = vld [vmem:[#allocation8 + $0xa8] sm:$0xff] }
  0x89   :  { %14999 = vst [vmem:[#allocation39_spill] sm:$0xff] %v12364_v20  ;;  %15000 = vst [vmem:[#allocation40_spill] sm:$0xff] %v12366_v21  ;;  %v12368_v22 = vld [vmem:[#allocation8 + $0xb0] sm:$0xff]  ;;  %v12370_v23 = vld [vmem:[#allocation8 + $0xb8] sm:$0xff] }
  0x8a   :  { %15001 = vst [vmem:[#allocation41_spill] sm:$0xff] %v12368_v22  ;;  %15002 = vst [vmem:[#allocation42_spill] sm:$0xff] %v12370_v23  ;;  %v12372_v24 = vld [vmem:[#allocation8 + $0xc0] sm:$0xff]  ;;  %v12374_v25 = vld [vmem:[#allocation8 + $0xc8] sm:$0xff] }
  0x8b   :  { %15003 = vst [vmem:[#allocation43_spill] sm:$0xff] %v12372_v24  ;;  %15004 = vst [vmem:[#allocation44_spill] sm:$0xff] %v12374_v25  ;;  %v12376_v26 = vld [vmem:[#allocation8 + $0xd0] sm:$0xff]  ;;  %v12378_v27 = vld [vmem:[#allocation8 + $0xd8] sm:$0xff] }
  0x8c   :  { %15005 = vst [vmem:[#allocation45_spill] sm:$0xff] %v12376_v26  ;;  %15006 = vst [vmem:[#allocation46_spill] sm:$0xff] %v12378_v27  ;;  %v12380_v28 = vld [vmem:[#allocation8 + $0xe0] sm:$0xff]  ;;  %v12382_v29 = vld [vmem:[#allocation8 + $0xe8] sm:$0xff] }
  0x8d   :  { %15007 = vst [vmem:[#allocation47_spill] sm:$0xff] %v12380_v28  ;;  %15008 = vst [vmem:[#allocation48_spill] sm:$0xff] %v12382_v29  ;;  %v12384_v30 = vld [vmem:[#allocation8 + $0xf0] sm:$0xff]  ;;  %v12386_v31 = vld [vmem:[#allocation8 + $0xf8] sm:$0xff] }
  0x8e   :  { %15009 = vst [vmem:[#allocation49_spill] sm:$0xff] %v12384_v30  ;;  %15010 = vst [vmem:[#allocation50_spill] sm:$0xff] %v12386_v31  ;;  %v12388_v32 = vld [vmem:[#allocation8 + $0x100] sm:$0xff]  ;;  %v12390_v33 = vld [vmem:[#allocation8 + $0x108] sm:$0xff] }
  0x8f   :  { %15011 = vst [vmem:[#allocation51_spill] sm:$0xff] %v12388_v32  ;;  %15012 = vst [vmem:[#allocation52_spill] sm:$0xff] %v12390_v33  ;;  %v12392_v34 = vld [vmem:[#allocation8 + $0x110] sm:$0xff]  ;;  %v12394_v35 = vld [vmem:[#allocation8 + $0x118] sm:$0xff] }
  0x90   :  { %15013 = vst [vmem:[#allocation53_spill] sm:$0xff] %v12392_v34  ;;  %15014 = vst [vmem:[#allocation54_spill] sm:$0xff] %v12394_v35  ;;  %v12396_v36 = vld [vmem:[#allocation8 + $0x120] sm:$0xff]  ;;  %v12398_v37 = vld [vmem:[#allocation8 + $0x128] sm:$0xff] }
  0x91   :  { %15015 = vst [vmem:[#allocation55_spill] sm:$0xff] %v12396_v36  ;;  %15016 = vst [vmem:[#allocation56_spill] sm:$0xff] %v12398_v37  ;;  %v12400_v38 = vld [vmem:[#allocation8 + $0x130] sm:$0xff]  ;;  %v12402_v39 = vld [vmem:[#allocation8 + $0x138] sm:$0xff] }
  0x92   :  { %15017 = vst [vmem:[#allocation57_spill] sm:$0xff] %v12400_v38  ;;  %15018 = vst [vmem:[#allocation58_spill] sm:$0xff] %v12402_v39  ;;  %v12404_v40 = vld [vmem:[#allocation8 + $0x140] sm:$0xff]  ;;  %v12406_v41 = vld [vmem:[#allocation8 + $0x148] sm:$0xff] }
  0x93   :  { %15019 = vst [vmem:[#allocation59_spill] sm:$0xff] %v12404_v40  ;;  %15020 = vst [vmem:[#allocation60_spill] sm:$0xff] %v12406_v41  ;;  %v12408_v42 = vld [vmem:[#allocation8 + $0x150] sm:$0xff]  ;;  %v12410_v43 = vld [vmem:[#allocation8 + $0x158] sm:$0xff] }
  0x94   :  { %15021 = vst [vmem:[#allocation61_spill] sm:$0xff] %v12408_v42  ;;  %15022 = vst [vmem:[#allocation62_spill] sm:$0xff] %v12410_v43  ;;  %v12412_v44 = vld [vmem:[#allocation8 + $0x160] sm:$0xff]  ;;  %v12414_v45 = vld [vmem:[#allocation8 + $0x168] sm:$0xff] }
  0x95   :  { %15023 = vst [vmem:[#allocation63_spill] sm:$0xff] %v12412_v44  ;;  %15024 = vst [vmem:[#allocation64_spill] sm:$0xff] %v12414_v45  ;;  %v12416_v46 = vld [vmem:[#allocation8 + $0x170] sm:$0xff]  ;;  %v12418_v47 = vld [vmem:[#allocation8 + $0x178] sm:$0xff] }
  0x96   :  { %15025 = vst [vmem:[#allocation65_spill] sm:$0xff] %v12416_v46  ;;  %15026 = vst [vmem:[#allocation66_spill] sm:$0xff] %v12418_v47  ;;  %v12420_v48 = vld [vmem:[#allocation8 + $0x180] sm:$0xff]  ;;  %v12422_v49 = vld [vmem:[#allocation8 + $0x188] sm:$0xff] }
  0x97   :  { %15027 = vst [vmem:[#allocation67_spill] sm:$0xff] %v12420_v48  ;;  %15028 = vst [vmem:[#allocation68_spill] sm:$0xff] %v12422_v49  ;;  %v12424_v50 = vld [vmem:[#allocation8 + $0x190] sm:$0xff]  ;;  %v12426_v51 = vld [vmem:[#allocation8 + $0x198] sm:$0xff] }
  0x98   :  { %15029 = vst [vmem:[#allocation69_spill] sm:$0xff] %v12424_v50  ;;  %15030 = vst [vmem:[#allocation70_spill] sm:$0xff] %v12426_v51  ;;  %v12428_v52 = vld [vmem:[#allocation8 + $0x1a0] sm:$0xff]  ;;  %v12430_v53 = vld [vmem:[#allocation8 + $0x1a8] sm:$0xff] }
  0x99   :  { %15031 = vst [vmem:[#allocation71_spill] sm:$0xff] %v12428_v52  ;;  %15032 = vst [vmem:[#allocation72_spill] sm:$0xff] %v12430_v53  ;;  %v12432_v54 = vld [vmem:[#allocation8 + $0x1b0] sm:$0xff]  ;;  %v12434_v55 = vld [vmem:[#allocation8 + $0x1b8] sm:$0xff] }
  0x9a   :  { %15033 = vst [vmem:[#allocation73_spill] sm:$0xff] %v12432_v54  ;;  %15034 = vst [vmem:[#allocation74_spill] sm:$0xff] %v12434_v55  ;;  %v12436_v56 = vld [vmem:[#allocation8 + $0x1c0] sm:$0xff]  ;;  %v12438_v57 = vld [vmem:[#allocation8 + $0x1c8] sm:$0xff] }
  0x9b   :  { %15035 = vst [vmem:[#allocation75_spill] sm:$0xff] %v12436_v56  ;;  %15036 = vst [vmem:[#allocation76_spill] sm:$0xff] %v12438_v57  ;;  %v12440_v58 = vld [vmem:[#allocation8 + $0x1d0] sm:$0xff]  ;;  %v12442_v59 = vld [vmem:[#allocation8 + $0x1d8] sm:$0xff] }
  0x9c   :  { %15037 = vst [vmem:[#allocation77_spill] sm:$0xff] %v12440_v58  ;;  %15038 = vst [vmem:[#allocation78_spill] sm:$0xff] %v12442_v59  ;;  %v12444_v60 = vld [vmem:[#allocation8 + $0x1e0] sm:$0xff]  ;;  %v12446_v61 = vld [vmem:[#allocation8 + $0x1e8] sm:$0xff] }
  0x9d   :  { %15039 = vst [vmem:[#allocation79_spill] sm:$0xff] %v12444_v60  ;;  %15040 = vst [vmem:[#allocation80_spill] sm:$0xff] %v12446_v61  ;;  %v12448_v62 = vld [vmem:[#allocation8 + $0x1f0] sm:$0xff]  ;;  %v12450_v63 = vld [vmem:[#allocation8 + $0x1f8] sm:$0xff] }
  0x9e   :  { %15041 = vst [vmem:[#allocation81_spill] sm:$0xff] %v12448_v62  ;;  %15042 = vst [vmem:[#allocation82_spill] sm:$0xff] %v12450_v63  ;;  %v12452_v51 = vld [vmem:[#allocation8 + $0x200] sm:$0xff]  ;;  %v12454_v50 = vld [vmem:[#allocation8 + $0x208] sm:$0xff] }
  0x9f   :  { %15043 = vst [vmem:[#allocation83_spill] sm:$0xff] %v12452_v51  ;;  %15044 = vst [vmem:[#allocation84_spill] sm:$0xff] %v12454_v50  ;;  %v12456_v55 = vld [vmem:[#allocation8 + $0x210] sm:$0xff]  ;;  %v12458_v54 = vld [vmem:[#allocation8 + $0x218] sm:$0xff] }
  0xa0   :  { %15045 = vst [vmem:[#allocation85_spill] sm:$0xff] %v12456_v55  ;;  %15046 = vst [vmem:[#allocation86_spill] sm:$0xff] %v12458_v54  ;;  %v12460_v43 = vld [vmem:[#allocation8 + $0x220] sm:$0xff]  ;;  %v12462_v58 = vld [vmem:[#allocation8 + $0x228] sm:$0xff] }
  0xa1   :  { %15047 = vst [vmem:[#allocation87_spill] sm:$0xff] %v12460_v43  ;;  %15048 = vst [vmem:[#allocation88_spill] sm:$0xff] %v12462_v58  ;;  %v12464_v59 = vld [vmem:[#allocation8 + $0x230] sm:$0xff]  ;;  %v12466_v47 = vld [vmem:[#allocation8 + $0x238] sm:$0xff] }
  0xa2   :  { %15049 = vst [vmem:[#allocation89_spill] sm:$0xff] %v12464_v59  ;;  %15050 = vst [vmem:[#allocation90_spill] sm:$0xff] %v12466_v47  ;;  %v12468_v42 = vld [vmem:[#allocation8 + $0x240] sm:$0xff]  ;;  %v12470_v62 = vld [vmem:[#allocation8 + $0x248] sm:$0xff] }
  0xa3   :  { %15051 = vst [vmem:[#allocation91_spill] sm:$0xff] %v12468_v42  ;;  %15052 = vst [vmem:[#allocation92_spill] sm:$0xff] %v12470_v62  ;;  %v12472_v63 = vld [vmem:[#allocation8 + $0x250] sm:$0xff]  ;;  %v12474_v46 = vld [vmem:[#allocation8 + $0x258] sm:$0xff] }
  0xa4   :  { %15053 = vst [vmem:[#allocation93_spill] sm:$0xff] %v12472_v63  ;;  %15054 = vst [vmem:[#allocation94_spill] sm:$0xff] %v12474_v46  ;;  %v12476_v35 = vld [vmem:[#allocation8 + $0x260] sm:$0xff]  ;;  %v12478_v55 = vld [vmem:[#allocation8 + $0x268] sm:$0xff] }
  0xa5   :  { %15055 = vst [vmem:[#allocation95_spill] sm:$0xff] %v12476_v35  ;;  %15056 = vst [vmem:[#allocation96_spill] sm:$0xff] %v12478_v55  ;;  %v12480_v54 = vld [vmem:[#allocation8 + $0x270] sm:$0xff]  ;;  %v12482_v39 = vld [vmem:[#allocation8 + $0x278] sm:$0xff] }
  0xa6   :  { %15057 = vst [vmem:[#allocation97_spill] sm:$0xff] %v12480_v54  ;;  %15058 = vst [vmem:[#allocation98_spill] sm:$0xff] %v12482_v39  ;;  %v12484_v34 = vld [vmem:[#allocation8 + $0x280] sm:$0xff]  ;;  %v12486_v59 = vld [vmem:[#allocation8 + $0x288] sm:$0xff] }
  0xa7   :  { %15059 = vst [vmem:[#allocation99_spill] sm:$0xff] %v12484_v34  ;;  %15060 = vst [vmem:[#allocation100_spill] sm:$0xff] %v12486_v59  ;;  %v12488_v47 = vld [vmem:[#allocation8 + $0x290] sm:$0xff]  ;;  %v12490_v38 = vld [vmem:[#allocation8 + $0x298] sm:$0xff] }
  0xa8   :  { %15061 = vst [vmem:[#allocation101_spill] sm:$0xff] %v12488_v47  ;;  %15062 = vst [vmem:[#allocation102_spill] sm:$0xff] %v12490_v38  ;;  %v12492_v27 = vld [vmem:[#allocation8 + $0x2a0] sm:$0xff]  ;;  %v12494_v63 = vld [vmem:[#allocation8 + $0x2a8] sm:$0xff] }
  0xa9   :  { %15063 = vst [vmem:[#allocation103_spill] sm:$0xff] %v12492_v27  ;;  %15064 = vst [vmem:[#allocation104_spill] sm:$0xff] %v12494_v63  ;;  %v12496_v46 = vld [vmem:[#allocation8 + $0x2b0] sm:$0xff]  ;;  %v12498_v31 = vld [vmem:[#allocation8 + $0x2b8] sm:$0xff] }
  0xaa   :  { %15065 = vst [vmem:[#allocation105_spill] sm:$0xff] %v12496_v46  ;;  %15066 = vst [vmem:[#allocation106_spill] sm:$0xff] %v12498_v31  ;;  %v12500_v26 = vld [vmem:[#allocation8 + $0x2c0] sm:$0xff]  ;;  %v12502_v54 = vld [vmem:[#allocation8 + $0x2c8] sm:$0xff] }
  0xab   :  { %15067 = vst [vmem:[#allocation107_spill] sm:$0xff] %v12500_v26  ;;  %15068 = vst [vmem:[#allocation108_spill] sm:$0xff] %v12502_v54  ;;  %v12504_v39 = vld [vmem:[#allocation8 + $0x2d0] sm:$0xff]  ;;  %v12506_v30 = vld [vmem:[#allocation8 + $0x2d8] sm:$0xff] }
  0xac   :  { %15069 = vst [vmem:[#allocation109_spill] sm:$0xff] %v12504_v39  ;;  %15070 = vst [vmem:[#allocation110_spill] sm:$0xff] %v12506_v30  ;;  %v12508_v19 = vld [vmem:[#allocation8 + $0x2e0] sm:$0xff]  ;;  %v12510_v47 = vld [vmem:[#allocation8 + $0x2e8] sm:$0xff] }
  0xad   :  { %15071 = vst [vmem:[#allocation111_spill] sm:$0xff] %v12508_v19  ;;  %15072 = vst [vmem:[#allocation112_spill] sm:$0xff] %v12510_v47  ;;  %v12512_v38 = vld [vmem:[#allocation8 + $0x2f0] sm:$0xff]  ;;  %v12514_v23 = vld [vmem:[#allocation8 + $0x2f8] sm:$0xff] }
  0xae   :  { %15073 = vst [vmem:[#allocation113_spill] sm:$0xff] %v12512_v38  ;;  %15074 = vst [vmem:[#allocation114_spill] sm:$0xff] %v12514_v23  ;;  %v12516_v18 = vld [vmem:[#allocation8 + $0x300] sm:$0xff]  ;;  %v12518_v46 = vld [vmem:[#allocation8 + $0x308] sm:$0xff] }
  0xaf   :  { %15075 = vst [vmem:[#allocation115_spill] sm:$0xff] %v12516_v18  ;;  %15076 = vst [vmem:[#allocation116_spill] sm:$0xff] %v12518_v46  ;;  %v12520_v31 = vld [vmem:[#allocation8 + $0x310] sm:$0xff]  ;;  %v12522_v22 = vld [vmem:[#allocation8 + $0x318] sm:$0xff] }
  0xb0   :  { %15077 = vst [vmem:[#allocation117_spill] sm:$0xff] %v12520_v31  ;;  %15078 = vst [vmem:[#allocation118_spill] sm:$0xff] %v12522_v22  ;;  %v12524_v11 = vld [vmem:[#allocation8 + $0x320] sm:$0xff]  ;;  %v12526_v39 = vld [vmem:[#allocation8 + $0x328] sm:$0xff] }
  0xb1   :  { %15079 = vst [vmem:[#allocation119_spill] sm:$0xff] %v12524_v11  ;;  %15080 = vst [vmem:[#allocation120_spill] sm:$0xff] %v12526_v39  ;;  %v12528_v30 = vld [vmem:[#allocation8 + $0x330] sm:$0xff]  ;;  %v12530_v15 = vld [vmem:[#allocation8 + $0x338] sm:$0xff] }
  0xb2   :  { %15081 = vst [vmem:[#allocation121_spill] sm:$0xff] %v12528_v30  ;;  %15082 = vst [vmem:[#allocation122_spill] sm:$0xff] %v12530_v15  ;;  %v12532_v10 = vld [vmem:[#allocation8 + $0x340] sm:$0xff]  ;;  %v12534_v38 = vld [vmem:[#allocation8 + $0x348] sm:$0xff] }
  0xb3   :  { %15083 = vst [vmem:[#allocation123_spill] sm:$0xff] %v12532_v10  ;;  %15084 = vst [vmem:[#allocation124_spill] sm:$0xff] %v12534_v38  ;;  %v12536_v23 = vld [vmem:[#allocation8 + $0x350] sm:$0xff]  ;;  %v12538_v14 = vld [vmem:[#allocation8 + $0x358] sm:$0xff] }
  0xb4   :  { %15085 = vst [vmem:[#allocation125_spill] sm:$0xff] %v12536_v23  ;;  %15086 = vst [vmem:[#allocation126_spill] sm:$0xff] %v12538_v14  ;;  %v12540_v3 = vld [vmem:[#allocation8 + $0x360] sm:$0xff]  ;;  %v12542_v31 = vld [vmem:[#allocation8 + $0x368] sm:$0xff] }
  0xb5   :  { %15087 = vst [vmem:[#allocation127_spill] sm:$0xff] %v12540_v3  ;;  %15088 = vst [vmem:[#allocation128_spill] sm:$0xff] %v12542_v31  ;;  %v12544_v22 = vld [vmem:[#allocation8 + $0x370] sm:$0xff]  ;;  %v12546_v7 = vld [vmem:[#allocation8 + $0x378] sm:$0xff] }
  0xb6   :  { %15089 = vst [vmem:[#allocation129_spill] sm:$0xff] %v12544_v22  ;;  %15090 = vst [vmem:[#allocation130_spill] sm:$0xff] %v12546_v7  ;;  %v12548_v2 = vld [vmem:[#allocation8 + $0x380] sm:$0xff]  ;;  %v12550_v30 = vld [vmem:[#allocation8 + $0x388] sm:$0xff] }
  0xb7   :  { %15091 = vst [vmem:[#allocation131_spill] sm:$0xff] %v12548_v2  ;;  %15092 = vst [vmem:[#allocation132_spill] sm:$0xff] %v12550_v30  ;;  %v12552_v15 = vld [vmem:[#allocation8 + $0x390] sm:$0xff]  ;;  %v12554_v6 = vld [vmem:[#allocation8 + $0x398] sm:$0xff] }
  0xb8   :  { %15093 = vst [vmem:[#allocation133_spill] sm:$0xff] %v12552_v15  ;;  %15094 = vst [vmem:[#allocation134_spill] sm:$0xff] %v12554_v6  ;;  %v12556_v38 = vld [vmem:[#allocation8 + $0x3a0] sm:$0xff]  ;;  %v12558_v23 = vld [vmem:[#allocation8 + $0x3a8] sm:$0xff] }
  0xb9   :  { %15095 = vst [vmem:[#allocation135_spill] sm:$0xff] %v12556_v38  ;;  %15096 = vst [vmem:[#allocation136_spill] sm:$0xff] %v12558_v23  ;;  %v12560_v14 = vld [vmem:[#allocation8 + $0x3b0] sm:$0xff]  ;;  %v12562_v10 = vld [vmem:[#allocation8 + $0x3b8] sm:$0xff] }
  0xba   :  { %15097 = vst [vmem:[#allocation137_spill] sm:$0xff] %v12560_v14  ;;  %15098 = vst [vmem:[#allocation138_spill] sm:$0xff] %v12562_v10  ;;  %v12564_v31 = vld [vmem:[#allocation8 + $0x3c0] sm:$0xff]  ;;  %v12566_v22 = vld [vmem:[#allocation8 + $0x3c8] sm:$0xff] }
  0xbb   :  { %15099 = vst [vmem:[#allocation139_spill] sm:$0xff] %v12564_v31  ;;  %15100 = vst [vmem:[#allocation140_spill] sm:$0xff] %v12566_v22  ;;  %v12568_v7 = vld [vmem:[#allocation8 + $0x3d0] sm:$0xff]  ;;  %v12570_v2 = vld [vmem:[#allocation8 + $0x3d8] sm:$0xff] }
  0xbc   :  { %15101 = vst [vmem:[#allocation141_spill] sm:$0xff] %v12568_v7  ;;  %15102 = vst [vmem:[#allocation142_spill] sm:$0xff] %v12570_v2  ;;  %v12572_v30 = vld [vmem:[#allocation8 + $0x3e0] sm:$0xff]  ;;  %v12574_v15 = vld [vmem:[#allocation8 + $0x3e8] sm:$0xff] }
  0xbd   :  { %15103 = vst [vmem:[#allocation143_spill] sm:$0xff] %v12572_v30  ;;  %15104 = vst [vmem:[#allocation144_spill] sm:$0xff] %v12574_v15  ;;  %v12576_v6 = vld [vmem:[#allocation8 + $0x3f0] sm:$0xff]  ;;  %v12578_v38 = vld [vmem:[#allocation8 + $0x3f8] sm:$0xff] }
  0xbe   :  { %15105 = vst [vmem:[#allocation145_spill] sm:$0xff] %v12576_v6  ;;  %15106 = vst [vmem:[#allocation146_spill] sm:$0xff] %v12578_v38  ;;  %v149_v23 = vld [vmem:[#allocation4] sm:$0xff]  ;;  %v150_v3 = vld [vmem:[#allocation4 + $0x8] sm:$0xff] }
  0xbf   :  { %v153_v14 = vld [vmem:[#allocation4 + $0x20] sm:$0xff]  ;;  %v154_v10 = vld [vmem:[#allocation4 + $0x28] sm:$0xff]  ;;  %v3761_v53 = vld [vmem:[#allocation4 + $0x3b8] sm:$0xff] }
  0xc0   :  { %v9901_v46 = vcombine.high %v149_v23, %v153_v14  ;;  %v9903_v31 = vcombine.high %v150_v3, %v154_v10  ;;  %v9900_v39 = vcombine.low %v149_v23, %v153_v14  ;;  %v9902_v22 = vcombine.low %v150_v3, %v154_v10  ;;  %v157_v18 = vld [vmem:[#allocation4 + $0x40] sm:$0xff]  ;;  %v158_v11 = vld [vmem:[#allocation4 + $0x48] sm:$0xff] }
  0xc1   :  { %v161_v7 = vld [vmem:[#allocation4 + $0x60] sm:$0xff]  ;;  %v162_v54 = vld [vmem:[#allocation4 + $0x68] sm:$0xff] }
  0xc2   :  { %v9909_v2 = vcombine.high %v157_v18, %v161_v7  ;;  %v165_v30 = vld [vmem:[#allocation4 + $0x80] sm:$0xff]  ;;  %2614 = vmatprep.subr.bf16.mxu0 %v9901_v46  ;;  %2833 = vmatprep.subr.bf16.mxu1 %v9903_v31  ;;  %v9911_v6 = vcombine.high %v158_v11, %v162_v54  ;;  %v166_v15 = vld [vmem:[#allocation4 + $0x88] sm:$0xff]  ;;  %v9908_v26 = vcombine.low %v157_v18, %v161_v7 }
  0xc3   :  { %v169_v47 = vld [vmem:[#allocation4 + $0xa0] sm:$0xff]  ;;  %v170_v38 = vld [vmem:[#allocation4 + $0xa8] sm:$0xff]  ;;  %2615 = vmatpush1.bf16.msra.mxu0 %v9900_v39  ;;  %2834 = vmatpush1.bf16.msra.mxu1 %v9902_v22  ;;  %v9910_v19 = vcombine.low %v158_v11, %v162_v54 }
  0xc4   :  { %2616 = vmatprep.subr.bf16.mxu0 %v9909_v2  ;;  %2835 = vmatprep.subr.bf16.mxu1 %v9911_v6  ;;  %v9917_v14 = vcombine.high %v165_v30, %v169_v47  ;;  %v9919_v3 = vcombine.high %v166_v15, %v170_v38  ;;  %v173_v10 = vld [vmem:[#allocation4 + $0xc0] sm:$0xff]  ;;  %v174_v59 = vld [vmem:[#allocation4 + $0xc8] sm:$0xff]  ;;  %v9916_v34 = vcombine.low %v165_v30, %v169_v47 }
  0xc5   :  { %v177_v23 = vld [vmem:[#allocation4 + $0xe0] sm:$0xff]  ;;  %v178_v63 = vld [vmem:[#allocation4 + $0xe8] sm:$0xff]  ;;  %v9918_v46 = vcombine.low %v166_v15, %v170_v38 }
  0xc6   :  { %v9925_v31 = vcombine.high %v173_v10, %v177_v23  ;;  %v9927_v27 = vcombine.high %v174_v59, %v178_v63  ;;  %v181_v39 = vld [vmem:[#allocation4 + $0x100] sm:$0xff]  ;;  %v182_v7 = vld [vmem:[#allocation4 + $0x108] sm:$0xff]  ;;  %v9924_v2 = vcombine.low %v173_v10, %v177_v23  ;;  %v9926_v6 = vcombine.low %v174_v59, %v178_v63 }
  0xc7   :  { %2617 = vmatpush1.bf16.msra.mxu0 %v9908_v26  ;;  %2836 = vmatpush1.bf16.msra.mxu1 %v9910_v19  ;;  %v185_v22 = vld [vmem:[#allocation4 + $0x120] sm:$0xff]  ;;  %v186_v11 = vld [vmem:[#allocation4 + $0x128] sm:$0xff] }
  0xc8   :  { %2618 = vmatprep.subr.bf16.mxu0 %v9917_v14  ;;  %2837 = vmatprep.subr.bf16.mxu1 %v9919_v3  ;;  %v9933_v18 = vcombine.high %v181_v39, %v185_v22  ;;  %v9935_v54 = vcombine.high %v182_v7, %v186_v11  ;;  %v189_v26 = vld [vmem:[#allocation4 + $0x140] sm:$0xff]  ;;  %v190_v30 = vld [vmem:[#allocation4 + $0x148] sm:$0xff]  ;;  %v9932_v38 = vcombine.low %v181_v39, %v185_v22 }
  0xc9   :  { %v193_v19 = vld [vmem:[#allocation4 + $0x160] sm:$0xff]  ;;  %v194_v15 = vld [vmem:[#allocation4 + $0x168] sm:$0xff]  ;;  %v9934_v47 = vcombine.low %v182_v7, %v186_v11 }
  0xca   :  { %v9941_v14 = vcombine.high %v189_v26, %v193_v19  ;;  %v9943_v3 = vcombine.high %v190_v30, %v194_v15  ;;  %v198_v10 = vld [vmem:[#allocation4 + $0x188] sm:$0xff]  ;;  %v9942_v63 = vcombine.low %v190_v30, %v194_v15  ;;  %v205_v23 = vld [vmem:[#allocation4 + $0x1c0] sm:$0xff] }
  0xcb   :  { %2619 = vmatpush1.bf16.msra.mxu0 %v9916_v34  ;;  %2838 = vmatpush1.bf16.msra.mxu1 %v9918_v46  ;;  %v197_v34 = vld [vmem:[#allocation4 + $0x180] sm:$0xff]  ;;  %v202_v59 = vld [vmem:[#allocation4 + $0x1a8] sm:$0xff] }
  0xcc   :  { %2620 = vmatprep.subr.bf16.mxu0 %v9925_v31  ;;  %2839 = vmatprep.subr.bf16.mxu1 %v9927_v27  ;;  %v201_v46 = vld [vmem:[#allocation4 + $0x1a0] sm:$0xff]  ;;  %v9940_v27 = vcombine.low %v189_v26, %v193_v19  ;;  %v206_v7 = vld [vmem:[#allocation4 + $0x1c8] sm:$0xff] }
  0xcd   :  { %v9949_v31 = vcombine.high %v197_v34, %v201_v46  ;;  %v11505_v39 = vld [vmem:[%s14508_s0 + $0x4] ss:$24 sps:$4 sm:$0xff]   ;;  %v210_v11 = vld [vmem:[#allocation4 + $0x1e8] sm:$0xff] }
  0xce   :  { %v209_v22 = vld [vmem:[#allocation4 + $0x1e0] sm:$0xff]  ;;  %2646 = vmatprep.mubr.bf16.mxu0 %v11505_v39  ;;  %2865 = vmatprep.mubr.bf16.mxu1 %v11505_v39  ;;  %v9959_v26 = vcombine.high %v206_v7, %v210_v11  ;;  %v214_v15 = vld [vmem:[#allocation4 + $0x208] sm:$0xff] }
  0xcf   :  { %2621 = vmatpush1.bf16.msra.mxu0 %v9924_v2  ;;  %2840 = vmatpush1.bf16.msra.mxu1 %v9926_v6  ;;  %v9951_v2 = vcombine.high %v198_v10, %v202_v59  ;;  %v9948_v6 = vcombine.low %v197_v34, %v201_v46  ;;  %v213_v19 = vld [vmem:[#allocation4 + $0x200] sm:$0xff]  ;;  %v222_v34 = vld [vmem:[#allocation4 + $0x248] sm:$0xff] }
  0xd0   :  { %2622 = vmatprep.subr.bf16.mxu0 %v9933_v18  ;;  %2841 = vmatprep.subr.bf16.mxu1 %v9935_v54  ;;  %v9950_v18 = vcombine.low %v198_v10, %v202_v59  ;;  %v9957_v54 = vcombine.high %v205_v23, %v209_v22  ;;  %v217_v30 = vld [vmem:[#allocation4 + $0x220] sm:$0xff]  ;;  %v226_v46 = vld [vmem:[#allocation4 + $0x268] sm:$0xff] }
  0xd1   :  { %v9964_v10 = vcombine.low %v213_v19, %v217_v30  ;;  %v357_v62 = vld [vmem:[#allocation4 + $0x680] sm:$0xff]  ;;  %v3759_v56 = vld [vmem:[#allocation4 + $0x3a8] sm:$0xff] }
  0xd2   :  { %v12740_v55 = vld [vmem:[#allocation4 + $0x1c0] sm:$0xff] }
  0xd3   :  { %2623 = vmatpush1.bf16.msra.mxu0 %v9932_v38  ;;  %2842 = vmatpush1.bf16.msra.mxu1 %v9934_v47  ;;  %v218_v38 = vld [vmem:[#allocation4 + $0x228] sm:$0xff]  ;;  %v9956_v47 = vcombine.low %v205_v23, %v209_v22  ;;  %v12742_v42 = vld [vmem:[#allocation4 + $0x1e0] sm:$0xff] }
  0xd4   :  { %2624 = vmatprep.subr.bf16.mxu0 %v9941_v14  ;;  %2843 = vmatprep.subr.bf16.mxu1 %v9943_v3  ;;  %v9958_v14 = vcombine.low %v206_v7, %v210_v11  ;;  %v9965_v3 = vcombine.high %v213_v19, %v217_v30  ;;  %v9967_v39 = vcombine.high %v214_v15, %v218_v38  ;;  %v230_v23 = vld [vmem:[#allocation4 + $0x288] sm:$0xff] }
  0xd5   :  { %v9966_v59 = vcombine.low %v214_v15, %v218_v38  ;;  %v234_v22 = vld [vmem:[#allocation4 + $0x2a8] sm:$0xff]  ;;  %v9974_v11 = vcombine.low %v222_v34, %v226_v46 }
  0xd6   :  { %v238_v19 = vld [vmem:[#allocation4 + $0x2c8] sm:$0xff]  ;;  %v9982_v38 = vcombine.low %v230_v23, %v234_v22 }
  0xd7   :  { %2625 = vmatpush1.bf16.msra.mxu0 %v9940_v27  ;;  %2844 = vmatpush1.bf16.msra.mxu1 %v9942_v63  ;;  %v221_v27 = vld [vmem:[#allocation4 + $0x240] sm:$0xff]  ;;  %v242_v30 = vld [vmem:[#allocation4 + $0x2e8] sm:$0xff] }
  0xd8   :  { %2626 = vmatprep.subr.bf16.mxu0 %v9949_v31  ;;  %2845 = vmatprep.subr.bf16.mxu1 %v9951_v2  ;;  %v225_v63 = vld [vmem:[#allocation4 + $0x260] sm:$0xff]  ;;  %v9975_v2 = vcombine.high %v222_v34, %v226_v46  ;;  %v9990_v46 = vcombine.low %v238_v19, %v242_v30 }
  0xd9   :  { %v9973_v31 = vcombine.high %v221_v27, %v225_v63  ;;  %v9972_v7 = vcombine.low %v221_v27, %v225_v63  ;;  %v246_v27 = vld [vmem:[#allocation4 + $0x308] sm:$0xff] }
  0xda   :  { %v250_v63 = vld [vmem:[#allocation4 + $0x328] sm:$0xff] }
  0xdb   :  { %2627 = vmatpush1.bf16.msra.mxu0 %v9948_v6  ;;  %2846 = vmatpush1.bf16.msra.mxu1 %v9950_v18  ;;  %v229_v6 = vld [vmem:[#allocation4 + $0x280] sm:$0xff] }
  0xdc   :  { %2628 = vmatprep.subr.bf16.mxu0 %v9957_v54  ;;  %2847 = vmatprep.subr.bf16.mxu1 %v9959_v26  ;;  %v233_v18 = vld [vmem:[#allocation4 + $0x2a0] sm:$0xff]  ;;  %v9983_v26 = vcombine.high %v230_v23, %v234_v22  ;;  %v9998_v22 = vcombine.low %v246_v27, %v250_v63 }
  0xdd   :  { %v9981_v54 = vcombine.high %v229_v6, %v233_v18  ;;  %v9980_v15 = vcombine.low %v229_v6, %v233_v18  ;;  %v254_v6 = vld [vmem:[#allocation4 + $0x348] sm:$0xff] }
  0xde   :  { %v258_v18 = vld [vmem:[#allocation4 + $0x368] sm:$0xff] }
  0xdf   :  { %2629 = vmatpush1.bf16.msra.mxu0 %v9956_v47  ;;  %2848 = vmatpush1.bf16.msra.mxu1 %v9958_v14  ;;  %v237_v47 = vld [vmem:[#allocation4 + $0x2c0] sm:$0xff] }
  0xe0   :  { %2630 = vmatprep.subr.bf16.mxu0 %v9965_v3  ;;  %2849 = vmatprep.subr.bf16.mxu1 %v9967_v39  ;;  %v241_v14 = vld [vmem:[#allocation4 + $0x2e0] sm:$0xff]  ;;  %v9991_v39 = vcombine.high %v238_v19, %v242_v30  ;;  %v10006_v30 = vcombine.low %v254_v6, %v258_v18 }
  0xe1   :  { %v9989_v3 = vcombine.high %v237_v47, %v241_v14  ;;  %v9988_v34 = vcombine.low %v237_v47, %v241_v14  ;;  %v262_v47 = vld [vmem:[#allocation4 + $0x388] sm:$0xff] }
  0xe2   :  { %v266_v14 = vld [vmem:[#allocation4 + $0x3a8] sm:$0xff] }
  0xe3   :  { %2631 = vmatpush1.bf16.msra.mxu0 %v9964_v10  ;;  %2850 = vmatpush1.bf16.msra.mxu1 %v9966_v59  ;;  %v245_v10 = vld [vmem:[#allocation4 + $0x300] sm:$0xff] }
  0xe4   :  { %2632 = vmatprep.subr.bf16.mxu0 %v9973_v31  ;;  %2851 = vmatprep.subr.bf16.mxu1 %v9975_v2  ;;  %v249_v59 = vld [vmem:[#allocation4 + $0x320] sm:$0xff]  ;;  %v9999_v2 = vcombine.high %v246_v27, %v250_v63  ;;  %v10014_v63 = vcombine.low %v262_v47, %v266_v14 }
  0xe5   :  { %v9997_v31 = vcombine.high %v245_v10, %v249_v59  ;;  %v9996_v23 = vcombine.low %v245_v10, %v249_v59  ;;  %v270_v10 = vld [vmem:[#allocation4 + $0x3c8] sm:$0xff] }
  0xe6   :  { %v274_v59 = vld [vmem:[#allocation4 + $0x3e8] sm:$0xff] }
  0xe7   :  { %2633 = vmatpush1.bf16.msra.mxu0 %v9972_v7  ;;  %2852 = vmatpush1.bf16.msra.mxu1 %v9974_v11  ;;  %v253_v7 = vld [vmem:[#allocation4 + $0x340] sm:$0xff] }
  0xe8   :  { %2634 = vmatprep.subr.bf16.mxu0 %v9981_v54  ;;  %2853 = vmatprep.subr.bf16.mxu1 %v9983_v26  ;;  %v257_v11 = vld [vmem:[#allocation4 + $0x360] sm:$0xff]  ;;  %v10007_v26 = vcombine.high %v254_v6, %v258_v18  ;;  %v10022_v18 = vcombine.low %v270_v10, %v274_v59 }
  0xe9   :  { %v10005_v54 = vcombine.high %v253_v7, %v257_v11  ;;  %v10004_v19 = vcombine.low %v253_v7, %v257_v11  ;;  %v278_v7 = vld [vmem:[#allocation4 + $0x408] sm:$0xff] }
  0xea   :  { %v282_v11 = vld [vmem:[#allocation4 + $0x428] sm:$0xff] }
  0xeb   :  { %2635 = vmatpush1.bf16.msra.mxu0 %v9980_v15  ;;  %2854 = vmatpush1.bf16.msra.mxu1 %v9982_v38  ;;  %v261_v15 = vld [vmem:[#allocation4 + $0x380] sm:$0xff] }
  0xec   :  { %2636 = vmatprep.subr.bf16.mxu0 %v9989_v3  ;;  %2855 = vmatprep.subr.bf16.mxu1 %v9991_v39  ;;  %v265_v38 = vld [vmem:[#allocation4 + $0x3a0] sm:$0xff]  ;;  %v10015_v39 = vcombine.high %v262_v47, %v266_v14 }
  0xed   :  { %v10013_v3 = vcombine.high %v261_v15, %v265_v38  ;;  %v10012_v27 = vcombine.low %v261_v15, %v265_v38  ;;  %v286_v15 = vld [vmem:[#allocation4 + $0x448] sm:$0xff]  ;;  %v11507_v47 = vld [vmem:[%s14508_s0] ss:$24 sps:$4 sm:$0xff]  }
  0xee   :  { %v290_v38 = vld [vmem:[#allocation4 + $0x468] sm:$0xff] }
  0xef   :  { %2637 = vmatpush1.bf16.msra.mxu0 %v9988_v34  ;;  %2856 = vmatpush1.bf16.msra.mxu1 %v9990_v46  ;;  %v269_v34 = vld [vmem:[#allocation4 + $0x3c0] sm:$0xff] }
  0xf0   :  { %2638 = vmatprep.subr.bf16.mxu0 %v9997_v31  ;;  %2857 = vmatprep.subr.bf16.mxu1 %v9999_v2  ;;  %v273_v46 = vld [vmem:[#allocation4 + $0x3e0] sm:$0xff]  ;;  %v10023_v2 = vcombine.high %v270_v10, %v274_v59  ;;  %v294_v59 = vld [vmem:[#allocation4 + $0x488] sm:$0xff] }
  0xf1   :  { %v10021_v31 = vcombine.high %v269_v34, %v273_v46  ;;  %v10020_v6 = vcombine.low %v269_v34, %v273_v46  ;;  %v10039_v46 = vcombine.high %v286_v15, %v290_v38  ;;  %v297_v10 = vld [vmem:[#allocation4 + $0x4a0] sm:$0xff] }
  0xf3   :  { %2639 = vmatpush1.bf16.msra.mxu0 %v9996_v23  ;;  %2858 = vmatpush1.bf16.msra.mxu1 %v9998_v22  ;;  %v277_v23 = vld [vmem:[#allocation4 + $0x400] sm:$0xff] }
  0xf4   :  { %2640 = vmatprep.subr.bf16.mxu0 %v10005_v54  ;;  %2859 = vmatprep.subr.bf16.mxu1 %v10007_v26  ;;  %v281_v22 = vld [vmem:[#allocation4 + $0x420] sm:$0xff]  ;;  %v10031_v26 = vcombine.high %v278_v7, %v282_v11 }
  0xf5   :  { %v10029_v54 = vcombine.high %v277_v23, %v281_v22  ;;  %v10028_v14 = vcombine.low %v277_v23, %v281_v22 }
  0xf7   :  { %2641 = vmatpush1.bf16.msra.mxu0 %v10004_v19  ;;  %2860 = vmatpush1.bf16.msra.mxu1 %v10006_v30  ;;  %v285_v19 = vld [vmem:[#allocation4 + $0x440] sm:$0xff] }
  0xf8   :  { %2642 = vmatprep.subr.bf16.mxu0 %v10013_v3  ;;  %2861 = vmatprep.subr.bf16.mxu1 %v10015_v39  ;;  %v289_v30 = vld [vmem:[#allocation4 + $0x460] sm:$0xff]  ;;  %v10030_v3 = vcombine.low %v278_v7, %v282_v11 }
  0xf9   :  { %v293_v39 = vld [vmem:[#allocation4 + $0x480] sm:$0xff]  ;;  %v10037_v34 = vcombine.high %v285_v19, %v289_v30 }
  0xfa   :  { %v10045_v23 = vcombine.high %v293_v39, %v297_v10  ;;  %v301_v7 = vld [vmem:[#allocation4 + $0x4c0] sm:$0xff] }
  0xfb   :  { %2643 = vmatpush1.bf16.msra.mxu0 %v10012_v27  ;;  %2862 = vmatpush1.bf16.msra.mxu1 %v10014_v63  ;;  %v298_v27 = vld [vmem:[#allocation4 + $0x4a8] sm:$0xff]  ;;  %v305_v11 = vld [vmem:[#allocation4 + $0x4e0] sm:$0xff] }
  0xfc   :  { %2644 = vmatprep.subr.bf16.mxu0 %v10021_v31  ;;  %2863 = vmatprep.subr.bf16.mxu1 %v10023_v2  ;;  %v11508_v63 = vld [vmem:[%s14508_s0 + $0x34] ss:$24 sps:$4 sm:$0xff]   ;;  %v10036_v31 = vcombine.low %v285_v19, %v289_v30  ;;  %v10038_v2 = vcombine.low %v286_v15, %v290_v38  ;;  %v10047_v22 = vcombine.high %v294_v59, %v298_v27  ;;  %v309_v19 = vld [vmem:[#allocation4 + $0x500] sm:$0xff] }
  0xfd   :  { %v10053_v30 = vcombine.high %v301_v7, %v305_v11  ;;  %v313_v38 = vld [vmem:[#allocation4 + $0x520] sm:$0xff] }
  0xff   :  { %2645 = vmatpush1.bf16.msra.mxu0 %v10020_v6  ;;  %2864 = vmatpush1.bf16.msra.mxu1 %v10022_v18  ;;  %v302_v6 = vld [vmem:[#allocation4 + $0x4c8] sm:$0xff] }
 0x100   :  { %2687 = vmatprep.subr.bf16.mxu0 %v10029_v54  ;;  %2906 = vmatprep.subr.bf16.mxu1 %v10031_v26  ;;  %v306_v18 = vld [vmem:[#allocation4 + $0x4e8] sm:$0xff]  ;;  %v10044_v26 = vcombine.low %v293_v39, %v297_v10  ;;  %v10061_v39 = vcombine.high %v309_v19, %v313_v38 }
 0x101   :  { %v11510_v54 = vld [vmem:[%s14508_s0 + $0x30] ss:$24 sps:$4 sm:$0xff]   ;;  %v10055_v15 = vcombine.high %v302_v6, %v306_v18 }
 0x102   :  { %2647 = vmatmul.mubr.bf16.vlgmr.msra.gmra.mrb[0].mxu0 %v11507_v47  ;;  %2866 = vmatmul.mubr.bf16.vlgmr.msra.gmra.mrb[0].mxu1 %v11507_v47  ;;  %v10046_v47 = vcombine.low %v294_v59, %v298_v27  ;;  %v317_v59 = vld [vmem:[#allocation4 + $0x540] sm:$0xff] }
 0x103   :  { %2688 = vmatpush1.bf16.msra.mxu0 %v10028_v14  ;;  %2907 = vmatpush1.bf16.msra.mxu1 %v10030_v3  ;;  %v310_v14 = vld [vmem:[#allocation4 + $0x508] sm:$0xff]  ;;  %v321_v27 = vld [vmem:[#allocation4 + $0x560] sm:$0xff] }
 0x104   :  { %2689 = vmatprep.subr.bf16.mxu0 %v10037_v34  ;;  %2908 = vmatprep.subr.bf16.mxu1 %v10039_v46  ;;  %v314_v3 = vld [vmem:[#allocation4 + $0x528] sm:$0xff]  ;;  %v11511_v34 = vld [vmem:[%s14508_s0 + $0x64] ss:$24 sps:$4 sm:$0xff]   ;;  %v10052_v46 = vcombine.low %v301_v7, %v305_v11  ;;  %v10069_v11 = vcombine.high %v317_v59, %v321_v27 }
 0x105   :  { %2656 = vmatprep.mubr.bf16.mxu0 %v11508_v63  ;;  %2875 = vmatprep.mubr.bf16.mxu1 %v11508_v63  ;;  %v10054_v63 = vcombine.low %v302_v6, %v306_v18  ;;  %v10063_v10 = vcombine.high %v310_v14, %v314_v3  ;;  %v325_v7 = vld [vmem:[#allocation4 + $0x580] sm:$0xff] }
 0x106   :  { %v329_v18 = vld [vmem:[#allocation4 + $0x5a0] sm:$0xff] }
 0x107   :  { %2690 = vmatpush1.bf16.msra.mxu0 %v10036_v31  ;;  %2909 = vmatpush1.bf16.msra.mxu1 %v10038_v2  ;;  %v318_v31 = vld [vmem:[#allocation4 + $0x548] sm:$0xff] }
 0x108   :  { %2691 = vmatprep.subr.bf16.mxu0 %v10045_v23  ;;  %2910 = vmatprep.subr.bf16.mxu1 %v10047_v22  ;;  %v322_v2 = vld [vmem:[#allocation4 + $0x568] sm:$0xff]  ;;  %v11513_v23 = vld [vmem:[%s14508_s0 + $0x60] ss:$24 sps:$4 sm:$0xff]   ;;  %v10060_v22 = vcombine.low %v309_v19, %v313_v38  ;;  %v10077_v38 = vcombine.high %v325_v7, %v329_v18 }
 0x109   :  { %v10071_v6 = vcombine.high %v318_v31, %v322_v2  ;;  %v333_v19 = vld [vmem:[#allocation4 + $0x5c0] sm:$0xff] }
 0x10a   :  { %2657 = vmatmul.mubr.bf16.gmra.mrb[4].mxu0 %v11510_v54  ;;  %2876 = vmatmul.mubr.bf16.gmra.mrb[4].mxu1 %v11510_v54  ;;  %v10062_v54 = vcombine.low %v310_v14, %v314_v3  ;;  %v337_v3 = vld [vmem:[#allocation4 + $0x5e0] sm:$0xff] }
 0x10b   :  { %2692 = vmatpush1.bf16.msra.mxu0 %v10044_v26  ;;  %2911 = vmatpush1.bf16.msra.mxu1 %v10046_v47  ;;  %v326_v26 = vld [vmem:[#allocation4 + $0x588] sm:$0xff] }
 0x10c   :  { %2693 = vmatprep.subr.bf16.mxu0 %v10053_v30  ;;  %2912 = vmatprep.subr.bf16.mxu1 %v10055_v15  ;;  %v330_v47 = vld [vmem:[#allocation4 + $0x5a8] sm:$0xff]  ;;  %v10068_v15 = vcombine.low %v317_v59, %v321_v27  ;;  %v341_v59 = vld [vmem:[#allocation4 + $0x600] sm:$0xff] }
 0x10d   :  { %2666 = vmatprep.mubr.bf16.mxu0 %v11511_v34  ;;  %2885 = vmatprep.mubr.bf16.mxu1 %v11511_v34  ;;  %v11514_v30 = vld [vmem:[%s14508_s0 + $0x94] ss:$24 sps:$4 sm:$0xff]   ;;  %v10070_v34 = vcombine.low %v318_v31, %v322_v2  ;;  %v10079_v14 = vcombine.high %v326_v26, %v330_v47  ;;  %v345_v27 = vld [vmem:[#allocation4 + $0x620] sm:$0xff]  ;;  %v10085_v31 = vcombine.high %v333_v19, %v337_v3 }
 0x10f   :  { %2694 = vmatpush1.bf16.msra.mxu0 %v10052_v46  ;;  %2913 = vmatpush1.bf16.msra.mxu1 %v10054_v63  ;;  %v334_v46 = vld [vmem:[#allocation4 + $0x5c8] sm:$0xff] }
 0x110   :  { %2695 = vmatprep.subr.bf16.mxu0 %v10061_v39  ;;  %2914 = vmatprep.subr.bf16.mxu1 %v10063_v10  ;;  %v338_v63 = vld [vmem:[#allocation4 + $0x5e8] sm:$0xff]  ;;  %v10076_v10 = vcombine.low %v325_v7, %v329_v18  ;;  %v349_v7 = vld [vmem:[#allocation4 + $0x640] sm:$0xff] }
 0x111   :  { %v11516_v39 = vld [vmem:[%s14508_s0 + $0x90] ss:$24 sps:$4 sm:$0xff]   ;;  %v10087_v2 = vcombine.high %v334_v46, %v338_v63  ;;  %v353_v18 = vld [vmem:[#allocation4 + $0x660] sm:$0xff] }
 0x112   :  { %2667 = vmatmul.mubr.bf16.gmra.mrb[8].mxu0 %v11513_v23  ;;  %2886 = vmatmul.mubr.bf16.gmra.mrb[8].mxu1 %v11513_v23  ;;  %v10078_v23 = vcombine.low %v326_v26, %v330_v47  ;;  %v350_v26 = vld [vmem:[#allocation4 + $0x648] sm:$0xff]  ;;  %v10093_v47 = vcombine.high %v341_v59, %v345_v27 }
 0x113   :  { %2696 = vmatpush1.bf16.msra.mxu0 %v10060_v22  ;;  %2915 = vmatpush1.bf16.msra.mxu1 %v10062_v54  ;;  %v342_v22 = vld [vmem:[#allocation4 + $0x608] sm:$0xff] }
 0x114   :  { %2697 = vmatprep.subr.bf16.mxu0 %v10069_v11  ;;  %2916 = vmatprep.subr.bf16.mxu1 %v10071_v6  ;;  %v346_v54 = vld [vmem:[#allocation4 + $0x628] sm:$0xff]  ;;  %v10084_v6 = vcombine.low %v333_v19, %v337_v3  ;;  %v10101_v19 = vcombine.high %v349_v7, %v353_v18 }
 0x115   :  { %2676 = vmatprep.mubr.bf16.mxu0 %v11514_v30  ;;  %2895 = vmatprep.mubr.bf16.mxu1 %v11514_v30  ;;  %v11519_v11 = vld [vmem:[%s14508_s0 + $0xc] ss:$24 sps:$4 sm:$0xff]   ;;  %v10086_v30 = vcombine.low %v334_v46, %v338_v63  ;;  %v10100_v63 = vcombine.low %v349_v7, %v353_v18 }
 0x116   :  { %v362_v46 = vld [vmem:[#allocation4 + $0x6a8] sm:$0xff] }
 0x117   :  { %2698 = vmatpush1.bf16.msra.mxu0 %v10068_v15  ;;  %2917 = vmatpush1.bf16.msra.mxu1 %v10070_v34  ;;  %v10095_v15 = vcombine.high %v342_v22, %v346_v54  ;;  %v354_v34 = vld [vmem:[#allocation4 + $0x668] sm:$0xff] }
 0x118   :  { %2699 = vmatprep.subr.bf16.mxu0 %v10077_v38  ;;  %2918 = vmatprep.subr.bf16.mxu1 %v10079_v14  ;;  %v10092_v38 = vcombine.low %v341_v59, %v345_v27  ;;  %v10094_v14 = vcombine.low %v342_v22, %v346_v54  ;;  %v10103_v3 = vcombine.high %v350_v26, %v354_v34  ;;  %v366_v59 = vld [vmem:[#allocation4 + $0x6c8] sm:$0xff] }
 0x119   :  { %v370_v27 = vld [vmem:[#allocation4 + $0x6e8] sm:$0xff] }
 0x11a   :  { %2677 = vmatmul.mubr.bf16.gmra.mrb[12].mxu0 %v11516_v39  ;;  %2896 = vmatmul.mubr.bf16.gmra.mrb[12].mxu1 %v11516_v39  ;;  %v361_v39 = vld [vmem:[#allocation4 + $0x6a0] sm:$0xff]  ;;  %v374_v7 = vld [vmem:[#allocation4 + $0x708] sm:$0xff] }
 0x11b   :  { %2700 = vmatpush1.bf16.msra.mxu0 %v10076_v10  ;;  %2919 = vmatpush1.bf16.msra.mxu1 %v10078_v23  ;;  %v358_v10 = vld [vmem:[#allocation4 + $0x688] sm:$0xff]  ;;  %v10102_v23 = vcombine.low %v350_v26, %v354_v34  ;;  %v10108_v22 = vcombine.low %v357_v62, %v361_v39  ;;  %v10118_v34 = vcombine.low %v366_v59, %v370_v27 }
 0x11c   :  { %2701 = vmatprep.subr.bf16.mxu0 %v10085_v31  ;;  %2920 = vmatprep.subr.bf16.mxu1 %v10087_v2  ;;  %v10109_v31 = vcombine.high %v357_v62, %v361_v39  ;;  %v10111_v2 = vcombine.high %v358_v10, %v362_v46  ;;  %v10110_v54 = vcombine.low %v358_v10, %v362_v46  ;;  %v378_v18 = vld [vmem:[#allocation4 + $0x728] sm:$0xff] }
 0x11d   :  { %2719 = vmatprep.mubr.bf16.mxu0 %v11519_v11  ;;  %2938 = vmatprep.mubr.bf16.mxu1 %v11519_v11  ;;  %v365_v11 = vld [vmem:[#allocation4 + $0x6c0] sm:$0xff]  ;;  %v382_v62 = vld [vmem:[#allocation4 + $0x748] sm:$0xff]  ;;  %v10126_v46 = vcombine.low %v374_v7, %v378_v18 }
 0x11e   :  { %v386_v39 = vld [vmem:[#allocation4 + $0x768] sm:$0xff] }
 0x11f   :  { %2702 = vmatpush1.bf16.msra.mxu0 %v10084_v6  ;;  %2921 = vmatpush1.bf16.msra.mxu1 %v10086_v30  ;;  %v369_v6 = vld [vmem:[#allocation4 + $0x6e0] sm:$0xff] }
 0x120   :  { %2703 = vmatprep.subr.bf16.mxu0 %v10093_v47  ;;  %2922 = vmatprep.subr.bf16.mxu1 %v10095_v15  ;;  %v10117_v30 = vcombine.high %v365_v11, %v369_v6  ;;  %v10119_v47 = vcombine.high %v366_v59, %v370_v27  ;;  %v373_v15 = vld [vmem:[#allocation4 + $0x700] sm:$0xff]  ;;  %v10116_v26 = vcombine.low %v365_v11, %v369_v6  ;;  %v390_v11 = vld [vmem:[#allocation4 + $0x788] sm:$0xff] }
 0x121   :  { %v394_v6 = vld [vmem:[#allocation4 + $0x7a8] sm:$0xff]  ;;  %v10134_v27 = vcombine.low %v382_v62, %v386_v39 }
 0x123   :  { %2704 = vmatpush1.bf16.msra.mxu0 %v10092_v38  ;;  %2923 = vmatpush1.bf16.msra.mxu1 %v10094_v14  ;;  %v377_v38 = vld [vmem:[#allocation4 + $0x720] sm:$0xff] }
 0x124   :  { %2705 = vmatprep.subr.bf16.mxu0 %v10101_v19  ;;  %2924 = vmatprep.subr.bf16.mxu1 %v10103_v3  ;;  %v10125_v14 = vcombine.high %v373_v15, %v377_v38  ;;  %v10127_v19 = vcombine.high %v374_v7, %v378_v18  ;;  %v381_v3 = vld [vmem:[#allocation4 + $0x740] sm:$0xff]  ;;  %v10124_v10 = vcombine.low %v373_v15, %v377_v38  ;;  %v398_v15 = vld [vmem:[#allocation4 + $0x7c8] sm:$0xff] }
 0x125   :  { %v402_v38 = vld [vmem:[#allocation4 + $0x7e8] sm:$0xff]  ;;  %v10142_v18 = vcombine.low %v390_v11, %v394_v6 }
 0x127   :  { %2706 = vmatpush1.bf16.msra.mxu0 %v10100_v63  ;;  %2925 = vmatpush1.bf16.msra.mxu1 %v10102_v23  ;;  %v385_v63 = vld [vmem:[#allocation4 + $0x760] sm:$0xff] }
 0x128   :  { %2707 = vmatprep.subr.bf16.mxu0 %v10109_v31  ;;  %2926 = vmatprep.subr.bf16.mxu1 %v10111_v2  ;;  %v10133_v23 = vcombine.high %v381_v3, %v385_v63  ;;  %v10135_v31 = vcombine.high %v382_v62, %v386_v39  ;;  %v389_v2 = vld [vmem:[#allocation4 + $0x780] sm:$0xff]  ;;  %v10132_v59 = vcombine.low %v381_v3, %v385_v63  ;;  %v406_v3 = vld [vmem:[#allocation4 + $0x808] sm:$0xff] }
 0x129   :  { %v410_v63 = vld [vmem:[#allocation4 + $0x828] sm:$0xff]  ;;  %v10150_v39 = vcombine.low %v398_v15, %v402_v38 }
 0x12b   :  { %2708 = vmatpush1.bf16.msra.mxu0 %v10108_v22  ;;  %2927 = vmatpush1.bf16.msra.mxu1 %v10110_v54  ;;  %v393_v22 = vld [vmem:[#allocation4 + $0x7a0] sm:$0xff] }
 0x12c   :  { %2709 = vmatprep.subr.bf16.mxu0 %v10117_v30  ;;  %2928 = vmatprep.subr.bf16.mxu1 %v10119_v47  ;;  %v10141_v54 = vcombine.high %v389_v2, %v393_v22  ;;  %v10143_v30 = vcombine.high %v390_v11, %v394_v6  ;;  %v397_v47 = vld [vmem:[#allocation4 + $0x7c0] sm:$0xff]  ;;  %v10140_v7 = vcombine.low %v389_v2, %v393_v22  ;;  %v414_v2 = vld [vmem:[#allocation4 + $0x848] sm:$0xff] }
 0x12d   :  { %v418_v22 = vld [vmem:[#allocation4 + $0x868] sm:$0xff] }
 0x12e   :  { %v11517_v11 = vld [vmem:[%s14508_s0 + $0x8] ss:$24 sps:$4 sm:$0xff]  }
 0x12f   :  { %2710 = vmatpush1.bf16.msra.mxu0 %v10116_v26  ;;  %2929 = vmatpush1.bf16.msra.mxu1 %v10118_v34  ;;  %v401_v26 = vld [vmem:[#allocation4 + $0x7e0] sm:$0xff] }
 0x130   :  { %2711 = vmatprep.subr.bf16.mxu0 %v10125_v14  ;;  %2930 = vmatprep.subr.bf16.mxu1 %v10127_v19  ;;  %v10149_v34 = vcombine.high %v397_v47, %v401_v26  ;;  %v10151_v14 = vcombine.high %v398_v15, %v402_v38  ;;  %v405_v19 = vld [vmem:[#allocation4 + $0x800] sm:$0xff]  ;;  %v10148_v62 = vcombine.low %v397_v47, %v401_v26  ;;  %v422_v15 = vld [vmem:[#allocation4 + $0x888] sm:$0xff] }
 0x131   :  { %v421_v47 = vld [vmem:[#allocation4 + $0x880] sm:$0xff]  ;;  %v426_v38 = vld [vmem:[#allocation4 + $0x8a8] sm:$0xff] }
 0x132   :  { %v425_v26 = vld [vmem:[#allocation4 + $0x8a0] sm:$0xff] }
 0x133   :  { %2712 = vmatpush1.bf16.msra.mxu0 %v10124_v10  ;;  %2931 = vmatpush1.bf16.msra.mxu1 %v10126_v46  ;;  %v409_v10 = vld [vmem:[#allocation4 + $0x820] sm:$0xff] }
 0x134   :  { %2713 = vmatprep.subr.bf16.mxu0 %v10133_v23  ;;  %2932 = vmatprep.subr.bf16.mxu1 %v10135_v31  ;;  %v10157_v46 = vcombine.high %v405_v19, %v409_v10  ;;  %v10159_v23 = vcombine.high %v406_v3, %v410_v63  ;;  %v413_v31 = vld [vmem:[#allocation4 + $0x840] sm:$0xff]  ;;  %v10156_v6 = vcombine.low %v405_v19, %v409_v10 }
 0x135   :  { %v10175_v19 = vcombine.high %v422_v15, %v426_v38  ;;  %v429_v10 = vld [vmem:[#allocation4 + $0x8c0] sm:$0xff] }
 0x137   :  { %2714 = vmatpush1.bf16.msra.mxu0 %v10132_v59  ;;  %2933 = vmatpush1.bf16.msra.mxu1 %v10134_v27  ;;  %v417_v59 = vld [vmem:[#allocation4 + $0x860] sm:$0xff]  ;;  %v10158_v27 = vcombine.low %v406_v3, %v410_v63  ;;  %v430_v63 = vld [vmem:[#allocation4 + $0x8c8] sm:$0xff] }
 0x138   :  { %2715 = vmatprep.subr.bf16.mxu0 %v10141_v54  ;;  %2934 = vmatprep.subr.bf16.mxu1 %v10143_v30  ;;  %v10165_v54 = vcombine.high %v413_v31, %v417_v59  ;;  %v10167_v30 = vcombine.high %v414_v2, %v418_v22  ;;  %v433_v3 = vld [vmem:[#allocation4 + $0x8e0] sm:$0xff] }
 0x13b   :  { %2716 = vmatpush1.bf16.msra.mxu0 %v10140_v7  ;;  %2935 = vmatpush1.bf16.msra.mxu1 %v10142_v18  ;;  %v11520_v7 = vld [vmem:[%s14508_s0 + $0x3c] ss:$24 sps:$4 sm:$0xff]   ;;  %v10164_v18 = vcombine.low %v413_v31, %v417_v59  ;;  %v10181_v31 = vcombine.high %v429_v10, %v433_v3 }
 0x13c   :  { %2717 = vmatprep.subr.bf16.mxu0 %v10149_v34  ;;  %2936 = vmatprep.subr.bf16.mxu1 %v10151_v14  ;;  %v10166_v34 = vcombine.low %v414_v2, %v418_v22  ;;  %v10173_v14 = vcombine.high %v421_v47, %v425_v26  ;;  %v437_v2 = vld [vmem:[#allocation4 + $0x900] sm:$0xff] }
 0x13d   :  { %v441_v22 = vld [vmem:[#allocation4 + $0x920] sm:$0xff] }
 0x13f   :  { %2718 = vmatpush1.bf16.msra.mxu0 %v10148_v62  ;;  %2937 = vmatpush1.bf16.msra.mxu1 %v10150_v39  ;;  %v434_v62 = vld [vmem:[#allocation4 + $0x8e8] sm:$0xff]  ;;  %v11522_v39 = vld [vmem:[%s14508_s0 + $0x38] ss:$24 sps:$4 sm:$0xff]  }
 0x140   :  { %2760 = vmatprep.subr.bf16.mxu0 %v10157_v46  ;;  %2979 = vmatprep.subr.bf16.mxu1 %v10159_v23  ;;  %v10172_v46 = vcombine.low %v421_v47, %v425_v26  ;;  %v10174_v23 = vcombine.low %v422_v15, %v426_v38  ;;  %v10183_v59 = vcombine.high %v430_v63, %v434_v62  ;;  %v445_v15 = vld [vmem:[#allocation4 + $0x940] sm:$0xff] }
 0x141   :  { %v10189_v47 = vcombine.high %v437_v2, %v441_v22  ;;  %v449_v38 = vld [vmem:[#allocation4 + $0x960] sm:$0xff] }
 0x142   :  { %2720 = vmatmul.mubr.bf16.vlgmr.msra.gmra.mrb[0].mxu0 %v11517_v11  ;;  %2939 = vmatmul.mubr.bf16.vlgmr.msra.gmra.mrb[0].mxu1 %v11517_v11  ;;  %v438_v11 = vld [vmem:[#allocation4 + $0x908] sm:$0xff] }
 0x143   :  { %2761 = vmatpush1.bf16.msra.mxu0 %v10156_v6  ;;  %2980 = vmatpush1.bf16.msra.mxu1 %v10158_v27  ;;  %v442_v6 = vld [vmem:[#allocation4 + $0x928] sm:$0xff] }
 0x144   :  { %2762 = vmatprep.subr.bf16.mxu0 %v10165_v54  ;;  %2981 = vmatprep.subr.bf16.mxu1 %v10167_v30  ;;  %v11523_v27 = vld [vmem:[%s14508_s0 + $0x6c] ss:$24 sps:$4 sm:$0xff]   ;;  %v10180_v54 = vcombine.low %v429_v10, %v433_v3  ;;  %v10182_v30 = vcombine.low %v430_v63, %v434_v62  ;;  %v10191_v26 = vcombine.high %v438_v11, %v442_v6 }
 0x145   :  { %2729 = vmatprep.mubr.bf16.mxu0 %v11520_v7  ;;  %2948 = vmatprep.mubr.bf16.mxu1 %v11520_v7  ;;  %v446_v7 = vld [vmem:[#allocation4 + $0x948] sm:$0xff]  ;;  %v10197_v10 = vcombine.high %v445_v15, %v449_v38  ;;  %v453_v63 = vld [vmem:[#allocation4 + $0x980] sm:$0xff] }
 0x146   :  { %v457_v62 = vld [vmem:[#allocation4 + $0x9a0] sm:$0xff] }
 0x147   :  { %2763 = vmatpush1.bf16.msra.mxu0 %v10164_v18  ;;  %2982 = vmatpush1.bf16.msra.mxu1 %v10166_v34  ;;  %v450_v18 = vld [vmem:[#allocation4 + $0x968] sm:$0xff] }
 0x148   :  { %2764 = vmatprep.subr.bf16.mxu0 %v10173_v14  ;;  %2983 = vmatprep.subr.bf16.mxu1 %v10175_v19  ;;  %v11525_v34 = vld [vmem:[%s14508_s0 + $0x68] ss:$24 sps:$4 sm:$0xff]   ;;  %v10188_v14 = vcombine.low %v437_v2, %v441_v22  ;;  %v10190_v19 = vcombine.low %v438_v11, %v442_v6  ;;  %v10199_v3 = vcombine.high %v446_v7, %v450_v18 }
 0x149   :  { %v10205_v2 = vcombine.high %v453_v63, %v457_v62  ;;  %v461_v11 = vld [vmem:[#allocation4 + $0x9c0] sm:$0xff] }
 0x14a   :  { %2730 = vmatmul.mubr.bf16.gmra.mrb[4].mxu0 %v11522_v39  ;;  %2949 = vmatmul.mubr.bf16.gmra.mrb[4].mxu1 %v11522_v39  ;;  %v454_v39 = vld [vmem:[#allocation4 + $0x988] sm:$0xff]  ;;  %v465_v6 = vld [vmem:[#allocation4 + $0x9e0] sm:$0xff] }
 0x14b   :  { %2765 = vmatpush1.bf16.msra.mxu0 %v10172_v46  ;;  %2984 = vmatpush1.bf16.msra.mxu1 %v10174_v23  ;;  %v458_v46 = vld [vmem:[#allocation4 + $0x9a8] sm:$0xff]  ;;  %v11526_v23 = vld [vmem:[%s14508_s0 + $0x9c] ss:$24 sps:$4 sm:$0xff]  }
 0x14c   :  { %2766 = vmatprep.subr.bf16.mxu0 %v10181_v31  ;;  %2985 = vmatprep.subr.bf16.mxu1 %v10183_v59  ;;  %v10196_v31 = vcombine.low %v445_v15, %v449_v38  ;;  %v10198_v59 = vcombine.low %v446_v7, %v450_v18  ;;  %v10207_v22 = vcombine.high %v454_v39, %v458_v46  ;;  %v469_v7 = vld [vmem:[#allocation4 + $0xa00] sm:$0xff] }
 0x14d   :  { %2739 = vmatprep.mubr.bf16.mxu0 %v11523_v27  ;;  %2958 = vmatprep.mubr.bf16.mxu1 %v11523_v27  ;;  %v462_v27 = vld [vmem:[#allocation4 + $0x9c8] sm:$0xff]  ;;  %v10213_v15 = vcombine.high %v461_v11, %v465_v6  ;;  %v473_v18 = vld [vmem:[#allocation4 + $0xa20] sm:$0xff] }
 0x14f   :  { %2767 = vmatpush1.bf16.msra.mxu0 %v10180_v54  ;;  %2986 = vmatpush1.bf16.msra.mxu1 %v10182_v30  ;;  %v466_v54 = vld [vmem:[#allocation4 + $0x9e8] sm:$0xff]  ;;  %v11528_v30 = vld [vmem:[%s14508_s0 + $0x98] ss:$24 sps:$4 sm:$0xff]  }
 0x150   :  { %2768 = vmatprep.subr.bf16.mxu0 %v10189_v47  ;;  %2987 = vmatprep.subr.bf16.mxu1 %v10191_v26  ;;  %v10204_v47 = vcombine.low %v453_v63, %v457_v62  ;;  %v10206_v26 = vcombine.low %v454_v39, %v458_v46  ;;  %v10215_v38 = vcombine.high %v462_v27, %v466_v54  ;;  %v477_v39 = vld [vmem:[#allocation4 + $0xa40] sm:$0xff] }
 0x151   :  { %v10221_v63 = vcombine.high %v469_v7, %v473_v18  ;;  %v481_v46 = vld [vmem:[#allocation4 + $0xa60] sm:$0xff] }
 0x152   :  { %2740 = vmatmul.mubr.bf16.gmra.mrb[8].mxu0 %v11525_v34  ;;  %2959 = vmatmul.mubr.bf16.gmra.mrb[8].mxu1 %v11525_v34  ;;  %v470_v34 = vld [vmem:[#allocation4 + $0xa08] sm:$0xff] }
 0x153   :  { %2769 = vmatpush1.bf16.msra.mxu0 %v10188_v14  ;;  %2988 = vmatpush1.bf16.msra.mxu1 %v10190_v19  ;;  %v474_v14 = vld [vmem:[#allocation4 + $0xa28] sm:$0xff] }
 0x154   :  { %2770 = vmatprep.subr.bf16.mxu0 %v10197_v10  ;;  %2989 = vmatprep.subr.bf16.mxu1 %v10199_v3  ;;  %v11531_v19 = vld [vmem:[%s14508_s0 + $0x14] ss:$24 sps:$4 sm:$0xff]   ;;  %v10212_v10 = vcombine.low %v461_v11, %v465_v6  ;;  %v10214_v3 = vcombine.low %v462_v27, %v466_v54  ;;  %v10223_v62 = vcombine.high %v470_v34, %v474_v14  ;;  %v485_v11 = vld [vmem:[#allocation4 + $0xa80] sm:$0xff] }
 0x155   :  { %2749 = vmatprep.mubr.bf16.mxu0 %v11526_v23  ;;  %2968 = vmatprep.mubr.bf16.mxu1 %v11526_v23  ;;  %v478_v23 = vld [vmem:[#allocation4 + $0xa48] sm:$0xff]  ;;  %v489_v6 = vld [vmem:[#allocation4 + $0xaa0] sm:$0xff] }
 0x156   :  { %v486_v27 = vld [vmem:[#allocation4 + $0xa88] sm:$0xff] }
 0x157   :  { %2771 = vmatpush1.bf16.msra.mxu0 %v10196_v31  ;;  %2990 = vmatpush1.bf16.msra.mxu1 %v10198_v59  ;;  %v482_v31 = vld [vmem:[#allocation4 + $0xa68] sm:$0xff]  ;;  %v10220_v59 = vcombine.low %v469_v7, %v473_v18 }
 0x158   :  { %2772 = vmatprep.subr.bf16.mxu0 %v10205_v2  ;;  %2991 = vmatprep.subr.bf16.mxu1 %v10207_v22  ;;  %v10222_v2 = vcombine.low %v470_v34, %v474_v14  ;;  %v10229_v22 = vcombine.high %v477_v39, %v481_v46  ;;  %v490_v54 = vld [vmem:[#allocation4 + $0xaa8] sm:$0xff]  ;;  %v10236_v34 = vcombine.low %v485_v11, %v489_v6 }
 0x159   :  { %v494_v7 = vld [vmem:[#allocation4 + $0xac8] sm:$0xff]  ;;  %v10238_v14 = vcombine.low %v486_v27, %v490_v54 }
 0x15a   :  { %2750 = vmatmul.mubr.bf16.gmra.mrb[12].mxu0 %v11528_v30  ;;  %2969 = vmatmul.mubr.bf16.gmra.mrb[12].mxu1 %v11528_v30  ;;  %v10231_v30 = vcombine.high %v478_v23, %v482_v31  ;;  %v498_v18 = vld [vmem:[#allocation4 + $0xae8] sm:$0xff] }
 0x15b   :  { %2773 = vmatpush1.bf16.msra.mxu0 %v10204_v47  ;;  %2992 = vmatpush1.bf16.msra.mxu1 %v10206_v26  ;;  %v10228_v47 = vcombine.low %v477_v39, %v481_v46  ;;  %v10230_v26 = vcombine.low %v478_v23, %v482_v31  ;;  %v502_v39 = vld [vmem:[#allocation4 + $0xb08] sm:$0xff]  ;;  %v10246_v31 = vcombine.low %v494_v7, %v498_v18 }
 0x15c   :  { %2774 = vmatprep.subr.bf16.mxu0 %v10213_v15  ;;  %2993 = vmatprep.subr.bf16.mxu1 %v10215_v38  ;;  %v10237_v15 = vcombine.high %v485_v11, %v489_v6  ;;  %v10239_v38 = vcombine.high %v486_v27, %v490_v54  ;;  %v506_v46 = vld [vmem:[#allocation4 + $0xb28] sm:$0xff] }
 0x15d   :  { %2792 = vmatprep.mubr.bf16.mxu0 %v11531_v19  ;;  %3011 = vmatprep.mubr.bf16.mxu1 %v11531_v19  ;;  %v493_v19 = vld [vmem:[#allocation4 + $0xac0] sm:$0xff]  ;;  %v510_v11 = vld [vmem:[#allocation4 + $0xb48] sm:$0xff]  ;;  %v10254_v54 = vcombine.low %v502_v39, %v506_v46 }
 0x15e   :  { %v514_v6 = vld [vmem:[#allocation4 + $0xb68] sm:$0xff] }
 0x15f   :  { %2775 = vmatpush1.bf16.msra.mxu0 %v10212_v10  ;;  %2994 = vmatpush1.bf16.msra.mxu1 %v10214_v3  ;;  %v497_v10 = vld [vmem:[#allocation4 + $0xae0] sm:$0xff] }
 0x160   :  { %2776 = vmatprep.subr.bf16.mxu0 %v10221_v63  ;;  %2995 = vmatprep.subr.bf16.mxu1 %v10223_v62  ;;  %v10245_v3 = vcombine.high %v493_v19, %v497_v10  ;;  %v10247_v63 = vcombine.high %v494_v7, %v498_v18  ;;  %v501_v62 = vld [vmem:[#allocation4 + $0xb00] sm:$0xff]  ;;  %v10244_v23 = vcombine.low %v493_v19, %v497_v10  ;;  %v518_v19 = vld [vmem:[#allocation4 + $0xb88] sm:$0xff] }
 0x161   :  { %v522_v10 = vld [vmem:[#allocation4 + $0xba8] sm:$0xff]  ;;  %v10262_v18 = vcombine.low %v510_v11, %v514_v6 }
 0x163   :  { %2777 = vmatpush1.bf16.msra.mxu0 %v10220_v59  ;;  %2996 = vmatpush1.bf16.msra.mxu1 %v10222_v2  ;;  %v505_v59 = vld [vmem:[#allocation4 + $0xb20] sm:$0xff] }
 0x164   :  { %2778 = vmatprep.subr.bf16.mxu0 %v10229_v22  ;;  %2997 = vmatprep.subr.bf16.mxu1 %v10231_v30  ;;  %v10253_v2 = vcombine.high %v501_v62, %v505_v59  ;;  %v10255_v22 = vcombine.high %v502_v39, %v506_v46  ;;  %v509_v30 = vld [vmem:[#allocation4 + $0xb40] sm:$0xff]  ;;  %v10252_v27 = vcombine.low %v501_v62, %v505_v59  ;;  %v526_v62 = vld [vmem:[#allocation4 + $0xbc8] sm:$0xff] }
 0x165   :  { %v530_v59 = vld [vmem:[#allocation4 + $0xbe8] sm:$0xff]  ;;  %v10270_v46 = vcombine.low %v518_v19, %v522_v10 }
 0x167   :  { %2779 = vmatpush1.bf16.msra.mxu0 %v10228_v47  ;;  %2998 = vmatpush1.bf16.msra.mxu1 %v10230_v26  ;;  %v513_v47 = vld [vmem:[#allocation4 + $0xb60] sm:$0xff] }
 0x168   :  { %2780 = vmatprep.subr.bf16.mxu0 %v10237_v15  ;;  %2999 = vmatprep.subr.bf16.mxu1 %v10239_v38  ;;  %v10261_v26 = vcombine.high %v509_v30, %v513_v47  ;;  %v10263_v15 = vcombine.high %v510_v11, %v514_v6  ;;  %v517_v38 = vld [vmem:[#allocation4 + $0xb80] sm:$0xff]  ;;  %v10260_v7 = vcombine.low %v509_v30, %v513_v47  ;;  %v152_v30 = vld [vmem:[#allocation4 + $0x18] sm:$0xff] }
 0x169   :  { %v156_v47 = vld [vmem:[#allocation4 + $0x38] sm:$0xff]  ;;  %v10278_v6 = vcombine.low %v526_v62, %v530_v59 }
 0x16b   :  { %2781 = vmatpush1.bf16.msra.mxu0 %v10236_v34  ;;  %3000 = vmatpush1.bf16.msra.mxu1 %v10238_v14  ;;  %v521_v34 = vld [vmem:[#allocation4 + $0xba0] sm:$0xff] }
 0x16c   :  { %2782 = vmatprep.subr.bf16.mxu0 %v10245_v3  ;;  %3001 = vmatprep.subr.bf16.mxu1 %v10247_v63  ;;  %v10269_v14 = vcombine.high %v517_v38, %v521_v34  ;;  %v10271_v3 = vcombine.high %v518_v19, %v522_v10  ;;  %v525_v63 = vld [vmem:[#allocation4 + $0xbc0] sm:$0xff]  ;;  %v10268_v39 = vcombine.low %v517_v38, %v521_v34  ;;  %v160_v38 = vld [vmem:[#allocation4 + $0x58] sm:$0xff]  ;;  %v11529_v19 = vld [vmem:[%s14508_s0 + $0x10] ss:$24 sps:$4 sm:$0xff]  }
 0x16d   :  { %v164_v34 = vld [vmem:[#allocation4 + $0x78] sm:$0xff] }
 0x16f   :  { %2783 = vmatpush1.bf16.msra.mxu0 %v10244_v23  ;;  %3002 = vmatpush1.bf16.msra.mxu1 %v10246_v31  ;;  %v529_v23 = vld [vmem:[#allocation4 + $0xbe0] sm:$0xff] }
 0x170   :  { %2784 = vmatprep.subr.bf16.mxu0 %v10253_v2  ;;  %3003 = vmatprep.subr.bf16.mxu1 %v10255_v22  ;;  %v10277_v31 = vcombine.high %v525_v63, %v529_v23  ;;  %v10279_v2 = vcombine.high %v526_v62, %v530_v59  ;;  %v151_v22 = vld [vmem:[#allocation4 + $0x10] sm:$0xff]  ;;  %v10276_v11 = vcombine.low %v525_v63, %v529_v23  ;;  %v11532_v63 = vld [vmem:[%s14508_s0 + $0x44] ss:$24 sps:$4 sm:$0xff]  }
 0x171   :  { %v167_v23 = vld [vmem:[#allocation4 + $0x90] sm:$0xff]  ;;  %v168_v59 = vld [vmem:[#allocation4 + $0x98] sm:$0xff] }
 0x172   :  { %v171_v62 = vld [vmem:[#allocation4 + $0xb0] sm:$0xff] }
 0x173   :  { %2785 = vmatpush1.bf16.msra.mxu0 %v10252_v27  ;;  %3004 = vmatpush1.bf16.msra.mxu1 %v10254_v54  ;;  %v155_v27 = vld [vmem:[#allocation4 + $0x30] sm:$0xff] }
 0x174   :  { %2786 = vmatprep.subr.bf16.mxu0 %v10261_v26  ;;  %3005 = vmatprep.subr.bf16.mxu1 %v10263_v15  ;;  %v9905_v54 = vcombine.high %v151_v22, %v155_v27  ;;  %v9907_v26 = vcombine.high %v152_v30, %v156_v47  ;;  %v159_v15 = vld [vmem:[#allocation4 + $0x50] sm:$0xff]  ;;  %v9904_v10 = vcombine.low %v151_v22, %v155_v27 }
 0x175   :  { %v175_v27 = vld [vmem:[#allocation4 + $0xd0] sm:$0xff] }
 0x177   :  { %2787 = vmatpush1.bf16.msra.mxu0 %v10260_v7  ;;  %3006 = vmatpush1.bf16.msra.mxu1 %v10262_v18  ;;  %v163_v7 = vld [vmem:[#allocation4 + $0x70] sm:$0xff]  ;;  %v9906_v18 = vcombine.low %v152_v30, %v156_v47  ;;  %v176_v47 = vld [vmem:[#allocation4 + $0xd8] sm:$0xff] }
 0x178   :  { %2788 = vmatprep.subr.bf16.mxu0 %v10269_v14  ;;  %3007 = vmatprep.subr.bf16.mxu1 %v10271_v3  ;;  %v9913_v14 = vcombine.high %v159_v15, %v163_v7  ;;  %v9915_v3 = vcombine.high %v160_v38, %v164_v34  ;;  %v179_v30 = vld [vmem:[#allocation4 + $0xf0] sm:$0xff] }
 0x17b   :  { %2789 = vmatpush1.bf16.msra.mxu0 %v10268_v39  ;;  %3008 = vmatpush1.bf16.msra.mxu1 %v10270_v46  ;;  %v172_v39 = vld [vmem:[#allocation4 + $0xb8] sm:$0xff]  ;;  %v9912_v46 = vcombine.low %v159_v15, %v163_v7  ;;  %v9929_v15 = vcombine.high %v175_v27, %v179_v30 }
 0x17c   :  { %2790 = vmatprep.subr.bf16.mxu0 %v10277_v31  ;;  %3009 = vmatprep.subr.bf16.mxu1 %v10279_v2  ;;  %v9914_v31 = vcombine.low %v160_v38, %v164_v34  ;;  %v9921_v2 = vcombine.high %v167_v23, %v171_v62  ;;  %v9923_v22 = vcombine.high %v168_v59, %v172_v39  ;;  %v11535_v38 = vld [vmem:[%s14508_s0 + $0x74] ss:$24 sps:$4 sm:$0xff]  }
 0x17d   :  { %v183_v34 = vld [vmem:[#allocation4 + $0x110] sm:$0xff] }
 0x17f   :  { %2791 = vmatpush1.bf16.msra.mxu0 %v10276_v11  ;;  %3010 = vmatpush1.bf16.msra.mxu1 %v10278_v6  ;;  %v180_v11 = vld [vmem:[#allocation4 + $0xf8] sm:$0xff] }
 0x180   :  { %3052 = vmatprep.subr.bf16.mxu0 %v9905_v54  ;;  %3271 = vmatprep.subr.bf16.mxu1 %v9907_v26  ;;  %v11534_v6 = vld [vmem:[%s14508_s0 + $0x40] ss:$24 sps:$4 sm:$0xff]   ;;  %v9920_v54 = vcombine.low %v167_v23, %v171_v62  ;;  %v9922_v26 = vcombine.low %v168_v59, %v172_v39  ;;  %v9931_v7 = vcombine.high %v176_v47, %v180_v11  ;;  %v191_v62 = vld [vmem:[#allocation4 + $0x150] sm:$0xff] }
 0x181   :  { %v195_v59 = vld [vmem:[#allocation4 + $0x170] sm:$0xff]  ;;  %v192_v39 = vld [vmem:[#allocation4 + $0x158] sm:$0xff] }
 0x182   :  { %2793 = vmatmul.mubr.bf16.vlgmr.msra.gmra.mrb[0].mxu0 %v11529_v19  ;;  %3012 = vmatmul.mubr.bf16.vlgmr.msra.gmra.mrb[0].mxu1 %v11529_v19  ;;  %v187_v19 = vld [vmem:[#allocation4 + $0x130] sm:$0xff] }
 0x183   :  { %3053 = vmatpush1.bf16.msra.mxu0 %v9904_v10  ;;  %3272 = vmatpush1.bf16.msra.mxu1 %v9906_v18  ;;  %v184_v10 = vld [vmem:[#allocation4 + $0x118] sm:$0xff] }
 0x184   :  { %3054 = vmatprep.subr.bf16.mxu0 %v9913_v14  ;;  %3273 = vmatprep.subr.bf16.mxu1 %v9915_v3  ;;  %v188_v18 = vld [vmem:[#allocation4 + $0x138] sm:$0xff]  ;;  %v9928_v14 = vcombine.low %v175_v27, %v179_v30  ;;  %v9930_v3 = vcombine.low %v176_v47, %v180_v11  ;;  %v9945_v27 = vcombine.high %v191_v62, %v195_v59  ;;  %v199_v11 = vld [vmem:[#allocation4 + $0x190] sm:$0xff] }
 0x185   :  { %2802 = vmatprep.mubr.bf16.mxu0 %v11532_v63  ;;  %3021 = vmatprep.mubr.bf16.mxu1 %v11532_v63  ;;  %v9937_v63 = vcombine.high %v183_v34, %v187_v19  ;;  %v9939_v23 = vcombine.high %v184_v10, %v188_v18  ;;  %v11538_v47 = vld [vmem:[%s14508_s0 + $0xa4] ss:$24 sps:$4 sm:$0xff]  }
 0x187   :  { %3055 = vmatpush1.bf16.msra.mxu0 %v9912_v46  ;;  %3274 = vmatpush1.bf16.msra.mxu1 %v9914_v31  ;;  %v196_v46 = vld [vmem:[#allocation4 + $0x178] sm:$0xff]  ;;  %v11537_v31 = vld [vmem:[%s14508_s0 + $0x70] ss:$24 sps:$4 sm:$0xff]  }
 0x188   :  { %3056 = vmatprep.subr.bf16.mxu0 %v9921_v2  ;;  %3275 = vmatprep.subr.bf16.mxu1 %v9923_v22  ;;  %v9936_v2 = vcombine.low %v183_v34, %v187_v19  ;;  %v9938_v22 = vcombine.low %v184_v10, %v188_v18  ;;  %v9947_v30 = vcombine.high %v192_v39, %v196_v46  ;;  %v207_v19 = vld [vmem:[#allocation4 + $0x1d0] sm:$0xff]  ;;  %v208_v18 = vld [vmem:[#allocation4 + $0x1d8] sm:$0xff] }
 0x189   :  { %v211_v10 = vld [vmem:[#allocation4 + $0x1f0] sm:$0xff] }
 0x18a   :  { %2803 = vmatmul.mubr.bf16.gmra.mrb[4].mxu0 %v11534_v6  ;;  %3022 = vmatmul.mubr.bf16.gmra.mrb[4].mxu1 %v11534_v6  ;;  %v203_v6 = vld [vmem:[#allocation4 + $0x1b0] sm:$0xff] }
 0x18b   :  { %3057 = vmatpush1.bf16.msra.mxu0 %v9920_v54  ;;  %3276 = vmatpush1.bf16.msra.mxu1 %v9922_v26  ;;  %v200_v54 = vld [vmem:[#allocation4 + $0x198] sm:$0xff] }
 0x18c   :  { %3058 = vmatprep.subr.bf16.mxu0 %v9929_v15  ;;  %3277 = vmatprep.subr.bf16.mxu1 %v9931_v7  ;;  %v204_v26 = vld [vmem:[#allocation4 + $0x1b8] sm:$0xff]  ;;  %v9944_v15 = vcombine.low %v191_v62, %v195_v59  ;;  %v9946_v7 = vcombine.low %v192_v39, %v196_v46  ;;  %v9961_v62 = vcombine.high %v207_v19, %v211_v10  ;;  %v215_v39 = vld [vmem:[#allocation4 + $0x210] sm:$0xff] }
 0x18d   :  { %2812 = vmatprep.mubr.bf16.mxu0 %v11535_v38  ;;  %3031 = vmatprep.mubr.bf16.mxu1 %v11535_v38  ;;  %v9953_v38 = vcombine.high %v199_v11, %v203_v6  ;;  %v9955_v34 = vcombine.high %v200_v54, %v204_v26  ;;  %v219_v46 = vld [vmem:[#allocation4 + $0x230] sm:$0xff] }
 0x18f   :  { %3059 = vmatpush1.bf16.msra.mxu0 %v9928_v14  ;;  %3278 = vmatpush1.bf16.msra.mxu1 %v9930_v3  ;;  %v212_v14 = vld [vmem:[#allocation4 + $0x1f8] sm:$0xff] }
 0x190   :  { %3060 = vmatprep.subr.bf16.mxu0 %v9937_v63  ;;  %3279 = vmatprep.subr.bf16.mxu1 %v9939_v23  ;;  %v11540_v3 = vld [vmem:[%s14508_s0 + $0xa0] ss:$24 sps:$4 sm:$0xff]   ;;  %v9952_v63 = vcombine.low %v199_v11, %v203_v6  ;;  %v9954_v23 = vcombine.low %v200_v54, %v204_v26  ;;  %v9963_v59 = vcombine.high %v208_v18, %v212_v14  ;;  %v223_v11 = vld [vmem:[#allocation4 + $0x250] sm:$0xff] }
 0x191   :  { %v227_v6 = vld [vmem:[#allocation4 + $0x270] sm:$0xff]  ;;  %v224_v54 = vld [vmem:[#allocation4 + $0x258] sm:$0xff] }
 0x192   :  { %2813 = vmatmul.mubr.bf16.gmra.mrb[8].mxu0 %v11537_v31  ;;  %3032 = vmatmul.mubr.bf16.gmra.mrb[8].mxu1 %v11537_v31  ;;  %v216_v31 = vld [vmem:[#allocation4 + $0x218] sm:$0xff] }
 0x193   :  { %3061 = vmatpush1.bf16.msra.mxu0 %v9936_v2  ;;  %3280 = vmatpush1.bf16.msra.mxu1 %v9938_v22  ;;  %v220_v2 = vld [vmem:[#allocation4 + $0x238] sm:$0xff]  ;;  %v9960_v22 = vcombine.low %v207_v19, %v211_v10  ;;  %v231_v10 = vld [vmem:[#allocation4 + $0x290] sm:$0xff] }
 0x194   :  { %3062 = vmatprep.subr.bf16.mxu0 %v9945_v27  ;;  %3281 = vmatprep.subr.bf16.mxu1 %v9947_v30  ;;  %v9962_v27 = vcombine.low %v208_v18, %v212_v14  ;;  %v9969_v30 = vcombine.high %v215_v39, %v219_v46  ;;  %v228_v26 = vld [vmem:[#allocation4 + $0x278] sm:$0xff]  ;;  %v235_v18 = vld [vmem:[#allocation4 + $0x2b0] sm:$0xff] }
 0x195   :  { %2822 = vmatprep.mubr.bf16.mxu0 %v11538_v47  ;;  %3041 = vmatprep.mubr.bf16.mxu1 %v11538_v47  ;;  %v9971_v47 = vcombine.high %v216_v31, %v220_v2  ;;  %v9979_v19 = vcombine.high %v224_v54, %v228_v26  ;;  %v232_v14 = vld [vmem:[#allocation4 + $0x298] sm:$0xff] }
 0x197   :  { %3063 = vmatpush1.bf16.msra.mxu0 %v9944_v15  ;;  %3282 = vmatpush1.bf16.msra.mxu1 %v9946_v7  ;;  %v11577_v15 = vld [vmem:[%s14508_s0 + $0x4] ss:$24 sps:$4 sm:$0xff]   ;;  %v9968_v7 = vcombine.low %v215_v39, %v219_v46 }
 0x198   :  { %3064 = vmatprep.subr.bf16.mxu0 %v9953_v38  ;;  %3283 = vmatprep.subr.bf16.mxu1 %v9955_v34  ;;  %v9970_v38 = vcombine.low %v216_v31, %v220_v2  ;;  %v9977_v34 = vcombine.high %v223_v11, %v227_v6  ;;  %v240_v39 = vld [vmem:[#allocation4 + $0x2d8] sm:$0xff]  ;;  %v9984_v31 = vcombine.low %v231_v10, %v235_v18 }
 0x199   :  { %v244_v46 = vld [vmem:[#allocation4 + $0x2f8] sm:$0xff] }
 0x19a   :  { %2823 = vmatmul.mubr.bf16.gmra.mrb[12].mxu0 %v11540_v3  ;;  %3042 = vmatmul.mubr.bf16.gmra.mrb[12].mxu1 %v11540_v3  ;;  %v236_v3 = vld [vmem:[#allocation4 + $0x2b8] sm:$0xff] }
 0x19b   :  { %3065 = vmatpush1.bf16.msra.mxu0 %v9952_v63  ;;  %3284 = vmatpush1.bf16.msra.mxu1 %v9954_v23  ;;  %v9976_v63 = vcombine.low %v223_v11, %v227_v6  ;;  %v9978_v23 = vcombine.low %v224_v54, %v228_v26  ;;  %v9986_v2 = vcombine.low %v232_v14, %v236_v3  ;;  %v248_v11 = vld [vmem:[#allocation4 + $0x318] sm:$0xff] }
 0x19c   :  { %3066 = vmatprep.subr.bf16.mxu0 %v9961_v62  ;;  %3285 = vmatprep.subr.bf16.mxu1 %v9963_v59  ;;  %v9985_v62 = vcombine.high %v231_v10, %v235_v18  ;;  %v9987_v59 = vcombine.high %v232_v14, %v236_v3  ;;  %v252_v6 = vld [vmem:[#allocation4 + $0x338] sm:$0xff]  ;;  %v9994_v26 = vcombine.low %v240_v39, %v244_v46 }
 0x19d   :  { %3084 = vmatprep.mubr.bf16.mxu0 %v11577_v15  ;;  %3303 = vmatprep.mubr.bf16.mxu1 %v11577_v15  ;;  %v247_v15 = vld [vmem:[#allocation4 + $0x310] sm:$0xff]  ;;  %v256_v10 = vld [vmem:[#allocation4 + $0x358] sm:$0xff]  ;;  %v10002_v3 = vcombine.low %v248_v11, %v252_v6 }
 0x19e   :  { %v260_v18 = vld [vmem:[#allocation4 + $0x378] sm:$0xff] }
 0x19f   :  { %3067 = vmatpush1.bf16.msra.mxu0 %v9960_v22  ;;  %3286 = vmatpush1.bf16.msra.mxu1 %v9962_v27  ;;  %v239_v22 = vld [vmem:[#allocation4 + $0x2d0] sm:$0xff] }
 0x1a0   :  { %3068 = vmatprep.subr.bf16.mxu0 %v9969_v30  ;;  %3287 = vmatprep.subr.bf16.mxu1 %v9971_v47  ;;  %v243_v27 = vld [vmem:[#allocation4 + $0x2f0] sm:$0xff]  ;;  %v9995_v47 = vcombine.high %v240_v39, %v244_v46  ;;  %v10010_v46 = vcombine.low %v256_v10, %v260_v18 }
 0x1a1   :  { %v9993_v30 = vcombine.high %v239_v22, %v243_v27  ;;  %v9992_v54 = vcombine.low %v239_v22, %v243_v27  ;;  %v264_v22 = vld [vmem:[#allocation4 + $0x398] sm:$0xff] }
 0x1a2   :  { %v268_v27 = vld [vmem:[#allocation4 + $0x3b8] sm:$0xff] }
 0x1a3   :  { %3069 = vmatpush1.bf16.msra.mxu0 %v9968_v7  ;;  %3288 = vmatpush1.bf16.msra.mxu1 %v9970_v38  ;;  %v251_v7 = vld [vmem:[#allocation4 + $0x330] sm:$0xff] }
 0x1a4   :  { %3070 = vmatprep.subr.bf16.mxu0 %v9977_v34  ;;  %3289 = vmatprep.subr.bf16.mxu1 %v9979_v19  ;;  %v10001_v38 = vcombine.high %v247_v15, %v251_v7  ;;  %v10003_v34 = vcombine.high %v248_v11, %v252_v6  ;;  %v255_v19 = vld [vmem:[#allocation4 + $0x350] sm:$0xff]  ;;  %v10000_v14 = vcombine.low %v247_v15, %v251_v7  ;;  %v272_v15 = vld [vmem:[#allocation4 + $0x3d8] sm:$0xff] }
 0x1a5   :  { %v276_v7 = vld [vmem:[#allocation4 + $0x3f8] sm:$0xff]  ;;  %v10018_v6 = vcombine.low %v264_v22, %v268_v27 }
 0x1a7   :  { %3071 = vmatpush1.bf16.msra.mxu0 %v9976_v63  ;;  %3290 = vmatpush1.bf16.msra.mxu1 %v9978_v23  ;;  %v259_v63 = vld [vmem:[#allocation4 + $0x370] sm:$0xff] }
 0x1a8   :  { %3072 = vmatprep.subr.bf16.mxu0 %v9985_v62  ;;  %3291 = vmatprep.subr.bf16.mxu1 %v9987_v59  ;;  %v10009_v23 = vcombine.high %v255_v19, %v259_v63  ;;  %v10011_v62 = vcombine.high %v256_v10, %v260_v18  ;;  %v263_v59 = vld [vmem:[#allocation4 + $0x390] sm:$0xff]  ;;  %v10008_v39 = vcombine.low %v255_v19, %v259_v63  ;;  %v280_v19 = vld [vmem:[#allocation4 + $0x418] sm:$0xff] }
 0x1a9   :  { %v284_v63 = vld [vmem:[#allocation4 + $0x438] sm:$0xff]  ;;  %v10026_v18 = vcombine.low %v272_v15, %v276_v7 }
 0x1ab   :  { %3073 = vmatpush1.bf16.msra.mxu0 %v9984_v31  ;;  %3292 = vmatpush1.bf16.msra.mxu1 %v9986_v2  ;;  %v267_v31 = vld [vmem:[#allocation4 + $0x3b0] sm:$0xff] }
 0x1ac   :  { %3074 = vmatprep.subr.bf16.mxu0 %v9993_v30  ;;  %3293 = vmatprep.subr.bf16.mxu1 %v9995_v47  ;;  %v10017_v2 = vcombine.high %v263_v59, %v267_v31  ;;  %v10019_v30 = vcombine.high %v264_v22, %v268_v27  ;;  %v271_v47 = vld [vmem:[#allocation4 + $0x3d0] sm:$0xff]  ;;  %v10016_v11 = vcombine.low %v263_v59, %v267_v31  ;;  %v288_v59 = vld [vmem:[#allocation4 + $0x458] sm:$0xff] }
 0x1ad   :  { %v292_v31 = vld [vmem:[#allocation4 + $0x478] sm:$0xff]  ;;  %v10034_v27 = vcombine.low %v280_v19, %v284_v63 }
 0x1af   :  { %3075 = vmatpush1.bf16.msra.mxu0 %v9992_v54  ;;  %3294 = vmatpush1.bf16.msra.mxu1 %v9994_v26  ;;  %v275_v54 = vld [vmem:[#allocation4 + $0x3f0] sm:$0xff] }
 0x1b0   :  { %3076 = vmatprep.subr.bf16.mxu0 %v10001_v38  ;;  %3295 = vmatprep.subr.bf16.mxu1 %v10003_v34  ;;  %v10025_v26 = vcombine.high %v271_v47, %v275_v54  ;;  %v10027_v38 = vcombine.high %v272_v15, %v276_v7  ;;  %v279_v34 = vld [vmem:[#allocation4 + $0x410] sm:$0xff]  ;;  %v10024_v10 = vcombine.low %v271_v47, %v275_v54  ;;  %v296_v47 = vld [vmem:[#allocation4 + $0x498] sm:$0xff] }
 0x1b1   :  { %v300_v54 = vld [vmem:[#allocation4 + $0x4b8] sm:$0xff] }
 0x1b2   :  { %v11578_v15 = vld [vmem:[%s14508_s0] ss:$24 sps:$4 sm:$0xff]  }
 0x1b3   :  { %3077 = vmatpush1.bf16.msra.mxu0 %v10000_v14  ;;  %3296 = vmatpush1.bf16.msra.mxu1 %v10002_v3  ;;  %v283_v14 = vld [vmem:[#allocation4 + $0x430] sm:$0xff] }
 0x1b4   :  { %3078 = vmatprep.subr.bf16.mxu0 %v10009_v23  ;;  %3297 = vmatprep.subr.bf16.mxu1 %v10011_v62  ;;  %v10033_v3 = vcombine.high %v279_v34, %v283_v14  ;;  %v10035_v23 = vcombine.high %v280_v19, %v284_v63  ;;  %v287_v62 = vld [vmem:[#allocation4 + $0x450] sm:$0xff]  ;;  %v10032_v22 = vcombine.low %v279_v34, %v283_v14  ;;  %v304_v19 = vld [vmem:[#allocation4 + $0x4d8] sm:$0xff] }
 0x1b5   :  { %v303_v34 = vld [vmem:[#allocation4 + $0x4d0] sm:$0xff]  ;;  %v308_v63 = vld [vmem:[#allocation4 + $0x4f8] sm:$0xff] }
 0x1b6   :  { %v307_v14 = vld [vmem:[#allocation4 + $0x4f0] sm:$0xff] }
 0x1b7   :  { %3079 = vmatpush1.bf16.msra.mxu0 %v10008_v39  ;;  %3298 = vmatpush1.bf16.msra.mxu1 %v10010_v46  ;;  %v291_v39 = vld [vmem:[#allocation4 + $0x470] sm:$0xff] }
 0x1b8   :  { %3080 = vmatprep.subr.bf16.mxu0 %v10017_v2  ;;  %3299 = vmatprep.subr.bf16.mxu1 %v10019_v30  ;;  %v10041_v46 = vcombine.high %v287_v62, %v291_v39  ;;  %v10043_v2 = vcombine.high %v288_v59, %v292_v31  ;;  %v295_v30 = vld [vmem:[#allocation4 + $0x490] sm:$0xff]  ;;  %v10040_v7 = vcombine.low %v287_v62, %v291_v39 }
 0x1b9   :  { %v10059_v62 = vcombine.high %v304_v19, %v308_v63  ;;  %v311_v39 = vld [vmem:[#allocation4 + $0x510] sm:$0xff] }
 0x1bb   :  { %3081 = vmatpush1.bf16.msra.mxu0 %v10016_v11  ;;  %3300 = vmatpush1.bf16.msra.mxu1 %v10018_v6  ;;  %v299_v11 = vld [vmem:[#allocation4 + $0x4b0] sm:$0xff]  ;;  %v10042_v6 = vcombine.low %v288_v59, %v292_v31  ;;  %v312_v31 = vld [vmem:[#allocation4 + $0x518] sm:$0xff] }
 0x1bc   :  { %3082 = vmatprep.subr.bf16.mxu0 %v10025_v26  ;;  %3301 = vmatprep.subr.bf16.mxu1 %v10027_v38  ;;  %v10049_v26 = vcombine.high %v295_v30, %v299_v11  ;;  %v10051_v38 = vcombine.high %v296_v47, %v300_v54  ;;  %v315_v59 = vld [vmem:[#allocation4 + $0x530] sm:$0xff] }
 0x1bf   :  { %3083 = vmatpush1.bf16.msra.mxu0 %v10024_v10  ;;  %3302 = vmatpush1.bf16.msra.mxu1 %v10026_v18  ;;  %v11579_v10 = vld [vmem:[%s14508_s0 + $0x34] ss:$24 sps:$4 sm:$0xff]   ;;  %v10048_v18 = vcombine.low %v295_v30, %v299_v11  ;;  %v10065_v30 = vcombine.high %v311_v39, %v315_v59 }
 0x1c0   :  { %3125 = vmatprep.subr.bf16.mxu0 %v10033_v3  ;;  %3344 = vmatprep.subr.bf16.mxu1 %v10035_v23  ;;  %v10050_v3 = vcombine.low %v296_v47, %v300_v54  ;;  %v10057_v23 = vcombine.high %v303_v34, %v307_v14  ;;  %v319_v47 = vld [vmem:[#allocation4 + $0x550] sm:$0xff] }
 0x1c1   :  { %v323_v54 = vld [vmem:[#allocation4 + $0x570] sm:$0xff] }
 0x1c2   :  { %3085 = vmatmul.mubr.bf16.vlgmr.msra.gmra.mrb[16].mxu0 %v11578_v15  ;;  %3304 = vmatmul.mubr.bf16.vlgmr.msra.gmra.mrb[16].mxu1 %v11578_v15  ;;  %v320_v15 = vld [vmem:[#allocation4 + $0x558] sm:$0xff] }
 0x1c3   :  { %3126 = vmatpush1.bf16.msra.mxu0 %v10032_v22  ;;  %3345 = vmatpush1.bf16.msra.mxu1 %v10034_v27  ;;  %v316_v22 = vld [vmem:[#allocation4 + $0x538] sm:$0xff]  ;;  %v11580_v27 = vld [vmem:[%s14508_s0 + $0x30] ss:$24 sps:$4 sm:$0xff]  }
 0x1c4   :  { %3127 = vmatprep.subr.bf16.mxu0 %v10041_v46  ;;  %3346 = vmatprep.subr.bf16.mxu1 %v10043_v2  ;;  %v10056_v46 = vcombine.low %v303_v34, %v307_v14  ;;  %v10058_v2 = vcombine.low %v304_v19, %v308_v63  ;;  %v10067_v11 = vcombine.high %v312_v31, %v316_v22  ;;  %v327_v19 = vld [vmem:[#allocation4 + $0x590] sm:$0xff] }
 0x1c5   :  { %3094 = vmatprep.mubr.bf16.mxu0 %v11579_v10  ;;  %3313 = vmatprep.mubr.bf16.mxu1 %v11579_v10  ;;  %v10073_v34 = vcombine.high %v319_v47, %v323_v54  ;;  %v331_v63 = vld [vmem:[#allocation4 + $0x5b0] sm:$0xff]  ;;  %v328_v10 = vld [vmem:[#allocation4 + $0x598] sm:$0xff] }
 0x1c7   :  { %3128 = vmatpush1.bf16.msra.mxu0 %v10040_v7  ;;  %3347 = vmatpush1.bf16.msra.mxu1 %v10042_v6  ;;  %v324_v7 = vld [vmem:[#allocation4 + $0x578] sm:$0xff] }
 0x1c8   :  { %3129 = vmatprep.subr.bf16.mxu0 %v10049_v26  ;;  %3348 = vmatprep.subr.bf16.mxu1 %v10051_v38  ;;  %v11581_v6 = vld [vmem:[%s14508_s0 + $0x64] ss:$24 sps:$4 sm:$0xff]   ;;  %v10064_v26 = vcombine.low %v311_v39, %v315_v59  ;;  %v10066_v38 = vcombine.low %v312_v31, %v316_v22  ;;  %v10075_v14 = vcombine.high %v320_v15, %v324_v7  ;;  %v335_v31 = vld [vmem:[#allocation4 + $0x5d0] sm:$0xff] }
 0x1c9   :  { %v10081_v39 = vcombine.high %v327_v19, %v331_v63  ;;  %v339_v22 = vld [vmem:[#allocation4 + $0x5f0] sm:$0xff] }
 0x1ca   :  { %3095 = vmatmul.mubr.bf16.gmra.mrb[20].mxu0 %v11580_v27  ;;  %3314 = vmatmul.mubr.bf16.gmra.mrb[20].mxu1 %v11580_v27  ;;  %v336_v27 = vld [vmem:[#allocation4 + $0x5d8] sm:$0xff] }
 0x1cb   :  { %3130 = vmatpush1.bf16.msra.mxu0 %v10048_v18  ;;  %3349 = vmatpush1.bf16.msra.mxu1 %v10050_v3  ;;  %v332_v18 = vld [vmem:[#allocation4 + $0x5b8] sm:$0xff] }
 0x1cc   :  { %3131 = vmatprep.subr.bf16.mxu0 %v10057_v23  ;;  %3350 = vmatprep.subr.bf16.mxu1 %v10059_v62  ;;  %v11582_v3 = vld [vmem:[%s14508_s0 + $0x60] ss:$24 sps:$4 sm:$0xff]   ;;  %v10072_v23 = vcombine.low %v319_v47, %v323_v54  ;;  %v10074_v62 = vcombine.low %v320_v15, %v324_v7  ;;  %v10083_v59 = vcombine.high %v328_v10, %v332_v18  ;;  %v343_v15 = vld [vmem:[#allocation4 + $0x610] sm:$0xff] }
 0x1cd   :  { %3104 = vmatprep.mubr.bf16.mxu0 %v11581_v6  ;;  %3323 = vmatprep.mubr.bf16.mxu1 %v11581_v6  ;;  %v10089_v47 = vcombine.high %v335_v31, %v339_v22  ;;  %v347_v7 = vld [vmem:[#allocation4 + $0x630] sm:$0xff]  ;;  %v344_v6 = vld [vmem:[#allocation4 + $0x618] sm:$0xff] }
 0x1cf   :  { %3132 = vmatpush1.bf16.msra.mxu0 %v10056_v46  ;;  %3351 = vmatpush1.bf16.msra.mxu1 %v10058_v2  ;;  %v340_v46 = vld [vmem:[#allocation4 + $0x5f8] sm:$0xff]  ;;  %v11583_v2 = vld [vmem:[%s14508_s0 + $0x94] ss:$24 sps:$4 sm:$0xff]  }
 0x1d0   :  { %3133 = vmatprep.subr.bf16.mxu0 %v10065_v30  ;;  %3352 = vmatprep.subr.bf16.mxu1 %v10067_v11  ;;  %v10080_v30 = vcombine.low %v327_v19, %v331_v63  ;;  %v10082_v11 = vcombine.low %v328_v10, %v332_v18  ;;  %v10091_v54 = vcombine.high %v336_v27, %v340_v46  ;;  %v351_v10 = vld [vmem:[#allocation4 + $0x650] sm:$0xff] }
 0x1d1   :  { %v10097_v19 = vcombine.high %v343_v15, %v347_v7  ;;  %v355_v18 = vld [vmem:[#allocation4 + $0x670] sm:$0xff] }
 0x1d2   :  { %3105 = vmatmul.mubr.bf16.gmra.mrb[24].mxu0 %v11582_v3  ;;  %3324 = vmatmul.mubr.bf16.gmra.mrb[24].mxu1 %v11582_v3  ;;  %v352_v3 = vld [vmem:[#allocation4 + $0x658] sm:$0xff] }
 0x1d3   :  { %3134 = vmatpush1.bf16.msra.mxu0 %v10064_v26  ;;  %3353 = vmatpush1.bf16.msra.mxu1 %v10066_v38  ;;  %v348_v26 = vld [vmem:[#allocation4 + $0x638] sm:$0xff]  ;;  %v11584_v38 = vld [vmem:[%s14508_s0 + $0x90] ss:$24 sps:$4 sm:$0xff]  }
 0x1d4   :  { %3135 = vmatprep.subr.bf16.mxu0 %v10073_v34  ;;  %3354 = vmatprep.subr.bf16.mxu1 %v10075_v14  ;;  %v10088_v34 = vcombine.low %v335_v31, %v339_v22  ;;  %v10090_v14 = vcombine.low %v336_v27, %v340_v46  ;;  %v10099_v63 = vcombine.high %v344_v6, %v348_v26  ;;  %v359_v27 = vld [vmem:[#allocation4 + $0x690] sm:$0xff] }
 0x1d5   :  { %3114 = vmatprep.mubr.bf16.mxu0 %v11583_v2  ;;  %3333 = vmatprep.mubr.bf16.mxu1 %v11583_v2  ;;  %v10105_v31 = vcombine.high %v351_v10, %v355_v18  ;;  %v363_v46 = vld [vmem:[#allocation4 + $0x6b0] sm:$0xff]  ;;  %v360_v2 = vld [vmem:[#allocation4 + $0x698] sm:$0xff] }
 0x1d7   :  { %3136 = vmatpush1.bf16.msra.mxu0 %v10072_v23  ;;  %3355 = vmatpush1.bf16.msra.mxu1 %v10074_v62  ;;  %v356_v23 = vld [vmem:[#allocation4 + $0x678] sm:$0xff]  ;;  %v11585_v62 = vld [vmem:[%s14508_s0 + $0xc] ss:$24 sps:$4 sm:$0xff]  }
 0x1d8   :  { %3137 = vmatprep.subr.bf16.mxu0 %v10081_v39  ;;  %3356 = vmatprep.subr.bf16.mxu1 %v10083_v59  ;;  %v10096_v39 = vcombine.low %v343_v15, %v347_v7  ;;  %v10098_v59 = vcombine.low %v344_v6, %v348_v26  ;;  %v10107_v22 = vcombine.high %v352_v3, %v356_v23  ;;  %v368_v15 = vld [vmem:[#allocation4 + $0x6d8] sm:$0xff] }
 0x1d9   :  { %v372_v7 = vld [vmem:[#allocation4 + $0x6f8] sm:$0xff]  ;;  %v10112_v6 = vcombine.low %v359_v27, %v363_v46 }
 0x1da   :  { %3115 = vmatmul.mubr.bf16.gmra.mrb[28].mxu0 %v11584_v38  ;;  %3334 = vmatmul.mubr.bf16.gmra.mrb[28].mxu1 %v11584_v38 }
 0x1db   :  { %3138 = vmatpush1.bf16.msra.mxu0 %v10080_v30  ;;  %3357 = vmatpush1.bf16.msra.mxu1 %v10082_v11  ;;  %v364_v30 = vld [vmem:[#allocation4 + $0x6b8] sm:$0xff]  ;;  %v10104_v11 = vcombine.low %v351_v10, %v355_v18 }
 0x1dc   :  { %3139 = vmatprep.subr.bf16.mxu0 %v10089_v47  ;;  %3358 = vmatprep.subr.bf16.mxu1 %v10091_v54  ;;  %v10106_v47 = vcombine.low %v352_v3, %v356_v23  ;;  %v10113_v54 = vcombine.high %v359_v27, %v363_v46  ;;  %v10115_v38 = vcombine.high %v360_v2, %v364_v30  ;;  %v376_v10 = vld [vmem:[#allocation4 + $0x718] sm:$0xff] }
 0x1dd   :  { %3157 = vmatprep.mubr.bf16.mxu0 %v11585_v62  ;;  %3376 = vmatprep.mubr.bf16.mxu1 %v11585_v62  ;;  %v10114_v26 = vcombine.low %v360_v2, %v364_v30  ;;  %v375_v62 = vld [vmem:[#allocation4 + $0x710] sm:$0xff]  ;;  %v380_v18 = vld [vmem:[#allocation4 + $0x738] sm:$0xff]  ;;  %v10122_v23 = vcombine.low %v368_v15, %v372_v7 }
 0x1de   :  { %v384_v27 = vld [vmem:[#allocation4 + $0x758] sm:$0xff]  ;;  %v10130_v30 = vcombine.low %v376_v10, %v380_v18 }
 0x1df   :  { %3140 = vmatpush1.bf16.msra.mxu0 %v10088_v34  ;;  %3359 = vmatpush1.bf16.msra.mxu1 %v10090_v14  ;;  %v367_v34 = vld [vmem:[#allocation4 + $0x6d0] sm:$0xff]  ;;  %v388_v46 = vld [vmem:[#allocation4 + $0x778] sm:$0xff] }
 0x1e0   :  { %3141 = vmatprep.subr.bf16.mxu0 %v10097_v19  ;;  %3360 = vmatprep.subr.bf16.mxu1 %v10099_v63  ;;  %v371_v14 = vld [vmem:[#allocation4 + $0x6f0] sm:$0xff]  ;;  %v10123_v63 = vcombine.high %v368_v15, %v372_v7  ;;  %v10138_v7 = vcombine.low %v384_v27, %v388_v46 }
 0x1e1   :  { %v10121_v19 = vcombine.high %v367_v34, %v371_v14  ;;  %v10120_v3 = vcombine.low %v367_v34, %v371_v14  ;;  %v392_v34 = vld [vmem:[#allocation4 + $0x798] sm:$0xff] }
 0x1e2   :  { %v396_v14 = vld [vmem:[#allocation4 + $0x7b8] sm:$0xff] }
 0x1e3   :  { %3142 = vmatpush1.bf16.msra.mxu0 %v10096_v39  ;;  %3361 = vmatpush1.bf16.msra.mxu1 %v10098_v59  ;;  %v379_v39 = vld [vmem:[#allocation4 + $0x730] sm:$0xff] }
 0x1e4   :  { %3143 = vmatprep.subr.bf16.mxu0 %v10105_v31  ;;  %3362 = vmatprep.subr.bf16.mxu1 %v10107_v22  ;;  %v10129_v59 = vcombine.high %v375_v62, %v379_v39  ;;  %v10131_v31 = vcombine.high %v376_v10, %v380_v18  ;;  %v383_v22 = vld [vmem:[#allocation4 + $0x750] sm:$0xff]  ;;  %v10128_v2 = vcombine.low %v375_v62, %v379_v39  ;;  %v400_v62 = vld [vmem:[#allocation4 + $0x7d8] sm:$0xff] }
 0x1e5   :  { %v404_v39 = vld [vmem:[#allocation4 + $0x7f8] sm:$0xff]  ;;  %v10146_v18 = vcombine.low %v392_v34, %v396_v14 }
 0x1e7   :  { %3144 = vmatpush1.bf16.msra.mxu0 %v10104_v11  ;;  %3363 = vmatpush1.bf16.msra.mxu1 %v10106_v47  ;;  %v387_v11 = vld [vmem:[#allocation4 + $0x770] sm:$0xff] }
 0x1e8   :  { %3145 = vmatprep.subr.bf16.mxu0 %v10113_v54  ;;  %3364 = vmatprep.subr.bf16.mxu1 %v10115_v38  ;;  %v10137_v47 = vcombine.high %v383_v22, %v387_v11  ;;  %v10139_v54 = vcombine.high %v384_v27, %v388_v46  ;;  %v391_v38 = vld [vmem:[#allocation4 + $0x790] sm:$0xff]  ;;  %v10136_v15 = vcombine.low %v383_v22, %v387_v11  ;;  %v408_v22 = vld [vmem:[#allocation4 + $0x818] sm:$0xff] }
 0x1e9   :  { %v412_v11 = vld [vmem:[#allocation4 + $0x838] sm:$0xff]  ;;  %v10154_v46 = vcombine.low %v400_v62, %v404_v39 }
 0x1eb   :  { %3146 = vmatpush1.bf16.msra.mxu0 %v10112_v6  ;;  %3365 = vmatpush1.bf16.msra.mxu1 %v10114_v26  ;;  %v395_v6 = vld [vmem:[#allocation4 + $0x7b0] sm:$0xff] }
 0x1ec   :  { %3147 = vmatprep.subr.bf16.mxu0 %v10121_v19  ;;  %3366 = vmatprep.subr.bf16.mxu1 %v10123_v63  ;;  %v10145_v26 = vcombine.high %v391_v38, %v395_v6  ;;  %v10147_v19 = vcombine.high %v392_v34, %v396_v14  ;;  %v399_v63 = vld [vmem:[#allocation4 + $0x7d0] sm:$0xff]  ;;  %v10144_v10 = vcombine.low %v391_v38, %v395_v6  ;;  %v416_v38 = vld [vmem:[#allocation4 + $0x858] sm:$0xff] }
 0x1ed   :  { %v420_v6 = vld [vmem:[#allocation4 + $0x878] sm:$0xff]  ;;  %v10162_v14 = vcombine.low %v408_v22, %v412_v11 }
 0x1ef   :  { %3148 = vmatpush1.bf16.msra.mxu0 %v10120_v3  ;;  %3367 = vmatpush1.bf16.msra.mxu1 %v10122_v23  ;;  %v403_v3 = vld [vmem:[#allocation4 + $0x7f0] sm:$0xff] }
 0x1f0   :  { %3149 = vmatprep.subr.bf16.mxu0 %v10129_v59  ;;  %3368 = vmatprep.subr.bf16.mxu1 %v10131_v31  ;;  %v10153_v23 = vcombine.high %v399_v63, %v403_v3  ;;  %v10155_v59 = vcombine.high %v400_v62, %v404_v39  ;;  %v407_v31 = vld [vmem:[#allocation4 + $0x810] sm:$0xff]  ;;  %v10152_v27 = vcombine.low %v399_v63, %v403_v3  ;;  %v424_v63 = vld [vmem:[#allocation4 + $0x898] sm:$0xff]  ;;  %v11586_v62 = vld [vmem:[%s14508_s0 + $0x8] ss:$24 sps:$4 sm:$0xff]  }
 0x1f1   :  { %v428_v3 = vld [vmem:[#allocation4 + $0x8b8] sm:$0xff] }
 0x1f3   :  { %3150 = vmatpush1.bf16.msra.mxu0 %v10128_v2  ;;  %3369 = vmatpush1.bf16.msra.mxu1 %v10130_v30  ;;  %v411_v2 = vld [vmem:[#allocation4 + $0x830] sm:$0xff] }
 0x1f4   :  { %3151 = vmatprep.subr.bf16.mxu0 %v10137_v47  ;;  %3370 = vmatprep.subr.bf16.mxu1 %v10139_v54  ;;  %v10161_v30 = vcombine.high %v407_v31, %v411_v2  ;;  %v10163_v47 = vcombine.high %v408_v22, %v412_v11  ;;  %v415_v54 = vld [vmem:[#allocation4 + $0x850] sm:$0xff]  ;;  %v10160_v34 = vcombine.low %v407_v31, %v411_v2  ;;  %v432_v22 = vld [vmem:[#allocation4 + $0x8d8] sm:$0xff] }
 0x1f5   :  { %v431_v31 = vld [vmem:[#allocation4 + $0x8d0] sm:$0xff]  ;;  %v436_v11 = vld [vmem:[#allocation4 + $0x8f8] sm:$0xff] }
 0x1f6   :  { %v435_v2 = vld [vmem:[#allocation4 + $0x8f0] sm:$0xff] }
 0x1f7   :  { %3152 = vmatpush1.bf16.msra.mxu0 %v10136_v15  ;;  %3371 = vmatpush1.bf16.msra.mxu1 %v10138_v7  ;;  %v419_v15 = vld [vmem:[#allocation4 + $0x870] sm:$0xff] }
 0x1f8   :  { %3153 = vmatprep.subr.bf16.mxu0 %v10145_v26  ;;  %3372 = vmatprep.subr.bf16.mxu1 %v10147_v19  ;;  %v10169_v7 = vcombine.high %v415_v54, %v419_v15  ;;  %v10171_v26 = vcombine.high %v416_v38, %v420_v6  ;;  %v423_v19 = vld [vmem:[#allocation4 + $0x890] sm:$0xff]  ;;  %v10168_v39 = vcombine.low %v415_v54, %v419_v15 }
 0x1f9   :  { %v10187_v54 = vcombine.high %v432_v22, %v436_v11  ;;  %v439_v15 = vld [vmem:[#allocation4 + $0x910] sm:$0xff] }
 0x1fb   :  { %3154 = vmatpush1.bf16.msra.mxu0 %v10144_v10  ;;  %3373 = vmatpush1.bf16.msra.mxu1 %v10146_v18  ;;  %v427_v10 = vld [vmem:[#allocation4 + $0x8b0] sm:$0xff]  ;;  %v10170_v18 = vcombine.low %v416_v38, %v420_v6  ;;  %v440_v6 = vld [vmem:[#allocation4 + $0x918] sm:$0xff] }
 0x1fc   :  { %3155 = vmatprep.subr.bf16.mxu0 %v10153_v23  ;;  %3374 = vmatprep.subr.bf16.mxu1 %v10155_v59  ;;  %v10177_v23 = vcombine.high %v423_v19, %v427_v10  ;;  %v10179_v59 = vcombine.high %v424_v63, %v428_v3  ;;  %v443_v38 = vld [vmem:[#allocation4 + $0x930] sm:$0xff] }
 0x1ff   :  { %3156 = vmatpush1.bf16.msra.mxu0 %v10152_v27  ;;  %3375 = vmatpush1.bf16.msra.mxu1 %v10154_v46  ;;  %v11587_v27 = vld [vmem:[%s14508_s0 + $0x3c] ss:$24 sps:$4 sm:$0xff]   ;;  %v10176_v46 = vcombine.low %v423_v19, %v427_v10  ;;  %v10193_v19 = vcombine.high %v439_v15, %v443_v38 }
 0x200   :  { %3198 = vmatprep.subr.bf16.mxu0 %v10161_v30  ;;  %3417 = vmatprep.subr.bf16.mxu1 %v10163_v47  ;;  %v10178_v30 = vcombine.low %v424_v63, %v428_v3  ;;  %v10185_v47 = vcombine.high %v431_v31, %v435_v2  ;;  %v447_v63 = vld [vmem:[#allocation4 + $0x950] sm:$0xff] }
 0x201   :  { %v451_v3 = vld [vmem:[#allocation4 + $0x970] sm:$0xff] }
 0x202   :  { %3158 = vmatmul.mubr.bf16.vlgmr.msra.gmra.mrb[16].mxu0 %v11586_v62  ;;  %3377 = vmatmul.mubr.bf16.vlgmr.msra.gmra.mrb[16].mxu1 %v11586_v62  ;;  %v448_v62 = vld [vmem:[#allocation4 + $0x958] sm:$0xff] }
 0x203   :  { %3199 = vmatpush1.bf16.msra.mxu0 %v10160_v34  ;;  %3418 = vmatpush1.bf16.msra.mxu1 %v10162_v14  ;;  %v444_v34 = vld [vmem:[#allocation4 + $0x938] sm:$0xff] }
 0x204   :  { %3200 = vmatprep.subr.bf16.mxu0 %v10169_v7  ;;  %3419 = vmatprep.subr.bf16.mxu1 %v10171_v26  ;;  %v11588_v14 = vld [vmem:[%s14508_s0 + $0x38] ss:$24 sps:$4 sm:$0xff]   ;;  %v10184_v7 = vcombine.low %v431_v31, %v435_v2  ;;  %v10186_v26 = vcombine.low %v432_v22, %v436_v11  ;;  %v10195_v10 = vcombine.high %v440_v6, %v444_v34 }
 0x205   :  { %3167 = vmatprep.mubr.bf16.mxu0 %v11587_v27  ;;  %3386 = vmatprep.mubr.bf16.mxu1 %v11587_v27  ;;  %v10201_v31 = vcombine.high %v447_v63, %v451_v3  ;;  %v455_v22 = vld [vmem:[#allocation4 + $0x990] sm:$0xff]  ;;  %v456_v27 = vld [vmem:[#allocation4 + $0x998] sm:$0xff] }
 0x206   :  { %v459_v11 = vld [vmem:[#allocation4 + $0x9b0] sm:$0xff] }
 0x207   :  { %3201 = vmatpush1.bf16.msra.mxu0 %v10168_v39  ;;  %3420 = vmatpush1.bf16.msra.mxu1 %v10170_v18  ;;  %v452_v39 = vld [vmem:[#allocation4 + $0x978] sm:$0xff]  ;;  %v11589_v18 = vld [vmem:[%s14508_s0 + $0x6c] ss:$24 sps:$4 sm:$0xff]  }
 0x208   :  { %3202 = vmatprep.subr.bf16.mxu0 %v10177_v23  ;;  %3421 = vmatprep.subr.bf16.mxu1 %v10179_v59  ;;  %v10192_v23 = vcombine.low %v439_v15, %v443_v38  ;;  %v10194_v59 = vcombine.low %v440_v6, %v444_v34  ;;  %v10203_v2 = vcombine.high %v448_v62, %v452_v39  ;;  %v463_v6 = vld [vmem:[#allocation4 + $0x9d0] sm:$0xff] }
 0x209   :  { %v10209_v15 = vcombine.high %v455_v22, %v459_v11  ;;  %v467_v34 = vld [vmem:[#allocation4 + $0x9f0] sm:$0xff] }
 0x20a   :  { %3168 = vmatmul.mubr.bf16.gmra.mrb[20].mxu0 %v11588_v14  ;;  %3387 = vmatmul.mubr.bf16.gmra.mrb[20].mxu1 %v11588_v14  ;;  %v464_v14 = vld [vmem:[#allocation4 + $0x9d8] sm:$0xff] }
 0x20b   :  { %3203 = vmatpush1.bf16.msra.mxu0 %v10176_v46  ;;  %3422 = vmatpush1.bf16.msra.mxu1 %v10178_v30  ;;  %v460_v46 = vld [vmem:[#allocation4 + $0x9b8] sm:$0xff]  ;;  %v11590_v30 = vld [vmem:[%s14508_s0 + $0x68] ss:$24 sps:$4 sm:$0xff]  }
 0x20c   :  { %3204 = vmatprep.subr.bf16.mxu0 %v10185_v47  ;;  %3423 = vmatprep.subr.bf16.mxu1 %v10187_v54  ;;  %v10200_v47 = vcombine.low %v447_v63, %v451_v3  ;;  %v10202_v54 = vcombine.low %v448_v62, %v452_v39  ;;  %v10211_v38 = vcombine.high %v456_v27, %v460_v46  ;;  %v471_v62 = vld [vmem:[#allocation4 + $0xa10] sm:$0xff] }
 0x20d   :  { %3177 = vmatprep.mubr.bf16.mxu0 %v11589_v18  ;;  %3396 = vmatprep.mubr.bf16.mxu1 %v11589_v18  ;;  %v10217_v63 = vcombine.high %v463_v6, %v467_v34  ;;  %v475_v39 = vld [vmem:[#allocation4 + $0xa30] sm:$0xff]  ;;  %v472_v18 = vld [vmem:[#allocation4 + $0xa18] sm:$0xff] }
 0x20f   :  { %3205 = vmatpush1.bf16.msra.mxu0 %v10184_v7  ;;  %3424 = vmatpush1.bf16.msra.mxu1 %v10186_v26  ;;  %v468_v7 = vld [vmem:[#allocation4 + $0x9f8] sm:$0xff] }
 0x210   :  { %3206 = vmatprep.subr.bf16.mxu0 %v10193_v19  ;;  %3425 = vmatprep.subr.bf16.mxu1 %v10195_v10  ;;  %v11591_v26 = vld [vmem:[%s14508_s0 + $0x9c] ss:$24 sps:$4 sm:$0xff]   ;;  %v10208_v19 = vcombine.low %v455_v22, %v459_v11  ;;  %v10210_v10 = vcombine.low %v456_v27, %v460_v46  ;;  %v10219_v3 = vcombine.high %v464_v14, %v468_v7 }
 0x211   :  { %v10225_v22 = vcombine.high %v471_v62, %v475_v39  ;;  %v479_v27 = vld [vmem:[#allocation4 + $0xa50] sm:$0xff] }
 0x212   :  { %3178 = vmatmul.mubr.bf16.gmra.mrb[24].mxu0 %v11590_v30  ;;  %3397 = vmatmul.mubr.bf16.gmra.mrb[24].mxu1 %v11590_v30  ;;  %v483_v46 = vld [vmem:[#allocation4 + $0xa70] sm:$0xff]  ;;  %v480_v30 = vld [vmem:[#allocation4 + $0xa58] sm:$0xff] }
 0x213   :  { %3207 = vmatpush1.bf16.msra.mxu0 %v10192_v23  ;;  %3426 = vmatpush1.bf16.msra.mxu1 %v10194_v59  ;;  %v476_v23 = vld [vmem:[#allocation4 + $0xa38] sm:$0xff] }
 0x214   :  { %3208 = vmatprep.subr.bf16.mxu0 %v10201_v31  ;;  %3427 = vmatprep.subr.bf16.mxu1 %v10203_v2  ;;  %v11592_v59 = vld [vmem:[%s14508_s0 + $0x98] ss:$24 sps:$4 sm:$0xff]   ;;  %v10216_v31 = vcombine.low %v463_v6, %v467_v34  ;;  %v10218_v2 = vcombine.low %v464_v14, %v468_v7  ;;  %v10227_v11 = vcombine.high %v472_v18, %v476_v23 }
 0x215   :  { %3187 = vmatprep.mubr.bf16.mxu0 %v11591_v26  ;;  %3406 = vmatprep.mubr.bf16.mxu1 %v11591_v26  ;;  %v10233_v6 = vcombine.high %v479_v27, %v483_v46  ;;  %v487_v14 = vld [vmem:[#allocation4 + $0xa90] sm:$0xff]  ;;  %v488_v26 = vld [vmem:[#allocation4 + $0xa98] sm:$0xff] }
 0x216   :  { %v491_v7 = vld [vmem:[#allocation4 + $0xab0] sm:$0xff] }
 0x217   :  { %3209 = vmatpush1.bf16.msra.mxu0 %v10200_v47  ;;  %3428 = vmatpush1.bf16.msra.mxu1 %v10202_v54  ;;  %v484_v47 = vld [vmem:[#allocation4 + $0xa78] sm:$0xff]  ;;  %v11593_v54 = vld [vmem:[%s14508_s0 + $0x14] ss:$24 sps:$4 sm:$0xff]  }
 0x218   :  { %3210 = vmatprep.subr.bf16.mxu0 %v10209_v15  ;;  %3429 = vmatprep.subr.bf16.mxu1 %v10211_v38  ;;  %v10224_v15 = vcombine.low %v471_v62, %v475_v39  ;;  %v10226_v38 = vcombine.low %v472_v18, %v476_v23  ;;  %v10235_v34 = vcombine.high %v480_v30, %v484_v47  ;;  %v496_v62 = vld [vmem:[#allocation4 + $0xad8] sm:$0xff] }
 0x219   :  { %v500_v39 = vld [vmem:[#allocation4 + $0xaf8] sm:$0xff]  ;;  %v10240_v18 = vcombine.low %v487_v14, %v491_v7 }
 0x21a   :  { %3188 = vmatmul.mubr.bf16.gmra.mrb[28].mxu0 %v11592_v59  ;;  %3407 = vmatmul.mubr.bf16.gmra.mrb[28].mxu1 %v11592_v59 }
 0x21b   :  { %3211 = vmatpush1.bf16.msra.mxu0 %v10208_v19  ;;  %3430 = vmatpush1.bf16.msra.mxu1 %v10210_v10  ;;  %v492_v19 = vld [vmem:[#allocation4 + $0xab8] sm:$0xff]  ;;  %v10232_v10 = vcombine.low %v479_v27, %v483_v46 }
 0x21c   :  { %3212 = vmatprep.subr.bf16.mxu0 %v10217_v63  ;;  %3431 = vmatprep.subr.bf16.mxu1 %v10219_v3  ;;  %v10234_v63 = vcombine.low %v480_v30, %v484_v47  ;;  %v10241_v3 = vcombine.high %v487_v14, %v491_v7  ;;  %v10243_v59 = vcombine.high %v488_v26, %v492_v19  ;;  %v504_v27 = vld [vmem:[#allocation4 + $0xb18] sm:$0xff] }
 0x21d   :  { %3230 = vmatprep.mubr.bf16.mxu0 %v11593_v54  ;;  %3449 = vmatprep.mubr.bf16.mxu1 %v11593_v54  ;;  %v10242_v23 = vcombine.low %v488_v26, %v492_v19  ;;  %v503_v54 = vld [vmem:[#allocation4 + $0xb10] sm:$0xff]  ;;  %v508_v46 = vld [vmem:[#allocation4 + $0xb38] sm:$0xff]  ;;  %v10250_v47 = vcombine.low %v496_v62, %v500_v39 }
 0x21e   :  { %v512_v14 = vld [vmem:[#allocation4 + $0xb58] sm:$0xff]  ;;  %v10258_v19 = vcombine.low %v504_v27, %v508_v46 }
 0x21f   :  { %3213 = vmatpush1.bf16.msra.mxu0 %v10216_v31  ;;  %3432 = vmatpush1.bf16.msra.mxu1 %v10218_v2  ;;  %v495_v31 = vld [vmem:[#allocation4 + $0xad0] sm:$0xff]  ;;  %v516_v7 = vld [vmem:[#allocation4 + $0xb78] sm:$0xff] }
 0x220   :  { %3214 = vmatprep.subr.bf16.mxu0 %v10225_v22  ;;  %3433 = vmatprep.subr.bf16.mxu1 %v10227_v11  ;;  %v499_v2 = vld [vmem:[#allocation4 + $0xaf0] sm:$0xff]  ;;  %v10251_v11 = vcombine.high %v496_v62, %v500_v39  ;;  %v10266_v39 = vcombine.low %v512_v14, %v516_v7 }
 0x221   :  { %v10249_v22 = vcombine.high %v495_v31, %v499_v2  ;;  %v10248_v30 = vcombine.low %v495_v31, %v499_v2  ;;  %v520_v31 = vld [vmem:[#allocation4 + $0xb98] sm:$0xff] }
 0x222   :  { %v524_v2 = vld [vmem:[#allocation4 + $0xbb8] sm:$0xff] }
 0x223   :  { %3215 = vmatpush1.bf16.msra.mxu0 %v10224_v15  ;;  %3434 = vmatpush1.bf16.msra.mxu1 %v10226_v38  ;;  %v507_v15 = vld [vmem:[#allocation4 + $0xb30] sm:$0xff] }
 0x224   :  { %3216 = vmatprep.subr.bf16.mxu0 %v10233_v6  ;;  %3435 = vmatprep.subr.bf16.mxu1 %v10235_v34  ;;  %v10257_v38 = vcombine.high %v503_v54, %v507_v15  ;;  %v10259_v6 = vcombine.high %v504_v27, %v508_v46  ;;  %v511_v34 = vld [vmem:[#allocation4 + $0xb50] sm:$0xff]  ;;  %v10256_v26 = vcombine.low %v503_v54, %v507_v15  ;;  %v528_v54 = vld [vmem:[#allocation4 + $0xbd8] sm:$0xff] }
 0x225   :  { %v532_v15 = vld [vmem:[#allocation4 + $0xbf8] sm:$0xff]  ;;  %v10274_v46 = vcombine.low %v520_v31, %v524_v2 }
 0x227   :  { %3217 = vmatpush1.bf16.msra.mxu0 %v10232_v10  ;;  %3436 = vmatpush1.bf16.msra.mxu1 %v10234_v63  ;;  %v515_v10 = vld [vmem:[#allocation4 + $0xb70] sm:$0xff] }
 0x228   :  { %3218 = vmatprep.subr.bf16.mxu0 %v10241_v3  ;;  %3437 = vmatprep.subr.bf16.mxu1 %v10243_v59  ;;  %v10265_v63 = vcombine.high %v511_v34, %v515_v10  ;;  %v10267_v3 = vcombine.high %v512_v14, %v516_v7  ;;  %v519_v59 = vld [vmem:[#allocation4 + $0xb90] sm:$0xff]  ;;  %v10264_v62 = vcombine.low %v511_v34, %v515_v10  ;;  %v3643_v34 = vld [vmem:[#allocation4 + $0x8] sm:$0xff] }
 0x229   :  { %v3647_v10 = vld [vmem:[#allocation4 + $0x28] sm:$0xff]  ;;  %v10282_v7 = vcombine.low %v528_v54, %v532_v15 }
 0x22b   :  { %3219 = vmatpush1.bf16.msra.mxu0 %v10240_v18  ;;  %3438 = vmatpush1.bf16.msra.mxu1 %v10242_v23  ;;  %v523_v18 = vld [vmem:[#allocation4 + $0xbb0] sm:$0xff] }
 0x22c   :  { %3220 = vmatprep.subr.bf16.mxu0 %v10249_v22  ;;  %3439 = vmatprep.subr.bf16.mxu1 %v10251_v11  ;;  %v10273_v23 = vcombine.high %v519_v59, %v523_v18  ;;  %v10275_v22 = vcombine.high %v520_v31, %v524_v2  ;;  %v527_v11 = vld [vmem:[#allocation4 + $0xbd0] sm:$0xff]  ;;  %v10272_v27 = vcombine.low %v519_v59, %v523_v18  ;;  %v3651_v59 = vld [vmem:[#allocation4 + $0x48] sm:$0xff] }
 0x22d   :  { %v3655_v18 = vld [vmem:[#allocation4 + $0x68] sm:$0xff]  ;;  %v10310_v2 = vcombine.low %v3643_v34, %v3647_v10 }
 0x22f   :  { %3221 = vmatpush1.bf16.msra.mxu0 %v10248_v30  ;;  %3440 = vmatpush1.bf16.msra.mxu1 %v10250_v47  ;;  %v531_v30 = vld [vmem:[#allocation4 + $0xbf0] sm:$0xff] }
 0x230   :  { %3222 = vmatprep.subr.bf16.mxu0 %v10257_v38  ;;  %3441 = vmatprep.subr.bf16.mxu1 %v10259_v6  ;;  %v10281_v47 = vcombine.high %v527_v11, %v531_v30  ;;  %v10283_v38 = vcombine.high %v528_v54, %v532_v15  ;;  %v3642_v6 = vld [vmem:[#allocation4] sm:$0xff]  ;;  %v10280_v14 = vcombine.low %v527_v11, %v531_v30  ;;  %v3659_v11 = vld [vmem:[#allocation4 + $0x88] sm:$0xff] }
 0x231   :  { %v3663_v30 = vld [vmem:[#allocation4 + $0xa8] sm:$0xff] }
 0x232   :  { %v11594_v54 = vld [vmem:[%s14508_s0 + $0x10] ss:$24 sps:$4 sm:$0xff]  }
 0x233   :  { %3223 = vmatpush1.bf16.msra.mxu0 %v10256_v26  ;;  %3442 = vmatpush1.bf16.msra.mxu1 %v10258_v19  ;;  %v3646_v26 = vld [vmem:[#allocation4 + $0x20] sm:$0xff] }
 0x234   :  { %3224 = vmatprep.subr.bf16.mxu0 %v10265_v63  ;;  %3443 = vmatprep.subr.bf16.mxu1 %v10267_v3  ;;  %v10309_v19 = vcombine.high %v3642_v6, %v3646_v26  ;;  %v10311_v63 = vcombine.high %v3643_v34, %v3647_v10  ;;  %v3650_v3 = vld [vmem:[#allocation4 + $0x40] sm:$0xff]  ;;  %v10308_v31 = vcombine.low %v3642_v6, %v3646_v26  ;;  %v3667_v10 = vld [vmem:[#allocation4 + $0xc8] sm:$0xff] }
 0x235   :  { %v3666_v6 = vld [vmem:[#allocation4 + $0xc0] sm:$0xff] }
 0x236   :  { %v11595_v26 = vld [vmem:[%s14508_s0 + $0x44] ss:$24 sps:$4 sm:$0xff]  }
 0x237   :  { %3225 = vmatpush1.bf16.msra.mxu0 %v10264_v62  ;;  %3444 = vmatpush1.bf16.msra.mxu1 %v10266_v39  ;;  %v3654_v62 = vld [vmem:[#allocation4 + $0x60] sm:$0xff] }
 0x238   :  { %3226 = vmatprep.subr.bf16.mxu0 %v10273_v23  ;;  %3445 = vmatprep.subr.bf16.mxu1 %v10275_v22  ;;  %v10317_v39 = vcombine.high %v3650_v3, %v3654_v62  ;;  %v10319_v23 = vcombine.high %v3651_v59, %v3655_v18  ;;  %v3658_v22 = vld [vmem:[#allocation4 + $0x80] sm:$0xff]  ;;  %v10316_v15 = vcombine.low %v3650_v3, %v3654_v62 }
 0x239   :  { %v3670_v34 = vld [vmem:[#allocation4 + $0xe0] sm:$0xff] }
 0x23a   :  { %v10333_v3 = vcombine.high %v3666_v6, %v3670_v34 }
 0x23b   :  { %3227 = vmatpush1.bf16.msra.mxu0 %v10272_v27  ;;  %3446 = vmatpush1.bf16.msra.mxu1 %v10274_v46  ;;  %v3662_v27 = vld [vmem:[#allocation4 + $0xa0] sm:$0xff]  ;;  %v10318_v46 = vcombine.low %v3651_v59, %v3655_v18 }
 0x23c   :  { %3228 = vmatprep.subr.bf16.mxu0 %v10281_v47  ;;  %3447 = vmatprep.subr.bf16.mxu1 %v10283_v38  ;;  %v10325_v47 = vcombine.high %v3658_v22, %v3662_v27  ;;  %v10327_v38 = vcombine.high %v3659_v11, %v3663_v30  ;;  %v3674_v59 = vld [vmem:[#allocation4 + $0x100] sm:$0xff] }
 0x23d   :  { %v3678_v18 = vld [vmem:[#allocation4 + $0x120] sm:$0xff] }
 0x23f   :  { %3229 = vmatpush1.bf16.msra.mxu0 %v10280_v14  ;;  %3448 = vmatpush1.bf16.msra.mxu1 %v10282_v7  ;;  %v3671_v14 = vld [vmem:[#allocation4 + $0xe8] sm:$0xff]  ;;  %v534_v7 = vlaneseq }
 0x240   :  { %6066 = vmatprep.subr.bf16.mxu0 %v10309_v19  ;;  %6285 = vmatprep.subr.bf16.mxu1 %v10311_v63  ;;  %v10324_v19 = vcombine.low %v3658_v22, %v3662_v27  ;;  %v10326_v63 = vcombine.low %v3659_v11, %v3663_v30  ;;  %v10335_v62 = vcombine.high %v3667_v10, %v3671_v14 }
 0x241   :  { %v10332_v22 = vcombine.low %v3666_v6, %v3670_v34  ;;  %v10334_v27 = vcombine.low %v3667_v10, %v3671_v14  ;;  %v10341_v11 = vcombine.high %v3674_v59, %v3678_v18  ;;  %v10340_v34 = vcombine.low %v3674_v59, %v3678_v18  ;;  %v124_v14 = vld [vmem:[#allocation6] sm:$0xff] }
 0x242   :  { %3231 = vmatmul.mubr.bf16.vlgmr.msra.gmra.mrb[16].mxu0 %v11594_v54  ;;  %3450 = vmatmul.mubr.bf16.vlgmr.msra.gmra.mrb[16].mxu1 %v11594_v54  ;;  %v3682_v54 = vld [vmem:[#allocation4 + $0x140] sm:$0xff] }
 0x243   :  { %6067 = vmatpush1.bf16.msra.mxu0 %v10308_v31  ;;  %6286 = vmatpush1.bf16.msra.mxu1 %v10310_v2  ;;  %v3675_v31 = vld [vmem:[#allocation4 + $0x108] sm:$0xff] }
 0x244   :  { %6068 = vmatprep.subr.bf16.mxu0 %v10317_v39  ;;  %6287 = vmatprep.subr.bf16.mxu1 %v10319_v23  ;;  %v3679_v2 = vld [vmem:[#allocation4 + $0x128] sm:$0xff]  ;;  %v11596_v39 = vld [vmem:[%s14508_s0 + $0x40] ss:$24 sps:$4 sm:$0xff]   ;;  %v12712_v23 = vshrl.u32 %v534_v7, 7 }
 0x245   :  { %3240 = vmatprep.mubr.bf16.mxu0 %v11595_v26  ;;  %3459 = vmatprep.mubr.bf16.mxu1 %v11595_v26  ;;  %v10343_v30 = vcombine.high %v3675_v31, %v3679_v2  ;;  %v10342_v10 = vcombine.low %v3675_v31, %v3679_v2  ;;  %v12734_v31 = vld [vmem:[#allocation4 + $0x188] sm:$0xff] }
 0x246   :  { %v536_v26 = vsub.s32 0, %v12712_v23  ;;  %v544_v7 = vsub.s32 2, %v12712_v23  ;;  %v540_v6 = vsub.s32 1, %v12712_v23  ;;  %v12736_v2 = vld [vmem:[#allocation4 + $0x1a8] sm:$0xff] }
 0x247   :  { %6069 = vmatpush1.bf16.msra.mxu0 %v10316_v15  ;;  %6288 = vmatpush1.bf16.msra.mxu1 %v10318_v46  ;;  %v11597_v15 = vld [vmem:[%s14508_s0 + $0x74] ss:$24 sps:$4 sm:$0xff]   ;;  %v3686_v46 = vld [vmem:[#allocation4 + $0x160] sm:$0xff] }
 0x248   :  { %6070 = vmatprep.subr.bf16.mxu0 %v10325_v47  ;;  %6289 = vmatprep.subr.bf16.mxu1 %v10327_v38  ;;  %v3683_v47 = vld [vmem:[#allocation4 + $0x148] sm:$0xff]  ;;  %v12730_v59 = vrot.slane %v124_v14, %v544_v7  ;;  %v12732_v18 = vrot.slane %v124_v14, %v540_v6 }
 0x249   :  { %v3687_v38 = vld [vmem:[#allocation4 + $0x168] sm:$0xff] }
 0x24a   :  { %3241 = vmatmul.mubr.bf16.gmra.mrb[20].mxu0 %v11596_v39  ;;  %3460 = vmatmul.mubr.bf16.gmra.mrb[20].mxu1 %v11596_v39  ;;  %v12723_v39 = vld [vmem:[#allocation4 + $0x1a0] sm:$0xff]  ;;  %v12746_v7 = vld [vmem:[#allocation4 + $0x1c8] sm:$0xff] }
 0x24b   :  { %6071 = vmatpush1.bf16.msra.mxu0 %v10324_v19  ;;  %6290 = vmatpush1.bf16.msra.mxu1 %v10326_v63  ;;  %v548_v19 = vsub.s32 3, %v12712_v23  ;;  %v10349_v63 = vcombine.high %v3682_v54, %v3686_v46  ;;  %v12748_v6 = vld [vmem:[#allocation4 + $0x1e8] sm:$0xff] }
 0x24c   :  { %6072 = vmatprep.subr.bf16.mxu0 %v10333_v3  ;;  %6291 = vmatprep.subr.bf16.mxu1 %v10335_v62  ;;  %v10351_v3 = vcombine.high %v3683_v47, %v3687_v38  ;;  %v12721_v62 = vld [vmem:[#allocation4 + $0x180] sm:$0xff] }
 0x24d   :  { %3250 = vmatprep.mubr.bf16.mxu0 %v11597_v15  ;;  %3469 = vmatprep.mubr.bf16.mxu1 %v11597_v15  ;;  %v11598_v15 = vld [vmem:[%s14508_s0 + $0x70] ss:$24 sps:$4 sm:$0xff]  }
 0x24f   :  { %6073 = vmatpush1.bf16.msra.mxu0 %v10332_v22  ;;  %6292 = vmatpush1.bf16.msra.mxu1 %v10334_v27  ;;  %v12728_v22 = vrot.slane %v124_v14, %v536_v26  ;;  %v12738_v27 = vrot.slane %v124_v14, %v548_v19  ;;  %v10357_v26 = vcombine.high %v12721_v62, %v12723_v39 }
 0x250   :  { %6074 = vmatprep.subr.bf16.mxu0 %v10341_v11  ;;  %6293 = vmatprep.subr.bf16.mxu1 %v10343_v30  ;;  %v10348_v11 = vcombine.low %v3682_v54, %v3686_v46  ;;  %v10350_v30 = vcombine.low %v3683_v47, %v3687_v38  ;;  %v11599_v54 = vld [vmem:[%s14508_s0 + $0xa4] ss:$24 sps:$4 sm:$0xff]   ;;  %v10356_v46 = vcombine.low %v12721_v62, %v12723_v39 }
 0x251   :  { %v10359_v47 = vcombine.high %v12734_v31, %v12736_v2 }
 0x252   :  { %3251 = vmatmul.mubr.bf16.gmra.mrb[24].mxu0 %v11598_v15  ;;  %3470 = vmatmul.mubr.bf16.gmra.mrb[24].mxu1 %v11598_v15 }
 0x253   :  { %6075 = vmatpush1.bf16.msra.mxu0 %v10340_v34  ;;  %6294 = vmatpush1.bf16.msra.mxu1 %v10342_v10 }
 0x254   :  { %6076 = vmatprep.subr.bf16.mxu0 %v10349_v63  ;;  %6295 = vmatprep.subr.bf16.mxu1 %v10351_v3  ;;  %v10358_v63 = vcombine.low %v12734_v31, %v12736_v2  ;;  %v10365_v3 = vcombine.high %v12740_v55, %v12742_v42 }
 0x255   :  { %v2794_v15 = vpop.f32.mrb[0].mxu0  ;;  %v3013_v34 = vpop.f32.mrb[0].mxu1  ;;  %3260 = vmatprep.mubr.bf16.mxu0 %v11599_v54  ;;  %3479 = vmatprep.mubr.bf16.mxu1 %v11599_v54 }
 0x256   :  { %v11038_v38 = vadd.f32 %v2794_v15, %v12728_v22  ;;  %v11054_v10 = vadd.f32 %v3013_v34, %v12730_v59  ;;  %v2796_v14 = vpop.f32.mrb[1].mxu0  ;;  %v3015_v19 = vpop.f32.mrb[1].mxu1  ;;  %v10367_v15 = vcombine.high %v12746_v7, %v12748_v6 }
 0x257   :  { %v11039_v54 = vadd.f32 %v2796_v14, %v12732_v18  ;;  %v11055_v35 = vadd.f32 %v3015_v19, %v12738_v27  ;;  %v2798_v62 = vpop.f32.mrb[2].mxu0  ;;  %v3017_v39 = vpop.f32.mrb[2].mxu1  ;;  %6077 = vmatpush1.bf16.msra.mxu0 %v10348_v11  ;;  %6296 = vmatpush1.bf16.msra.mxu1 %v10350_v30  ;;  %v12771_v11 = vld [vmem:[#allocation4 + $0x200] sm:$0xff] }
 0x258   :  { %v3490_v34 = vpack.c.bf16 %v11038_v38, %v11038_v38  ;;  %v3492_v50 = vpack.c.bf16 %v11054_v10, %v11054_v10  ;;  %v11040_v58 = vadd.f32 %v2798_v62, %v12728_v22  ;;  %v11056_v31 = vadd.f32 %v3017_v39, %v12730_v59  ;;  %v2800_v2 = vpop.f32.mrb[3].mxu0  ;;  %v3019_v51 = vpop.f32.mrb[3].mxu1  ;;  %6078 = vmatprep.subr.bf16.mxu0 %v10357_v26  ;;  %v12773_v30 = vld [vmem:[#allocation4 + $0x220] sm:$0xff]  ;;  %v12783_v26 = vld [vmem:[#allocation4 + $0x208] sm:$0xff] }
 0x259   :  { %v3491_v43 = vpack.c.bf16 %v11039_v54, %v11039_v54  ;;  %v3493_v14 = vpack.c.bf16 %v11055_v35, %v11055_v35  ;;  %v11041_v19 = vadd.f32 %v2800_v2, %v12732_v18  ;;  %v11057_v57 = vadd.f32 %v3019_v51, %v12738_v27  ;;  %6297 = vmatprep.subr.bf16.mxu1 %v10359_v47  ;;  %v11543_v38 = vld [vmem:[%s14509_s1 + $0x4] ss:$24 sps:$4 sm:$0xff]   ;;  %v11600_v35 = vld [vmem:[%s14508_s0 + $0xa0] ss:$24 sps:$4 sm:$0xff]   ;;  %v12785_v47 = vld [vmem:[#allocation4 + $0x228] sm:$0xff] }
 0x25a   :  { %3554 = vst [vmem:[#allocation2] sm:$0xf] %v3490_v34  ;;  %3556 = vst [vmem:[#allocation2 + $0x10] sm:$0xf] %v3492_v50  ;;  %v3498_v10 = vpack.c.bf16 %v11040_v58, %v11040_v58  ;;  %v3500_v62 = vpack.c.bf16 %v11056_v31, %v11056_v31  ;;  %3261 = vmatmul.mubr.bf16.gmra.mrb[28].mxu0 %v11600_v35  ;;  %3480 = vmatmul.mubr.bf16.gmra.mrb[28].mxu1 %v11600_v35  ;;  %v12789_v58 = vld [vmem:[#allocation4 + $0x240] sm:$0xff] }
 0x25b   :  { %v10364_v51 = vcombine.low %v12740_v55, %v12742_v42  ;;  %3555 = vst [vmem:[#allocation2 + $0x8] sm:$0xf] %v3491_v43  ;;  %3557 = vst [vmem:[#allocation2 + $0x18] sm:$0xf] %v3493_v14  ;;  %v3499_v54 = vpack.c.bf16 %v11041_v19, %v11041_v19  ;;  %v3501_v39 = vpack.c.bf16 %v11057_v57, %v11057_v57  ;;  %6079 = vmatpush1.bf16.msra.mxu0 %v10356_v46  ;;  %v12791_v34 = vld [vmem:[#allocation4 + $0x260] sm:$0xff]  ;;  %v12795_v43 = vld [vmem:[#allocation4 + $0x248] sm:$0xff] }
 0x25c   :  { %6298 = vmatpush1.bf16.msra.mxu1 %v10358_v63  ;;  %v10366_v50 = vcombine.low %v12746_v7, %v12748_v6  ;;  %3562 = vst [vmem:[#allocation2 + $0x40] sm:$0xf] %v3498_v10  ;;  %3564 = vst [vmem:[#allocation2 + $0x50] sm:$0xf] %v3500_v62  ;;  %6080 = vmatprep.subr.bf16.mxu0 %v10365_v3  ;;  %v10373_v42 = vcombine.high %v12771_v11, %v12773_v30  ;;  %v12797_v55 = vld [vmem:[#allocation4 + $0x268] sm:$0xff] }
 0x25d   :  { %6299 = vmatprep.subr.bf16.mxu1 %v10367_v15  ;;  %3563 = vst [vmem:[#allocation2 + $0x48] sm:$0xf] %v3499_v54  ;;  %3565 = vst [vmem:[#allocation2 + $0x58] sm:$0xf] %v3501_v39  ;;  %v2804_v57 = vpop.f32.mrb[4].mxu0  ;;  %v3023_v46 = vpop.f32.mrb[4].mxu1  ;;  %v10372_v7 = vcombine.low %v12771_v11, %v12773_v30  ;;  %v10375_v6 = vcombine.high %v12783_v26, %v12785_v47  ;;  %6098 = vmatprep.mubr.bf16.mxu0 %v11543_v38 }
 0x25e   :  { %6317 = vmatprep.mubr.bf16.mxu1 %v11543_v38  ;;  %v11042_v63 = vadd.f32 %v2804_v57, %v12728_v22  ;;  %v11058_v3 = vadd.f32 %v3023_v46, %v12730_v59  ;;  %v2806_v15 = vpop.f32.mrb[5].mxu0  ;;  %v3025_v31 = vpop.f32.mrb[5].mxu1  ;;  %v10374_v2 = vcombine.low %v12783_v26, %v12785_v47  ;;  %v10381_v14 = vcombine.high %v12789_v58, %v12791_v34 }
 0x25f   :  { %v11043_v19 = vadd.f32 %v2806_v15, %v12732_v18  ;;  %v11059_v11 = vadd.f32 %v3025_v31, %v12738_v27  ;;  %v2808_v30 = vpop.f32.mrb[6].mxu0  ;;  %v3027_v10 = vpop.f32.mrb[6].mxu1  ;;  %6081 = vmatpush1.bf16.msra.mxu0 %v10364_v51  ;;  %v10383_v38 = vcombine.high %v12795_v43, %v12797_v55  ;;  %v12817_v51 = vld [vmem:[#allocation4 + $0x280] sm:$0xff] }
 0x260   :  { %6300 = vmatpush1.bf16.msra.mxu1 %v10366_v50  ;;  %v3506_v62 = vpack.c.bf16 %v11042_v63, %v11042_v63  ;;  %v3508_v35 = vpack.c.bf16 %v11058_v3, %v11058_v3  ;;  %v11044_v54 = vadd.f32 %v2808_v30, %v12728_v22  ;;  %v11060_v26 = vadd.f32 %v3027_v10, %v12730_v59  ;;  %v2810_v47 = vpop.f32.mrb[7].mxu0  ;;  %v3029_v39 = vpop.f32.mrb[7].mxu1  ;;  %v12819_v50 = vld [vmem:[#allocation4 + $0x2a0] sm:$0xff]  ;;  %v12823_v10 = vld [vmem:[#allocation4 + $0x288] sm:$0xff] }
 0x261   :  { %6082 = vmatprep.subr.bf16.mxu0 %v10373_v42  ;;  %v3507_v57 = vpack.c.bf16 %v11043_v19, %v11043_v19  ;;  %v3509_v46 = vpack.c.bf16 %v11059_v11, %v11059_v11  ;;  %v11045_v15 = vadd.f32 %v2810_v47, %v12732_v18  ;;  %v11061_v31 = vadd.f32 %v3029_v39, %v12738_v27  ;;  %v3727_v42 = vld [vmem:[#allocation4 + $0x2a8] sm:$0xff]  ;;  %v12827_v47 = vld [vmem:[#allocation4 + $0x2c0] sm:$0xff] }
 0x262   :  { %6301 = vmatprep.subr.bf16.mxu1 %v10375_v6  ;;  %3570 = vst [vmem:[#allocation2 + $0x80] sm:$0xf] %v3506_v62  ;;  %3572 = vst [vmem:[#allocation2 + $0x90] sm:$0xf] %v3508_v35  ;;  %v3514_v63 = vpack.c.bf16 %v11044_v54, %v11044_v54  ;;  %v3516_v3 = vpack.c.bf16 %v11060_v26, %v11060_v26  ;;  %v10380_v30 = vcombine.low %v12789_v58, %v12791_v34  ;;  %v12829_v62 = vld [vmem:[#allocation4 + $0x2e0] sm:$0xff]  ;;  %v12833_v34 = vld [vmem:[#allocation4 + $0x2c8] sm:$0xff] }
 0x263   :  { %3571 = vst [vmem:[#allocation2 + $0x88] sm:$0xf] %v3507_v57  ;;  %3573 = vst [vmem:[#allocation2 + $0x98] sm:$0xf] %v3509_v46  ;;  %v3515_v19 = vpack.c.bf16 %v11045_v15, %v11045_v15  ;;  %v3517_v11 = vpack.c.bf16 %v11061_v31, %v11061_v31  ;;  %6083 = vmatpush1.bf16.msra.mxu0 %v10372_v7  ;;  %v10382_v6 = vcombine.low %v12795_v43, %v12797_v55  ;;  %v12835_v35 = vld [vmem:[#allocation4 + $0x2e8] sm:$0xff] }
 0x264   :  { %6302 = vmatpush1.bf16.msra.mxu1 %v10374_v2  ;;  %3578 = vst [vmem:[#allocation2 + $0xc0] sm:$0xf] %v3514_v63  ;;  %3580 = vst [vmem:[#allocation2 + $0xd0] sm:$0xf] %v3516_v3  ;;  %6084 = vmatprep.subr.bf16.mxu0 %v10381_v14  ;;  %v10389_v58 = vcombine.high %v12817_v51, %v12819_v50  ;;  %v10388_v43 = vcombine.low %v12817_v51, %v12819_v50 }
 0x265   :  { %6303 = vmatprep.subr.bf16.mxu1 %v10383_v38  ;;  %3579 = vst [vmem:[#allocation2 + $0xc8] sm:$0xf] %v3515_v19  ;;  %3581 = vst [vmem:[#allocation2 + $0xd8] sm:$0xf] %v3517_v11  ;;  %v2814_v7 = vpop.f32.mrb[8].mxu0  ;;  %v3033_v2 = vpop.f32.mrb[8].mxu1  ;;  %v10391_v55 = vcombine.high %v12823_v10, %v3727_v42  ;;  %v10390_v39 = vcombine.low %v12823_v10, %v3727_v42  ;;  %v10397_v57 = vcombine.high %v12827_v47, %v12829_v62 }
 0x266   :  { %v11046_v54 = vadd.f32 %v2814_v7, %v12728_v22  ;;  %v11062_v14 = vadd.f32 %v3033_v2, %v12730_v59  ;;  %v2816_v38 = vpop.f32.mrb[9].mxu0  ;;  %v3035_v26 = vpop.f32.mrb[9].mxu1  ;;  %v10399_v51 = vcombine.high %v12833_v34, %v12835_v35 }
 0x267   :  { %v11047_v46 = vadd.f32 %v2816_v38, %v12732_v18  ;;  %v11063_v15 = vadd.f32 %v3035_v26, %v12738_v27  ;;  %v2818_v31 = vpop.f32.mrb[10].mxu0  ;;  %v3037_v63 = vpop.f32.mrb[10].mxu1  ;;  %6085 = vmatpush1.bf16.msra.mxu0 %v10380_v30  ;;  %v12853_v30 = vld [vmem:[#allocation4 + $0x300] sm:$0xff] }
 0x268   :  { %6304 = vmatpush1.bf16.msra.mxu1 %v10382_v6  ;;  %v3522_v50 = vpack.c.bf16 %v11046_v54, %v11046_v54  ;;  %v3524_v3 = vpack.c.bf16 %v11062_v14, %v11062_v14  ;;  %v11048_v19 = vadd.f32 %v2818_v31, %v12728_v22  ;;  %v11064_v10 = vadd.f32 %v3037_v63, %v12730_v59  ;;  %v2820_v42 = vpop.f32.mrb[11].mxu0  ;;  %v3039_v11 = vpop.f32.mrb[11].mxu1  ;;  %v12855_v6 = vld [vmem:[#allocation4 + $0x320] sm:$0xff]  ;;  %v12859_v63 = vld [vmem:[#allocation4 + $0x308] sm:$0xff] }
 0x269   :  { %6086 = vmatprep.subr.bf16.mxu0 %v10389_v58  ;;  %v3523_v7 = vpack.c.bf16 %v11047_v46, %v11047_v46  ;;  %v3525_v2 = vpack.c.bf16 %v11063_v15, %v11063_v15  ;;  %v11049_v38 = vadd.f32 %v2820_v42, %v12732_v18  ;;  %v11065_v26 = vadd.f32 %v3039_v11, %v12738_v27  ;;  %v3743_v58 = vld [vmem:[#allocation4 + $0x328] sm:$0xff]  ;;  %v12863_v42 = vld [vmem:[#allocation4 + $0x340] sm:$0xff] }
 0x26a   :  { %6305 = vmatprep.subr.bf16.mxu1 %v10391_v55  ;;  %3586 = vst [vmem:[#allocation2 + $0x100] sm:$0xf] %v3522_v50  ;;  %3588 = vst [vmem:[#allocation2 + $0x110] sm:$0xf] %v3524_v3  ;;  %v3530_v54 = vpack.c.bf16 %v11048_v19, %v11048_v19  ;;  %v3532_v14 = vpack.c.bf16 %v11064_v10, %v11064_v10  ;;  %v10396_v31 = vcombine.low %v12827_v47, %v12829_v62  ;;  %v12865_v50 = vld [vmem:[#allocation4 + $0x360] sm:$0xff]  ;;  %v3747_v62 = vld [vmem:[#allocation4 + $0x348] sm:$0xff] }
 0x26b   :  { %3587 = vst [vmem:[#allocation2 + $0x108] sm:$0xf] %v3523_v7  ;;  %3589 = vst [vmem:[#allocation2 + $0x118] sm:$0xf] %v3525_v2  ;;  %v3531_v46 = vpack.c.bf16 %v11049_v38, %v11049_v38  ;;  %v3533_v15 = vpack.c.bf16 %v11065_v26, %v11065_v26  ;;  %6087 = vmatpush1.bf16.msra.mxu0 %v10388_v43  ;;  %v10398_v55 = vcombine.low %v12833_v34, %v12835_v35  ;;  %v3751_v3 = vld [vmem:[#allocation4 + $0x368] sm:$0xff] }
 0x26c   :  { %6306 = vmatpush1.bf16.msra.mxu1 %v10390_v39  ;;  %3594 = vst [vmem:[#allocation2 + $0x140] sm:$0xf] %v3530_v54  ;;  %3596 = vst [vmem:[#allocation2 + $0x150] sm:$0xf] %v3532_v14  ;;  %6088 = vmatprep.subr.bf16.mxu0 %v10397_v57  ;;  %v10405_v47 = vcombine.high %v12853_v30, %v12855_v6  ;;  %v10404_v34 = vcombine.low %v12853_v30, %v12855_v6 }
 0x26d   :  { %6307 = vmatprep.subr.bf16.mxu1 %v10399_v51  ;;  %3595 = vst [vmem:[#allocation2 + $0x148] sm:$0xf] %v3531_v46  ;;  %3597 = vst [vmem:[#allocation2 + $0x158] sm:$0xf] %v3533_v15  ;;  %v2824_v43 = vpop.f32.mrb[12].mxu0  ;;  %v3043_v39 = vpop.f32.mrb[12].mxu1  ;;  %v10407_v35 = vcombine.high %v12859_v63, %v3743_v58  ;;  %v10406_v11 = vcombine.low %v12859_v63, %v3743_v58  ;;  %v10413_v7 = vcombine.high %v12863_v42, %v12865_v50 }
 0x26e   :  { %v11050_v19 = vadd.f32 %v2824_v43, %v12728_v22  ;;  %v11066_v10 = vadd.f32 %v3043_v39, %v12730_v59  ;;  %v2826_v57 = vpop.f32.mrb[13].mxu0  ;;  %v3045_v51 = vpop.f32.mrb[13].mxu1  ;;  %v10415_v30 = vcombine.high %v3747_v62, %v3751_v3  ;;  %v3754_v58 = vld [vmem:[#allocation4 + $0x380] sm:$0xff] }
 0x26f   :  { %v11051_v2 = vadd.f32 %v2826_v57, %v12732_v18  ;;  %v11067_v38 = vadd.f32 %v3045_v51, %v12738_v27  ;;  %v2828_v26 = vpop.f32.mrb[14].mxu0  ;;  %v3047_v54 = vpop.f32.mrb[14].mxu1  ;;  %6089 = vmatpush1.bf16.msra.mxu0 %v10396_v31  ;;  %v3758_v31 = vld [vmem:[#allocation4 + $0x3a0] sm:$0xff] }
 0x270   :  { %6308 = vmatpush1.bf16.msra.mxu1 %v10398_v55  ;;  %v3538_v6 = vpack.c.bf16 %v11050_v19, %v11050_v19  ;;  %v3540_v14 = vpack.c.bf16 %v11066_v10, %v11066_v10  ;;  %v11052_v46 = vadd.f32 %v2828_v26, %v12728_v22  ;;  %v11068_v15 = vadd.f32 %v3047_v54, %v12730_v59  ;;  %v2830_v43 = vpop.f32.mrb[15].mxu0  ;;  %v3049_v63 = vpop.f32.mrb[15].mxu1  ;;  %v3755_v55 = vld [vmem:[#allocation4 + $0x388] sm:$0xff] }
 0x271   :  { %6090 = vmatprep.subr.bf16.mxu0 %v10405_v47  ;;  %v3539_v39 = vpack.c.bf16 %v11051_v2, %v11051_v2  ;;  %v3541_v61 = vpack.c.bf16 %v11067_v38, %v11067_v38  ;;  %v11053_v57 = vadd.f32 %v2830_v43, %v12732_v18  ;;  %v11069_v51 = vadd.f32 %v3049_v63, %v12738_v27 }
 0x272   :  { %6309 = vmatprep.subr.bf16.mxu1 %v10407_v35  ;;  %3602 = vst [vmem:[#allocation2 + $0x180] sm:$0xf] %v3538_v6  ;;  %3604 = vst [vmem:[#allocation2 + $0x190] sm:$0xf] %v3540_v14  ;;  %v3546_v19 = vpack.c.bf16 %v11052_v46, %v11052_v46  ;;  %v3548_v10 = vpack.c.bf16 %v11068_v15, %v11068_v15  ;;  %v10412_v26 = vcombine.low %v12863_v42, %v12865_v50  ;;  %v3762_v6 = vld [vmem:[#allocation4 + $0x3c0] sm:$0xff]  ;;  %v3763_v46 = vld [vmem:[#allocation4 + $0x3c8] sm:$0xff] }
 0x273   :  { %3603 = vst [vmem:[#allocation2 + $0x188] sm:$0xf] %v3539_v39  ;;  %3605 = vst [vmem:[#allocation2 + $0x198] sm:$0xf] %v3541_v61  ;;  %v3547_v47 = vpack.c.bf16 %v11053_v57, %v11053_v57  ;;  %v3549_v2 = vpack.c.bf16 %v11069_v51, %v11069_v51  ;;  %6091 = vmatpush1.bf16.msra.mxu0 %v10404_v34  ;;  %v10414_v38 = vcombine.low %v3747_v62, %v3751_v3  ;;  %v3766_v14 = vld [vmem:[#allocation4 + $0x3e0] sm:$0xff]  ;;  %v3767_v15 = vld [vmem:[#allocation4 + $0x3e8] sm:$0xff] }
 0x274   :  { %6310 = vmatpush1.bf16.msra.mxu1 %v10406_v11  ;;  %3610 = vst [vmem:[#allocation2 + $0x1c0] sm:$0xf] %v3546_v19  ;;  %3612 = vst [vmem:[#allocation2 + $0x1d0] sm:$0xf] %v3548_v10  ;;  %6092 = vmatprep.subr.bf16.mxu0 %v10413_v7  ;;  %v10421_v35 = vcombine.high %v3754_v58, %v3758_v31  ;;  %v10423_v54 = vcombine.high %v3755_v55, %v3759_v56  ;;  %v3770_v3 = vld [vmem:[#allocation4 + $0x400] sm:$0xff]  ;;  %v3771_v11 = vld [vmem:[#allocation4 + $0x408] sm:$0xff] }
 0x275   :  { %6311 = vmatprep.subr.bf16.mxu1 %v10415_v30  ;;  %3611 = vst [vmem:[#allocation2 + $0x1c8] sm:$0xf] %v3547_v47  ;;  %3613 = vst [vmem:[#allocation2 + $0x1d8] sm:$0xf] %v3549_v2  ;;  %v10420_v61 = vcombine.low %v3754_v58, %v3758_v31  ;;  %v10422_v42 = vcombine.low %v3755_v55, %v3759_v56  ;;  %v10429_v50 = vcombine.high %v3762_v6, %v3766_v14  ;;  %v3774_v34 = vld [vmem:[#allocation4 + $0x420] sm:$0xff]  ;;  %v3775_v7 = vld [vmem:[#allocation4 + $0x428] sm:$0xff] }
 0x276   :  { %v10431_v62 = vcombine.high %v3763_v46, %v3767_v15  ;;  %v10428_v30 = vcombine.low %v3762_v6, %v3766_v14  ;;  %v10430_v43 = vcombine.low %v3763_v46, %v3767_v15  ;;  %v10437_v63 = vcombine.high %v3770_v3, %v3774_v34  ;;  %v3778_v57 = vld [vmem:[#allocation4 + $0x440] sm:$0xff]  ;;  %v3779_v58 = vld [vmem:[#allocation4 + $0x448] sm:$0xff] }
 0x277   :  { %6093 = vmatpush1.bf16.msra.mxu0 %v10412_v26  ;;  %v10439_v39 = vcombine.high %v3771_v11, %v3775_v7  ;;  %v3782_v51 = vld [vmem:[#allocation4 + $0x460] sm:$0xff]  ;;  %v3783_v56 = vld [vmem:[#allocation4 + $0x468] sm:$0xff]  ;;  %v10436_v55 = vcombine.low %v3770_v3, %v3774_v34  ;;  %v10438_v19 = vcombine.low %v3771_v11, %v3775_v7 }
 0x278   :  { %6312 = vmatpush1.bf16.msra.mxu1 %v10414_v38  ;;  %6094 = vmatprep.subr.bf16.mxu0 %v10421_v35  ;;  %v11541_v31 = vld [vmem:[%s14509_s1] ss:$24 sps:$4 sm:$0xff]   ;;  %v10445_v10 = vcombine.high %v3778_v57, %v3782_v51  ;;  %v10447_v26 = vcombine.high %v3779_v58, %v3783_v56  ;;  %v3787_v38 = vld [vmem:[#allocation4 + $0x488] sm:$0xff]  ;;  %v10444_v6 = vcombine.low %v3778_v57, %v3782_v51  ;;  %v11547_v51 = vld [vmem:[%s14509_s1 + $0x64] ss:$24 sps:$4 sm:$0xff]  }
 0x279   :  { %6313 = vmatprep.subr.bf16.mxu1 %v10423_v54  ;;  %v3786_v47 = vld [vmem:[#allocation4 + $0x480] sm:$0xff]  ;;  %v3791_v35 = vld [vmem:[#allocation4 + $0x4a8] sm:$0xff]  ;;  %v10446_v14 = vcombine.low %v3779_v58, %v3783_v56 }
 0x27a   :  { %v3790_v2 = vld [vmem:[#allocation4 + $0x4a0] sm:$0xff]  ;;  %v11544_v54 = vld [vmem:[%s14509_s1 + $0x34] ss:$24 sps:$4 sm:$0xff]   ;;  %v10455_v15 = vcombine.high %v3787_v38, %v3791_v35  ;;  %v11546_v3 = vld [vmem:[%s14509_s1 + $0x30] ss:$24 sps:$4 sm:$0xff]   ;;  %v10454_v11 = vcombine.low %v3787_v38, %v3791_v35 }
 0x27b   :  { %6095 = vmatpush1.bf16.msra.mxu0 %v10420_v61  ;;  %v10453_v46 = vcombine.high %v3786_v47, %v3790_v2  ;;  %v3794_v61 = vld [vmem:[#allocation4 + $0x4c0] sm:$0xff]  ;;  %v10452_v34 = vcombine.low %v3786_v47, %v3790_v2  ;;  %v3807_v57 = vld [vmem:[#allocation4 + $0x528] sm:$0xff] }
 0x27c   :  { %6314 = vmatpush1.bf16.msra.mxu1 %v10422_v42  ;;  %6096 = vmatprep.subr.bf16.mxu0 %v10429_v50  ;;  %v3798_v42 = vld [vmem:[#allocation4 + $0x4e0] sm:$0xff]  ;;  %v3795_v50 = vld [vmem:[#allocation4 + $0x4c8] sm:$0xff] }
 0x27d   :  { %6315 = vmatprep.subr.bf16.mxu1 %v10431_v62  ;;  %v3799_v62 = vld [vmem:[#allocation4 + $0x4e8] sm:$0xff]  ;;  %v10461_v7 = vcombine.high %v3794_v61, %v3798_v42  ;;  %v10460_v58 = vcombine.low %v3794_v61, %v3798_v42  ;;  %v11549_v2 = vld [vmem:[%s14509_s1 + $0x60] ss:$24 sps:$4 sm:$0xff]  }
 0x27e   :  { %v10462_v56 = vcombine.low %v3795_v50, %v3799_v62  ;;  %v3815_v47 = vld [vmem:[#allocation4 + $0x568] sm:$0xff] }
 0x27f   :  { %6097 = vmatpush1.bf16.msra.mxu0 %v10428_v30  ;;  %v10463_v30 = vcombine.high %v3795_v50, %v3799_v62  ;;  %v3823_v61 = vld [vmem:[#allocation4 + $0x5a8] sm:$0xff] }
 0x280   :  { %6316 = vmatpush1.bf16.msra.mxu1 %v10430_v43  ;;  %6139 = vmatprep.subr.bf16.mxu0 %v10437_v63  ;;  %v3802_v43 = vld [vmem:[#allocation4 + $0x500] sm:$0xff]  ;;  %v11550_v42 = vld [vmem:[%s14509_s1 + $0x94] ss:$24 sps:$4 sm:$0xff]  }
 0x281   :  { %6358 = vmatprep.subr.bf16.mxu1 %v10439_v39  ;;  %v3806_v63 = vld [vmem:[#allocation4 + $0x520] sm:$0xff]  ;;  %v3803_v39 = vld [vmem:[#allocation4 + $0x508] sm:$0xff] }
 0x282   :  { %6099 = vmatmul.mubr.bf16.vlgmr.msra.gmra.mrb[32].mxu0 %v11541_v31  ;;  %v10468_v38 = vcombine.low %v3802_v43, %v3806_v63  ;;  %v10470_v35 = vcombine.low %v3803_v39, %v3807_v57 }
 0x283   :  { %6318 = vmatmul.mubr.bf16.vlgmr.msra.gmra.mrb[32].mxu1 %v11541_v31  ;;  %6140 = vmatpush1.bf16.msra.mxu0 %v10436_v55  ;;  %v10469_v31 = vcombine.high %v3802_v43, %v3806_v63  ;;  %v10471_v55 = vcombine.high %v3803_v39, %v3807_v57  ;;  %v3831_v43 = vld [vmem:[#allocation4 + $0x5e8] sm:$0xff] }
 0x284   :  { %6359 = vmatpush1.bf16.msra.mxu1 %v10438_v19  ;;  %6141 = vmatprep.subr.bf16.mxu0 %v10445_v10  ;;  %v3810_v19 = vld [vmem:[#allocation4 + $0x540] sm:$0xff]  ;;  %v11552_v63 = vld [vmem:[%s14509_s1 + $0x90] ss:$24 sps:$4 sm:$0xff]  }
 0x285   :  { %6360 = vmatprep.subr.bf16.mxu1 %v10447_v26  ;;  %6108 = vmatprep.mubr.bf16.mxu0 %v11544_v54  ;;  %v3814_v10 = vld [vmem:[#allocation4 + $0x560] sm:$0xff]  ;;  %v3811_v26 = vld [vmem:[#allocation4 + $0x548] sm:$0xff] }
 0x286   :  { %6327 = vmatprep.mubr.bf16.mxu1 %v11544_v54  ;;  %v10477_v54 = vcombine.high %v3810_v19, %v3814_v10  ;;  %v10476_v50 = vcombine.low %v3810_v19, %v3814_v10  ;;  %v10478_v62 = vcombine.low %v3811_v26, %v3815_v47  ;;  %v3839_v19 = vld [vmem:[#allocation4 + $0x628] sm:$0xff] }
 0x287   :  { %6142 = vmatpush1.bf16.msra.mxu0 %v10444_v6  ;;  %v10479_v6 = vcombine.high %v3811_v26, %v3815_v47  ;;  %v11555_v10 = vld [vmem:[%s14509_s1 + $0xc] ss:$24 sps:$4 sm:$0xff]  }
 0x288   :  { %6361 = vmatpush1.bf16.msra.mxu1 %v10446_v14  ;;  %6143 = vmatprep.subr.bf16.mxu0 %v10453_v46  ;;  %v3818_v14 = vld [vmem:[#allocation4 + $0x580] sm:$0xff] }
 0x289   :  { %6362 = vmatprep.subr.bf16.mxu1 %v10455_v15  ;;  %v3822_v46 = vld [vmem:[#allocation4 + $0x5a0] sm:$0xff]  ;;  %v3819_v15 = vld [vmem:[#allocation4 + $0x588] sm:$0xff] }
 0x28a   :  { %6109 = vmatmul.mubr.bf16.gmra.mrb[36].mxu0 %v11546_v3  ;;  %v10484_v39 = vcombine.low %v3818_v14, %v3822_v46  ;;  %v10486_v57 = vcombine.low %v3819_v15, %v3823_v61 }
 0x28b   :  { %6328 = vmatmul.mubr.bf16.gmra.mrb[36].mxu1 %v11546_v3  ;;  %6144 = vmatpush1.bf16.msra.mxu0 %v10452_v34  ;;  %v10485_v3 = vcombine.high %v3818_v14, %v3822_v46  ;;  %v10487_v34 = vcombine.high %v3819_v15, %v3823_v61  ;;  %v3847_v14 = vld [vmem:[#allocation4 + $0x668] sm:$0xff] }
 0x28c   :  { %6363 = vmatpush1.bf16.msra.mxu1 %v10454_v11  ;;  %6145 = vmatprep.subr.bf16.mxu0 %v10461_v7  ;;  %v3826_v11 = vld [vmem:[#allocation4 + $0x5c0] sm:$0xff] }
 0x28d   :  { %6364 = vmatprep.subr.bf16.mxu1 %v10463_v30  ;;  %6118 = vmatprep.mubr.bf16.mxu0 %v11547_v51  ;;  %v3830_v7 = vld [vmem:[#allocation4 + $0x5e0] sm:$0xff]  ;;  %v3827_v30 = vld [vmem:[#allocation4 + $0x5c8] sm:$0xff] }
 0x28e   :  { %6337 = vmatprep.mubr.bf16.mxu1 %v11547_v51  ;;  %v10493_v51 = vcombine.high %v3826_v11, %v3830_v7  ;;  %v10492_v26 = vcombine.low %v3826_v11, %v3830_v7  ;;  %v10494_v47 = vcombine.low %v3827_v30, %v3831_v43 }
 0x28f   :  { %6146 = vmatpush1.bf16.msra.mxu0 %v10460_v58  ;;  %v10495_v58 = vcombine.high %v3827_v30, %v3831_v43 }
 0x290   :  { %6365 = vmatpush1.bf16.msra.mxu1 %v10462_v56  ;;  %6147 = vmatprep.subr.bf16.mxu0 %v10469_v31  ;;  %v3834_v56 = vld [vmem:[#allocation4 + $0x600] sm:$0xff] }
 0x291   :  { %6366 = vmatprep.subr.bf16.mxu1 %v10471_v55  ;;  %v3838_v31 = vld [vmem:[#allocation4 + $0x620] sm:$0xff]  ;;  %v3835_v55 = vld [vmem:[#allocation4 + $0x608] sm:$0xff] }
 0x292   :  { %6119 = vmatmul.mubr.bf16.gmra.mrb[40].mxu0 %v11549_v2  ;;  %v10500_v46 = vcombine.low %v3834_v56, %v3838_v31  ;;  %v10502_v15 = vcombine.low %v3835_v55, %v3839_v19 }
 0x293   :  { %6338 = vmatmul.mubr.bf16.gmra.mrb[40].mxu1 %v11549_v2  ;;  %6148 = vmatpush1.bf16.msra.mxu0 %v10468_v38  ;;  %v10501_v2 = vcombine.high %v3834_v56, %v3838_v31  ;;  %v10503_v38 = vcombine.high %v3835_v55, %v3839_v19  ;;  %v3866_v19 = vld [vmem:[#allocation4 + $0x700] sm:$0xff] }
 0x294   :  { %6367 = vmatpush1.bf16.msra.mxu1 %v10470_v35  ;;  %6149 = vmatprep.subr.bf16.mxu0 %v10477_v54  ;;  %v3842_v35 = vld [vmem:[#allocation4 + $0x640] sm:$0xff] }
 0x295   :  { %6368 = vmatprep.subr.bf16.mxu1 %v10479_v6  ;;  %6128 = vmatprep.mubr.bf16.mxu0 %v11550_v42  ;;  %v3846_v54 = vld [vmem:[#allocation4 + $0x660] sm:$0xff]  ;;  %v3843_v6 = vld [vmem:[#allocation4 + $0x648] sm:$0xff] }
 0x296   :  { %6347 = vmatprep.mubr.bf16.mxu1 %v11550_v42  ;;  %v10509_v61 = vcombine.high %v3842_v35, %v3846_v54  ;;  %v10511_v42 = vcombine.high %v3843_v6, %v3847_v14  ;;  %v10508_v11 = vcombine.low %v3842_v35, %v3846_v54  ;;  %v10510_v7 = vcombine.low %v3843_v6, %v3847_v14  ;;  %v3874_v6 = vld [vmem:[#allocation4 + $0x740] sm:$0xff] }
 0x297   :  { %6150 = vmatpush1.bf16.msra.mxu0 %v10476_v50  ;;  %v3850_v50 = vld [vmem:[#allocation4 + $0x680] sm:$0xff] }
 0x298   :  { %6369 = vmatpush1.bf16.msra.mxu1 %v10478_v62  ;;  %6151 = vmatprep.subr.bf16.mxu0 %v10485_v3  ;;  %v3854_v62 = vld [vmem:[#allocation4 + $0x6a0] sm:$0xff]  ;;  %v3851_v3 = vld [vmem:[#allocation4 + $0x688] sm:$0xff] }
 0x299   :  { %6370 = vmatprep.subr.bf16.mxu1 %v10487_v34  ;;  %v3855_v34 = vld [vmem:[#allocation4 + $0x6a8] sm:$0xff]  ;;  %v10517_v30 = vcombine.high %v3850_v50, %v3854_v62  ;;  %v3878_v14 = vld [vmem:[#allocation4 + $0x760] sm:$0xff] }
 0x29a   :  { %6129 = vmatmul.mubr.bf16.gmra.mrb[44].mxu0 %v11552_v63  ;;  %v10519_v43 = vcombine.high %v3851_v3, %v3855_v34  ;;  %v10518_v56 = vcombine.low %v3851_v3, %v3855_v34  ;;  %v3882_v3 = vld [vmem:[#allocation4 + $0x780] sm:$0xff] }
 0x29b   :  { %6348 = vmatmul.mubr.bf16.gmra.mrb[44].mxu1 %v11552_v63  ;;  %6152 = vmatpush1.bf16.msra.mxu0 %v10484_v39  ;;  %v3858_v63 = vld [vmem:[#allocation4 + $0x6c0] sm:$0xff] }
 0x29c   :  { %6371 = vmatpush1.bf16.msra.mxu1 %v10486_v57  ;;  %6153 = vmatprep.subr.bf16.mxu0 %v10493_v51  ;;  %v3862_v39 = vld [vmem:[#allocation4 + $0x6e0] sm:$0xff]  ;;  %v3859_v57 = vld [vmem:[#allocation4 + $0x6c8] sm:$0xff] }
 0x29d   :  { %6372 = vmatprep.subr.bf16.mxu1 %v10495_v58  ;;  %6171 = vmatprep.mubr.bf16.mxu0 %v11555_v10  ;;  %v3863_v51 = vld [vmem:[#allocation4 + $0x6e8] sm:$0xff]  ;;  %v10516_v58 = vcombine.low %v3850_v50, %v3854_v62  ;;  %v10525_v31 = vcombine.high %v3858_v63, %v3862_v39  ;;  %v10541_v50 = vcombine.high %v3874_v6, %v3878_v14  ;;  %v3886_v34 = vld [vmem:[#allocation4 + $0x7a0] sm:$0xff] }
 0x29e   :  { %6390 = vmatprep.mubr.bf16.mxu1 %v11555_v10  ;;  %v10527_v55 = vcombine.high %v3859_v57, %v3863_v51  ;;  %v3870_v10 = vld [vmem:[#allocation4 + $0x720] sm:$0xff] }
 0x29f   :  { %6154 = vmatpush1.bf16.msra.mxu0 %v10492_v26  ;;  %v3867_v26 = vld [vmem:[#allocation4 + $0x708] sm:$0xff]  ;;  %v10533_v35 = vcombine.high %v3866_v19, %v3870_v10 }
 0x2a0   :  { %6373 = vmatpush1.bf16.msra.mxu1 %v10494_v47  ;;  %6155 = vmatprep.subr.bf16.mxu0 %v10501_v2  ;;  %v3871_v47 = vld [vmem:[#allocation4 + $0x728] sm:$0xff]  ;;  %v10524_v2 = vcombine.low %v3858_v63, %v3862_v39  ;;  %v10549_v63 = vcombine.high %v3882_v3, %v3886_v34 }
 0x2a1   :  { %6374 = vmatprep.subr.bf16.mxu1 %v10503_v38  ;;  %v10526_v38 = vcombine.low %v3859_v57, %v3863_v51  ;;  %v10535_v54 = vcombine.high %v3867_v26, %v3871_v47  ;;  %v3890_v57 = vld [vmem:[#allocation4 + $0x7c0] sm:$0xff] }
 0x2a2   :  { %v3894_v51 = vld [vmem:[#allocation4 + $0x7e0] sm:$0xff] }
 0x2a3   :  { %6156 = vmatpush1.bf16.msra.mxu0 %v10500_v46  ;;  %v3875_v46 = vld [vmem:[#allocation4 + $0x748] sm:$0xff] }
 0x2a4   :  { %6375 = vmatpush1.bf16.msra.mxu1 %v10502_v15  ;;  %6157 = vmatprep.subr.bf16.mxu0 %v10509_v61  ;;  %v3879_v15 = vld [vmem:[#allocation4 + $0x768] sm:$0xff]  ;;  %v10532_v61 = vcombine.low %v3866_v19, %v3870_v10  ;;  %v10557_v19 = vcombine.high %v3890_v57, %v3894_v51 }
 0x2a5   :  { %6376 = vmatprep.subr.bf16.mxu1 %v10511_v42  ;;  %v10534_v42 = vcombine.low %v3867_v26, %v3871_v47  ;;  %v10543_v62 = vcombine.high %v3875_v46, %v3879_v15  ;;  %v3898_v26 = vld [vmem:[#allocation4 + $0x800] sm:$0xff] }
 0x2a6   :  { %v3902_v47 = vld [vmem:[#allocation4 + $0x820] sm:$0xff] }
 0x2a7   :  { %6158 = vmatpush1.bf16.msra.mxu0 %v10508_v11  ;;  %v3883_v11 = vld [vmem:[#allocation4 + $0x788] sm:$0xff] }
 0x2a8   :  { %6377 = vmatpush1.bf16.msra.mxu1 %v10510_v7  ;;  %6159 = vmatprep.subr.bf16.mxu0 %v10517_v30  ;;  %v3887_v7 = vld [vmem:[#allocation4 + $0x7a8] sm:$0xff]  ;;  %v10540_v30 = vcombine.low %v3874_v6, %v3878_v14  ;;  %v10565_v6 = vcombine.high %v3898_v26, %v3902_v47 }
 0x2a9   :  { %6378 = vmatprep.subr.bf16.mxu1 %v10519_v43  ;;  %v10542_v43 = vcombine.low %v3875_v46, %v3879_v15  ;;  %v10551_v39 = vcombine.high %v3883_v11, %v3887_v7  ;;  %v3906_v46 = vld [vmem:[#allocation4 + $0x840] sm:$0xff] }
 0x2aa   :  { %v3910_v15 = vld [vmem:[#allocation4 + $0x860] sm:$0xff] }
 0x2ab   :  { %6160 = vmatpush1.bf16.msra.mxu0 %v10516_v58  ;;  %v3891_v58 = vld [vmem:[#allocation4 + $0x7c8] sm:$0xff] }
 0x2ac   :  { %6379 = vmatpush1.bf16.msra.mxu1 %v10518_v56  ;;  %6161 = vmatprep.subr.bf16.mxu0 %v10525_v31  ;;  %v3895_v56 = vld [vmem:[#allocation4 + $0x7e8] sm:$0xff]  ;;  %v10548_v31 = vcombine.low %v3882_v3, %v3886_v34  ;;  %v10573_v34 = vcombine.high %v3906_v46, %v3910_v15 }
 0x2ad   :  { %6380 = vmatprep.subr.bf16.mxu1 %v10527_v55  ;;  %v10550_v55 = vcombine.low %v3883_v11, %v3887_v7  ;;  %v10559_v10 = vcombine.high %v3891_v58, %v3895_v56  ;;  %v3914_v7 = vld [vmem:[#allocation4 + $0x880] sm:$0xff] }
 0x2af   :  { %6162 = vmatpush1.bf16.msra.mxu0 %v10524_v2  ;;  %v3899_v2 = vld [vmem:[#allocation4 + $0x808] sm:$0xff] }
 0x2b0   :  { %6381 = vmatpush1.bf16.msra.mxu1 %v10526_v38  ;;  %6163 = vmatprep.subr.bf16.mxu0 %v10533_v35  ;;  %v3903_v38 = vld [vmem:[#allocation4 + $0x828] sm:$0xff]  ;;  %v10556_v35 = vcombine.low %v3890_v57, %v3894_v51  ;;  %v10572_v57 = vcombine.low %v3906_v46, %v3910_v15 }
 0x2b1   :  { %6382 = vmatprep.subr.bf16.mxu1 %v10535_v54  ;;  %v10558_v54 = vcombine.low %v3891_v58, %v3895_v56  ;;  %v10567_v14 = vcombine.high %v3899_v2, %v3903_v38  ;;  %v10566_v3 = vcombine.low %v3899_v2, %v3903_v38  ;;  %v3935_v46 = vld [vmem:[#allocation4 + $0x928] sm:$0xff] }
 0x2b2   :  { %v11559_v15 = vld [vmem:[%s14509_s1 + $0x6c] ss:$24 sps:$4 sm:$0xff]  }
 0x2b3   :  { %6164 = vmatpush1.bf16.msra.mxu0 %v10532_v61  ;;  %v3907_v61 = vld [vmem:[#allocation4 + $0x848] sm:$0xff] }
 0x2b4   :  { %6383 = vmatpush1.bf16.msra.mxu1 %v10534_v42  ;;  %6165 = vmatprep.subr.bf16.mxu0 %v10541_v50  ;;  %v3911_v42 = vld [vmem:[#allocation4 + $0x868] sm:$0xff] }
 0x2b5   :  { %6384 = vmatprep.subr.bf16.mxu1 %v10543_v62  ;;  %v11553_v50 = vld [vmem:[%s14509_s1 + $0x8] ss:$24 sps:$4 sm:$0xff]   ;;  %v10564_v62 = vcombine.low %v3898_v26, %v3902_v47  ;;  %v10575_v11 = vcombine.high %v3907_v61, %v3911_v42  ;;  %v10574_v51 = vcombine.low %v3907_v61, %v3911_v42  ;;  %v11558_v26 = vld [vmem:[%s14509_s1 + $0x38] ss:$24 sps:$4 sm:$0xff]  }
 0x2b7   :  { %6166 = vmatpush1.bf16.msra.mxu0 %v10540_v30  ;;  %v3918_v30 = vld [vmem:[#allocation4 + $0x8a0] sm:$0xff] }
 0x2b8   :  { %6385 = vmatpush1.bf16.msra.mxu1 %v10542_v43  ;;  %6167 = vmatprep.subr.bf16.mxu0 %v10549_v63  ;;  %v3915_v43 = vld [vmem:[#allocation4 + $0x888] sm:$0xff]  ;;  %v10581_v58 = vcombine.high %v3914_v7, %v3918_v30  ;;  %v10580_v47 = vcombine.low %v3914_v7, %v3918_v30 }
 0x2b9   :  { %6386 = vmatprep.subr.bf16.mxu1 %v10551_v39  ;;  %v3919_v63 = vld [vmem:[#allocation4 + $0x8a8] sm:$0xff]  ;;  %v11556_v39 = vld [vmem:[%s14509_s1 + $0x3c] ss:$24 sps:$4 sm:$0xff]  }
 0x2ba   :  { %v10583_v56 = vcombine.high %v3915_v43, %v3919_v63  ;;  %v10582_v2 = vcombine.low %v3915_v43, %v3919_v63  ;;  %v3943_v7 = vld [vmem:[#allocation4 + $0x968] sm:$0xff] }
 0x2bb   :  { %6168 = vmatpush1.bf16.msra.mxu0 %v10548_v31  ;;  %v3922_v31 = vld [vmem:[#allocation4 + $0x8c0] sm:$0xff] }
 0x2bc   :  { %6387 = vmatpush1.bf16.msra.mxu1 %v10550_v55  ;;  %6169 = vmatprep.subr.bf16.mxu0 %v10557_v19  ;;  %v3926_v55 = vld [vmem:[#allocation4 + $0x8e0] sm:$0xff]  ;;  %v3923_v19 = vld [vmem:[#allocation4 + $0x8c8] sm:$0xff] }
 0x2bd   :  { %6388 = vmatprep.subr.bf16.mxu1 %v10559_v10  ;;  %v3927_v10 = vld [vmem:[#allocation4 + $0x8e8] sm:$0xff]  ;;  %v10589_v38 = vcombine.high %v3922_v31, %v3926_v55  ;;  %v10588_v61 = vcombine.low %v3922_v31, %v3926_v55  ;;  %v11562_v55 = vld [vmem:[%s14509_s1 + $0x9c] ss:$24 sps:$4 sm:$0xff]  }
 0x2be   :  { %v10590_v42 = vcombine.low %v3923_v19, %v3927_v10  ;;  %v11561_v30 = vld [vmem:[%s14509_s1 + $0x68] ss:$24 sps:$4 sm:$0xff]  }
 0x2bf   :  { %6170 = vmatpush1.bf16.msra.mxu0 %v10556_v35  ;;  %v10591_v35 = vcombine.high %v3923_v19, %v3927_v10  ;;  %v3951_v31 = vld [vmem:[#allocation4 + $0x9a8] sm:$0xff] }
 0x2c0   :  { %6389 = vmatpush1.bf16.msra.mxu1 %v10558_v54  ;;  %6212 = vmatprep.subr.bf16.mxu0 %v10565_v6  ;;  %v3930_v54 = vld [vmem:[#allocation4 + $0x900] sm:$0xff] }
 0x2c1   :  { %6431 = vmatprep.subr.bf16.mxu1 %v10567_v14  ;;  %v3934_v6 = vld [vmem:[#allocation4 + $0x920] sm:$0xff]  ;;  %v3931_v14 = vld [vmem:[#allocation4 + $0x908] sm:$0xff] }
 0x2c2   :  { %6172 = vmatmul.mubr.bf16.vlgmr.msra.gmra.mrb[32].mxu0 %v11553_v50  ;;  %v10596_v43 = vcombine.low %v3930_v54, %v3934_v6  ;;  %v10598_v63 = vcombine.low %v3931_v14, %v3935_v46 }
 0x2c3   :  { %6391 = vmatmul.mubr.bf16.vlgmr.msra.gmra.mrb[32].mxu1 %v11553_v50  ;;  %6213 = vmatpush1.bf16.msra.mxu0 %v10564_v62  ;;  %v10597_v50 = vcombine.high %v3930_v54, %v3934_v6  ;;  %v10599_v62 = vcombine.high %v3931_v14, %v3935_v46  ;;  %v3959_v54 = vld [vmem:[#allocation4 + $0x9e8] sm:$0xff]  ;;  %v11564_v6 = vld [vmem:[%s14509_s1 + $0x98] ss:$24 sps:$4 sm:$0xff]  }
 0x2c4   :  { %6432 = vmatpush1.bf16.msra.mxu1 %v10566_v3  ;;  %6214 = vmatprep.subr.bf16.mxu0 %v10573_v34  ;;  %v3938_v3 = vld [vmem:[#allocation4 + $0x940] sm:$0xff] }
 0x2c5   :  { %6433 = vmatprep.subr.bf16.mxu1 %v10575_v11  ;;  %6181 = vmatprep.mubr.bf16.mxu0 %v11556_v39  ;;  %v3942_v34 = vld [vmem:[#allocation4 + $0x960] sm:$0xff]  ;;  %v3939_v11 = vld [vmem:[#allocation4 + $0x948] sm:$0xff] }
 0x2c6   :  { %6400 = vmatprep.mubr.bf16.mxu1 %v11556_v39  ;;  %v10605_v39 = vcombine.high %v3938_v3, %v3942_v34  ;;  %v10604_v19 = vcombine.low %v3938_v3, %v3942_v34  ;;  %v10606_v10 = vcombine.low %v3939_v11, %v3943_v7  ;;  %v3967_v3 = vld [vmem:[#allocation4 + $0xa28] sm:$0xff] }
 0x2c7   :  { %6215 = vmatpush1.bf16.msra.mxu0 %v10572_v57  ;;  %v10607_v57 = vcombine.high %v3939_v11, %v3943_v7  ;;  %v11567_v34 = vld [vmem:[%s14509_s1 + $0x14] ss:$24 sps:$4 sm:$0xff]  }
 0x2c8   :  { %6434 = vmatpush1.bf16.msra.mxu1 %v10574_v51  ;;  %6216 = vmatprep.subr.bf16.mxu0 %v10581_v58  ;;  %v3946_v51 = vld [vmem:[#allocation4 + $0x980] sm:$0xff] }
 0x2c9   :  { %6435 = vmatprep.subr.bf16.mxu1 %v10583_v56  ;;  %v3950_v58 = vld [vmem:[#allocation4 + $0x9a0] sm:$0xff]  ;;  %v3947_v56 = vld [vmem:[#allocation4 + $0x988] sm:$0xff] }
 0x2ca   :  { %6182 = vmatmul.mubr.bf16.gmra.mrb[36].mxu0 %v11558_v26  ;;  %v10612_v14 = vcombine.low %v3946_v51, %v3950_v58  ;;  %v10614_v46 = vcombine.low %v3947_v56, %v3951_v31 }
 0x2cb   :  { %6401 = vmatmul.mubr.bf16.gmra.mrb[36].mxu1 %v11558_v26  ;;  %6217 = vmatpush1.bf16.msra.mxu0 %v10580_v47  ;;  %v10613_v26 = vcombine.high %v3946_v51, %v3950_v58  ;;  %v10615_v47 = vcombine.high %v3947_v56, %v3951_v31  ;;  %v3975_v51 = vld [vmem:[#allocation4 + $0xa68] sm:$0xff] }
 0x2cc   :  { %6436 = vmatpush1.bf16.msra.mxu1 %v10582_v2  ;;  %6218 = vmatprep.subr.bf16.mxu0 %v10589_v38  ;;  %v3954_v2 = vld [vmem:[#allocation4 + $0x9c0] sm:$0xff] }
 0x2cd   :  { %6437 = vmatprep.subr.bf16.mxu1 %v10591_v35  ;;  %6191 = vmatprep.mubr.bf16.mxu0 %v11559_v15  ;;  %v3958_v38 = vld [vmem:[#allocation4 + $0x9e0] sm:$0xff]  ;;  %v3955_v35 = vld [vmem:[#allocation4 + $0x9c8] sm:$0xff] }
 0x2ce   :  { %6410 = vmatprep.mubr.bf16.mxu1 %v11559_v15  ;;  %v10621_v15 = vcombine.high %v3954_v2, %v3958_v38  ;;  %v10620_v11 = vcombine.low %v3954_v2, %v3958_v38  ;;  %v10622_v7 = vcombine.low %v3955_v35, %v3959_v54 }
 0x2cf   :  { %6219 = vmatpush1.bf16.msra.mxu0 %v10588_v61  ;;  %v10623_v61 = vcombine.high %v3955_v35, %v3959_v54 }
 0x2d0   :  { %6438 = vmatpush1.bf16.msra.mxu1 %v10590_v42  ;;  %6220 = vmatprep.subr.bf16.mxu0 %v10597_v50  ;;  %v3962_v42 = vld [vmem:[#allocation4 + $0xa00] sm:$0xff] }
 0x2d1   :  { %6439 = vmatprep.subr.bf16.mxu1 %v10599_v62  ;;  %v3966_v50 = vld [vmem:[#allocation4 + $0xa20] sm:$0xff]  ;;  %v3963_v62 = vld [vmem:[#allocation4 + $0xa08] sm:$0xff] }
 0x2d2   :  { %6192 = vmatmul.mubr.bf16.gmra.mrb[40].mxu0 %v11561_v30  ;;  %v10628_v58 = vcombine.low %v3962_v42, %v3966_v50  ;;  %v10630_v56 = vcombine.low %v3963_v62, %v3967_v3 }
 0x2d3   :  { %6411 = vmatmul.mubr.bf16.gmra.mrb[40].mxu1 %v11561_v30  ;;  %6221 = vmatpush1.bf16.msra.mxu0 %v10596_v43  ;;  %v10629_v30 = vcombine.high %v3962_v42, %v3966_v50  ;;  %v10631_v43 = vcombine.high %v3963_v62, %v3967_v3  ;;  %v3994_v3 = vld [vmem:[#allocation4 + $0xb00] sm:$0xff] }
 0x2d4   :  { %6440 = vmatpush1.bf16.msra.mxu1 %v10598_v63  ;;  %6222 = vmatprep.subr.bf16.mxu0 %v10605_v39  ;;  %v3970_v63 = vld [vmem:[#allocation4 + $0xa40] sm:$0xff] }
 0x2d5   :  { %6441 = vmatprep.subr.bf16.mxu1 %v10607_v57  ;;  %6201 = vmatprep.mubr.bf16.mxu0 %v11562_v55  ;;  %v3974_v39 = vld [vmem:[#allocation4 + $0xa60] sm:$0xff]  ;;  %v3971_v57 = vld [vmem:[#allocation4 + $0xa48] sm:$0xff] }
 0x2d6   :  { %6420 = vmatprep.mubr.bf16.mxu1 %v11562_v55  ;;  %v10637_v31 = vcombine.high %v3970_v63, %v3974_v39  ;;  %v10639_v55 = vcombine.high %v3971_v57, %v3975_v51  ;;  %v10636_v2 = vcombine.low %v3970_v63, %v3974_v39  ;;  %v10638_v38 = vcombine.low %v3971_v57, %v3975_v51  ;;  %v4002_v57 = vld [vmem:[#allocation4 + $0xb40] sm:$0xff] }
 0x2d7   :  { %6223 = vmatpush1.bf16.msra.mxu0 %v10604_v19  ;;  %v3978_v19 = vld [vmem:[#allocation4 + $0xa80] sm:$0xff] }
 0x2d8   :  { %6442 = vmatpush1.bf16.msra.mxu1 %v10606_v10  ;;  %6224 = vmatprep.subr.bf16.mxu0 %v10613_v26  ;;  %v3982_v10 = vld [vmem:[#allocation4 + $0xaa0] sm:$0xff]  ;;  %v3979_v26 = vld [vmem:[#allocation4 + $0xa88] sm:$0xff] }
 0x2d9   :  { %6443 = vmatprep.subr.bf16.mxu1 %v10615_v47  ;;  %v3983_v47 = vld [vmem:[#allocation4 + $0xaa8] sm:$0xff]  ;;  %v10645_v35 = vcombine.high %v3978_v19, %v3982_v10  ;;  %v4006_v51 = vld [vmem:[#allocation4 + $0xb60] sm:$0xff] }
 0x2da   :  { %6202 = vmatmul.mubr.bf16.gmra.mrb[44].mxu0 %v11564_v6  ;;  %v10647_v54 = vcombine.high %v3979_v26, %v3983_v47  ;;  %v10646_v42 = vcombine.low %v3979_v26, %v3983_v47  ;;  %v4010_v26 = vld [vmem:[#allocation4 + $0xb80] sm:$0xff] }
 0x2db   :  { %6421 = vmatmul.mubr.bf16.gmra.mrb[44].mxu1 %v11564_v6  ;;  %6225 = vmatpush1.bf16.msra.mxu0 %v10612_v14  ;;  %v3986_v6 = vld [vmem:[#allocation4 + $0xac0] sm:$0xff] }
 0x2dc   :  { %6444 = vmatpush1.bf16.msra.mxu1 %v10614_v46  ;;  %6226 = vmatprep.subr.bf16.mxu0 %v10621_v15  ;;  %v3990_v14 = vld [vmem:[#allocation4 + $0xae0] sm:$0xff]  ;;  %v3987_v46 = vld [vmem:[#allocation4 + $0xac8] sm:$0xff] }
 0x2dd   :  { %6445 = vmatprep.subr.bf16.mxu1 %v10623_v61  ;;  %6244 = vmatprep.mubr.bf16.mxu0 %v11567_v34  ;;  %v3991_v15 = vld [vmem:[#allocation4 + $0xae8] sm:$0xff]  ;;  %v10644_v61 = vcombine.low %v3978_v19, %v3982_v10  ;;  %v10653_v50 = vcombine.high %v3986_v6, %v3990_v14  ;;  %v10669_v19 = vcombine.high %v4002_v57, %v4006_v51  ;;  %v4014_v47 = vld [vmem:[#allocation4 + $0xba0] sm:$0xff] }
 0x2de   :  { %6463 = vmatprep.mubr.bf16.mxu1 %v11567_v34  ;;  %v10655_v62 = vcombine.high %v3987_v46, %v3991_v15  ;;  %v3998_v34 = vld [vmem:[#allocation4 + $0xb20] sm:$0xff] }
 0x2df   :  { %6227 = vmatpush1.bf16.msra.mxu0 %v10620_v11  ;;  %v3995_v11 = vld [vmem:[#allocation4 + $0xb08] sm:$0xff]  ;;  %v10661_v63 = vcombine.high %v3994_v3, %v3998_v34 }
 0x2e0   :  { %6446 = vmatpush1.bf16.msra.mxu1 %v10622_v7  ;;  %6228 = vmatprep.subr.bf16.mxu0 %v10629_v30  ;;  %v3999_v7 = vld [vmem:[#allocation4 + $0xb28] sm:$0xff]  ;;  %v10652_v30 = vcombine.low %v3986_v6, %v3990_v14  ;;  %v10677_v6 = vcombine.high %v4010_v26, %v4014_v47 }
 0x2e1   :  { %6447 = vmatprep.subr.bf16.mxu1 %v10631_v43  ;;  %v10654_v43 = vcombine.low %v3987_v46, %v3991_v15  ;;  %v10663_v39 = vcombine.high %v3995_v11, %v3999_v7  ;;  %v4018_v46 = vld [vmem:[#allocation4 + $0xbc0] sm:$0xff] }
 0x2e2   :  { %v4022_v15 = vld [vmem:[#allocation4 + $0xbe0] sm:$0xff] }
 0x2e3   :  { %6229 = vmatpush1.bf16.msra.mxu0 %v10628_v58  ;;  %v4003_v58 = vld [vmem:[#allocation4 + $0xb48] sm:$0xff] }
 0x2e4   :  { %6448 = vmatpush1.bf16.msra.mxu1 %v10630_v56  ;;  %6230 = vmatprep.subr.bf16.mxu0 %v10637_v31  ;;  %v4007_v56 = vld [vmem:[#allocation4 + $0xb68] sm:$0xff]  ;;  %v10660_v31 = vcombine.low %v3994_v3, %v3998_v34  ;;  %v10685_v3 = vcombine.high %v4018_v46, %v4022_v15 }
 0x2e5   :  { %6449 = vmatprep.subr.bf16.mxu1 %v10639_v55  ;;  %v10662_v55 = vcombine.low %v3995_v11, %v3999_v7  ;;  %v10671_v10 = vcombine.high %v4003_v58, %v4007_v56  ;;  %v3644_v11 = vld [vmem:[#allocation4 + $0x10] sm:$0xff] }
 0x2e6   :  { %v3648_v7 = vld [vmem:[#allocation4 + $0x30] sm:$0xff] }
 0x2e7   :  { %6231 = vmatpush1.bf16.msra.mxu0 %v10636_v2  ;;  %v4011_v2 = vld [vmem:[#allocation4 + $0xb88] sm:$0xff] }
 0x2e8   :  { %6450 = vmatpush1.bf16.msra.mxu1 %v10638_v38  ;;  %6232 = vmatprep.subr.bf16.mxu0 %v10645_v35  ;;  %v4015_v38 = vld [vmem:[#allocation4 + $0xba8] sm:$0xff]  ;;  %v10668_v35 = vcombine.low %v4002_v57, %v4006_v51  ;;  %v10313_v57 = vcombine.high %v3644_v11, %v3648_v7 }
 0x2e9   :  { %6451 = vmatprep.subr.bf16.mxu1 %v10647_v54  ;;  %v10670_v54 = vcombine.low %v4003_v58, %v4007_v56  ;;  %v10679_v14 = vcombine.high %v4011_v2, %v4015_v38  ;;  %v3652_v58 = vld [vmem:[#allocation4 + $0x50] sm:$0xff] }
 0x2ea   :  { %v3656_v56 = vld [vmem:[#allocation4 + $0x70] sm:$0xff] }
 0x2eb   :  { %6233 = vmatpush1.bf16.msra.mxu0 %v10644_v61  ;;  %v4019_v61 = vld [vmem:[#allocation4 + $0xbc8] sm:$0xff] }
 0x2ec   :  { %6452 = vmatpush1.bf16.msra.mxu1 %v10646_v42  ;;  %6234 = vmatprep.subr.bf16.mxu0 %v10653_v50  ;;  %v4023_v42 = vld [vmem:[#allocation4 + $0xbe8] sm:$0xff]  ;;  %v10676_v50 = vcombine.low %v4010_v26, %v4014_v47  ;;  %v10321_v47 = vcombine.high %v3652_v58, %v3656_v56 }
 0x2ed   :  { %6453 = vmatprep.subr.bf16.mxu1 %v10655_v62  ;;  %v10678_v62 = vcombine.low %v4011_v2, %v4015_v38  ;;  %v10687_v34 = vcombine.high %v4019_v61, %v4023_v42  ;;  %v11568_v38 = vld [vmem:[%s14509_s1 + $0x44] ss:$24 sps:$4 sm:$0xff]  }
 0x2ef   :  { %6235 = vmatpush1.bf16.msra.mxu0 %v10652_v30  ;;  %v3645_v30 = vld [vmem:[#allocation4 + $0x18] sm:$0xff] }
 0x2f0   :  { %6454 = vmatpush1.bf16.msra.mxu1 %v10654_v43  ;;  %6236 = vmatprep.subr.bf16.mxu0 %v10661_v63  ;;  %v3649_v43 = vld [vmem:[#allocation4 + $0x38] sm:$0xff]  ;;  %v10684_v63 = vcombine.low %v4018_v46, %v4022_v15  ;;  %v10320_v46 = vcombine.low %v3652_v58, %v3656_v56 }
 0x2f1   :  { %6455 = vmatprep.subr.bf16.mxu1 %v10663_v39  ;;  %v10686_v39 = vcombine.low %v4019_v61, %v4023_v42  ;;  %v10315_v51 = vcombine.high %v3645_v30, %v3649_v43  ;;  %v10314_v26 = vcombine.low %v3645_v30, %v3649_v43  ;;  %v3677_v58 = vld [vmem:[#allocation4 + $0x118] sm:$0xff] }
 0x2f2   :  { %v3681_v56 = vld [vmem:[#allocation4 + $0x138] sm:$0xff] }
 0x2f3   :  { %6237 = vmatpush1.bf16.msra.mxu0 %v10660_v31  ;;  %v3653_v31 = vld [vmem:[#allocation4 + $0x58] sm:$0xff] }
 0x2f4   :  { %6456 = vmatpush1.bf16.msra.mxu1 %v10662_v55  ;;  %6238 = vmatprep.subr.bf16.mxu0 %v10669_v19  ;;  %v3657_v55 = vld [vmem:[#allocation4 + $0x78] sm:$0xff]  ;;  %v11565_v19 = vld [vmem:[%s14509_s1 + $0x10] ss:$24 sps:$4 sm:$0xff]  }
 0x2f5   :  { %6457 = vmatprep.subr.bf16.mxu1 %v10671_v10  ;;  %v10312_v10 = vcombine.low %v3644_v11, %v3648_v7  ;;  %v10323_v2 = vcombine.high %v3653_v31, %v3657_v55  ;;  %v10322_v15 = vcombine.low %v3653_v31, %v3657_v55  ;;  %v11570_v11 = vld [vmem:[%s14509_s1 + $0x40] ss:$24 sps:$4 sm:$0xff]  }
 0x2f7   :  { %6239 = vmatpush1.bf16.msra.mxu0 %v10668_v35  ;;  %v3660_v35 = vld [vmem:[#allocation4 + $0x90] sm:$0xff] }
 0x2f8   :  { %6458 = vmatpush1.bf16.msra.mxu1 %v10670_v54  ;;  %6240 = vmatprep.subr.bf16.mxu0 %v10677_v6  ;;  %v3664_v54 = vld [vmem:[#allocation4 + $0xb0] sm:$0xff]  ;;  %v3661_v6 = vld [vmem:[#allocation4 + $0x98] sm:$0xff] }
 0x2f9   :  { %6459 = vmatprep.subr.bf16.mxu1 %v10679_v14  ;;  %v3665_v14 = vld [vmem:[#allocation4 + $0xb8] sm:$0xff]  ;;  %v10329_v61 = vcombine.high %v3660_v35, %v3664_v54  ;;  %v10328_v7 = vcombine.low %v3660_v35, %v3664_v54  ;;  %v11573_v35 = vld [vmem:[%s14509_s1 + $0x70] ss:$24 sps:$4 sm:$0xff]   ;;  %v552_v54 = vsub.s32 4, %v12712_v23 }
 0x2fa   :  { %v10331_v42 = vcombine.high %v3661_v6, %v3665_v14  ;;  %v10330_v30 = vcombine.low %v3661_v6, %v3665_v14  ;;  %v560_v6 = vsub.s32 6, %v12712_v23  ;;  %v556_v14 = vsub.s32 5, %v12712_v23 }
 0x2fb   :  { %6241 = vmatpush1.bf16.msra.mxu0 %v10676_v50  ;;  %v3668_v50 = vld [vmem:[#allocation4 + $0xd0] sm:$0xff] }
 0x2fc   :  { %6460 = vmatpush1.bf16.msra.mxu1 %v10678_v62  ;;  %6242 = vmatprep.subr.bf16.mxu0 %v10685_v3  ;;  %v3672_v62 = vld [vmem:[#allocation4 + $0xf0] sm:$0xff]  ;;  %v3669_v3 = vld [vmem:[#allocation4 + $0xd8] sm:$0xff] }
 0x2fd   :  { %6461 = vmatprep.subr.bf16.mxu1 %v10687_v34  ;;  %v3673_v34 = vld [vmem:[#allocation4 + $0xf8] sm:$0xff]  ;;  %v10337_v43 = vcombine.high %v3668_v50, %v3672_v62  ;;  %v10336_v31 = vcombine.low %v3668_v50, %v3672_v62 }
 0x2fe   :  { %v10338_v55 = vcombine.low %v3669_v3, %v3673_v34  ;;  %v11574_v62 = vld [vmem:[%s14509_s1 + $0xa4] ss:$24 sps:$4 sm:$0xff]  }
 0x2ff   :  { %6243 = vmatpush1.bf16.msra.mxu0 %v10684_v63  ;;  %v10339_v63 = vcombine.high %v3669_v3, %v3673_v34  ;;  %v12955_v3 = vld [vmem:[#allocation4 + $0x190] sm:$0xff] }
 0x300   :  { %6462 = vmatpush1.bf16.msra.mxu1 %v10686_v39  ;;  %6504 = vmatprep.subr.bf16.mxu0 %v10313_v57  ;;  %v11571_v39 = vld [vmem:[%s14509_s1 + $0x74] ss:$24 sps:$4 sm:$0xff]  }
 0x301   :  { %6723 = vmatprep.subr.bf16.mxu1 %v10315_v51  ;;  %v3676_v57 = vld [vmem:[#allocation4 + $0x110] sm:$0xff] }
 0x302   :  { %6245 = vmatmul.mubr.bf16.vlgmr.msra.gmra.mrb[32].mxu0 %v11565_v19  ;;  %v3680_v51 = vld [vmem:[#allocation4 + $0x130] sm:$0xff] }
 0x303   :  { %6464 = vmatmul.mubr.bf16.vlgmr.msra.gmra.mrb[32].mxu1 %v11565_v19  ;;  %6505 = vmatpush1.bf16.msra.mxu0 %v10312_v10  ;;  %v10345_v19 = vcombine.high %v3676_v57, %v3680_v51  ;;  %v10347_v10 = vcombine.high %v3677_v58, %v3681_v56  ;;  %v12957_v34 = vld [vmem:[#allocation4 + $0x1b0] sm:$0xff] }
 0x304   :  { %6724 = vmatpush1.bf16.msra.mxu1 %v10314_v26  ;;  %6506 = vmatprep.subr.bf16.mxu0 %v10321_v47  ;;  %v3684_v26 = vld [vmem:[#allocation4 + $0x150] sm:$0xff] }
 0x305   :  { %6725 = vmatprep.subr.bf16.mxu1 %v10323_v2  ;;  %6254 = vmatprep.mubr.bf16.mxu0 %v11568_v38  ;;  %v3688_v47 = vld [vmem:[#allocation4 + $0x170] sm:$0xff]  ;;  %v3685_v2 = vld [vmem:[#allocation4 + $0x158] sm:$0xff] }
 0x306   :  { %6473 = vmatprep.mubr.bf16.mxu1 %v11568_v38  ;;  %v3689_v38 = vld [vmem:[#allocation4 + $0x178] sm:$0xff] }
 0x307   :  { %6507 = vmatpush1.bf16.msra.mxu0 %v10320_v46  ;;  %v10344_v46 = vcombine.low %v3676_v57, %v3680_v51  ;;  %v10355_v50 = vcombine.high %v3685_v2, %v3689_v38  ;;  %v10352_v57 = vcombine.low %v3684_v26, %v3688_v47  ;;  %v10354_v51 = vcombine.low %v3685_v2, %v3689_v38 }
 0x308   :  { %6726 = vmatpush1.bf16.msra.mxu1 %v10322_v15  ;;  %6508 = vmatprep.subr.bf16.mxu0 %v10329_v61  ;;  %v10346_v15 = vcombine.low %v3677_v58, %v3681_v56  ;;  %v564_v61 = vsub.s32 7, %v12712_v23  ;;  %v12967_v58 = vld [vmem:[#allocation4 + $0x1d0] sm:$0xff] }
 0x309   :  { %6727 = vmatprep.subr.bf16.mxu1 %v10331_v42  ;;  %v10353_v42 = vcombine.high %v3684_v26, %v3688_v47  ;;  %v12969_v56 = vld [vmem:[#allocation4 + $0x1f0] sm:$0xff]  ;;  %v10360_v26 = vcombine.low %v12955_v3, %v12957_v34 }
 0x30a   :  { %6255 = vmatmul.mubr.bf16.gmra.mrb[36].mxu0 %v11570_v11 }
 0x30b   :  { %6474 = vmatmul.mubr.bf16.gmra.mrb[36].mxu1 %v11570_v11  ;;  %6509 = vmatpush1.bf16.msra.mxu0 %v10328_v7  ;;  %v11601_v11 = vld [vmem:[#allocation6] sm:$0xff] }
 0x30c   :  { %6728 = vmatpush1.bf16.msra.mxu1 %v10330_v30  ;;  %6510 = vmatprep.subr.bf16.mxu0 %v10337_v43  ;;  %v12959_v7 = vrot.slane %v11601_v11, %v552_v54  ;;  %v12961_v30 = vrot.slane %v11601_v11, %v560_v6  ;;  %v12963_v23 = vrot.slane %v11601_v11, %v556_v14  ;;  %v3693_v43 = vld [vmem:[#allocation4 + $0x198] sm:$0xff] }
 0x30d   :  { %6729 = vmatprep.subr.bf16.mxu1 %v10339_v63  ;;  %6264 = vmatprep.mubr.bf16.mxu0 %v11571_v39  ;;  %v3697_v63 = vld [vmem:[#allocation4 + $0x1b8] sm:$0xff] }
 0x30e   :  { %6483 = vmatprep.mubr.bf16.mxu1 %v11571_v39  ;;  %v12965_v39 = vrot.slane %v11601_v11, %v564_v61  ;;  %v10363_v47 = vcombine.high %v3693_v43, %v3697_v63  ;;  %v11576_v14 = vld [vmem:[%s14509_s1 + $0xa0] ss:$24 sps:$4 sm:$0xff]  }
 0x30f   :  { %6511 = vmatpush1.bf16.msra.mxu0 %v10336_v31  ;;  %v10361_v31 = vcombine.high %v12955_v3, %v12957_v34 }
 0x310   :  { %6730 = vmatpush1.bf16.msra.mxu1 %v10338_v55  ;;  %6512 = vmatprep.subr.bf16.mxu0 %v10345_v19  ;;  %v12973_v55 = vld [vmem:[#allocation4 + $0x1d8] sm:$0xff] }
 0x311   :  { %6731 = vmatprep.subr.bf16.mxu1 %v10347_v10  ;;  %v12975_v19 = vld [vmem:[#allocation4 + $0x1f8] sm:$0xff] }
 0x312   :  { %6265 = vmatmul.mubr.bf16.gmra.mrb[40].mxu0 %v11573_v35  ;;  %v10371_v3 = vcombine.high %v12973_v55, %v12975_v19 }
 0x313   :  { %6484 = vmatmul.mubr.bf16.gmra.mrb[40].mxu1 %v11573_v35  ;;  %6513 = vmatpush1.bf16.msra.mxu0 %v10344_v46  ;;  %v10362_v46 = vcombine.low %v3693_v43, %v3697_v63 }
 0x314   :  { %6732 = vmatpush1.bf16.msra.mxu1 %v10346_v15  ;;  %6514 = vmatprep.subr.bf16.mxu0 %v10353_v42  ;;  %v10369_v15 = vcombine.high %v12967_v58, %v12969_v56 }
 0x315   :  { %6733 = vmatprep.subr.bf16.mxu1 %v10355_v50  ;;  %v3232_v10 = vpop.f32.mrb[16].mxu0  ;;  %v3451_v35 = vpop.f32.mrb[16].mxu1  ;;  %6274 = vmatprep.mubr.bf16.mxu0 %v11574_v62 }
 0x316   :  { %6493 = vmatprep.mubr.bf16.mxu1 %v11574_v62  ;;  %v11070_v2 = vadd.f32 %v3232_v10, %v12959_v7  ;;  %v11086_v38 = vadd.f32 %v3451_v35, %v12961_v30  ;;  %v3234_v54 = vpop.f32.mrb[17].mxu0  ;;  %v3453_v6 = vpop.f32.mrb[17].mxu1 }
 0x317   :  { %v11071_v61 = vadd.f32 %v3234_v54, %v12963_v23  ;;  %v11087_v42 = vadd.f32 %v3453_v6, %v12965_v39  ;;  %v3236_v50 = vpop.f32.mrb[18].mxu0  ;;  %v3455_v62 = vpop.f32.mrb[18].mxu1  ;;  %6515 = vmatpush1.bf16.msra.mxu0 %v10352_v57  ;;  %v12994_v57 = vld [vmem:[#allocation4 + $0x210] sm:$0xff] }
 0x318   :  { %6734 = vmatpush1.bf16.msra.mxu1 %v10354_v51  ;;  %v3494_v34 = vpack.c.bf16 %v11070_v2, %v11070_v2  ;;  %v3496_v11 = vpack.c.bf16 %v11086_v38, %v11086_v38  ;;  %v11072_v10 = vadd.f32 %v3236_v50, %v12959_v7  ;;  %v11088_v43 = vadd.f32 %v3455_v62, %v12961_v30  ;;  %v3238_v63 = vpop.f32.mrb[19].mxu0  ;;  %v3457_v35 = vpop.f32.mrb[19].mxu1  ;;  %v12996_v51 = vld [vmem:[#allocation4 + $0x230] sm:$0xff] }
 0x319   :  { %6516 = vmatprep.subr.bf16.mxu0 %v10361_v31  ;;  %v3495_v60 = vpack.c.bf16 %v11071_v61, %v11071_v61  ;;  %v3497_v54 = vpack.c.bf16 %v11087_v42, %v11087_v42  ;;  %v11073_v6 = vadd.f32 %v3238_v63, %v12963_v23  ;;  %v11089_v49 = vadd.f32 %v3457_v35, %v12965_v39  ;;  %v13000_v61 = vld [vmem:[#allocation4 + $0x218] sm:$0xff] }
 0x31a   :  { %6735 = vmatprep.subr.bf16.mxu1 %v10363_v47  ;;  %3558 = vst [vmem:[#allocation2 + $0x20] sm:$0xf] %v3494_v34  ;;  %3560 = vst [vmem:[#allocation2 + $0x30] sm:$0xf] %v3496_v11  ;;  %v3502_v2 = vpack.c.bf16 %v11072_v10, %v11072_v10  ;;  %v3504_v38 = vpack.c.bf16 %v11088_v43, %v11088_v43  ;;  %6275 = vmatmul.mubr.bf16.gmra.mrb[44].mxu0 %v11576_v14  ;;  %v13002_v42 = vld [vmem:[#allocation4 + $0x238] sm:$0xff]  ;;  %v13006_v34 = vld [vmem:[#allocation4 + $0x250] sm:$0xff] }
 0x31b   :  { %6494 = vmatmul.mubr.bf16.gmra.mrb[44].mxu1 %v11576_v14  ;;  %v10368_v31 = vcombine.low %v12967_v58, %v12969_v56  ;;  %3559 = vst [vmem:[#allocation2 + $0x28] sm:$0xf] %v3495_v60  ;;  %3561 = vst [vmem:[#allocation2 + $0x38] sm:$0xf] %v3497_v54  ;;  %v3503_v47 = vpack.c.bf16 %v11073_v6, %v11073_v6  ;;  %v3505_v50 = vpack.c.bf16 %v11089_v49, %v11089_v49  ;;  %v13008_v11 = vld [vmem:[#allocation4 + $0x270] sm:$0xff]  ;;  %v13012_v60 = vld [vmem:[#allocation4 + $0x258] sm:$0xff] }
 0x31c   :  { %6517 = vmatpush1.bf16.msra.mxu0 %v10360_v26  ;;  %6736 = vmatpush1.bf16.msra.mxu1 %v10362_v46  ;;  %v10370_v62 = vcombine.low %v12973_v55, %v12975_v19  ;;  %3566 = vst [vmem:[#allocation2 + $0x60] sm:$0xf] %v3502_v2  ;;  %3568 = vst [vmem:[#allocation2 + $0x70] sm:$0xf] %v3504_v38  ;;  %v10377_v58 = vcombine.high %v12994_v57, %v12996_v51  ;;  %v13014_v56 = vld [vmem:[#allocation4 + $0x278] sm:$0xff] }
 0x31d   :  { %6518 = vmatprep.subr.bf16.mxu0 %v10369_v15  ;;  %6737 = vmatprep.subr.bf16.mxu1 %v10371_v3  ;;  %3567 = vst [vmem:[#allocation2 + $0x68] sm:$0xf] %v3503_v47  ;;  %3569 = vst [vmem:[#allocation2 + $0x78] sm:$0xf] %v3505_v50  ;;  %v3242_v49 = vpop.f32.mrb[20].mxu0  ;;  %v3461_v26 = vpop.f32.mrb[20].mxu1  ;;  %v10376_v55 = vcombine.low %v12994_v57, %v12996_v51  ;;  %v10379_v19 = vcombine.high %v13000_v61, %v13002_v42 }
 0x31e   :  { %v11602_v14 = vld [vmem:[%s14509_s1 + $0x4] ss:$24 sps:$4 sm:$0xff]   ;;  %v11074_v46 = vadd.f32 %v3242_v49, %v12959_v7  ;;  %v11090_v15 = vadd.f32 %v3461_v26, %v12961_v30  ;;  %v3244_v3 = vpop.f32.mrb[21].mxu0  ;;  %v3463_v10 = vpop.f32.mrb[21].mxu1  ;;  %v10378_v43 = vcombine.low %v13000_v61, %v13002_v42  ;;  %v10385_v63 = vcombine.high %v13006_v34, %v13008_v11 }
 0x31f   :  { %6536 = vmatprep.mubr.bf16.mxu0 %v11602_v14  ;;  %6755 = vmatprep.mubr.bf16.mxu1 %v11602_v14  ;;  %v11075_v35 = vadd.f32 %v3244_v3, %v12963_v23  ;;  %v11091_v54 = vadd.f32 %v3463_v10, %v12965_v39  ;;  %v3246_v6 = vpop.f32.mrb[22].mxu0  ;;  %v3465_v57 = vpop.f32.mrb[22].mxu1  ;;  %v10387_v51 = vcombine.high %v13012_v60, %v13014_v56 }
 0x320   :  { %6519 = vmatpush1.bf16.msra.mxu0 %v10368_v31  ;;  %6738 = vmatpush1.bf16.msra.mxu1 %v10370_v62  ;;  %v3510_v2 = vpack.c.bf16 %v11074_v46, %v11074_v46  ;;  %v3512_v38 = vpack.c.bf16 %v11090_v15, %v11090_v15  ;;  %v11076_v47 = vadd.f32 %v3246_v6, %v12959_v7  ;;  %v3248_v42 = vpop.f32.mrb[23].mxu0  ;;  %v3467_v50 = vpop.f32.mrb[23].mxu1  ;;  %v13037_v31 = vld [vmem:[#allocation4 + $0x290] sm:$0xff]  ;;  %v13043_v6 = vld [vmem:[#allocation4 + $0x298] sm:$0xff] }
 0x321   :  { %v11092_v61 = vadd.f32 %v3465_v57, %v12961_v30  ;;  %6520 = vmatprep.subr.bf16.mxu0 %v10377_v58  ;;  %v3511_v49 = vpack.c.bf16 %v11075_v35, %v11075_v35  ;;  %v3513_v26 = vpack.c.bf16 %v11091_v54, %v11091_v54  ;;  %v11077_v14 = vadd.f32 %v3248_v42, %v12963_v23  ;;  %v13039_v62 = vld [vmem:[#allocation4 + $0x2b0] sm:$0xff]  ;;  %v3729_v58 = vld [vmem:[#allocation4 + $0x2b8] sm:$0xff] }
 0x322   :  { %v11093_v3 = vadd.f32 %v3467_v50, %v12965_v39  ;;  %6739 = vmatprep.subr.bf16.mxu1 %v10379_v19  ;;  %3574 = vst [vmem:[#allocation2 + $0xa0] sm:$0xf] %v3510_v2  ;;  %3576 = vst [vmem:[#allocation2 + $0xb0] sm:$0xf] %v3512_v38  ;;  %v3518_v46 = vpack.c.bf16 %v11076_v47, %v11076_v47  ;;  %v10384_v10 = vcombine.low %v13006_v34, %v13008_v11  ;;  %v13047_v57 = vld [vmem:[#allocation4 + $0x2d0] sm:$0xff]  ;;  %v13053_v11 = vld [vmem:[#allocation4 + $0x2d8] sm:$0xff] }
 0x323   :  { %v3520_v15 = vpack.c.bf16 %v11092_v61, %v11092_v61  ;;  %3575 = vst [vmem:[#allocation2 + $0xa8] sm:$0xf] %v3511_v49  ;;  %3577 = vst [vmem:[#allocation2 + $0xb8] sm:$0xf] %v3513_v26  ;;  %v3519_v35 = vpack.c.bf16 %v11077_v14, %v11077_v14  ;;  %v10386_v19 = vcombine.low %v13012_v60, %v13014_v56  ;;  %v13049_v2 = vld [vmem:[#allocation4 + $0x2f0] sm:$0xff]  ;;  %v13055_v38 = vld [vmem:[#allocation4 + $0x2f8] sm:$0xff] }
 0x324   :  { %v3521_v54 = vpack.c.bf16 %v11093_v3, %v11093_v3  ;;  %6521 = vmatpush1.bf16.msra.mxu0 %v10376_v55  ;;  %6740 = vmatpush1.bf16.msra.mxu1 %v10378_v43  ;;  %3582 = vst [vmem:[#allocation2 + $0xe0] sm:$0xf] %v3518_v46  ;;  %v10393_v34 = vcombine.high %v13037_v31, %v13039_v62 }
 0x325   :  { %3584 = vst [vmem:[#allocation2 + $0xf0] sm:$0xf] %v3520_v15  ;;  %6522 = vmatprep.subr.bf16.mxu0 %v10385_v63  ;;  %6741 = vmatprep.subr.bf16.mxu1 %v10387_v51  ;;  %3583 = vst [vmem:[#allocation2 + $0xe8] sm:$0xf] %v3519_v35  ;;  %v3252_v55 = vpop.f32.mrb[24].mxu0  ;;  %v3471_v43 = vpop.f32.mrb[24].mxu1  ;;  %v10392_v60 = vcombine.low %v13037_v31, %v13039_v62  ;;  %v10395_v56 = vcombine.high %v13043_v6, %v3729_v58 }
 0x326   :  { %3585 = vst [vmem:[#allocation2 + $0xf8] sm:$0xf] %v3521_v54  ;;  %v11078_v47 = vadd.f32 %v3252_v55, %v12959_v7  ;;  %v11094_v63 = vadd.f32 %v3471_v43, %v12961_v30  ;;  %v3254_v51 = vpop.f32.mrb[25].mxu0  ;;  %v3473_v61 = vpop.f32.mrb[25].mxu1  ;;  %v10394_v42 = vcombine.low %v13043_v6, %v3729_v58  ;;  %v10401_v50 = vcombine.high %v13047_v57, %v13049_v2 }
 0x327   :  { %v11079_v49 = vadd.f32 %v3254_v51, %v12963_v23  ;;  %v11095_v26 = vadd.f32 %v3473_v61, %v12965_v39  ;;  %v3256_v14 = vpop.f32.mrb[26].mxu0  ;;  %v3475_v3 = vpop.f32.mrb[26].mxu1  ;;  %v10403_v31 = vcombine.high %v13053_v11, %v13055_v38  ;;  %v10400_v61 = vcombine.low %v13047_v57, %v13049_v2  ;;  %v3749_v2 = vld [vmem:[#allocation4 + $0x358] sm:$0xff] }
 0x328   :  { %6523 = vmatpush1.bf16.msra.mxu0 %v10384_v10  ;;  %6742 = vmatpush1.bf16.msra.mxu1 %v10386_v19  ;;  %v3526_v62 = vpack.c.bf16 %v11078_v47, %v11078_v47  ;;  %v3528_v46 = vpack.c.bf16 %v11094_v63, %v11094_v63  ;;  %v11080_v15 = vadd.f32 %v3256_v14, %v12959_v7  ;;  %v3258_v58 = vpop.f32.mrb[27].mxu0  ;;  %v3477_v35 = vpop.f32.mrb[27].mxu1  ;;  %v13073_v10 = vld [vmem:[#allocation4 + $0x310] sm:$0xff]  ;;  %v13079_v14 = vld [vmem:[#allocation4 + $0x318] sm:$0xff] }
 0x329   :  { %v11096_v6 = vadd.f32 %v3475_v3, %v12961_v30  ;;  %6524 = vmatprep.subr.bf16.mxu0 %v10393_v34  ;;  %v3527_v54 = vpack.c.bf16 %v11079_v49, %v11079_v49  ;;  %v3529_v55 = vpack.c.bf16 %v11095_v26, %v11095_v26  ;;  %v11081_v43 = vadd.f32 %v3258_v58, %v12963_v23  ;;  %v13075_v19 = vld [vmem:[#allocation4 + $0x330] sm:$0xff]  ;;  %v3745_v34 = vld [vmem:[#allocation4 + $0x338] sm:$0xff] }
 0x32a   :  { %v11097_v51 = vadd.f32 %v3477_v35, %v12965_v39  ;;  %6743 = vmatprep.subr.bf16.mxu1 %v10395_v56  ;;  %3590 = vst [vmem:[#allocation2 + $0x120] sm:$0xf] %v3526_v62  ;;  %3592 = vst [vmem:[#allocation2 + $0x130] sm:$0xf] %v3528_v46  ;;  %v3534_v47 = vpack.c.bf16 %v11080_v15, %v11080_v15  ;;  %v10402_v56 = vcombine.low %v13053_v11, %v13055_v38  ;;  %v13083_v3 = vld [vmem:[#allocation4 + $0x350] sm:$0xff]  ;;  %v3753_v46 = vld [vmem:[#allocation4 + $0x378] sm:$0xff] }
 0x32b   :  { %v3536_v63 = vpack.c.bf16 %v11096_v6, %v11096_v6  ;;  %3591 = vst [vmem:[#allocation2 + $0x128] sm:$0xf] %v3527_v54  ;;  %3593 = vst [vmem:[#allocation2 + $0x138] sm:$0xf] %v3529_v55  ;;  %v3535_v49 = vpack.c.bf16 %v11081_v43, %v11081_v43  ;;  %v13085_v62 = vld [vmem:[#allocation4 + $0x370] sm:$0xff]  ;;  %v10409_v57 = vcombine.high %v13073_v10, %v13075_v19 }
 0x32c   :  { %v3537_v26 = vpack.c.bf16 %v11097_v51, %v11097_v51  ;;  %6525 = vmatpush1.bf16.msra.mxu0 %v10392_v60  ;;  %6744 = vmatpush1.bf16.msra.mxu1 %v10394_v42  ;;  %3598 = vst [vmem:[#allocation2 + $0x160] sm:$0xf] %v3534_v47  ;;  %v10408_v11 = vcombine.low %v13073_v10, %v13075_v19 }
 0x32d   :  { %3600 = vst [vmem:[#allocation2 + $0x170] sm:$0xf] %v3536_v63  ;;  %6526 = vmatprep.subr.bf16.mxu0 %v10401_v50  ;;  %6745 = vmatprep.subr.bf16.mxu1 %v10403_v31  ;;  %3599 = vst [vmem:[#allocation2 + $0x168] sm:$0xf] %v3535_v49  ;;  %v3262_v60 = vpop.f32.mrb[28].mxu0  ;;  %v3481_v42 = vpop.f32.mrb[28].mxu1  ;;  %v10411_v38 = vcombine.high %v13079_v14, %v3745_v34  ;;  %v10410_v58 = vcombine.low %v13079_v14, %v3745_v34 }
 0x32e   :  { %3601 = vst [vmem:[#allocation2 + $0x178] sm:$0xf] %v3537_v26  ;;  %v11082_v15 = vadd.f32 %v3262_v60, %v12959_v7  ;;  %v11098_v6 = vadd.f32 %v3481_v42, %v12961_v30  ;;  %v3264_v50 = vpop.f32.mrb[29].mxu0  ;;  %v3483_v31 = vpop.f32.mrb[29].mxu1  ;;  %v10417_v35 = vcombine.high %v13083_v3, %v13085_v62  ;;  %v10419_v10 = vcombine.high %v3749_v2, %v3753_v46  ;;  %v3756_v34 = vld [vmem:[#allocation4 + $0x390] sm:$0xff] }
 0x32f   :  { %v11083_v54 = vadd.f32 %v3264_v50, %v12963_v23  ;;  %v11099_v55 = vadd.f32 %v3483_v31, %v12965_v39  ;;  %v3266_v43 = vpop.f32.mrb[30].mxu0  ;;  %v3485_v51 = vpop.f32.mrb[30].mxu1 }
 0x330   :  { %6527 = vmatpush1.bf16.msra.mxu0 %v10400_v61  ;;  %6746 = vmatpush1.bf16.msra.mxu1 %v10402_v56  ;;  %v3542_v19 = vpack.c.bf16 %v11082_v15, %v11082_v15  ;;  %v3544_v47 = vpack.c.bf16 %v11098_v6, %v11098_v6  ;;  %v11084_v63 = vadd.f32 %v3266_v43, %v12959_v7  ;;  %v3268_v26 = vpop.f32.mrb[31].mxu0  ;;  %v3487_v14 = vpop.f32.mrb[31].mxu1  ;;  %v3760_v61 = vld [vmem:[#allocation4 + $0x3b0] sm:$0xff]  ;;  %v3757_v56 = vld [vmem:[#allocation4 + $0x398] sm:$0xff] }
 0x331   :  { %v11100_v49 = vadd.f32 %v3485_v51, %v12961_v30  ;;  %6528 = vmatprep.subr.bf16.mxu0 %v10409_v57  ;;  %v3543_v60 = vpack.c.bf16 %v11083_v54, %v11083_v54  ;;  %v3545_v42 = vpack.c.bf16 %v11099_v55, %v11099_v55  ;;  %v11085_v50 = vadd.f32 %v3268_v26, %v12963_v23 }
 0x332   :  { %v11101_v31 = vadd.f32 %v3487_v14, %v12965_v39  ;;  %6747 = vmatprep.subr.bf16.mxu1 %v10411_v38  ;;  %3606 = vst [vmem:[#allocation2 + $0x1a0] sm:$0xf] %v3542_v19  ;;  %3608 = vst [vmem:[#allocation2 + $0x1b0] sm:$0xf] %v3544_v47  ;;  %v3550_v15 = vpack.c.bf16 %v11084_v63, %v11084_v63  ;;  %v10416_v43 = vcombine.low %v13083_v3, %v13085_v62  ;;  %v3764_v19 = vld [vmem:[#allocation4 + $0x3d0] sm:$0xff]  ;;  %v3765_v63 = vld [vmem:[#allocation4 + $0x3d8] sm:$0xff] }
 0x333   :  { %v3552_v6 = vpack.c.bf16 %v11100_v49, %v11100_v49  ;;  %3607 = vst [vmem:[#allocation2 + $0x1a8] sm:$0xf] %v3543_v60  ;;  %3609 = vst [vmem:[#allocation2 + $0x1b8] sm:$0xf] %v3545_v42  ;;  %v3551_v57 = vpack.c.bf16 %v11085_v50, %v11085_v50  ;;  %v10418_v55 = vcombine.low %v3749_v2, %v3753_v46  ;;  %v3768_v47 = vld [vmem:[#allocation4 + $0x3f0] sm:$0xff]  ;;  %v3769_v49 = vld [vmem:[#allocation4 + $0x3f8] sm:$0xff] }
 0x334   :  { %v3553_v54 = vpack.c.bf16 %v11101_v31, %v11101_v31  ;;  %6529 = vmatpush1.bf16.msra.mxu0 %v10408_v11  ;;  %6748 = vmatpush1.bf16.msra.mxu1 %v10410_v58  ;;  %3614 = vst [vmem:[#allocation2 + $0x1e0] sm:$0xf] %v3550_v15  ;;  %v10425_v38 = vcombine.high %v3756_v34, %v3760_v61  ;;  %v3772_v46 = vld [vmem:[#allocation4 + $0x410] sm:$0xff] }
 0x335   :  { %3616 = vst [vmem:[#allocation2 + $0x1f0] sm:$0xf] %v3552_v6  ;;  %6530 = vmatprep.subr.bf16.mxu0 %v10417_v35  ;;  %6749 = vmatprep.subr.bf16.mxu1 %v10419_v10  ;;  %v10427_v51 = vcombine.high %v3757_v56, %v3761_v53  ;;  %3615 = vst [vmem:[#allocation2 + $0x1e8] sm:$0xf] %v3551_v57  ;;  %v10424_v3 = vcombine.low %v3756_v34, %v3760_v61  ;;  %v3776_v58 = vld [vmem:[#allocation4 + $0x430] sm:$0xff]  ;;  %v3773_v35 = vld [vmem:[#allocation4 + $0x418] sm:$0xff] }
 0x336   :  { %3617 = vst [vmem:[#allocation2 + $0x1f8] sm:$0xf] %v3553_v54  ;;  %v10426_v62 = vcombine.low %v3757_v56, %v3761_v53  ;;  %v10433_v11 = vcombine.high %v3764_v19, %v3768_v47  ;;  %v10435_v2 = vcombine.high %v3765_v63, %v3769_v49  ;;  %v3777_v10 = vld [vmem:[#allocation4 + $0x438] sm:$0xff]  ;;  %v10432_v26 = vcombine.low %v3764_v19, %v3768_v47  ;;  %v3780_v50 = vld [vmem:[#allocation4 + $0x450] sm:$0xff] }
 0x337   :  { %v10434_v14 = vcombine.low %v3765_v63, %v3769_v49  ;;  %v10441_v60 = vcombine.high %v3772_v46, %v3776_v58  ;;  %v10443_v42 = vcombine.high %v3773_v35, %v3777_v10  ;;  %v3784_v31 = vld [vmem:[#allocation4 + $0x470] sm:$0xff]  ;;  %v3781_v34 = vld [vmem:[#allocation4 + $0x458] sm:$0xff]  ;;  %v10440_v61 = vcombine.low %v3772_v46, %v3776_v58 }
 0x338   :  { %6531 = vmatpush1.bf16.msra.mxu0 %v10416_v43  ;;  %6750 = vmatpush1.bf16.msra.mxu1 %v10418_v55  ;;  %v3785_v53 = vld [vmem:[#allocation4 + $0x478] sm:$0xff]  ;;  %v10442_v56 = vcombine.low %v3773_v35, %v3777_v10  ;;  %v10449_v15 = vcombine.high %v3780_v50, %v3784_v31  ;;  %v3788_v43 = vld [vmem:[#allocation4 + $0x490] sm:$0xff] }
 0x339   :  { %6532 = vmatprep.subr.bf16.mxu0 %v10425_v38  ;;  %6751 = vmatprep.subr.bf16.mxu1 %v10427_v51  ;;  %v10451_v6 = vcombine.high %v3781_v34, %v3785_v53  ;;  %v3792_v57 = vld [vmem:[#allocation4 + $0x4b0] sm:$0xff]  ;;  %v3789_v54 = vld [vmem:[#allocation4 + $0x498] sm:$0xff]  ;;  %v10448_v51 = vcombine.low %v3780_v50, %v3784_v31  ;;  %v10450_v19 = vcombine.low %v3781_v34, %v3785_v53 }
 0x33a   :  { %v3793_v55 = vld [vmem:[#allocation4 + $0x4b8] sm:$0xff]  ;;  %v10457_v47 = vcombine.high %v3788_v43, %v3792_v57  ;;  %v3796_v49 = vld [vmem:[#allocation4 + $0x4d0] sm:$0xff]  ;;  %v10456_v46 = vcombine.low %v3788_v43, %v3792_v57 }
 0x33b   :  { %v11603_v38 = vld [vmem:[%s14509_s1] ss:$24 sps:$4 sm:$0xff]   ;;  %v10459_v63 = vcombine.high %v3789_v54, %v3793_v55  ;;  %v10458_v58 = vcombine.low %v3789_v54, %v3793_v55  ;;  %v11605_v50 = vld [vmem:[%s14509_s1 + $0x30] ss:$24 sps:$4 sm:$0xff]   ;;  %v11606_v57 = vld [vmem:[%s14509_s1 + $0x64] ss:$24 sps:$4 sm:$0xff]  }
 0x33c   :  { %6533 = vmatpush1.bf16.msra.mxu0 %v10424_v3  ;;  %6752 = vmatpush1.bf16.msra.mxu1 %v10426_v62  ;;  %v3800_v3 = vld [vmem:[#allocation4 + $0x4f0] sm:$0xff]  ;;  %v3797_v62 = vld [vmem:[#allocation4 + $0x4d8] sm:$0xff] }
 0x33d   :  { %6534 = vmatprep.subr.bf16.mxu0 %v10433_v11  ;;  %6753 = vmatprep.subr.bf16.mxu1 %v10435_v2  ;;  %v3801_v11 = vld [vmem:[#allocation4 + $0x4f8] sm:$0xff]  ;;  %v11604_v2 = vld [vmem:[%s14509_s1 + $0x34] ss:$24 sps:$4 sm:$0xff]   ;;  %v10465_v35 = vcombine.high %v3796_v49, %v3800_v3  ;;  %v10464_v31 = vcombine.low %v3796_v49, %v3800_v3 }
 0x33e   :  { %v10467_v10 = vcombine.high %v3797_v62, %v3801_v11  ;;  %v10466_v34 = vcombine.low %v3797_v62, %v3801_v11  ;;  %v3817_v43 = vld [vmem:[#allocation4 + $0x578] sm:$0xff] }
 0x33f   :  { %v3825_v49 = vld [vmem:[#allocation4 + $0x5b8] sm:$0xff] }
 0x340   :  { %6535 = vmatpush1.bf16.msra.mxu0 %v10432_v26  ;;  %6754 = vmatpush1.bf16.msra.mxu1 %v10434_v14  ;;  %v3804_v26 = vld [vmem:[#allocation4 + $0x510] sm:$0xff]  ;;  %v11607_v3 = vld [vmem:[%s14509_s1 + $0x60] ss:$24 sps:$4 sm:$0xff]  }
 0x341   :  { %6577 = vmatprep.subr.bf16.mxu0 %v10441_v60  ;;  %6796 = vmatprep.subr.bf16.mxu1 %v10443_v42  ;;  %v3808_v14 = vld [vmem:[#allocation4 + $0x530] sm:$0xff]  ;;  %v3805_v60 = vld [vmem:[#allocation4 + $0x518] sm:$0xff] }
 0x342   :  { %v3809_v42 = vld [vmem:[#allocation4 + $0x538] sm:$0xff]  ;;  %v10473_v53 = vcombine.high %v3804_v26, %v3808_v14  ;;  %v10472_v54 = vcombine.low %v3804_v26, %v3808_v14  ;;  %v11608_v14 = vld [vmem:[%s14509_s1 + $0x94] ss:$24 sps:$4 sm:$0xff]  }
 0x343   :  { %6537 = vmatmul.mubr.bf16.vlgmr.msra.gmra.mrb[48].mxu0 %v11603_v38  ;;  %6756 = vmatmul.mubr.bf16.vlgmr.msra.gmra.mrb[48].mxu1 %v11603_v38  ;;  %v10474_v55 = vcombine.low %v3805_v60, %v3809_v42  ;;  %v3833_v26 = vld [vmem:[#allocation4 + $0x5f8] sm:$0xff] }
 0x344   :  { %6578 = vmatpush1.bf16.msra.mxu0 %v10440_v61  ;;  %6797 = vmatpush1.bf16.msra.mxu1 %v10442_v56  ;;  %v10475_v61 = vcombine.high %v3805_v60, %v3809_v42  ;;  %v3812_v56 = vld [vmem:[#allocation4 + $0x550] sm:$0xff] }
 0x345   :  { %6579 = vmatprep.subr.bf16.mxu0 %v10449_v15  ;;  %6798 = vmatprep.subr.bf16.mxu1 %v10451_v6  ;;  %v3816_v15 = vld [vmem:[#allocation4 + $0x570] sm:$0xff]  ;;  %v3813_v6 = vld [vmem:[#allocation4 + $0x558] sm:$0xff] }
 0x346   :  { %6546 = vmatprep.mubr.bf16.mxu0 %v11604_v2  ;;  %6765 = vmatprep.mubr.bf16.mxu1 %v11604_v2  ;;  %v10481_v38 = vcombine.high %v3812_v56, %v3816_v15  ;;  %v10480_v62 = vcombine.low %v3812_v56, %v3816_v15  ;;  %v10482_v11 = vcombine.low %v3813_v6, %v3817_v43  ;;  %v3841_v56 = vld [vmem:[#allocation4 + $0x638] sm:$0xff]  ;;  %v11609_v15 = vld [vmem:[%s14509_s1 + $0x90] ss:$24 sps:$4 sm:$0xff]  }
 0x348   :  { %6580 = vmatpush1.bf16.msra.mxu0 %v10448_v51  ;;  %6799 = vmatpush1.bf16.msra.mxu1 %v10450_v19  ;;  %v10483_v51 = vcombine.high %v3813_v6, %v3817_v43  ;;  %v3820_v19 = vld [vmem:[#allocation4 + $0x590] sm:$0xff] }
 0x349   :  { %6581 = vmatprep.subr.bf16.mxu0 %v10457_v47  ;;  %6800 = vmatprep.subr.bf16.mxu1 %v10459_v63  ;;  %v3824_v47 = vld [vmem:[#allocation4 + $0x5b0] sm:$0xff]  ;;  %v3821_v63 = vld [vmem:[#allocation4 + $0x598] sm:$0xff] }
 0x34a   :  { %v10489_v2 = vcombine.high %v3820_v19, %v3824_v47  ;;  %v10488_v60 = vcombine.low %v3820_v19, %v3824_v47  ;;  %v10490_v42 = vcombine.low %v3821_v63, %v3825_v49  ;;  %v3849_v19 = vld [vmem:[#allocation4 + $0x678] sm:$0xff]  ;;  %v11610_v47 = vld [vmem:[%s14509_s1 + $0xc] ss:$24 sps:$4 sm:$0xff]  }
 0x34b   :  { %6547 = vmatmul.mubr.bf16.gmra.mrb[52].mxu0 %v11605_v50  ;;  %6766 = vmatmul.mubr.bf16.gmra.mrb[52].mxu1 %v11605_v50 }
 0x34c   :  { %6582 = vmatpush1.bf16.msra.mxu0 %v10456_v46  ;;  %6801 = vmatpush1.bf16.msra.mxu1 %v10458_v58  ;;  %v10491_v46 = vcombine.high %v3821_v63, %v3825_v49  ;;  %v3828_v58 = vld [vmem:[#allocation4 + $0x5d0] sm:$0xff] }
 0x34d   :  { %6583 = vmatprep.subr.bf16.mxu0 %v10465_v35  ;;  %6802 = vmatprep.subr.bf16.mxu1 %v10467_v10  ;;  %v3832_v35 = vld [vmem:[#allocation4 + $0x5f0] sm:$0xff]  ;;  %v3829_v10 = vld [vmem:[#allocation4 + $0x5d8] sm:$0xff] }
 0x34e   :  { %6556 = vmatprep.mubr.bf16.mxu0 %v11606_v57  ;;  %6775 = vmatprep.mubr.bf16.mxu1 %v11606_v57  ;;  %v10497_v50 = vcombine.high %v3828_v58, %v3832_v35  ;;  %v10496_v6 = vcombine.low %v3828_v58, %v3832_v35  ;;  %v10498_v43 = vcombine.low %v3829_v10, %v3833_v26  ;;  %v3857_v58 = vld [vmem:[#allocation4 + $0x6b8] sm:$0xff] }
 0x350   :  { %6584 = vmatpush1.bf16.msra.mxu0 %v10464_v31  ;;  %6803 = vmatpush1.bf16.msra.mxu1 %v10466_v34  ;;  %v10499_v31 = vcombine.high %v3829_v10, %v3833_v26  ;;  %v3836_v34 = vld [vmem:[#allocation4 + $0x610] sm:$0xff] }
 0x351   :  { %6585 = vmatprep.subr.bf16.mxu0 %v10473_v53  ;;  %6804 = vmatprep.subr.bf16.mxu1 %v10475_v61  ;;  %v3840_v53 = vld [vmem:[#allocation4 + $0x630] sm:$0xff]  ;;  %v3837_v61 = vld [vmem:[#allocation4 + $0x618] sm:$0xff] }
 0x352   :  { %v10505_v57 = vcombine.high %v3836_v34, %v3840_v53  ;;  %v10504_v63 = vcombine.low %v3836_v34, %v3840_v53  ;;  %v10506_v49 = vcombine.low %v3837_v61, %v3841_v56 }
 0x353   :  { %6557 = vmatmul.mubr.bf16.gmra.mrb[56].mxu0 %v11607_v3  ;;  %6776 = vmatmul.mubr.bf16.gmra.mrb[56].mxu1 %v11607_v3 }
 0x354   :  { %6586 = vmatpush1.bf16.msra.mxu0 %v10472_v54  ;;  %6805 = vmatpush1.bf16.msra.mxu1 %v10474_v55  ;;  %v10507_v54 = vcombine.high %v3837_v61, %v3841_v56  ;;  %v3844_v55 = vld [vmem:[#allocation4 + $0x650] sm:$0xff] }
 0x355   :  { %6587 = vmatprep.subr.bf16.mxu0 %v10481_v38  ;;  %6806 = vmatprep.subr.bf16.mxu1 %v10483_v51  ;;  %v3848_v38 = vld [vmem:[#allocation4 + $0x670] sm:$0xff]  ;;  %v3845_v51 = vld [vmem:[#allocation4 + $0x658] sm:$0xff] }
 0x356   :  { %6566 = vmatprep.mubr.bf16.mxu0 %v11608_v14  ;;  %6785 = vmatprep.mubr.bf16.mxu1 %v11608_v14  ;;  %v10513_v3 = vcombine.high %v3844_v55, %v3848_v38  ;;  %v10512_v35 = vcombine.low %v3844_v55, %v3848_v38  ;;  %v10514_v10 = vcombine.low %v3845_v51, %v3849_v19 }
 0x358   :  { %6588 = vmatpush1.bf16.msra.mxu0 %v10480_v62  ;;  %6807 = vmatpush1.bf16.msra.mxu1 %v10482_v11  ;;  %v10515_v62 = vcombine.high %v3845_v51, %v3849_v19  ;;  %v3852_v11 = vld [vmem:[#allocation4 + $0x690] sm:$0xff] }
 0x359   :  { %6589 = vmatprep.subr.bf16.mxu0 %v10489_v2  ;;  %6808 = vmatprep.subr.bf16.mxu1 %v10491_v46  ;;  %v3856_v2 = vld [vmem:[#allocation4 + $0x6b0] sm:$0xff]  ;;  %v3853_v46 = vld [vmem:[#allocation4 + $0x698] sm:$0xff] }
 0x35a   :  { %v10521_v26 = vcombine.high %v3852_v11, %v3856_v2  ;;  %v10523_v14 = vcombine.high %v3853_v46, %v3857_v58  ;;  %v10520_v34 = vcombine.low %v3852_v11, %v3856_v2  ;;  %v10522_v53 = vcombine.low %v3853_v46, %v3857_v58  ;;  %v3876_v19 = vld [vmem:[#allocation4 + $0x750] sm:$0xff] }
 0x35b   :  { %6567 = vmatmul.mubr.bf16.gmra.mrb[60].mxu0 %v11609_v15  ;;  %6786 = vmatmul.mubr.bf16.gmra.mrb[60].mxu1 %v11609_v15  ;;  %v3868_v15 = vld [vmem:[#allocation4 + $0x710] sm:$0xff] }
 0x35c   :  { %6590 = vmatpush1.bf16.msra.mxu0 %v10488_v60  ;;  %6809 = vmatpush1.bf16.msra.mxu1 %v10490_v42  ;;  %v3860_v60 = vld [vmem:[#allocation4 + $0x6d0] sm:$0xff] }
 0x35d   :  { %6591 = vmatprep.subr.bf16.mxu0 %v10497_v50  ;;  %6810 = vmatprep.subr.bf16.mxu1 %v10499_v31  ;;  %v3864_v42 = vld [vmem:[#allocation4 + $0x6f0] sm:$0xff]  ;;  %v3861_v50 = vld [vmem:[#allocation4 + $0x6d8] sm:$0xff] }
 0x35e   :  { %6609 = vmatprep.mubr.bf16.mxu0 %v11610_v47  ;;  %6828 = vmatprep.mubr.bf16.mxu1 %v11610_v47  ;;  %v3865_v31 = vld [vmem:[#allocation4 + $0x6f8] sm:$0xff]  ;;  %v10529_v61 = vcombine.high %v3860_v60, %v3864_v42  ;;  %v3880_v47 = vld [vmem:[#allocation4 + $0x770] sm:$0xff] }
 0x35f   :  { %v10531_v56 = vcombine.high %v3861_v50, %v3865_v31  ;;  %v10530_v55 = vcombine.low %v3861_v50, %v3865_v31  ;;  %v10545_v11 = vcombine.high %v3876_v19, %v3880_v47  ;;  %v3884_v46 = vld [vmem:[#allocation4 + $0x790] sm:$0xff] }
 0x360   :  { %6592 = vmatpush1.bf16.msra.mxu0 %v10496_v6  ;;  %6811 = vmatpush1.bf16.msra.mxu1 %v10498_v43  ;;  %v3872_v6 = vld [vmem:[#allocation4 + $0x730] sm:$0xff]  ;;  %v3869_v43 = vld [vmem:[#allocation4 + $0x718] sm:$0xff] }
 0x361   :  { %6593 = vmatprep.subr.bf16.mxu0 %v10505_v57  ;;  %6812 = vmatprep.subr.bf16.mxu1 %v10507_v54  ;;  %v3873_v57 = vld [vmem:[#allocation4 + $0x738] sm:$0xff]  ;;  %v10528_v54 = vcombine.low %v3860_v60, %v3864_v42  ;;  %v10537_v38 = vcombine.high %v3868_v15, %v3872_v6  ;;  %v3888_v58 = vld [vmem:[#allocation4 + $0x7b0] sm:$0xff] }
 0x362   :  { %v10539_v51 = vcombine.high %v3869_v43, %v3873_v57  ;;  %v10553_v60 = vcombine.high %v3884_v46, %v3888_v58  ;;  %v3892_v50 = vld [vmem:[#allocation4 + $0x7d0] sm:$0xff] }
 0x363   :  { %v3896_v31 = vld [vmem:[#allocation4 + $0x7f0] sm:$0xff] }
 0x364   :  { %6594 = vmatpush1.bf16.msra.mxu0 %v10504_v63  ;;  %6813 = vmatpush1.bf16.msra.mxu1 %v10506_v49  ;;  %v3877_v63 = vld [vmem:[#allocation4 + $0x758] sm:$0xff] }
 0x365   :  { %6595 = vmatprep.subr.bf16.mxu0 %v10513_v3  ;;  %6814 = vmatprep.subr.bf16.mxu1 %v10515_v62  ;;  %v3881_v49 = vld [vmem:[#allocation4 + $0x778] sm:$0xff]  ;;  %v10536_v3 = vcombine.low %v3868_v15, %v3872_v6  ;;  %v10538_v62 = vcombine.low %v3869_v43, %v3873_v57  ;;  %v10561_v15 = vcombine.high %v3892_v50, %v3896_v31  ;;  %v3900_v43 = vld [vmem:[#allocation4 + $0x810] sm:$0xff] }
 0x366   :  { %v10547_v2 = vcombine.high %v3877_v63, %v3881_v49  ;;  %v3904_v57 = vld [vmem:[#allocation4 + $0x830] sm:$0xff] }
 0x368   :  { %6596 = vmatpush1.bf16.msra.mxu0 %v10512_v35  ;;  %6815 = vmatpush1.bf16.msra.mxu1 %v10514_v10  ;;  %v3885_v35 = vld [vmem:[#allocation4 + $0x798] sm:$0xff] }
 0x369   :  { %6597 = vmatprep.subr.bf16.mxu0 %v10521_v26  ;;  %6816 = vmatprep.subr.bf16.mxu1 %v10523_v14  ;;  %v3889_v10 = vld [vmem:[#allocation4 + $0x7b8] sm:$0xff]  ;;  %v10544_v26 = vcombine.low %v3876_v19, %v3880_v47  ;;  %v10546_v14 = vcombine.low %v3877_v63, %v3881_v49  ;;  %v10569_v19 = vcombine.high %v3900_v43, %v3904_v57  ;;  %v3908_v63 = vld [vmem:[#allocation4 + $0x850] sm:$0xff] }
 0x36a   :  { %v10555_v42 = vcombine.high %v3885_v35, %v3889_v10  ;;  %v3912_v49 = vld [vmem:[#allocation4 + $0x870] sm:$0xff] }
 0x36c   :  { %6598 = vmatpush1.bf16.msra.mxu0 %v10520_v34  ;;  %6817 = vmatpush1.bf16.msra.mxu1 %v10522_v53  ;;  %v3893_v34 = vld [vmem:[#allocation4 + $0x7d8] sm:$0xff] }
 0x36d   :  { %6599 = vmatprep.subr.bf16.mxu0 %v10529_v61  ;;  %6818 = vmatprep.subr.bf16.mxu1 %v10531_v56  ;;  %v3897_v53 = vld [vmem:[#allocation4 + $0x7f8] sm:$0xff]  ;;  %v10552_v61 = vcombine.low %v3884_v46, %v3888_v58  ;;  %v10554_v56 = vcombine.low %v3885_v35, %v3889_v10  ;;  %v10577_v46 = vcombine.high %v3908_v63, %v3912_v49  ;;  %v3916_v35 = vld [vmem:[#allocation4 + $0x890] sm:$0xff] }
 0x36e   :  { %v10563_v6 = vcombine.high %v3893_v34, %v3897_v53  ;;  %v3920_v10 = vld [vmem:[#allocation4 + $0x8b0] sm:$0xff] }
 0x370   :  { %6600 = vmatpush1.bf16.msra.mxu0 %v10528_v54  ;;  %6819 = vmatpush1.bf16.msra.mxu1 %v10530_v55  ;;  %v3901_v54 = vld [vmem:[#allocation4 + $0x818] sm:$0xff] }
 0x371   :  { %6601 = vmatprep.subr.bf16.mxu0 %v10537_v38  ;;  %6820 = vmatprep.subr.bf16.mxu1 %v10539_v51  ;;  %v3905_v55 = vld [vmem:[#allocation4 + $0x838] sm:$0xff]  ;;  %v10560_v38 = vcombine.low %v3892_v50, %v3896_v31  ;;  %v10562_v51 = vcombine.low %v3893_v34, %v3897_v53  ;;  %v10585_v31 = vcombine.high %v3916_v35, %v3920_v10  ;;  %v3924_v53 = vld [vmem:[#allocation4 + $0x8d0] sm:$0xff] }
 0x372   :  { %v10571_v47 = vcombine.high %v3901_v54, %v3905_v55 }
 0x374   :  { %6602 = vmatpush1.bf16.msra.mxu0 %v10536_v3  ;;  %6821 = vmatpush1.bf16.msra.mxu1 %v10538_v62  ;;  %v3909_v3 = vld [vmem:[#allocation4 + $0x858] sm:$0xff] }
 0x375   :  { %6603 = vmatprep.subr.bf16.mxu0 %v10545_v11  ;;  %6822 = vmatprep.subr.bf16.mxu1 %v10547_v2  ;;  %v3913_v62 = vld [vmem:[#allocation4 + $0x878] sm:$0xff]  ;;  %v10568_v11 = vcombine.low %v3900_v43, %v3904_v57  ;;  %v10570_v2 = vcombine.low %v3901_v54, %v3905_v55  ;;  %v10584_v43 = vcombine.low %v3916_v35, %v3920_v10  ;;  %v11614_v10 = vld [vmem:[%s14509_s1 + $0x6c] ss:$24 sps:$4 sm:$0xff]  }
 0x376   :  { %v10579_v58 = vcombine.high %v3909_v3, %v3913_v62  ;;  %v10578_v50 = vcombine.low %v3909_v3, %v3913_v62  ;;  %v3945_v35 = vld [vmem:[#allocation4 + $0x978] sm:$0xff] }
 0x378   :  { %6604 = vmatpush1.bf16.msra.mxu0 %v10544_v26  ;;  %6823 = vmatpush1.bf16.msra.mxu1 %v10546_v14  ;;  %v3917_v26 = vld [vmem:[#allocation4 + $0x898] sm:$0xff] }
 0x379   :  { %6605 = vmatprep.subr.bf16.mxu0 %v10553_v60  ;;  %6824 = vmatprep.subr.bf16.mxu1 %v10555_v42  ;;  %v3921_v14 = vld [vmem:[#allocation4 + $0x8b8] sm:$0xff]  ;;  %v11611_v60 = vld [vmem:[%s14509_s1 + $0x8] ss:$24 sps:$4 sm:$0xff]   ;;  %v10576_v42 = vcombine.low %v3908_v63, %v3912_v49 }
 0x37a   :  { %v10587_v34 = vcombine.high %v3917_v26, %v3921_v14  ;;  %v10586_v57 = vcombine.low %v3917_v26, %v3921_v14  ;;  %v11613_v63 = vld [vmem:[%s14509_s1 + $0x38] ss:$24 sps:$4 sm:$0xff]  }
 0x37c   :  { %6606 = vmatpush1.bf16.msra.mxu0 %v10552_v61  ;;  %6825 = vmatpush1.bf16.msra.mxu1 %v10554_v56  ;;  %v3928_v61 = vld [vmem:[#allocation4 + $0x8f0] sm:$0xff]  ;;  %v3925_v56 = vld [vmem:[#allocation4 + $0x8d8] sm:$0xff] }
 0x37d   :  { %6607 = vmatprep.subr.bf16.mxu0 %v10561_v15  ;;  %6826 = vmatprep.subr.bf16.mxu1 %v10563_v6  ;;  %v3929_v15 = vld [vmem:[#allocation4 + $0x8f8] sm:$0xff]  ;;  %v10593_v54 = vcombine.high %v3924_v53, %v3928_v61  ;;  %v10592_v49 = vcombine.low %v3924_v53, %v3928_v61  ;;  %v11615_v61 = vld [vmem:[%s14509_s1 + $0x68] ss:$24 sps:$4 sm:$0xff]  }
 0x37e   :  { %v11612_v6 = vld [vmem:[%s14509_s1 + $0x3c] ss:$24 sps:$4 sm:$0xff]   ;;  %v10595_v55 = vcombine.high %v3925_v56, %v3929_v15  ;;  %v10594_v3 = vcombine.low %v3925_v56, %v3929_v15 }
 0x37f   :  { %v3953_v53 = vld [vmem:[#allocation4 + $0x9b8] sm:$0xff] }
 0x380   :  { %6608 = vmatpush1.bf16.msra.mxu0 %v10560_v38  ;;  %6827 = vmatpush1.bf16.msra.mxu1 %v10562_v51  ;;  %v3932_v38 = vld [vmem:[#allocation4 + $0x910] sm:$0xff] }
 0x381   :  { %6650 = vmatprep.subr.bf16.mxu0 %v10569_v19  ;;  %6869 = vmatprep.subr.bf16.mxu1 %v10571_v47  ;;  %v3936_v51 = vld [vmem:[#allocation4 + $0x930] sm:$0xff]  ;;  %v3933_v19 = vld [vmem:[#allocation4 + $0x918] sm:$0xff] }
 0x382   :  { %v3937_v47 = vld [vmem:[#allocation4 + $0x938] sm:$0xff]  ;;  %v10601_v62 = vcombine.high %v3932_v38, %v3936_v51  ;;  %v10600_v26 = vcombine.low %v3932_v38, %v3936_v51 }
 0x383   :  { %6610 = vmatmul.mubr.bf16.vlgmr.msra.gmra.mrb[48].mxu0 %v11611_v60  ;;  %6829 = vmatmul.mubr.bf16.vlgmr.msra.gmra.mrb[48].mxu1 %v11611_v60  ;;  %v10602_v14 = vcombine.low %v3933_v19, %v3937_v47  ;;  %v3961_v38 = vld [vmem:[#allocation4 + $0x9f8] sm:$0xff] }
 0x384   :  { %6651 = vmatpush1.bf16.msra.mxu0 %v10568_v11  ;;  %6870 = vmatpush1.bf16.msra.mxu1 %v10570_v2  ;;  %v10603_v11 = vcombine.high %v3933_v19, %v3937_v47  ;;  %v3940_v2 = vld [vmem:[#allocation4 + $0x950] sm:$0xff] }
 0x385   :  { %6652 = vmatprep.subr.bf16.mxu0 %v10577_v46  ;;  %6871 = vmatprep.subr.bf16.mxu1 %v10579_v58  ;;  %v3944_v46 = vld [vmem:[#allocation4 + $0x970] sm:$0xff]  ;;  %v3941_v58 = vld [vmem:[#allocation4 + $0x958] sm:$0xff] }
 0x386   :  { %6619 = vmatprep.mubr.bf16.mxu0 %v11612_v6  ;;  %6838 = vmatprep.mubr.bf16.mxu1 %v11612_v6  ;;  %v10609_v60 = vcombine.high %v3940_v2, %v3944_v46  ;;  %v10608_v56 = vcombine.low %v3940_v2, %v3944_v46  ;;  %v10610_v15 = vcombine.low %v3941_v58, %v3945_v35  ;;  %v11616_v51 = vld [vmem:[%s14509_s1 + $0x9c] ss:$24 sps:$4 sm:$0xff]   ;;  %v11617_v46 = vld [vmem:[%s14509_s1 + $0x98] ss:$24 sps:$4 sm:$0xff]  }
 0x387   :  { %v3969_v2 = vld [vmem:[#allocation4 + $0xa38] sm:$0xff] }
 0x388   :  { %6653 = vmatpush1.bf16.msra.mxu0 %v10576_v42  ;;  %6872 = vmatpush1.bf16.msra.mxu1 %v10578_v50  ;;  %v10611_v42 = vcombine.high %v3941_v58, %v3945_v35  ;;  %v3948_v50 = vld [vmem:[#allocation4 + $0x990] sm:$0xff] }
 0x389   :  { %6654 = vmatprep.subr.bf16.mxu0 %v10585_v31  ;;  %6873 = vmatprep.subr.bf16.mxu1 %v10587_v34  ;;  %v3952_v31 = vld [vmem:[#allocation4 + $0x9b0] sm:$0xff]  ;;  %v3949_v34 = vld [vmem:[#allocation4 + $0x998] sm:$0xff] }
 0x38a   :  { %v10617_v6 = vcombine.high %v3948_v50, %v3952_v31  ;;  %v10616_v19 = vcombine.low %v3948_v50, %v3952_v31  ;;  %v10618_v47 = vcombine.low %v3949_v34, %v3953_v53  ;;  %v3977_v50 = vld [vmem:[#allocation4 + $0xa78] sm:$0xff]  ;;  %v11618_v31 = vld [vmem:[%s14509_s1 + $0x14] ss:$24 sps:$4 sm:$0xff]  }
 0x38b   :  { %6620 = vmatmul.mubr.bf16.gmra.mrb[52].mxu0 %v11613_v63  ;;  %6839 = vmatmul.mubr.bf16.gmra.mrb[52].mxu1 %v11613_v63 }
 0x38c   :  { %6655 = vmatpush1.bf16.msra.mxu0 %v10584_v43  ;;  %6874 = vmatpush1.bf16.msra.mxu1 %v10586_v57  ;;  %v10619_v43 = vcombine.high %v3949_v34, %v3953_v53  ;;  %v3956_v57 = vld [vmem:[#allocation4 + $0x9d0] sm:$0xff] }
 0x38d   :  { %6656 = vmatprep.subr.bf16.mxu0 %v10593_v54  ;;  %6875 = vmatprep.subr.bf16.mxu1 %v10595_v55  ;;  %v3960_v54 = vld [vmem:[#allocation4 + $0x9f0] sm:$0xff]  ;;  %v3957_v55 = vld [vmem:[#allocation4 + $0x9d8] sm:$0xff] }
 0x38e   :  { %6629 = vmatprep.mubr.bf16.mxu0 %v11614_v10  ;;  %6848 = vmatprep.mubr.bf16.mxu1 %v11614_v10  ;;  %v10625_v63 = vcombine.high %v3956_v57, %v3960_v54  ;;  %v10624_v58 = vcombine.low %v3956_v57, %v3960_v54  ;;  %v10626_v35 = vcombine.low %v3957_v55, %v3961_v38  ;;  %v3985_v57 = vld [vmem:[#allocation4 + $0xab8] sm:$0xff] }
 0x390   :  { %6657 = vmatpush1.bf16.msra.mxu0 %v10592_v49  ;;  %6876 = vmatpush1.bf16.msra.mxu1 %v10594_v3  ;;  %v10627_v49 = vcombine.high %v3957_v55, %v3961_v38  ;;  %v3964_v3 = vld [vmem:[#allocation4 + $0xa10] sm:$0xff] }
 0x391   :  { %6658 = vmatprep.subr.bf16.mxu0 %v10601_v62  ;;  %6877 = vmatprep.subr.bf16.mxu1 %v10603_v11  ;;  %v3968_v62 = vld [vmem:[#allocation4 + $0xa30] sm:$0xff]  ;;  %v3965_v11 = vld [vmem:[#allocation4 + $0xa18] sm:$0xff] }
 0x392   :  { %v10633_v10 = vcombine.high %v3964_v3, %v3968_v62  ;;  %v10632_v34 = vcombine.low %v3964_v3, %v3968_v62  ;;  %v10634_v53 = vcombine.low %v3965_v11, %v3969_v2 }
 0x393   :  { %6630 = vmatmul.mubr.bf16.gmra.mrb[56].mxu0 %v11615_v61  ;;  %6849 = vmatmul.mubr.bf16.gmra.mrb[56].mxu1 %v11615_v61 }
 0x394   :  { %6659 = vmatpush1.bf16.msra.mxu0 %v10600_v26  ;;  %6878 = vmatpush1.bf16.msra.mxu1 %v10602_v14  ;;  %v10635_v26 = vcombine.high %v3965_v11, %v3969_v2  ;;  %v3972_v14 = vld [vmem:[#allocation4 + $0xa50] sm:$0xff] }
 0x395   :  { %6660 = vmatprep.subr.bf16.mxu0 %v10609_v60  ;;  %6879 = vmatprep.subr.bf16.mxu1 %v10611_v42  ;;  %v3976_v60 = vld [vmem:[#allocation4 + $0xa70] sm:$0xff]  ;;  %v3973_v42 = vld [vmem:[#allocation4 + $0xa58] sm:$0xff] }
 0x396   :  { %6639 = vmatprep.mubr.bf16.mxu0 %v11616_v51  ;;  %6858 = vmatprep.mubr.bf16.mxu1 %v11616_v51  ;;  %v10641_v61 = vcombine.high %v3972_v14, %v3976_v60  ;;  %v10640_v54 = vcombine.low %v3972_v14, %v3976_v60  ;;  %v10642_v55 = vcombine.low %v3973_v42, %v3977_v50 }
 0x398   :  { %6661 = vmatpush1.bf16.msra.mxu0 %v10608_v56  ;;  %6880 = vmatpush1.bf16.msra.mxu1 %v10610_v15  ;;  %v10643_v56 = vcombine.high %v3973_v42, %v3977_v50  ;;  %v3980_v15 = vld [vmem:[#allocation4 + $0xa90] sm:$0xff] }
 0x399   :  { %6662 = vmatprep.subr.bf16.mxu0 %v10617_v6  ;;  %6881 = vmatprep.subr.bf16.mxu1 %v10619_v43  ;;  %v3984_v6 = vld [vmem:[#allocation4 + $0xab0] sm:$0xff]  ;;  %v3981_v43 = vld [vmem:[#allocation4 + $0xa98] sm:$0xff] }
 0x39a   :  { %v10649_v38 = vcombine.high %v3980_v15, %v3984_v6  ;;  %v10651_v51 = vcombine.high %v3981_v43, %v3985_v57  ;;  %v10648_v3 = vcombine.low %v3980_v15, %v3984_v6  ;;  %v10650_v62 = vcombine.low %v3981_v43, %v3985_v57  ;;  %v4004_v50 = vld [vmem:[#allocation4 + $0xb50] sm:$0xff] }
 0x39b   :  { %6640 = vmatmul.mubr.bf16.gmra.mrb[60].mxu0 %v11617_v46  ;;  %6859 = vmatmul.mubr.bf16.gmra.mrb[60].mxu1 %v11617_v46  ;;  %v3996_v46 = vld [vmem:[#allocation4 + $0xb10] sm:$0xff] }
 0x39c   :  { %6663 = vmatpush1.bf16.msra.mxu0 %v10616_v19  ;;  %6882 = vmatpush1.bf16.msra.mxu1 %v10618_v47  ;;  %v3988_v19 = vld [vmem:[#allocation4 + $0xad0] sm:$0xff] }
 0x39d   :  { %6664 = vmatprep.subr.bf16.mxu0 %v10625_v63  ;;  %6883 = vmatprep.subr.bf16.mxu1 %v10627_v49  ;;  %v3992_v47 = vld [vmem:[#allocation4 + $0xaf0] sm:$0xff]  ;;  %v3989_v63 = vld [vmem:[#allocation4 + $0xad8] sm:$0xff] }
 0x39e   :  { %6682 = vmatprep.mubr.bf16.mxu0 %v11618_v31  ;;  %6901 = vmatprep.mubr.bf16.mxu1 %v11618_v31  ;;  %v3993_v49 = vld [vmem:[#allocation4 + $0xaf8] sm:$0xff]  ;;  %v10657_v11 = vcombine.high %v3988_v19, %v3992_v47  ;;  %v4008_v31 = vld [vmem:[#allocation4 + $0xb70] sm:$0xff] }
 0x39f   :  { %v10659_v2 = vcombine.high %v3989_v63, %v3993_v49  ;;  %v10658_v14 = vcombine.low %v3989_v63, %v3993_v49  ;;  %v10673_v15 = vcombine.high %v4004_v50, %v4008_v31  ;;  %v4012_v43 = vld [vmem:[#allocation4 + $0xb90] sm:$0xff] }
 0x3a0   :  { %6665 = vmatpush1.bf16.msra.mxu0 %v10624_v58  ;;  %6884 = vmatpush1.bf16.msra.mxu1 %v10626_v35  ;;  %v4000_v58 = vld [vmem:[#allocation4 + $0xb30] sm:$0xff]  ;;  %v3997_v35 = vld [vmem:[#allocation4 + $0xb18] sm:$0xff] }
 0x3a1   :  { %6666 = vmatprep.subr.bf16.mxu0 %v10633_v10  ;;  %6885 = vmatprep.subr.bf16.mxu1 %v10635_v26  ;;  %v4001_v10 = vld [vmem:[#allocation4 + $0xb38] sm:$0xff]  ;;  %v10656_v26 = vcombine.low %v3988_v19, %v3992_v47  ;;  %v10665_v60 = vcombine.high %v3996_v46, %v4000_v58  ;;  %v4016_v57 = vld [vmem:[#allocation4 + $0xbb0] sm:$0xff] }
 0x3a2   :  { %v10667_v42 = vcombine.high %v3997_v35, %v4001_v10  ;;  %v10681_v19 = vcombine.high %v4012_v43, %v4016_v57  ;;  %v4020_v63 = vld [vmem:[#allocation4 + $0xbd0] sm:$0xff] }
 0x3a3   :  { %v4024_v49 = vld [vmem:[#allocation4 + $0xbf0] sm:$0xff] }
 0x3a4   :  { %6667 = vmatpush1.bf16.msra.mxu0 %v10632_v34  ;;  %6886 = vmatpush1.bf16.msra.mxu1 %v10634_v53  ;;  %v4005_v34 = vld [vmem:[#allocation4 + $0xb58] sm:$0xff] }
 0x3a5   :  { %6668 = vmatprep.subr.bf16.mxu0 %v10641_v61  ;;  %6887 = vmatprep.subr.bf16.mxu1 %v10643_v56  ;;  %v4009_v53 = vld [vmem:[#allocation4 + $0xb78] sm:$0xff]  ;;  %v10664_v61 = vcombine.low %v3996_v46, %v4000_v58  ;;  %v10666_v56 = vcombine.low %v3997_v35, %v4001_v10  ;;  %v10689_v46 = vcombine.high %v4020_v63, %v4024_v49 }
 0x3a6   :  { %v10675_v6 = vcombine.high %v4005_v34, %v4009_v53  ;;  %v10688_v35 = vcombine.low %v4020_v63, %v4024_v49 }
 0x3a8   :  { %6669 = vmatpush1.bf16.msra.mxu0 %v10640_v54  ;;  %6888 = vmatpush1.bf16.msra.mxu1 %v10642_v55  ;;  %v4013_v54 = vld [vmem:[#allocation4 + $0xb98] sm:$0xff] }
 0x3a9   :  { %6670 = vmatprep.subr.bf16.mxu0 %v10649_v38  ;;  %6889 = vmatprep.subr.bf16.mxu1 %v10651_v51  ;;  %v4017_v55 = vld [vmem:[#allocation4 + $0xbb8] sm:$0xff]  ;;  %v10672_v38 = vcombine.low %v4004_v50, %v4008_v31  ;;  %v10674_v51 = vcombine.low %v4005_v34, %v4009_v53  ;;  %v11623_v50 = vld [vmem:[%s14509_s1 + $0x70] ss:$24 sps:$4 sm:$0xff]  }
 0x3aa   :  { %v10683_v47 = vcombine.high %v4013_v54, %v4017_v55  ;;  %v11624_v31 = vld [vmem:[%s14509_s1 + $0xa4] ss:$24 sps:$4 sm:$0xff]  }
 0x3ac   :  { %6671 = vmatpush1.bf16.msra.mxu0 %v10648_v3  ;;  %6890 = vmatpush1.bf16.msra.mxu1 %v10650_v62  ;;  %v4021_v3 = vld [vmem:[#allocation4 + $0xbd8] sm:$0xff] }
 0x3ad   :  { %6672 = vmatprep.subr.bf16.mxu0 %v10657_v11  ;;  %6891 = vmatprep.subr.bf16.mxu1 %v10659_v2  ;;  %v4025_v62 = vld [vmem:[#allocation4 + $0xbf8] sm:$0xff]  ;;  %v10680_v11 = vcombine.low %v4012_v43, %v4016_v57  ;;  %v10682_v2 = vcombine.low %v4013_v54, %v4017_v55 }
 0x3ae   :  { %v10691_v58 = vcombine.high %v4021_v3, %v4025_v62  ;;  %v10690_v10 = vcombine.low %v4021_v3, %v4025_v62 }
 0x3b0   :  { %6673 = vmatpush1.bf16.msra.mxu0 %v10656_v26  ;;  %6892 = vmatpush1.bf16.msra.mxu1 %v10658_v14  ;;  %v11619_v26 = vld [vmem:[%s14509_s1 + $0x10] ss:$24 sps:$4 sm:$0xff]   ;;  %v11620_v14 = vld [vmem:[%s14509_s1 + $0x44] ss:$24 sps:$4 sm:$0xff]  }
 0x3b1   :  { %6674 = vmatprep.subr.bf16.mxu0 %v10665_v60  ;;  %6893 = vmatprep.subr.bf16.mxu1 %v10667_v42  ;;  %v11621_v60 = vld [vmem:[%s14509_s1 + $0x40] ss:$24 sps:$4 sm:$0xff]   ;;  %v11622_v42 = vld [vmem:[%s14509_s1 + $0x74] ss:$24 sps:$4 sm:$0xff]  }
 0x3b4   :  { %6675 = vmatpush1.bf16.msra.mxu0 %v10664_v61  ;;  %6894 = vmatpush1.bf16.msra.mxu1 %v10666_v56 }
 0x3b5   :  { %6676 = vmatprep.subr.bf16.mxu0 %v10673_v15  ;;  %6895 = vmatprep.subr.bf16.mxu1 %v10675_v6 }
 0x3b8   :  { %6677 = vmatpush1.bf16.msra.mxu0 %v10672_v38  ;;  %6896 = vmatpush1.bf16.msra.mxu1 %v10674_v51 }
 0x3b9   :  { %6678 = vmatprep.subr.bf16.mxu0 %v10681_v19  ;;  %6897 = vmatprep.subr.bf16.mxu1 %v10683_v47 }
 0x3bc   :  { %6679 = vmatpush1.bf16.msra.mxu0 %v10680_v11  ;;  %6898 = vmatpush1.bf16.msra.mxu1 %v10682_v2 }
 0x3bd   :  { %6680 = vmatprep.subr.bf16.mxu0 %v10689_v46  ;;  %6899 = vmatprep.subr.bf16.mxu1 %v10691_v58 }
 0x3c0   :  { %6681 = vmatpush1.bf16.msra.mxu0 %v10688_v35  ;;  %6900 = vmatpush1.bf16.msra.mxu1 %v10690_v10 }
 0x3c3   :  { %6683 = vmatmul.mubr.bf16.vlgmr.msra.gmra.mrb[48].mxu0 %v11619_v26  ;;  %6902 = vmatmul.mubr.bf16.vlgmr.msra.gmra.mrb[48].mxu1 %v11619_v26  ;;  %v11625_v26 = vld [vmem:[%s14509_s1 + $0xa0] ss:$24 sps:$4 sm:$0xff]   ;;  %s13254_s1 = smov 0  }
 0x3c4   :  { %6692 = vmatprep.mubr.bf16.mxu0 %v11620_v14  ;;  %6911 = vmatprep.mubr.bf16.mxu1 %v11620_v14 }
 0x3cb   :  { %6693 = vmatmul.mubr.bf16.gmra.mrb[52].mxu0 %v11621_v60  ;;  %6912 = vmatmul.mubr.bf16.gmra.mrb[52].mxu1 %v11621_v60 }
 0x3cc   :  { %6702 = vmatprep.mubr.bf16.mxu0 %v11622_v42  ;;  %6921 = vmatprep.mubr.bf16.mxu1 %v11622_v42 }
 0x3d3   :  { %6703 = vmatmul.mubr.bf16.gmra.mrb[56].mxu0 %v11623_v50  ;;  %6922 = vmatmul.mubr.bf16.gmra.mrb[56].mxu1 %v11623_v50 }
 0x3d4   :  { %6712 = vmatprep.mubr.bf16.mxu0 %v11624_v31  ;;  %6931 = vmatprep.mubr.bf16.mxu1 %v11624_v31 }
 0x3d5   :  { %v6246_v34 = vpop.f32.mrb[32].mxu0 }
 0x3d6   :  { %v6465_v53 = vpop.f32.mrb[32].mxu1  ;;  %v11102_v61 = vadd.f32 %v6246_v34, %v12728_v22  ;;  %v6248_v15 = vpop.f32.mrb[33].mxu0 }
 0x3d7   :  { %v11118_v56 = vadd.f32 %v6465_v53, %v12730_v59  ;;  %v6467_v6 = vpop.f32.mrb[33].mxu1  ;;  %v11103_v43 = vadd.f32 %v6248_v15, %v12732_v18  ;;  %v6250_v54 = vpop.f32.mrb[34].mxu0 }
 0x3d8   :  { %v11119_v57 = vadd.f32 %v6467_v6, %v12738_v27  ;;  %v6469_v55 = vpop.f32.mrb[34].mxu1  ;;  %v6942_v38 = vpack.c.bf16 %v11102_v61, %v11102_v61  ;;  %v11104_v19 = vadd.f32 %v6250_v54, %v12728_v22  ;;  %v6252_v63 = vpop.f32.mrb[35].mxu0 }
 0x3d9   :  { %v6944_v51 = vpack.c.bf16 %v11118_v56, %v11118_v56  ;;  %v11120_v47 = vadd.f32 %v6469_v55, %v12730_v59  ;;  %v6471_v49 = vpop.f32.mrb[35].mxu1  ;;  %v6943_v3 = vpack.c.bf16 %v11103_v43, %v11103_v43  ;;  %v11105_v11 = vadd.f32 %v6252_v63, %v12732_v18 }
 0x3da   :  { %v6945_v62 = vpack.c.bf16 %v11119_v57, %v11119_v57  ;;  %v11121_v2 = vadd.f32 %v6471_v49, %v12738_v27  ;;  %v7070_v46 = vrot.slane %v6942_v38, 4  ;;  %v6950_v35 = vpack.c.bf16 %v11104_v19, %v11104_v19 }
 0x3db   :  { %v7072_v58 = vrot.slane %v6944_v51, 4  ;;  %v6952_v10 = vpack.c.bf16 %v11120_v47, %v11120_v47  ;;  %6713 = vmatmul.mubr.bf16.gmra.mrb[60].mxu0 %v11625_v26  ;;  %6932 = vmatmul.mubr.bf16.gmra.mrb[60].mxu1 %v11625_v26  ;;  %v7071_v14 = vrot.slane %v6943_v3, 4  ;;  %v6951_v42 = vpack.c.bf16 %v11105_v11, %v11105_v11 }
 0x3dc   :  { %v7073_v60 = vrot.slane %v6945_v62, 4  ;;  %v6953_v50 = vpack.c.bf16 %v11121_v2, %v11121_v2  ;;  %7198 = vst [vmem:[#allocation2] sm:$0xf0] %v7070_v46  ;;  %v7078_v31 = vrot.slane %v6950_v35, 4 }
 0x3dd   :  { %7200 = vst [vmem:[#allocation2 + $0x10] sm:$0xf0] %v7072_v58  ;;  %v7080_v34 = vrot.slane %v6952_v10, 4  ;;  %7199 = vst [vmem:[#allocation2 + $0x8] sm:$0xf0] %v7071_v14  ;;  %v7079_v53 = vrot.slane %v6951_v42, 4 }
 0x3de   :  { %7201 = vst [vmem:[#allocation2 + $0x18] sm:$0xf0] %v7073_v60  ;;  %v7081_v61 = vrot.slane %v6953_v50, 4  ;;  %v6256_v56 = vpop.f32.mrb[36].mxu0  ;;  %v6475_v15 = vpop.f32.mrb[36].mxu1 }
 0x3df   :  { %7206 = vst [vmem:[#allocation2 + $0x40] sm:$0xf0] %v7078_v31  ;;  %7208 = vst [vmem:[#allocation2 + $0x50] sm:$0xf0] %v7080_v34  ;;  %v11106_v6 = vadd.f32 %v6256_v56, %v12728_v22  ;;  %v11122_v43 = vadd.f32 %v6475_v15, %v12730_v59  ;;  %v6258_v57 = vpop.f32.mrb[37].mxu0  ;;  %v6477_v54 = vpop.f32.mrb[37].mxu1 }
 0x3e0   :  { %7207 = vst [vmem:[#allocation2 + $0x48] sm:$0xf0] %v7079_v53  ;;  %7209 = vst [vmem:[#allocation2 + $0x58] sm:$0xf0] %v7081_v61  ;;  %v11107_v55 = vadd.f32 %v6258_v57, %v12732_v18  ;;  %v11123_v38 = vadd.f32 %v6477_v54, %v12738_v27  ;;  %v6260_v51 = vpop.f32.mrb[38].mxu0  ;;  %v6479_v19 = vpop.f32.mrb[38].mxu1 }
 0x3e1   :  { %v6958_v47 = vpack.c.bf16 %v11106_v6, %v11106_v6  ;;  %v6960_v63 = vpack.c.bf16 %v11122_v43, %v11122_v43  ;;  %v11108_v49 = vadd.f32 %v6260_v51, %v12728_v22  ;;  %v11124_v3 = vadd.f32 %v6479_v19, %v12730_v59  ;;  %v6262_v62 = vpop.f32.mrb[39].mxu0  ;;  %v6481_v11 = vpop.f32.mrb[39].mxu1 }
 0x3e2   :  { %v6959_v2 = vpack.c.bf16 %v11107_v55, %v11107_v55  ;;  %v6961_v46 = vpack.c.bf16 %v11123_v38, %v11123_v38  ;;  %v11109_v58 = vadd.f32 %v6262_v62, %v12732_v18  ;;  %v11125_v35 = vadd.f32 %v6481_v11, %v12738_v27 }
 0x3e3   :  { %v7086_v10 = vrot.slane %v6958_v47, 4  ;;  %v7088_v26 = vrot.slane %v6960_v63, 4  ;;  %v6966_v14 = vpack.c.bf16 %v11108_v49, %v11108_v49  ;;  %v6968_v60 = vpack.c.bf16 %v11124_v3, %v11124_v3 }
 0x3e4   :  { %v7087_v42 = vrot.slane %v6959_v2, 4  ;;  %v7089_v50 = vrot.slane %v6961_v46, 4  ;;  %v6967_v31 = vpack.c.bf16 %v11109_v58, %v11109_v58  ;;  %v6969_v34 = vpack.c.bf16 %v11125_v35, %v11125_v35 }
 0x3e5   :  { %7214 = vst [vmem:[#allocation2 + $0x80] sm:$0xf0] %v7086_v10  ;;  %7216 = vst [vmem:[#allocation2 + $0x90] sm:$0xf0] %v7088_v26  ;;  %v7094_v53 = vrot.slane %v6966_v14, 4  ;;  %v7096_v61 = vrot.slane %v6968_v60, 4 }
 0x3e6   :  { %7215 = vst [vmem:[#allocation2 + $0x88] sm:$0xf0] %v7087_v42  ;;  %7217 = vst [vmem:[#allocation2 + $0x98] sm:$0xf0] %v7089_v50  ;;  %v7095_v56 = vrot.slane %v6967_v31, 4  ;;  %v7097_v15 = vrot.slane %v6969_v34, 4 }
 0x3e7   :  { %v6266_v6 = vpop.f32.mrb[40].mxu0  ;;  %v6485_v43 = vpop.f32.mrb[40].mxu1  ;;  %7222 = vst [vmem:[#allocation2 + $0xc0] sm:$0xf0] %v7094_v53  ;;  %7224 = vst [vmem:[#allocation2 + $0xd0] sm:$0xf0] %v7096_v61 }
 0x3e8   :  { %v11110_v57 = vadd.f32 %v6266_v6, %v12728_v22  ;;  %v11126_v54 = vadd.f32 %v6485_v43, %v12730_v59  ;;  %v6268_v55 = vpop.f32.mrb[41].mxu0  ;;  %v6487_v38 = vpop.f32.mrb[41].mxu1  ;;  %7223 = vst [vmem:[#allocation2 + $0xc8] sm:$0xf0] %v7095_v56  ;;  %7225 = vst [vmem:[#allocation2 + $0xd8] sm:$0xf0] %v7097_v15 }
 0x3e9   :  { %v11111_v51 = vadd.f32 %v6268_v55, %v12732_v18  ;;  %v11127_v19 = vadd.f32 %v6487_v38, %v12738_v27  ;;  %v6270_v47 = vpop.f32.mrb[42].mxu0  ;;  %v6489_v63 = vpop.f32.mrb[42].mxu1 }
 0x3ea   :  { %v6974_v49 = vpack.c.bf16 %v11110_v57, %v11110_v57  ;;  %v6976_v3 = vpack.c.bf16 %v11126_v54, %v11126_v54  ;;  %v11112_v62 = vadd.f32 %v6270_v47, %v12728_v22  ;;  %v11128_v11 = vadd.f32 %v6489_v63, %v12730_v59  ;;  %v6272_v2 = vpop.f32.mrb[43].mxu0  ;;  %v6491_v46 = vpop.f32.mrb[43].mxu1 }
 0x3eb   :  { %v6975_v58 = vpack.c.bf16 %v11111_v51, %v11111_v51  ;;  %v6977_v35 = vpack.c.bf16 %v11127_v19, %v11127_v19  ;;  %v11113_v10 = vadd.f32 %v6272_v2, %v12732_v18  ;;  %v11129_v26 = vadd.f32 %v6491_v46, %v12738_v27 }
 0x3ec   :  { %v7102_v14 = vrot.slane %v6974_v49, 4  ;;  %v7104_v60 = vrot.slane %v6976_v3, 4  ;;  %v6982_v42 = vpack.c.bf16 %v11112_v62, %v11112_v62  ;;  %v6984_v50 = vpack.c.bf16 %v11128_v11, %v11128_v11 }
 0x3ed   :  { %v7103_v31 = vrot.slane %v6975_v58, 4  ;;  %v7105_v34 = vrot.slane %v6977_v35, 4  ;;  %v6983_v53 = vpack.c.bf16 %v11113_v10, %v11113_v10  ;;  %v6985_v61 = vpack.c.bf16 %v11129_v26, %v11129_v26  ;;  %v6276_v57 = vpop.f32.mrb[44].mxu0 }
 0x3ee   :  { %7230 = vst [vmem:[#allocation2 + $0x100] sm:$0xf0] %v7102_v14  ;;  %7232 = vst [vmem:[#allocation2 + $0x110] sm:$0xf0] %v7104_v60  ;;  %v7110_v56 = vrot.slane %v6982_v42, 4  ;;  %v7112_v15 = vrot.slane %v6984_v50, 4  ;;  %v11114_v55 = vadd.f32 %v6276_v57, %v12728_v22 }
 0x3ef   :  { %7231 = vst [vmem:[#allocation2 + $0x108] sm:$0xf0] %v7103_v31  ;;  %7233 = vst [vmem:[#allocation2 + $0x118] sm:$0xf0] %v7105_v34  ;;  %v7111_v6 = vrot.slane %v6983_v53, 4  ;;  %v7113_v43 = vrot.slane %v6985_v61, 4 }
 0x3f0   :  { %v6495_v54 = vpop.f32.mrb[44].mxu1  ;;  %7238 = vst [vmem:[#allocation2 + $0x140] sm:$0xf0] %v7110_v56  ;;  %7240 = vst [vmem:[#allocation2 + $0x150] sm:$0xf0] %v7112_v15  ;;  %v6278_v51 = vpop.f32.mrb[45].mxu0  ;;  %v6990_v62 = vpack.c.bf16 %v11114_v55, %v11114_v55 }
 0x3f1   :  { %v11130_v38 = vadd.f32 %v6495_v54, %v12730_v59  ;;  %v6497_v19 = vpop.f32.mrb[45].mxu1  ;;  %7239 = vst [vmem:[#allocation2 + $0x148] sm:$0xf0] %v7111_v6  ;;  %7241 = vst [vmem:[#allocation2 + $0x158] sm:$0xf0] %v7113_v43  ;;  %v11115_v47 = vadd.f32 %v6278_v51, %v12732_v18  ;;  %v6280_v49 = vpop.f32.mrb[46].mxu0 }
 0x3f2   :  { %v11131_v63 = vadd.f32 %v6497_v19, %v12738_v27  ;;  %v6499_v3 = vpop.f32.mrb[46].mxu1  ;;  %v11116_v2 = vadd.f32 %v6280_v49, %v12728_v22  ;;  %v6282_v58 = vpop.f32.mrb[47].mxu0  ;;  %v7118_v42 = vrot.slane %v6990_v62, 4 }
 0x3f3   :  { %v6992_v11 = vpack.c.bf16 %v11130_v38, %v11130_v38  ;;  %v11132_v46 = vadd.f32 %v6499_v3, %v12730_v59  ;;  %v6501_v35 = vpop.f32.mrb[47].mxu1  ;;  %v6991_v10 = vpack.c.bf16 %v11115_v47, %v11115_v47  ;;  %v11117_v14 = vadd.f32 %v6282_v58, %v12732_v18 }
 0x3f4   :  { %v6993_v26 = vpack.c.bf16 %v11131_v63, %v11131_v63  ;;  %v11133_v60 = vadd.f32 %v6501_v35, %v12738_v27  ;;  %v6998_v31 = vpack.c.bf16 %v11116_v2, %v11116_v2  ;;  %7246 = vst [vmem:[#allocation2 + $0x180] sm:$0xf0] %v7118_v42 }
 0x3f5   :  { %v7120_v50 = vrot.slane %v6992_v11, 4  ;;  %v7000_v34 = vpack.c.bf16 %v11132_v46, %v11132_v46  ;;  %v7119_v53 = vrot.slane %v6991_v10, 4  ;;  %v6999_v56 = vpack.c.bf16 %v11117_v14, %v11117_v14 }
 0x3f6   :  { %v7121_v61 = vrot.slane %v6993_v26, 4  ;;  %v7001_v15 = vpack.c.bf16 %v11133_v60, %v11133_v60  ;;  %v7126_v22 = vrot.slane %v6998_v31, 4 }
 0x3f7   :  { %7248 = vst [vmem:[#allocation2 + $0x190] sm:$0xf0] %v7120_v50  ;;  %v7128_v59 = vrot.slane %v7000_v34, 4  ;;  %7247 = vst [vmem:[#allocation2 + $0x188] sm:$0xf0] %v7119_v53  ;;  %v7127_v6 = vrot.slane %v6999_v56, 4 }
 0x3f8   :  { %7249 = vst [vmem:[#allocation2 + $0x198] sm:$0xf0] %v7121_v61  ;;  %v7129_v43 = vrot.slane %v7001_v15, 4  ;;  %7254 = vst [vmem:[#allocation2 + $0x1c0] sm:$0xf0] %v7126_v22 }
 0x3f9   :  { %7256 = vst [vmem:[#allocation2 + $0x1d0] sm:$0xf0] %v7128_v59  ;;  %7255 = vst [vmem:[#allocation2 + $0x1c8] sm:$0xf0] %v7127_v6 }
 0x3fa   :  { %7257 = vst [vmem:[#allocation2 + $0x1d8] sm:$0xf0] %v7129_v43 }
 0x496   :  { %v6684_v18 = vpop.f32.mrb[48].mxu0  ;;  %v6903_v27 = vpop.f32.mrb[48].mxu1 }
 0x497   :  { %v11134_v57 = vadd.f32 %v6684_v18, %v12959_v7  ;;  %v11150_v54 = vadd.f32 %v6903_v27, %v12961_v30  ;;  %v6686_v55 = vpop.f32.mrb[49].mxu0  ;;  %v6905_v38 = vpop.f32.mrb[49].mxu1 }
 0x498   :  { %v11135_v51 = vadd.f32 %v6686_v55, %v12963_v23  ;;  %v11151_v19 = vadd.f32 %v6905_v38, %v12965_v39  ;;  %v6688_v47 = vpop.f32.mrb[50].mxu0  ;;  %v6907_v63 = vpop.f32.mrb[50].mxu1 }
 0x499   :  { %v6946_v49 = vpack.c.bf16 %v11134_v57, %v11134_v57  ;;  %v6948_v3 = vpack.c.bf16 %v11150_v54, %v11150_v54  ;;  %v11136_v62 = vadd.f32 %v6688_v47, %v12959_v7  ;;  %v11152_v11 = vadd.f32 %v6907_v63, %v12961_v30  ;;  %v6690_v2 = vpop.f32.mrb[51].mxu0  ;;  %v6909_v46 = vpop.f32.mrb[51].mxu1 }
 0x49a   :  { %v6947_v58 = vpack.c.bf16 %v11135_v51, %v11135_v51  ;;  %v6949_v35 = vpack.c.bf16 %v11151_v19, %v11151_v19  ;;  %v11137_v10 = vadd.f32 %v6690_v2, %v12963_v23  ;;  %v11153_v26 = vadd.f32 %v6909_v46, %v12965_v39 }
 0x49b   :  { %v7074_v14 = vrot.slane %v6946_v49, 4  ;;  %v7076_v60 = vrot.slane %v6948_v3, 4  ;;  %v6954_v42 = vpack.c.bf16 %v11136_v62, %v11136_v62  ;;  %v6956_v50 = vpack.c.bf16 %v11152_v11, %v11152_v11 }
 0x49c   :  { %v7075_v31 = vrot.slane %v6947_v58, 4  ;;  %v7077_v34 = vrot.slane %v6949_v35, 4  ;;  %v6955_v53 = vpack.c.bf16 %v11137_v10, %v11137_v10  ;;  %v6957_v61 = vpack.c.bf16 %v11153_v26, %v11153_v26 }
 0x49d   :  { %7202 = vst [vmem:[#allocation2 + $0x20] sm:$0xf0] %v7074_v14  ;;  %7204 = vst [vmem:[#allocation2 + $0x30] sm:$0xf0] %v7076_v60  ;;  %v7082_v56 = vrot.slane %v6954_v42, 4  ;;  %v7084_v15 = vrot.slane %v6956_v50, 4 }
 0x49e   :  { %7203 = vst [vmem:[#allocation2 + $0x28] sm:$0xf0] %v7075_v31  ;;  %7205 = vst [vmem:[#allocation2 + $0x38] sm:$0xf0] %v7077_v34  ;;  %v7083_v22 = vrot.slane %v6955_v53, 4  ;;  %v7085_v59 = vrot.slane %v6957_v61, 4 }
 0x49f   :  { %v6694_v6 = vpop.f32.mrb[52].mxu0  ;;  %v6913_v43 = vpop.f32.mrb[52].mxu1  ;;  %7210 = vst [vmem:[#allocation2 + $0x60] sm:$0xf0] %v7082_v56  ;;  %7212 = vst [vmem:[#allocation2 + $0x70] sm:$0xf0] %v7084_v15 }
 0x4a0   :  { %v11138_v18 = vadd.f32 %v6694_v6, %v12959_v7  ;;  %v11154_v27 = vadd.f32 %v6913_v43, %v12961_v30  ;;  %v6696_v57 = vpop.f32.mrb[53].mxu0  ;;  %v6915_v54 = vpop.f32.mrb[53].mxu1  ;;  %7211 = vst [vmem:[#allocation2 + $0x68] sm:$0xf0] %v7083_v22  ;;  %7213 = vst [vmem:[#allocation2 + $0x78] sm:$0xf0] %v7085_v59 }
 0x4a1   :  { %v11139_v55 = vadd.f32 %v6696_v57, %v12963_v23  ;;  %v11155_v38 = vadd.f32 %v6915_v54, %v12965_v39  ;;  %v6698_v51 = vpop.f32.mrb[54].mxu0  ;;  %v6917_v19 = vpop.f32.mrb[54].mxu1 }
 0x4a2   :  { %v6962_v47 = vpack.c.bf16 %v11138_v18, %v11138_v18  ;;  %v6964_v63 = vpack.c.bf16 %v11154_v27, %v11154_v27  ;;  %v11140_v49 = vadd.f32 %v6698_v51, %v12959_v7  ;;  %v11156_v3 = vadd.f32 %v6917_v19, %v12961_v30  ;;  %v6700_v62 = vpop.f32.mrb[55].mxu0  ;;  %v6919_v11 = vpop.f32.mrb[55].mxu1 }
 0x4a3   :  { %v6963_v2 = vpack.c.bf16 %v11139_v55, %v11139_v55  ;;  %v6965_v46 = vpack.c.bf16 %v11155_v38, %v11155_v38  ;;  %v11141_v58 = vadd.f32 %v6700_v62, %v12963_v23  ;;  %v11157_v35 = vadd.f32 %v6919_v11, %v12965_v39 }
 0x4a4   :  { %v7090_v10 = vrot.slane %v6962_v47, 4  ;;  %v7092_v26 = vrot.slane %v6964_v63, 4  ;;  %v6970_v14 = vpack.c.bf16 %v11140_v49, %v11140_v49  ;;  %v6972_v60 = vpack.c.bf16 %v11156_v3, %v11156_v3 }
 0x4a5   :  { %v7091_v42 = vrot.slane %v6963_v2, 4  ;;  %v7093_v50 = vrot.slane %v6965_v46, 4  ;;  %v6971_v31 = vpack.c.bf16 %v11141_v58, %v11141_v58  ;;  %v6973_v34 = vpack.c.bf16 %v11157_v35, %v11157_v35 }
 0x4a6   :  { %7218 = vst [vmem:[#allocation2 + $0xa0] sm:$0xf0] %v7090_v10  ;;  %7220 = vst [vmem:[#allocation2 + $0xb0] sm:$0xf0] %v7092_v26  ;;  %v7098_v53 = vrot.slane %v6970_v14, 4  ;;  %v7100_v61 = vrot.slane %v6972_v60, 4 }
 0x4a7   :  { %7219 = vst [vmem:[#allocation2 + $0xa8] sm:$0xf0] %v7091_v42  ;;  %7221 = vst [vmem:[#allocation2 + $0xb8] sm:$0xf0] %v7093_v50  ;;  %v7099_v56 = vrot.slane %v6971_v31, 4  ;;  %v7101_v15 = vrot.slane %v6973_v34, 4 }
 0x4a8   :  { %v6704_v22 = vpop.f32.mrb[56].mxu0  ;;  %v6923_v59 = vpop.f32.mrb[56].mxu1  ;;  %7226 = vst [vmem:[#allocation2 + $0xe0] sm:$0xf0] %v7098_v53  ;;  %7228 = vst [vmem:[#allocation2 + $0xf0] sm:$0xf0] %v7100_v61 }
 0x4a9   :  { %v11142_v6 = vadd.f32 %v6704_v22, %v12959_v7  ;;  %v11158_v43 = vadd.f32 %v6923_v59, %v12961_v30  ;;  %v6706_v18 = vpop.f32.mrb[57].mxu0  ;;  %v6925_v27 = vpop.f32.mrb[57].mxu1  ;;  %7227 = vst [vmem:[#allocation2 + $0xe8] sm:$0xf0] %v7099_v56  ;;  %7229 = vst [vmem:[#allocation2 + $0xf8] sm:$0xf0] %v7101_v15 }
 0x4aa   :  { %v11143_v57 = vadd.f32 %v6706_v18, %v12963_v23  ;;  %v11159_v54 = vadd.f32 %v6925_v27, %v12965_v39  ;;  %v6708_v55 = vpop.f32.mrb[58].mxu0  ;;  %v6927_v38 = vpop.f32.mrb[58].mxu1 }
 0x4ab   :  { %v6978_v51 = vpack.c.bf16 %v11142_v6, %v11142_v6  ;;  %v6980_v19 = vpack.c.bf16 %v11158_v43, %v11158_v43  ;;  %v11144_v47 = vadd.f32 %v6708_v55, %v12959_v7  ;;  %v11160_v63 = vadd.f32 %v6927_v38, %v12961_v30  ;;  %v6710_v49 = vpop.f32.mrb[59].mxu0  ;;  %v6929_v3 = vpop.f32.mrb[59].mxu1 }
 0x4ac   :  { %v6979_v62 = vpack.c.bf16 %v11143_v57, %v11143_v57  ;;  %v6981_v11 = vpack.c.bf16 %v11159_v54, %v11159_v54  ;;  %v11145_v2 = vadd.f32 %v6710_v49, %v12963_v23  ;;  %v11161_v46 = vadd.f32 %v6929_v3, %v12965_v39 }
 0x4ad   :  { %v7106_v58 = vrot.slane %v6978_v51, 4  ;;  %v7108_v35 = vrot.slane %v6980_v19, 4  ;;  %v6986_v10 = vpack.c.bf16 %v11144_v47, %v11144_v47  ;;  %v6988_v26 = vpack.c.bf16 %v11160_v63, %v11160_v63 }
 0x4ae   :  { %v7107_v14 = vrot.slane %v6979_v62, 4  ;;  %v7109_v60 = vrot.slane %v6981_v11, 4  ;;  %v6987_v42 = vpack.c.bf16 %v11145_v2, %v11145_v2  ;;  %v6989_v50 = vpack.c.bf16 %v11161_v46, %v11161_v46  ;;  %v6714_v56 = vpop.f32.mrb[60].mxu0  ;;  %v6933_v15 = vpop.f32.mrb[60].mxu1 }
 0x4af   :  { %7234 = vst [vmem:[#allocation2 + $0x120] sm:$0xf0] %v7106_v58  ;;  %7236 = vst [vmem:[#allocation2 + $0x130] sm:$0xf0] %v7108_v35  ;;  %v7114_v31 = vrot.slane %v6986_v10, 4  ;;  %v7116_v34 = vrot.slane %v6988_v26, 4  ;;  %v11146_v22 = vadd.f32 %v6714_v56, %v12959_v7  ;;  %v11162_v59 = vadd.f32 %v6933_v15, %v12961_v30 }
 0x4b0   :  { %7235 = vst [vmem:[#allocation2 + $0x128] sm:$0xf0] %v7107_v14  ;;  %7237 = vst [vmem:[#allocation2 + $0x138] sm:$0xf0] %v7109_v60  ;;  %v7115_v53 = vrot.slane %v6987_v42, 4  ;;  %v7117_v61 = vrot.slane %v6989_v50, 4 }
 0x4b1   :  { %7242 = vst [vmem:[#allocation2 + $0x160] sm:$0xf0] %v7114_v31  ;;  %7244 = vst [vmem:[#allocation2 + $0x170] sm:$0xf0] %v7116_v34  ;;  %v6716_v6 = vpop.f32.mrb[61].mxu0  ;;  %v6935_v43 = vpop.f32.mrb[61].mxu1  ;;  %v6994_v55 = vpack.c.bf16 %v11146_v22, %v11146_v22  ;;  %v6996_v38 = vpack.c.bf16 %v11162_v59, %v11162_v59 }
 0x4b2   :  { %7243 = vst [vmem:[#allocation2 + $0x168] sm:$0xf0] %v7115_v53  ;;  %7245 = vst [vmem:[#allocation2 + $0x178] sm:$0xf0] %v7117_v61  ;;  %v11147_v18 = vadd.f32 %v6716_v6, %v12963_v23  ;;  %v11163_v27 = vadd.f32 %v6935_v43, %v12965_v39  ;;  %v6718_v57 = vpop.f32.mrb[62].mxu0  ;;  %v6937_v54 = vpop.f32.mrb[62].mxu1 }
 0x4b3   :  { %v11148_v51 = vadd.f32 %v6718_v57, %v12959_v7  ;;  %v11164_v19 = vadd.f32 %v6937_v54, %v12961_v30  ;;  %v6720_v47 = vpop.f32.mrb[63].mxu0  ;;  %v6939_v63 = vpop.f32.mrb[63].mxu1  ;;  %v7122_v2 = vrot.slane %v6994_v55, 4  ;;  %v7124_v46 = vrot.slane %v6996_v38, 4 }
 0x4b4   :  { %v6995_v49 = vpack.c.bf16 %v11147_v18, %v11147_v18  ;;  %v6997_v3 = vpack.c.bf16 %v11163_v27, %v11163_v27  ;;  %v11149_v62 = vadd.f32 %v6720_v47, %v12963_v23  ;;  %v11165_v11 = vadd.f32 %v6939_v63, %v12965_v39 }
 0x4b5   :  { %v7002_v58 = vpack.c.bf16 %v11148_v51, %v11148_v51  ;;  %v7004_v35 = vpack.c.bf16 %v11164_v19, %v11164_v19  ;;  %7250 = vst [vmem:[#allocation2 + $0x1a0] sm:$0xf0] %v7122_v2  ;;  %7252 = vst [vmem:[#allocation2 + $0x1b0] sm:$0xf0] %v7124_v46  ;;  %v13238_v23 = vmov 0.0   ;;  %v13240_v39 = vmov 0.0  }
 0x4b6   :  { %v7123_v10 = vrot.slane %v6995_v49, 4  ;;  %v7125_v26 = vrot.slane %v6997_v3, 4  ;;  %v7003_v14 = vpack.c.bf16 %v11149_v62, %v11149_v62  ;;  %v7005_v60 = vpack.c.bf16 %v11165_v11, %v11165_v11 }
 0x4b7   :  { %v7130_v7 = vrot.slane %v7002_v58, 4  ;;  %v7132_v30 = vrot.slane %v7004_v35, 4  ;;  %v13242_v31 = vmov 0.0   ;;  %v13244_v34 = vmov 0.0  }
 0x4b8   :  { %7251 = vst [vmem:[#allocation2 + $0x1a8] sm:$0xf0] %v7123_v10  ;;  %7253 = vst [vmem:[#allocation2 + $0x1b8] sm:$0xf0] %v7125_v26  ;;  %v7131_v42 = vrot.slane %v7003_v14, 4  ;;  %v7133_v50 = vrot.slane %v7005_v60, 4 }
 0x4b9   :  { %7258 = vst [vmem:[#allocation2 + $0x1e0] sm:$0xf0] %v7130_v7  ;;  %7260 = vst [vmem:[#allocation2 + $0x1f0] sm:$0xf0] %v7132_v30  ;;  %v13246_v53 = vmov 0.0   ;;  %v13248_v61 = vmov 0.0  }
 0x4ba   :  { %7259 = vst [vmem:[#allocation2 + $0x1e8] sm:$0xf0] %v7131_v42  ;;  %7261 = vst [vmem:[#allocation2 + $0x1f8] sm:$0xf0] %v7133_v50  ;;  %v13250_v56 = vmov 0.0   ;;  %v13252_v15 = vmov 0.0  }
 0x4bb LB: > { %v15107_v52 = vld [vmem:[#allocation71_spill] sm:$0xff]  ;;  %v15109_v45 = vld [vmem:[#allocation64_spill] sm:$0xff]  ;;  %15133 = vst [vmem:[#allocation147_spill] sm:$0xff] %v12126_v23  ;;  %15134 = vst [vmem:[#allocation148_spill] sm:$0xff] %v12130_v39  ;;  %v13370_v46 = vpack.c.bf16 %v12134_v31, %v12138_v34  ;;  %s10959_s2 = sshll.u32 %s12158_s1, 8  ;;  %s10962_s22 = sshll.u32 %s12158_s1, 5  ;;  %v12154_v15 = vphi %v13252_v15, %v15673_v15   ;;  %v12150_v56 = vphi %v13250_v56, %v14436_v56   ;;  %v12146_v61 = vphi %v13248_v61, %v14427_v61   ;;  %v12142_v53 = vphi %v13246_v53, %v14431_v53   ;;  %v12138_v34 = vphi %v13244_v34, %v15672_v34   ;;  %v12134_v31 = vphi %v13242_v31, %v9345_v31   ;;  %v12130_v39 = vphi %v13240_v39, %v9340_v39   ;;  %v12126_v23 = vphi %v13238_v23, %v9341_v23   ;;  %s12158_s1 = sphi %s13254_s1, %s7395_s1  }
 0x4bc   : > { %v15108_v48 = vld [vmem:[#allocation67_spill] sm:$0xff]  ;;  %v15111_v41 = vld [vmem:[#allocation60_spill] sm:$0xff]  ;;  %15135 = vst [vmem:[#allocation149_spill] sm:$0xff] %v12142_v53  ;;  %15136 = vst [vmem:[#allocation150_spill] sm:$0xff] %v12146_v61  ;;  %s14000_s8 = scalar_lea.vmem [#allocation2], %s10959_s2  ;;  %s14016_s12 = sshll.u32 %s12158_s1, 2 }
 0x4bd   : > { %v15110_v44 = vld [vmem:[#allocation63_spill] sm:$0xff]  ;;  %v15113_v37 = vld [vmem:[#allocation56_spill] sm:$0xff]  ;;  %v13385_v10 = vcombine.high %v15111_v41, %v15109_v45  ;;  %8110 = vmatprep.mubr.bf16.mxu0 %v13370_v46  ;;  %8153 = vmatprep.mubr.bf16.mxu1 %v13370_v46  ;;  %v13397_v14 = vcombine.high %v15108_v48, %v15107_v52  ;;  %v13402_v60 = vcombine.low %v15111_v41, %v15109_v45  ;;  %s7405_s13 = ssub.s32 7, %s14016_s12  ;;  %s14021_s15 = scalar_lea.vmem [#allocation3], %s10962_s22 }
 0x4be   : > { %v15112_v40 = vld [vmem:[#allocation59_spill] sm:$0xff]  ;;  %v15115_v33 = vld [vmem:[#allocation52_spill] sm:$0xff]  ;;  %v13412_v50 = vcombine.low %v15108_v48, %v15107_v52  ;;  %s10960_s17 = sshll.u32 %s7405_s13, 6  ;;  %s10963_s19 = sshll.u32 %s7405_s13, 3 }
 0x4bf   : > { %v15114_v36 = vld [vmem:[#allocation55_spill] sm:$0xff]  ;;  %v15117_v29 = vld [vmem:[#allocation48_spill] sm:$0xff]  ;;  %v13363_v11 = vcombine.high %v15115_v33, %v15113_v37  ;;  %v13375_v58 = vcombine.high %v15112_v40, %v15110_v44  ;;  %v13380_v35 = vcombine.low %v15115_v33, %v15113_v37  ;;  %15157 = vst [vmem:[#allocation171_spill] sm:$0xff] %v13385_v10  ;;  %v13392_v26 = vcombine.low %v15112_v40, %v15110_v44  ;;  %s7423_s18 = scalar_lea.vmem [#allocation2], %s10960_s17  ;;  %s8370_s21 = scalar_lea.vmem [#allocation3], %s10963_s19 }
 0x4c0   : > { %v15116_v32 = vld [vmem:[#allocation51_spill] sm:$0xff]  ;;  %v15119_v25 = vld [vmem:[#allocation44_spill] sm:$0xff]  ;;  %15159 = vst [vmem:[#allocation173_spill] sm:$0xff] %v13397_v14  ;;  %15160 = vst [vmem:[#allocation174_spill] sm:$0xff] %v13402_v60  ;;  %s8373_s14 = ssub.s32 6, %s14016_s12  ;;  %s8701_s3 = ssub.s32 5, %s14016_s12 }
 0x4c1   : > { %v15118_v28 = vld [vmem:[#allocation47_spill] sm:$0xff]  ;;  %v15121_v21 = vld [vmem:[#allocation40_spill] sm:$0xff]  ;;  %v13343_v63 = vcombine.high %v15119_v25, %v15117_v29  ;;  %v13353_v3 = vcombine.high %v15116_v32, %v15114_v36  ;;  %v13358_v62 = vcombine.low %v15119_v25, %v15117_v29  ;;  %15153 = vst [vmem:[#allocation167_spill] sm:$0xff] %v13363_v11  ;;  %v13368_v2 = vcombine.low %v15116_v32, %v15114_v36  ;;  %s10965_s20 = sshll.u32 %s8373_s14, 6  ;;  %s10967_s4 = sshll.u32 %s8373_s14, 3 }
 0x4c2   : > { %v15120_v24 = vld [vmem:[#allocation43_spill] sm:$0xff]  ;;  %v15123_v17 = vld [vmem:[#allocation36_spill] sm:$0xff]  ;;  %15155 = vst [vmem:[#allocation169_spill] sm:$0xff] %v13375_v58  ;;  %15156 = vst [vmem:[#allocation170_spill] sm:$0xff] %v13380_v35  ;;  %s8391_s23 = scalar_lea.vmem [#allocation2], %s10965_s20  ;;  %s8698_s7 = scalar_lea.vmem [#allocation3], %s10967_s4 }
 0x4c3   : > { %v15122_v20 = vld [vmem:[#allocation39_spill] sm:$0xff]  ;;  %v15125_v13 = vld [vmem:[#allocation32_spill] sm:$0xff]  ;;  %v13323_v38 = vcombine.high %v15123_v17, %v15121_v21  ;;  %v13333_v19 = vcombine.high %v15120_v24, %v15118_v28  ;;  %v13338_v47 = vcombine.low %v15123_v17, %v15121_v21  ;;  %15149 = vst [vmem:[#allocation163_spill] sm:$0xff] %v13343_v63  ;;  %v13348_v49 = vcombine.low %v15120_v24, %v15118_v28  ;;  %s10969_s24 = sshll.u32 %s8701_s3, 6  ;;  %s10971_s0 = sshll.u32 %s8701_s3, 3 }
 0x4c4   : > { %v15124_v16 = vld [vmem:[#allocation35_spill] sm:$0xff]  ;;  %v15127_v9 = vld [vmem:[#allocation28_spill] sm:$0xff]  ;;  %15151 = vst [vmem:[#allocation165_spill] sm:$0xff] %v13353_v3  ;;  %15152 = vst [vmem:[#allocation166_spill] sm:$0xff] %v13358_v62  ;;  %s8719_s25 = scalar_lea.vmem [#allocation2], %s10969_s24  ;;  %s9026_s27 = scalar_lea.vmem [#allocation3], %s10971_s0 }
 0x4c5   : > { %v15126_v12 = vld [vmem:[#allocation31_spill] sm:$0xff]  ;;  %v15129_v5 = vld [vmem:[#allocation24_spill] sm:$0xff]  ;;  %v13302_v27 = vcombine.high %v15127_v9, %v15125_v13  ;;  %v13313_v54 = vcombine.high %v15124_v16, %v15122_v20  ;;  %v13318_v55 = vcombine.low %v15127_v9, %v15125_v13  ;;  %15145 = vst [vmem:[#allocation159_spill] sm:$0xff] %v13323_v38  ;;  %v13328_v51 = vcombine.low %v15124_v16, %v15122_v20  ;;  %s9029_s28 = ssub.s32 4, %s14016_s12  ;;  %s7395_s1 = sadd.s32 1, %s12158_s1  }
 0x4c6   : > { %v15128_v8 = vld [vmem:[#allocation27_spill] sm:$0xff]  ;;  %v15131_v1 = vld [vmem:[#allocation20_spill] sm:$0xff]  ;;  %15147 = vst [vmem:[#allocation161_spill] sm:$0xff] %v13333_v19  ;;  %15148 = vst [vmem:[#allocation162_spill] sm:$0xff] %v13338_v47  ;;  %s10973_s29 = sshll.u32 %s9029_s28, 6  ;;  %s10975_s16 = sshll.u32 %s9029_s28, 3 }
 0x4c7   : > { %v15130_v4 = vld [vmem:[#allocation23_spill] sm:$0xff]  ;;  %v13289_v6 = vcombine.high %v15128_v8, %v15126_v12  ;;  %v13293_v43 = vcombine.high %v15131_v1, %v15129_v5  ;;  %v13298_v18 = vcombine.low %v15131_v1, %v15129_v5  ;;  %15141 = vst [vmem:[#allocation155_spill] sm:$0xff] %v13302_v27  ;;  %v13307_v57 = vcombine.low %v15128_v8, %v15126_v12  ;;  %v15161_v7 = vld [vmem:[#allocation72_spill] sm:$0xff]  ;;  %s9047_s5 = scalar_lea.vmem [#allocation2], %s10973_s29  ;;  %s9354_s30 = scalar_lea.vmem [#allocation3], %s10975_s16 }
 0x4c8   : > { %v15132_v0 = vld [vmem:[#allocation19_spill] sm:$0xff]  ;;  %15143 = vst [vmem:[#allocation157_spill] sm:$0xff] %v13313_v54  ;;  %15144 = vst [vmem:[#allocation158_spill] sm:$0xff] %v13318_v55  ;;  %v15162_v30 = vld [vmem:[#allocation68_spill] sm:$0xff]  ;;  %p7392_p0 = scmp.ge.s32.totalorder %s7395_s1, 2  }
 0x4c9   : > { %v13281_v22 = vcombine.high %v15132_v0, %v15130_v4  ;;  %v13285_v59 = vcombine.low %v15132_v0, %v15130_v4  ;;  %15138 = vst [vmem:[#allocation152_spill] sm:$0xff] %v13289_v6  ;;  %15139 = vst [vmem:[#allocation153_spill] sm:$0xff] %v13293_v43  ;;  %8121 = vmatprep.subr.bf16.mxu1 %v13293_v43  ;;  %v13407_v42 = vcombine.high %v15162_v30, %v15161_v7  ;;  %v15165_v31 = vld [vmem:[#allocation79_spill] sm:$0xff]  ;;  %v15171_v8 = vld [vmem:[#allocation80_spill] sm:$0xff]  ;;  %vm9782_vm0 = vcmask (%p7392_p0), 15360  }
 0x4ca   : > { %15140 = vst [vmem:[#allocation154_spill] sm:$0xff] %v13298_v18  ;;  %15142 = vst [vmem:[#allocation156_spill] sm:$0xff] %v13307_v57  ;;  %8122 = vmatpush1.bf16.msra.mxu1 %v13298_v18  ;;  %v15166_v0 = vmov %v15165_v31  ;;  %v15167_v34 = vld [vmem:[#allocation75_spill] sm:$0xff]  ;;  %v13422_v5 = vcombine.low %v15162_v30, %v15161_v7  ;;  %v15172_v9 = vld [vmem:[#allocation76_spill] sm:$0xff] }
 0x4cb   : > { %15137 = vst [vmem:[#allocation151_spill] sm:$0xff] %v13285_v59  ;;  %8078 = vmatprep.subr.bf16.mxu0 %v13281_v22  ;;  %8123 = vmatprep.subr.bf16.mxu1 %v13302_v27  ;;  %15146 = vst [vmem:[#allocation160_spill] sm:$0xff] %v13328_v51  ;;  %v15168_v1 = vmov %v15167_v34  ;;  %v13417_v4 = vcombine.high %v15167_v34, %v15165_v31  ;;  %v13427_v12 = vcombine.high %v15172_v9, %v15171_v8  ;;  %v15175_v31 = vld [vmem:[#allocation87_spill] sm:$0xff]  ;;  %v15181_v21 = vld [vmem:[#allocation88_spill] sm:$0xff] }
 0x4cc   : > { %8079 = vmatpush1.bf16.msra.mxu0 %v13285_v59  ;;  %15150 = vst [vmem:[#allocation164_spill] sm:$0xff] %v13348_v49  ;;  %15154 = vst [vmem:[#allocation168_spill] sm:$0xff] %v13368_v2  ;;  %v13432_v13 = vcombine.low %v15168_v1, %v15166_v0  ;;  %v15176_v16 = vmov %v15175_v31  ;;  %v15177_v34 = vld [vmem:[#allocation83_spill] sm:$0xff]  ;;  %v13442_v7 = vcombine.low %v15172_v9, %v15171_v8  ;;  %v15182_v24 = vld [vmem:[#allocation84_spill] sm:$0xff] }
 0x4cd   : > { %8080 = vmatprep.subr.bf16.mxu0 %v13289_v6  ;;  %15158 = vst [vmem:[#allocation172_spill] sm:$0xff] %v13392_v26  ;;  %15163 = vst [vmem:[#allocation175_spill] sm:$0xff] %v13407_v42  ;;  %v15178_v17 = vmov %v15177_v34  ;;  %v13437_v20 = vcombine.high %v15177_v34, %v15175_v31  ;;  %v13447_v25 = vcombine.high %v15182_v24, %v15181_v21  ;;  %v15185_v31 = vld [vmem:[#allocation95_spill] sm:$0xff]  ;;  %v15191_v9 = vld [vmem:[#allocation96_spill] sm:$0xff] }
 0x4ce   : > { %8124 = vmatpush1.bf16.msra.mxu1 %v13318_v55  ;;  %15164 = vst [vmem:[#allocation176_spill] sm:$0xff] %v13412_v50  ;;  %15169 = vst [vmem:[#allocation177_spill] sm:$0xff] %v13417_v4  ;;  %v13452_v0 = vcombine.low %v15178_v17, %v15176_v16  ;;  %v15186_v1 = vmov %v15185_v31  ;;  %v15187_v34 = vld [vmem:[#allocation91_spill] sm:$0xff]  ;;  %v13462_v8 = vcombine.low %v15182_v24, %v15181_v21  ;;  %v15192_v30 = vld [vmem:[#allocation92_spill] sm:$0xff] }
 0x4cf   : > { %8125 = vmatprep.subr.bf16.mxu1 %v13323_v38  ;;  %15170 = vst [vmem:[#allocation178_spill] sm:$0xff] %v13422_v5  ;;  %15173 = vst [vmem:[#allocation179_spill] sm:$0xff] %v13427_v12  ;;  %v15188_v28 = vmov %v15187_v34  ;;  %v13457_v29 = vcombine.high %v15187_v34, %v15185_v31  ;;  %v13467_v32 = vcombine.high %v15192_v30, %v15191_v9  ;;  %v15195_v31 = vld [vmem:[#allocation103_spill] sm:$0xff]  ;;  %v15201_v24 = vld [vmem:[#allocation104_spill] sm:$0xff] }
 0x4d0   : > { %8081 = vmatpush1.bf16.msra.mxu0 %v13307_v57  ;;  %15174 = vst [vmem:[#allocation180_spill] sm:$0xff] %v13432_v13  ;;  %15179 = vst [vmem:[#allocation181_spill] sm:$0xff] %v13437_v20  ;;  %v13472_v16 = vcombine.low %v15188_v28, %v15186_v1  ;;  %v15196_v17 = vmov %v15195_v31  ;;  %v15197_v34 = vld [vmem:[#allocation99_spill] sm:$0xff]  ;;  %v13482_v21 = vcombine.low %v15192_v30, %v15191_v9  ;;  %v15202_v37 = vld [vmem:[#allocation100_spill] sm:$0xff] }
 0x4d1   : > { %8082 = vmatprep.subr.bf16.mxu0 %v13313_v54  ;;  %15180 = vst [vmem:[#allocation182_spill] sm:$0xff] %v13442_v7  ;;  %15183 = vst [vmem:[#allocation183_spill] sm:$0xff] %v13447_v25  ;;  %v15198_v33 = vmov %v15197_v34  ;;  %v13477_v36 = vcombine.high %v15197_v34, %v15195_v31  ;;  %v13487_v40 = vcombine.high %v15202_v37, %v15201_v24  ;;  %v15205_v31 = vld [vmem:[#allocation111_spill] sm:$0xff]  ;;  %v15211_v30 = vld [vmem:[#allocation112_spill] sm:$0xff] }
 0x4d2   : > { %8126 = vmatpush1.bf16.msra.mxu1 %v13338_v47  ;;  %15184 = vst [vmem:[#allocation184_spill] sm:$0xff] %v13452_v0  ;;  %15189 = vst [vmem:[#allocation185_spill] sm:$0xff] %v13457_v29  ;;  %v13492_v1 = vcombine.low %v15198_v33, %v15196_v17  ;;  %v15206_v28 = vmov %v15205_v31  ;;  %v15207_v34 = vld [vmem:[#allocation107_spill] sm:$0xff]  ;;  %v13502_v9 = vcombine.low %v15202_v37, %v15201_v24  ;;  %v15212_v45 = vld [vmem:[#allocation108_spill] sm:$0xff] }
 0x4d3   : > { %8127 = vmatprep.subr.bf16.mxu1 %v13343_v63  ;;  %15190 = vst [vmem:[#allocation186_spill] sm:$0xff] %v13462_v8  ;;  %15193 = vst [vmem:[#allocation187_spill] sm:$0xff] %v13467_v32  ;;  %v15208_v41 = vmov %v15207_v34  ;;  %v13497_v44 = vcombine.high %v15207_v34, %v15205_v31  ;;  %v13507_v48 = vcombine.high %v15212_v45, %v15211_v30  ;;  %v15215_v31 = vld [vmem:[#allocation119_spill] sm:$0xff]  ;;  %v15221_v37 = vld [vmem:[#allocation120_spill] sm:$0xff] }
 0x4d4   : > { %8083 = vmatpush1.bf16.msra.mxu0 %v13328_v51  ;;  %15194 = vst [vmem:[#allocation188_spill] sm:$0xff] %v13472_v16  ;;  %15199 = vst [vmem:[#allocation189_spill] sm:$0xff] %v13477_v36  ;;  %v13512_v17 = vcombine.low %v15208_v41, %v15206_v28  ;;  %v15216_v33 = vmov %v15215_v31  ;;  %v15217_v34 = vld [vmem:[#allocation115_spill] sm:$0xff]  ;;  %v13522_v24 = vcombine.low %v15212_v45, %v15211_v30  ;;  %v15222_v39 = vld [vmem:[#allocation116_spill] sm:$0xff] }
 0x4d5   : > { %8084 = vmatprep.subr.bf16.mxu0 %v13333_v19  ;;  %15200 = vst [vmem:[#allocation190_spill] sm:$0xff] %v13482_v21  ;;  %15203 = vst [vmem:[#allocation191_spill] sm:$0xff] %v13487_v40  ;;  %v15218_v52 = vmov %v15217_v34  ;;  %v13517_v23 = vcombine.high %v15217_v34, %v15215_v31  ;;  %v13527_v53 = vcombine.high %v15222_v39, %v15221_v37  ;;  %v15226_v31 = vld [vmem:[#allocation127_spill] sm:$0xff] }
 0x4d6   : > { %8128 = vmatpush1.bf16.msra.mxu1 %v13358_v62  ;;  %15204 = vst [vmem:[#allocation192_spill] sm:$0xff] %v13492_v1  ;;  %15209 = vst [vmem:[#allocation193_spill] sm:$0xff] %v13497_v44  ;;  %v13532_v28 = vcombine.low %v15218_v52, %v15216_v33  ;;  %v15227_v41 = vmov %v15226_v31  ;;  %v15228_v34 = vld [vmem:[#allocation123_spill] sm:$0xff] }
 0x4d7   : > { %8129 = vmatprep.subr.bf16.mxu1 %v13363_v11  ;;  %15210 = vst [vmem:[#allocation194_spill] sm:$0xff] %v13502_v9  ;;  %15213 = vst [vmem:[#allocation195_spill] sm:$0xff] %v13507_v48  ;;  %v13537_v61 = vcombine.high %v15228_v34, %v15226_v31  ;;  %v15237_v31 = vld [vmem:[#allocation135_spill] sm:$0xff] }
 0x4d8   : > { %8085 = vmatpush1.bf16.msra.mxu0 %v13348_v49  ;;  %15214 = vst [vmem:[#allocation196_spill] sm:$0xff] %v13512_v17  ;;  %15219 = vst [vmem:[#allocation197_spill] sm:$0xff] %v13517_v23  ;;  %v15238_v52 = vmov %v15237_v31 }
 0x4d9   : > { %8086 = vmatprep.subr.bf16.mxu0 %v13353_v3  ;;  %15220 = vst [vmem:[#allocation198_spill] sm:$0xff] %v13522_v24  ;;  %15224 = vst [vmem:[#allocation199_spill] sm:$0xff] %v13527_v53 }
 0x4da   : > { %8130 = vmatpush1.bf16.msra.mxu1 %v13380_v35  ;;  %15225 = vst [vmem:[#allocation200_spill] sm:$0xff] %v13532_v28  ;;  %15230 = vst [vmem:[#allocation201_spill] sm:$0xff] %v13537_v61 }
 0x4db   : > { %8131 = vmatprep.subr.bf16.mxu1 %v13385_v10 }
 0x4dc   : > { %8087 = vmatpush1.bf16.msra.mxu0 %v13368_v2 }
 0x4dd   : > { %8088 = vmatprep.subr.bf16.mxu0 %v13375_v58 }
 0x4de   : > { %8132 = vmatpush1.bf16.msra.mxu1 %v13402_v60 }
 0x4df   : > { %8133 = vmatprep.subr.bf16.mxu1 %v13407_v42 }
 0x4e0   : > { %8089 = vmatpush1.bf16.msra.mxu0 %v13392_v26 }
 0x4e1   : > { %8090 = vmatprep.subr.bf16.mxu0 %v13397_v14 }
 0x4e2   : > { %8134 = vmatpush1.bf16.msra.mxu1 %v13422_v5 }
 0x4e3   : > { %8135 = vmatprep.subr.bf16.mxu1 %v13427_v12 }
 0x4e4   : > { %8091 = vmatpush1.bf16.msra.mxu0 %v13412_v50 }
 0x4e5   : > { %8092 = vmatprep.subr.bf16.mxu0 %v13417_v4 }
 0x4e6   : > { %8136 = vmatpush1.bf16.msra.mxu1 %v13442_v7 }
 0x4e7   : > { %8137 = vmatprep.subr.bf16.mxu1 %v13447_v25 }
 0x4e8   : > { %8093 = vmatpush1.bf16.msra.mxu0 %v13432_v13 }
 0x4e9   : > { %8094 = vmatprep.subr.bf16.mxu0 %v13437_v20 }
 0x4ea   : > { %8138 = vmatpush1.bf16.msra.mxu1 %v13462_v8 }
 0x4eb   : > { %8139 = vmatprep.subr.bf16.mxu1 %v13467_v32 }
 0x4ec   : > { %8095 = vmatpush1.bf16.msra.mxu0 %v13452_v0 }
 0x4ed   : > { %8096 = vmatprep.subr.bf16.mxu0 %v13457_v29 }
 0x4ee   : > { %8140 = vmatpush1.bf16.msra.mxu1 %v13482_v21 }
 0x4ef   : > { %8141 = vmatprep.subr.bf16.mxu1 %v13487_v40 }
 0x4f0   : > { %8097 = vmatpush1.bf16.msra.mxu0 %v13472_v16 }
 0x4f1   : > { %8098 = vmatprep.subr.bf16.mxu0 %v13477_v36 }
 0x4f2   : > { %8142 = vmatpush1.bf16.msra.mxu1 %v13502_v9 }
 0x4f3   : > { %8143 = vmatprep.subr.bf16.mxu1 %v13507_v48 }
 0x4f4   : > { %8099 = vmatpush1.bf16.msra.mxu0 %v13492_v1  ;;  %v15223_v1 = vmov %v15222_v39  ;;  %v15232_v39 = vld [vmem:[#allocation128_spill] sm:$0xff] }
 0x4f5   : > { %8100 = vmatprep.subr.bf16.mxu0 %v13497_v44  ;;  %v15229_v44 = vmov %v15228_v34  ;;  %v13542_v30 = vcombine.low %v15223_v1, %v15221_v37  ;;  %v15233_v45 = vmov %v15232_v39  ;;  %v15239_v34 = vld [vmem:[#allocation131_spill] sm:$0xff] }
 0x4f6   : > { %8144 = vmatpush1.bf16.msra.mxu1 %v13522_v24  ;;  %v13552_v33 = vcombine.low %v15229_v44, %v15227_v41  ;;  %v15240_v24 = vmov %v15239_v34 }
 0x4f7   : > { %15231 = vst [vmem:[#allocation202_spill] sm:$0xff] %v13542_v30  ;;  %8145 = vmatprep.subr.bf16.mxu1 %v13527_v53  ;;  %v13572_v41 = vcombine.low %v15240_v24, %v15238_v52 }
 0x4f8   : > { %8101 = vmatpush1.bf16.msra.mxu0 %v13512_v17  ;;  %v15234_v17 = vld [vmem:[#allocation124_spill] sm:$0xff]  ;;  %15236 = vst [vmem:[#allocation204_spill] sm:$0xff] %v13552_v33 }
 0x4f9   : > { %8102 = vmatprep.subr.bf16.mxu0 %v13517_v23  ;;  %v13547_v48 = vcombine.high %v15234_v17, %v15232_v39  ;;  %v13557_v23 = vcombine.high %v15239_v34, %v15237_v31  ;;  %v13562_v1 = vcombine.low %v15234_v17, %v15233_v45  ;;  %v15243_v39 = vld [vmem:[#allocation136_spill] sm:$0xff]  ;;  %15247 = vst [vmem:[#allocation208_spill] sm:$0xff] %v13572_v41  ;;  %v15248_v31 = vld [vmem:[#allocation143_spill] sm:$0xff] }
 0x4fa   : > { %8146 = vmatpush1.bf16.msra.mxu1 %v13542_v30  ;;  %v15244_v37 = vmov %v15243_v39  ;;  %v15249_v44 = vmov %v15248_v31  ;;  %v15250_v34 = vld [vmem:[#allocation139_spill] sm:$0xff] }
 0x4fb   : > { %15235 = vst [vmem:[#allocation203_spill] sm:$0xff] %v13547_v48  ;;  %15241 = vst [vmem:[#allocation205_spill] sm:$0xff] %v13557_v23  ;;  %8147 = vmatprep.subr.bf16.mxu1 %v13547_v48  ;;  %v15251_v30 = vmov %v15250_v34 }
 0x4fc   : > { %8103 = vmatpush1.bf16.msra.mxu0 %v13532_v28  ;;  %15242 = vst [vmem:[#allocation206_spill] sm:$0xff] %v13562_v1  ;;  %v15245_v28 = vld [vmem:[#allocation132_spill] sm:$0xff]  ;;  %v13592_v24 = vcombine.low %v15251_v30, %v15249_v44  ;;  %v13611_v30 = vpack.c.bf16 %v12150_v56, %v12154_v15  ;;  %v15272_v44 = vld [vmem:[#allocation29_spill] sm:$0xff]  ;;  %v15275_v56 = vld [vmem:[#allocation34_spill] sm:$0xff] }
 0x4fd   : > { %8104 = vmatprep.subr.bf16.mxu0 %v13537_v61  ;;  %v13567_v53 = vcombine.high %v15245_v28, %v15243_v39  ;;  %v13577_v61 = vcombine.high %v15250_v34, %v15248_v31  ;;  %v13582_v17 = vcombine.low %v15245_v28, %v15244_v37  ;;  %v15254_v39 = vld [vmem:[#allocation144_spill] sm:$0xff]  ;;  %v15259_v31 = vld [vmem:[#allocation25_spill] sm:$0xff]  ;;  %v15277_v15 = vld [vmem:[#allocation30_spill] sm:$0xff] }
 0x4fe   : > { %8148 = vmatpush1.bf16.msra.mxu1 %v13562_v1  ;;  %v15255_v45 = vmov %v15254_v39  ;;  %15258 = vst [vmem:[#allocation212_spill] sm:$0xff] %v13592_v24  ;;  %v15260_v52 = vmov %v15259_v31  ;;  %v15261_v34 = vld [vmem:[#allocation21_spill] sm:$0xff] }
 0x4ff   : > { %15246 = vst [vmem:[#allocation207_spill] sm:$0xff] %v13567_v53  ;;  %15252 = vst [vmem:[#allocation209_spill] sm:$0xff] %v13577_v61  ;;  %8149 = vmatprep.subr.bf16.mxu1 %v13567_v53  ;;  %v15262_v1 = vmov %v15261_v34 }
 0x500   : > { %8105 = vmatpush1.bf16.msra.mxu0 %v13552_v33  ;;  %15253 = vst [vmem:[#allocation210_spill] sm:$0xff] %v13582_v17  ;;  %v15256_v33 = vld [vmem:[#allocation140_spill] sm:$0xff] }
 0x501   : > { %8106 = vmatprep.subr.bf16.mxu0 %v13557_v23  ;;  %v13587_v48 = vcombine.high %v15256_v33, %v15254_v39  ;;  %v13597_v23 = vcombine.high %v15261_v34, %v15259_v31  ;;  %v13602_v28 = vcombine.low %v15256_v33, %v15255_v45  ;;  %v15265_v39 = vld [vmem:[#allocation26_spill] sm:$0xff]  ;;  %v13616_v31 = vcombine.low %v15262_v1, %v15260_v52  ;;  %v15270_v34 = vld [vmem:[#allocation33_spill] sm:$0xff] }
 0x502   : > { %8150 = vmatpush1.bf16.msra.mxu1 %v13582_v17  ;;  %v15266_v37 = vmov %v15265_v39  ;;  %v15271_v33 = vmov %v15270_v34  ;;  %v13621_v45 = vcombine.high %v15272_v44, %v15270_v34  ;;  %v15281_v1 = vld [vmem:[#allocation41_spill] sm:$0xff] }
 0x503   : > { %15257 = vst [vmem:[#allocation211_spill] sm:$0xff] %v13587_v48  ;;  %15263 = vst [vmem:[#allocation213_spill] sm:$0xff] %v13597_v23  ;;  %8151 = vmatprep.subr.bf16.mxu1 %v13587_v48  ;;  %v15276_v48 = vmov %v15275_v56  ;;  %v13637_v34 = vcombine.low %v15272_v44, %v15271_v33 }
 0x504   : > { %8107 = vmatpush1.bf16.msra.mxu0 %v13572_v41  ;;  %15264 = vst [vmem:[#allocation214_spill] sm:$0xff] %v13602_v28  ;;  %v15267_v41 = vld [vmem:[#allocation22_spill] sm:$0xff]  ;;  %15269 = vst [vmem:[#allocation216_spill] sm:$0xff] %v13616_v31 }
 0x505   : > { %8108 = vmatprep.subr.bf16.mxu0 %v13577_v61  ;;  %v13607_v53 = vcombine.high %v15267_v41, %v15265_v39  ;;  %15273 = vst [vmem:[#allocation217_spill] sm:$0xff] %v13621_v45  ;;  %v13626_v39 = vcombine.low %v15267_v41, %v15266_v37  ;;  %v13631_v61 = vcombine.high %v15277_v15, %v15275_v56  ;;  %15280 = vst [vmem:[#allocation220_spill] sm:$0xff] %v13637_v34  ;;  %v15282_v37 = vld [vmem:[#allocation37_spill] sm:$0xff] }
 0x506   : > { %8152 = vmatpush1.bf16.msra.mxu1 %v13602_v28  ;;  %v13643_v41 = vcombine.high %v15282_v37, %v15281_v1  ;;  %v13660_v44 = vcombine.low %v15282_v37, %v15281_v1  ;;  %v15300_v37 = vld [vmem:[#allocation57_spill] sm:$0xff] }
 0x507   : > { %15268 = vst [vmem:[#allocation215_spill] sm:$0xff] %v13607_v53  ;;  %15274 = vst [vmem:[#allocation218_spill] sm:$0xff] %v13626_v39  ;;  %8207 = vmatprep.subr.bf16.mxu1 %v13607_v53 }
 0x508   : > { %8109 = vmatpush1.bf16.msra.mxu0 %v13592_v24  ;;  %v15278_v24 = vmov %v15277_v15  ;;  %15279 = vst [vmem:[#allocation219_spill] sm:$0xff] %v13631_v61  ;;  %15283 = vst [vmem:[#allocation221_spill] sm:$0xff] %v13643_v41  ;;  %v15285_v15 = vld [vmem:[#allocation42_spill] sm:$0xff] }
 0x509   : > { %8164 = vmatprep.subr.bf16.mxu0 %v13597_v23  ;;  %8154 = vmatmul.mubr.bf16.vlgmr.msra.gmra.mrb[0].mxu1 %v13611_v30  ;;  %v13648_v56 = vcombine.low %v15278_v24, %v15276_v48  ;;  %v15286_v52 = vmov %v15285_v15  ;;  %15290 = vst [vmem:[#allocation224_spill] sm:$0xff] %v13660_v44  ;;  %v15291_v24 = vld [vmem:[#allocation49_spill] sm:$0xff] }
 0x50a   : > { %8208 = vmatpush1.bf16.msra.mxu1 %v13626_v39  ;;  %8239 = vmatprep.mubr.bf16.mxu1 %v13370_v46  ;;  %v15292_v48 = vld [vmem:[#allocation45_spill] sm:$0xff] }
 0x50b   : > { %8111 = vmatmul.mubr.bf16.vlgmr.msra.gmra.mrb[0].mxu0 %v13611_v30  ;;  %15284 = vst [vmem:[#allocation222_spill] sm:$0xff] %v13648_v56  ;;  %8209 = vmatprep.subr.bf16.mxu1 %v13631_v61  ;;  %v13680_v1 = vcombine.low %v15292_v48, %v15291_v24 }
 0x50c   : > { %8165 = vmatpush1.bf16.msra.mxu0 %v13616_v31  ;;  %v15287_v31 = vld [vmem:[#allocation38_spill] sm:$0xff]  ;;  %8196 = vmatprep.mubr.bf16.mxu0 %v13370_v46 }
 0x50d   : > { %8166 = vmatprep.subr.bf16.mxu0 %v13621_v45  ;;  %v15288_v28 = vmov %v15287_v31  ;;  %v13653_v33 = vcombine.high %v15287_v31, %v15285_v15  ;;  %v13665_v45 = vcombine.high %v15292_v48, %v15291_v24  ;;  %v15295_v46 = vld [vmem:[#allocation50_spill] sm:$0xff]  ;;  %15299 = vst [vmem:[#allocation228_spill] sm:$0xff] %v13680_v1  ;;  %v15309_v48 = vld [vmem:[#allocation65_spill] sm:$0xff] }
 0x50e   : > { %8210 = vmatpush1.bf16.msra.mxu1 %v13648_v56  ;;  %v13670_v31 = vcombine.low %v15288_v28, %v15286_v52  ;;  %v15296_v15 = vld [vmem:[#allocation46_spill] sm:$0xff] }
 0x50f   : > { %15289 = vst [vmem:[#allocation223_spill] sm:$0xff] %v13653_v33  ;;  %15293 = vst [vmem:[#allocation225_spill] sm:$0xff] %v13665_v45  ;;  %8211 = vmatprep.subr.bf16.mxu1 %v13653_v33  ;;  %v15297_v17 = vmov %v15296_v15 }
 0x510   : > { %8167 = vmatpush1.bf16.msra.mxu0 %v13637_v34  ;;  %15294 = vst [vmem:[#allocation226_spill] sm:$0xff] %v13670_v31  ;;  %v13675_v34 = vcombine.high %v15296_v15, %v15295_v46  ;;  %v13690_v28 = vcombine.low %v15297_v17, %v15295_v46  ;;  %v15304_v15 = vld [vmem:[#allocation58_spill] sm:$0xff] }
 0x511   : > { %8168 = vmatprep.subr.bf16.mxu0 %v13643_v41  ;;  %v15301_v41 = vld [vmem:[#allocation53_spill] sm:$0xff]  ;;  %v15305_v52 = vmov %v15304_v15 }
 0x512   : > { %15298 = vst [vmem:[#allocation227_spill] sm:$0xff] %v13675_v34  ;;  %v13685_v56 = vcombine.high %v15301_v41, %v15300_v37  ;;  %8212 = vmatpush1.bf16.msra.mxu1 %v13670_v31  ;;  %15303 = vst [vmem:[#allocation230_spill] sm:$0xff] %v13690_v28  ;;  %v13700_v24 = vcombine.low %v15301_v41, %v15300_v37  ;;  %v15318_v41 = vld [vmem:[#allocation73_spill] sm:$0xff] }
 0x513   : > { %8213 = vmatprep.subr.bf16.mxu1 %v13675_v34 }
 0x514   : > { %8169 = vmatpush1.bf16.msra.mxu0 %v13660_v44  ;;  %15302 = vst [vmem:[#allocation229_spill] sm:$0xff] %v13685_v56  ;;  %v15306_v44 = vld [vmem:[#allocation54_spill] sm:$0xff]  ;;  %15308 = vst [vmem:[#allocation232_spill] sm:$0xff] %v13700_v24 }
 0x515   : > { %8170 = vmatprep.subr.bf16.mxu0 %v13665_v45  ;;  %v13695_v33 = vcombine.high %v15306_v44, %v15304_v15  ;;  %v15310_v45 = vld [vmem:[#allocation61_spill] sm:$0xff]  ;;  %v13710_v17 = vcombine.low %v15306_v44, %v15305_v52  ;;  %v15313_v15 = vld [vmem:[#allocation66_spill] sm:$0xff] }
 0x516   : > { %v13705_v31 = vcombine.high %v15310_v45, %v15309_v48  ;;  %8214 = vmatpush1.bf16.msra.mxu1 %v13690_v28  ;;  %v15314_v46 = vmov %v15313_v15  ;;  %v13720_v37 = vcombine.low %v15310_v45, %v15309_v48 }
 0x517   : > { %15307 = vst [vmem:[#allocation231_spill] sm:$0xff] %v13695_v33  ;;  %15312 = vst [vmem:[#allocation234_spill] sm:$0xff] %v13710_v17  ;;  %8215 = vmatprep.subr.bf16.mxu1 %v13695_v33 }
 0x518   : > { %8171 = vmatpush1.bf16.msra.mxu0 %v13680_v1  ;;  %15311 = vst [vmem:[#allocation233_spill] sm:$0xff] %v13705_v31  ;;  %v15315_v1 = vld [vmem:[#allocation62_spill] sm:$0xff]  ;;  %15317 = vst [vmem:[#allocation236_spill] sm:$0xff] %v13720_v37 }
 0x519   : > { %8172 = vmatprep.subr.bf16.mxu0 %v13685_v56  ;;  %v13715_v34 = vcombine.high %v15315_v1, %v15313_v15  ;;  %v15319_v56 = vld [vmem:[#allocation69_spill] sm:$0xff]  ;;  %v13730_v44 = vcombine.low %v15315_v1, %v15314_v46  ;;  %v15323_v15 = vld [vmem:[#allocation74_spill] sm:$0xff] }
 0x51a   : > { %v15320_v28 = vmov %v15319_v56  ;;  %v13725_v61 = vcombine.high %v15319_v56, %v15318_v41  ;;  %8216 = vmatpush1.bf16.msra.mxu1 %v13710_v17  ;;  %v15324_v52 = vmov %v15323_v15  ;;  %v15328_v56 = vld [vmem:[#allocation81_spill] sm:$0xff] }
 0x51b   : > { %15316 = vst [vmem:[#allocation235_spill] sm:$0xff] %v13715_v34  ;;  %15322 = vst [vmem:[#allocation238_spill] sm:$0xff] %v13730_v44  ;;  %8217 = vmatprep.subr.bf16.mxu1 %v13715_v34  ;;  %v13740_v45 = vcombine.low %v15320_v28, %v15318_v41  ;;  %v15329_v48 = vmov %v15328_v56 }
 0x51c   : > { %8173 = vmatpush1.bf16.msra.mxu0 %v13700_v24  ;;  %15321 = vst [vmem:[#allocation237_spill] sm:$0xff] %v13725_v61  ;;  %v15325_v24 = vld [vmem:[#allocation70_spill] sm:$0xff] }
 0x51d   : > { %8174 = vmatprep.subr.bf16.mxu0 %v13705_v31  ;;  %v13735_v33 = vcombine.high %v15325_v24, %v15323_v15  ;;  %15327 = vst [vmem:[#allocation240_spill] sm:$0xff] %v13740_v45  ;;  %v15330_v31 = vld [vmem:[#allocation77_spill] sm:$0xff]  ;;  %v13750_v1 = vcombine.low %v15325_v24, %v15324_v52  ;;  %v15334_v15 = vld [vmem:[#allocation82_spill] sm:$0xff] }
 0x51e   : > { %v15331_v17 = vmov %v15330_v31  ;;  %v13745_v39 = vcombine.high %v15330_v31, %v15328_v56  ;;  %8218 = vmatpush1.bf16.msra.mxu1 %v13730_v44  ;;  %v15335_v46 = vmov %v15334_v15  ;;  %v15339_v31 = vld [vmem:[#allocation89_spill] sm:$0xff] }
 0x51f   : > { %15326 = vst [vmem:[#allocation239_spill] sm:$0xff] %v13735_v33  ;;  %15333 = vst [vmem:[#allocation242_spill] sm:$0xff] %v13750_v1  ;;  %8219 = vmatprep.subr.bf16.mxu1 %v13735_v33  ;;  %v13760_v28 = vcombine.low %v15331_v17, %v15329_v48  ;;  %v15340_v41 = vmov %v15339_v31  ;;  %v15341_v56 = vld [vmem:[#allocation85_spill] sm:$0xff] }
 0x520   : > { %8175 = vmatpush1.bf16.msra.mxu0 %v13720_v37  ;;  %15332 = vst [vmem:[#allocation241_spill] sm:$0xff] %v13745_v39  ;;  %v15336_v37 = vld [vmem:[#allocation78_spill] sm:$0xff]  ;;  %v15342_v44 = vmov %v15341_v56 }
 0x521   : > { %8176 = vmatprep.subr.bf16.mxu0 %v13725_v61  ;;  %v13755_v34 = vcombine.high %v15336_v37, %v15334_v15  ;;  %15338 = vst [vmem:[#allocation244_spill] sm:$0xff] %v13760_v28  ;;  %v13765_v61 = vcombine.high %v15341_v56, %v15339_v31  ;;  %v13770_v24 = vcombine.low %v15336_v37, %v15335_v46  ;;  %v15345_v15 = vld [vmem:[#allocation90_spill] sm:$0xff]  ;;  %v15350_v31 = vld [vmem:[#allocation97_spill] sm:$0xff] }
 0x522   : > { %8220 = vmatpush1.bf16.msra.mxu1 %v13750_v1  ;;  %v15346_v52 = vmov %v15345_v15  ;;  %v13780_v17 = vcombine.low %v15342_v44, %v15340_v41  ;;  %v15351_v48 = vmov %v15350_v31  ;;  %v15352_v56 = vld [vmem:[#allocation93_spill] sm:$0xff] }
 0x523   : > { %15337 = vst [vmem:[#allocation243_spill] sm:$0xff] %v13755_v34  ;;  %15343 = vst [vmem:[#allocation245_spill] sm:$0xff] %v13765_v61  ;;  %8221 = vmatprep.subr.bf16.mxu1 %v13755_v34  ;;  %v15353_v1 = vmov %v15352_v56 }
 0x524   : > { %8177 = vmatpush1.bf16.msra.mxu0 %v13740_v45  ;;  %15344 = vst [vmem:[#allocation246_spill] sm:$0xff] %v13770_v24  ;;  %v15347_v45 = vld [vmem:[#allocation86_spill] sm:$0xff]  ;;  %15349 = vst [vmem:[#allocation248_spill] sm:$0xff] %v13780_v17  ;;  %v13800_v41 = vcombine.low %v15353_v1, %v15351_v48 }
 0x525   : > { %8178 = vmatprep.subr.bf16.mxu0 %v13745_v39  ;;  %v13775_v33 = vcombine.high %v15347_v45, %v15345_v15  ;;  %v13785_v39 = vcombine.high %v15352_v56, %v15350_v31  ;;  %v13790_v37 = vcombine.low %v15347_v45, %v15346_v52  ;;  %v15356_v15 = vld [vmem:[#allocation98_spill] sm:$0xff]  ;;  %v15361_v31 = vld [vmem:[#allocation105_spill] sm:$0xff] }
 0x526   : > { %8222 = vmatpush1.bf16.msra.mxu1 %v13770_v24  ;;  %v15357_v46 = vmov %v15356_v15  ;;  %15360 = vst [vmem:[#allocation252_spill] sm:$0xff] %v13800_v41  ;;  %v15362_v44 = vmov %v15361_v31  ;;  %v15363_v56 = vld [vmem:[#allocation101_spill] sm:$0xff] }
 0x527   : > { %15348 = vst [vmem:[#allocation247_spill] sm:$0xff] %v13775_v33  ;;  %15354 = vst [vmem:[#allocation249_spill] sm:$0xff] %v13785_v39  ;;  %8223 = vmatprep.subr.bf16.mxu1 %v13775_v33  ;;  %v15364_v24 = vmov %v15363_v56 }
 0x528   : > { %8179 = vmatpush1.bf16.msra.mxu0 %v13760_v28  ;;  %15355 = vst [vmem:[#allocation250_spill] sm:$0xff] %v13790_v37  ;;  %v15358_v28 = vld [vmem:[#allocation94_spill] sm:$0xff]  ;;  %v13820_v1 = vcombine.low %v15364_v24, %v15362_v44 }
 0x529   : > { %8180 = vmatprep.subr.bf16.mxu0 %v13765_v61  ;;  %v13795_v34 = vcombine.high %v15358_v28, %v15356_v15  ;;  %v13805_v61 = vcombine.high %v15363_v56, %v15361_v31  ;;  %v13810_v45 = vcombine.low %v15358_v28, %v15357_v46  ;;  %v15367_v15 = vld [vmem:[#allocation106_spill] sm:$0xff]  ;;  %v15372_v31 = vld [vmem:[#allocation113_spill] sm:$0xff] }
 0x52a   : > { %8224 = vmatpush1.bf16.msra.mxu1 %v13790_v37  ;;  %v15368_v52 = vmov %v15367_v15  ;;  %15371 = vst [vmem:[#allocation256_spill] sm:$0xff] %v13820_v1  ;;  %v15373_v48 = vmov %v15372_v31  ;;  %v15374_v56 = vld [vmem:[#allocation109_spill] sm:$0xff] }
 0x52b   : > { %15359 = vst [vmem:[#allocation251_spill] sm:$0xff] %v13795_v34  ;;  %15365 = vst [vmem:[#allocation253_spill] sm:$0xff] %v13805_v61  ;;  %8225 = vmatprep.subr.bf16.mxu1 %v13795_v34  ;;  %v15375_v37 = vmov %v15374_v56 }
 0x52c   : > { %8181 = vmatpush1.bf16.msra.mxu0 %v13780_v17  ;;  %15366 = vst [vmem:[#allocation254_spill] sm:$0xff] %v13810_v45  ;;  %v15369_v17 = vld [vmem:[#allocation102_spill] sm:$0xff]  ;;  %v13840_v24 = vcombine.low %v15375_v37, %v15373_v48 }
 0x52d   : > { %8182 = vmatprep.subr.bf16.mxu0 %v13785_v39  ;;  %v13815_v33 = vcombine.high %v15369_v17, %v15367_v15  ;;  %v13825_v39 = vcombine.high %v15374_v56, %v15372_v31  ;;  %v13830_v28 = vcombine.low %v15369_v17, %v15368_v52  ;;  %v15378_v15 = vld [vmem:[#allocation114_spill] sm:$0xff]  ;;  %v15383_v31 = vld [vmem:[#allocation121_spill] sm:$0xff] }
 0x52e   : > { %8226 = vmatpush1.bf16.msra.mxu1 %v13810_v45  ;;  %v15379_v46 = vmov %v15378_v15  ;;  %15382 = vst [vmem:[#allocation260_spill] sm:$0xff] %v13840_v24  ;;  %v15384_v44 = vmov %v15383_v31  ;;  %v15385_v56 = vld [vmem:[#allocation117_spill] sm:$0xff] }
 0x52f   : > { %15370 = vst [vmem:[#allocation255_spill] sm:$0xff] %v13815_v33  ;;  %15376 = vst [vmem:[#allocation257_spill] sm:$0xff] %v13825_v39  ;;  %8227 = vmatprep.subr.bf16.mxu1 %v13815_v33  ;;  %v15386_v45 = vmov %v15385_v56 }
 0x530   : > { %8183 = vmatpush1.bf16.msra.mxu0 %v13800_v41  ;;  %15377 = vst [vmem:[#allocation258_spill] sm:$0xff] %v13830_v28  ;;  %v15380_v41 = vld [vmem:[#allocation110_spill] sm:$0xff]  ;;  %v13860_v37 = vcombine.low %v15386_v45, %v15384_v44 }
 0x531   : > { %8184 = vmatprep.subr.bf16.mxu0 %v13805_v61  ;;  %v13835_v34 = vcombine.high %v15380_v41, %v15378_v15  ;;  %v13845_v61 = vcombine.high %v15385_v56, %v15383_v31  ;;  %v13850_v17 = vcombine.low %v15380_v41, %v15379_v46  ;;  %v15389_v15 = vld [vmem:[#allocation122_spill] sm:$0xff]  ;;  %v15394_v31 = vld [vmem:[#allocation129_spill] sm:$0xff] }
 0x532   : > { %8228 = vmatpush1.bf16.msra.mxu1 %v13830_v28  ;;  %v15390_v52 = vmov %v15389_v15  ;;  %15393 = vst [vmem:[#allocation264_spill] sm:$0xff] %v13860_v37  ;;  %v15395_v48 = vmov %v15394_v31  ;;  %v15396_v56 = vld [vmem:[#allocation125_spill] sm:$0xff] }
 0x533   : > { %15381 = vst [vmem:[#allocation259_spill] sm:$0xff] %v13835_v34  ;;  %15387 = vst [vmem:[#allocation261_spill] sm:$0xff] %v13845_v61  ;;  %8229 = vmatprep.subr.bf16.mxu1 %v13835_v34  ;;  %v15397_v28 = vmov %v15396_v56 }
 0x534   : > { %8185 = vmatpush1.bf16.msra.mxu0 %v13820_v1  ;;  %15388 = vst [vmem:[#allocation262_spill] sm:$0xff] %v13850_v17  ;;  %v15391_v1 = vld [vmem:[#allocation118_spill] sm:$0xff]  ;;  %v13880_v44 = vcombine.low %v15397_v28, %v15395_v48 }
 0x535   : > { %8186 = vmatprep.subr.bf16.mxu0 %v13825_v39  ;;  %v13855_v33 = vcombine.high %v15391_v1, %v15389_v15  ;;  %v13865_v39 = vcombine.high %v15396_v56, %v15394_v31  ;;  %v13870_v41 = vcombine.low %v15391_v1, %v15390_v52  ;;  %v15400_v15 = vld [vmem:[#allocation130_spill] sm:$0xff]  ;;  %v15405_v31 = vld [vmem:[#allocation137_spill] sm:$0xff] }
 0x536   : > { %8230 = vmatpush1.bf16.msra.mxu1 %v13850_v17  ;;  %v15401_v46 = vmov %v15400_v15  ;;  %15404 = vst [vmem:[#allocation268_spill] sm:$0xff] %v13880_v44  ;;  %v15406_v45 = vmov %v15405_v31  ;;  %v15407_v56 = vld [vmem:[#allocation133_spill] sm:$0xff] }
 0x537   : > { %15392 = vst [vmem:[#allocation263_spill] sm:$0xff] %v13855_v33  ;;  %15398 = vst [vmem:[#allocation265_spill] sm:$0xff] %v13865_v39  ;;  %8231 = vmatprep.subr.bf16.mxu1 %v13855_v33  ;;  %v15408_v17 = vmov %v15407_v56 }
 0x538   : > { %8187 = vmatpush1.bf16.msra.mxu0 %v13840_v24  ;;  %15399 = vst [vmem:[#allocation266_spill] sm:$0xff] %v13870_v41  ;;  %v15402_v24 = vld [vmem:[#allocation126_spill] sm:$0xff]  ;;  %v13900_v28 = vcombine.low %v15408_v17, %v15406_v45  ;;  %v15434_v45 = vld [vmem:[#allocation199_spill] sm:$0xff] }
 0x539   : > { %8188 = vmatprep.subr.bf16.mxu0 %v13845_v61  ;;  %v13875_v34 = vcombine.high %v15402_v24, %v15400_v15  ;;  %v13885_v61 = vcombine.high %v15407_v56, %v15405_v31  ;;  %v13890_v1 = vcombine.low %v15402_v24, %v15401_v46  ;;  %v15411_v15 = vld [vmem:[#allocation138_spill] sm:$0xff]  ;;  %v15416_v31 = vld [vmem:[#allocation145_spill] sm:$0xff] }
 0x53a   : > { %8232 = vmatpush1.bf16.msra.mxu1 %v13870_v41  ;;  %v15412_v52 = vmov %v15411_v15  ;;  %15415 = vst [vmem:[#allocation272_spill] sm:$0xff] %v13900_v28  ;;  %v15417_v48 = vmov %v15416_v31  ;;  %v15418_v56 = vld [vmem:[#allocation141_spill] sm:$0xff] }
 0x53b   : > { %15403 = vst [vmem:[#allocation267_spill] sm:$0xff] %v13875_v34  ;;  %15409 = vst [vmem:[#allocation269_spill] sm:$0xff] %v13885_v61  ;;  %8233 = vmatprep.subr.bf16.mxu1 %v13875_v34  ;;  %v15419_v41 = vmov %v15418_v56 }
 0x53c   : > { %8189 = vmatpush1.bf16.msra.mxu0 %v13860_v37  ;;  %15410 = vst [vmem:[#allocation270_spill] sm:$0xff] %v13890_v1  ;;  %v15413_v37 = vld [vmem:[#allocation134_spill] sm:$0xff]  ;;  %v13920_v17 = vcombine.low %v15419_v41, %v15417_v48 }
 0x53d   : > { %8190 = vmatprep.subr.bf16.mxu0 %v13865_v39  ;;  %v13895_v33 = vcombine.high %v15413_v37, %v15411_v15  ;;  %v13905_v39 = vcombine.high %v15418_v56, %v15416_v31  ;;  %v13910_v24 = vcombine.low %v15413_v37, %v15412_v52  ;;  %v15422_v15 = vld [vmem:[#allocation146_spill] sm:$0xff]  ;;  %v15429_v56 = vld [vmem:[#allocation193_spill] sm:$0xff]  ;;  %v15431_v37 = vld [vmem:[#allocation196_spill] sm:$0xff] }
 0x53e   : > { %8234 = vmatpush1.bf16.msra.mxu1 %v13890_v1  ;;  %v15423_v46 = vmov %v15422_v15  ;;  %15426 = vst [vmem:[#allocation276_spill] sm:$0xff] %v13920_v17  ;;  %v15432_v41 = vld [vmem:[#allocation198_spill] sm:$0xff]  ;;  %v15437_v52 = vld [vmem:[#allocation201_spill] sm:$0xff] }
 0x53f   : > { %15414 = vst [vmem:[#allocation271_spill] sm:$0xff] %v13895_v33  ;;  %15420 = vst [vmem:[#allocation273_spill] sm:$0xff] %v13905_v39  ;;  %8235 = vmatprep.subr.bf16.mxu1 %v13895_v33  ;;  %v15436_v48 = vld [vmem:[#allocation202_spill] sm:$0xff] }
 0x540   : > { %8191 = vmatpush1.bf16.msra.mxu0 %v13880_v44  ;;  %15421 = vst [vmem:[#allocation274_spill] sm:$0xff] %v13910_v24  ;;  %v15424_v44 = vld [vmem:[#allocation142_spill] sm:$0xff] }
 0x541   : > { %8192 = vmatprep.subr.bf16.mxu0 %v13885_v61  ;;  %v13915_v34 = vcombine.high %v15424_v44, %v15422_v15  ;;  %v13926_v31 = vcombine.low %v15424_v44, %v15423_v46  ;;  %v15430_v15 = vld [vmem:[#allocation195_spill] sm:$0xff]  ;;  %v15433_v44 = vld [vmem:[#allocation197_spill] sm:$0xff]  ;;  %v15435_v46 = vld [vmem:[#allocation200_spill] sm:$0xff] }
 0x542   : > { %8236 = vmatpush1.bf16.msra.mxu1 %v13910_v24 }
 0x543   : > { %15425 = vst [vmem:[#allocation275_spill] sm:$0xff] %v13915_v34  ;;  %15427 = vst [vmem:[#allocation277_spill] sm:$0xff] %v13926_v31  ;;  %8237 = vmatprep.subr.bf16.mxu1 %v13915_v34 }
 0x544   : > { %8193 = vmatpush1.bf16.msra.mxu0 %v13900_v28 }
 0x545   : > { %8194 = vmatprep.subr.bf16.mxu0 %v13905_v39 }
 0x546   : > { %8238 = vmatpush1.bf16.msra.mxu1 %v13926_v31 }
 0x547   : > { %8449 = vmatprep.subr.bf16.mxu1 %v13293_v43 }
 0x548   : > { %8195 = vmatpush1.bf16.msra.mxu0 %v13920_v17 }
 0x549   : > { %8406 = vmatprep.subr.bf16.mxu0 %v13281_v22  ;;  %8240 = vmatmul.mubr.bf16.vlgmr.msra.gmra.mrb[4].mxu1 %v13611_v30 }
 0x54a   : > { %8450 = vmatpush1.bf16.msra.mxu1 %v13298_v18 }
 0x54b   : > { %8197 = vmatmul.mubr.bf16.vlgmr.msra.gmra.mrb[4].mxu0 %v13611_v30  ;;  %8451 = vmatprep.subr.bf16.mxu1 %v13302_v27  ;;  %v15428_v30 = vld [vmem:[#allocation192_spill] sm:$0xff] }
 0x54c   : > { %8407 = vmatpush1.bf16.msra.mxu0 %v13285_v59 }
 0x54d   : > { %8408 = vmatprep.subr.bf16.mxu0 %v13289_v6 }
 0x54e   : > { %8452 = vmatpush1.bf16.msra.mxu1 %v13318_v55 }
 0x54f   : > { %8453 = vmatprep.subr.bf16.mxu1 %v13323_v38 }
 0x550   : > { %8409 = vmatpush1.bf16.msra.mxu0 %v13307_v57 }
 0x551   : > { %8410 = vmatprep.subr.bf16.mxu0 %v13313_v54 }
 0x552   : > { %8454 = vmatpush1.bf16.msra.mxu1 %v13338_v47 }
 0x553   : > { %8455 = vmatprep.subr.bf16.mxu1 %v13343_v63 }
 0x554   : > { %8411 = vmatpush1.bf16.msra.mxu0 %v13328_v51 }
 0x555   : > { %8412 = vmatprep.subr.bf16.mxu0 %v13333_v19 }
 0x556   : > { %8456 = vmatpush1.bf16.msra.mxu1 %v13358_v62 }
 0x557   : > { %8457 = vmatprep.subr.bf16.mxu1 %v13363_v11 }
 0x558   : > { %8413 = vmatpush1.bf16.msra.mxu0 %v13348_v49 }
 0x559   : > { %8414 = vmatprep.subr.bf16.mxu0 %v13353_v3 }
 0x55a   : > { %8458 = vmatpush1.bf16.msra.mxu1 %v13380_v35 }
 0x55b   : > { %8459 = vmatprep.subr.bf16.mxu1 %v13385_v10 }
 0x55c   : > { %8415 = vmatpush1.bf16.msra.mxu0 %v13368_v2 }
 0x55d   : > { %8416 = vmatprep.subr.bf16.mxu0 %v13375_v58 }
 0x55e   : > { %8460 = vmatpush1.bf16.msra.mxu1 %v13402_v60 }
 0x55f   : > { %8461 = vmatprep.subr.bf16.mxu1 %v13407_v42 }
 0x560   : > { %8417 = vmatpush1.bf16.msra.mxu0 %v13392_v26 }
 0x561   : > { %8418 = vmatprep.subr.bf16.mxu0 %v13397_v14 }
 0x562   : > { %8462 = vmatpush1.bf16.msra.mxu1 %v13422_v5 }
 0x563   : > { %8463 = vmatprep.subr.bf16.mxu1 %v13427_v12 }
 0x564   : > { %8419 = vmatpush1.bf16.msra.mxu0 %v13412_v50 }
 0x565   : > { %8420 = vmatprep.subr.bf16.mxu0 %v13417_v4 }
 0x566   : > { %8464 = vmatpush1.bf16.msra.mxu1 %v13442_v7 }
 0x567   : > { %8465 = vmatprep.subr.bf16.mxu1 %v13447_v25 }
 0x568   : > { %8421 = vmatpush1.bf16.msra.mxu0 %v13432_v13 }
 0x569   : > { %8422 = vmatprep.subr.bf16.mxu0 %v13437_v20 }
 0x56a   : > { %8466 = vmatpush1.bf16.msra.mxu1 %v13462_v8 }
 0x56b   : > { %8467 = vmatprep.subr.bf16.mxu1 %v13467_v32 }
 0x56c   : > { %8423 = vmatpush1.bf16.msra.mxu0 %v13452_v0 }
 0x56d   : > { %8424 = vmatprep.subr.bf16.mxu0 %v13457_v29 }
 0x56e   : > { %8468 = vmatpush1.bf16.msra.mxu1 %v13482_v21 }
 0x56f   : > { %8469 = vmatprep.subr.bf16.mxu1 %v13487_v40 }
 0x570   : > { %8425 = vmatpush1.bf16.msra.mxu0 %v13472_v16 }
 0x571   : > { %8426 = vmatprep.subr.bf16.mxu0 %v13477_v36 }
 0x572   : > { %8470 = vmatpush1.bf16.msra.mxu1 %v13502_v9  ;;  %v15438_v9 = vld [vmem:[#allocation203_spill] sm:$0xff] }
 0x573   : > { %8471 = vmatprep.subr.bf16.mxu1 %v15430_v15  ;;  %v15440_v15 = vld [vmem:[#allocation206_spill] sm:$0xff] }
 0x574   : > { %8427 = vmatpush1.bf16.msra.mxu0 %v15428_v30  ;;  %v15446_v30 = vld [vmem:[#allocation211_spill] sm:$0xff] }
 0x575   : > { %8428 = vmatprep.subr.bf16.mxu0 %v15429_v56  ;;  %v15439_v56 = vld [vmem:[#allocation204_spill] sm:$0xff] }
 0x576   : > { %8472 = vmatpush1.bf16.msra.mxu1 %v15432_v41  ;;  %v15442_v41 = vld [vmem:[#allocation207_spill] sm:$0xff] }
 0x577   : > { %8473 = vmatprep.subr.bf16.mxu1 %v15434_v45  ;;  %v15444_v45 = vld [vmem:[#allocation210_spill] sm:$0xff] }
 0x578   : > { %8429 = vmatpush1.bf16.msra.mxu0 %v15431_v37  ;;  %v15441_v37 = vld [vmem:[#allocation205_spill] sm:$0xff] }
 0x579   : > { %8430 = vmatprep.subr.bf16.mxu0 %v15433_v44  ;;  %v15443_v44 = vld [vmem:[#allocation208_spill] sm:$0xff] }
 0x57a   : > { %8474 = vmatpush1.bf16.msra.mxu1 %v15436_v48  ;;  %v15447_v48 = vld [vmem:[#allocation212_spill] sm:$0xff] }
 0x57b   : > { %8475 = vmatprep.subr.bf16.mxu1 %v15438_v9 }
 0x57c   : > { %8431 = vmatpush1.bf16.msra.mxu0 %v15435_v46  ;;  %v15445_v46 = vld [vmem:[#allocation209_spill] sm:$0xff] }
 0x57d   : > { %8432 = vmatprep.subr.bf16.mxu0 %v15437_v52  ;;  %v15448_v52 = vld [vmem:[#allocation214_spill] sm:$0xff] }
 0x57e   : > { %8476 = vmatpush1.bf16.msra.mxu1 %v15440_v15 }
 0x57f   : > { %8477 = vmatprep.subr.bf16.mxu1 %v15442_v41  ;;  %v7412_v41 = vld [vmem:[%s14000_s8 + $0x18] sm:$0xff] }
 0x580   : > { %8433 = vmatpush1.bf16.msra.mxu0 %v15439_v56 }
 0x581   : > { %8434 = vmatprep.subr.bf16.mxu0 %v15441_v37 }
 0x582   : > { %8478 = vmatpush1.bf16.msra.mxu1 %v15444_v45  ;;  %v7409_v45 = vld [vmem:[%s14000_s8] sm:$0xff] }
 0x583   : > { %8479 = vmatprep.subr.bf16.mxu1 %v15446_v30  ;;  %v7413_v30 = vunpack.c.l.bf16 %v7409_v45  ;;  %v7417_v15 = vunpack.c.h.bf16 %v7409_v45 }
 0x584   : > { %8435 = vmatpush1.bf16.msra.mxu0 %v15443_v44  ;;  %v7410_v44 = vld [vmem:[%s14000_s8 + $0x8] sm:$0xff] }
 0x585   : > { %8436 = vmatprep.subr.bf16.mxu0 %v15445_v46  ;;  %v7411_v46 = vld [vmem:[%s14000_s8 + $0x10] sm:$0xff]  ;;  %v7414_v37 = vunpack.c.l.bf16 %v7410_v44 }
 0x586   : > { %8480 = vmatpush1.bf16.msra.mxu1 %v15448_v52  ;;  %v7416_v52 = vunpack.c.l.bf16 %v7412_v41  ;;  %v7419_v12 = vunpack.c.h.bf16 %v7411_v46 }
 0x587   : > { %8535 = vmatprep.subr.bf16.mxu1 %v13607_v53 }
 0x588   : > { %8437 = vmatpush1.bf16.msra.mxu0 %v15447_v48  ;;  %v7415_v48 = vunpack.c.l.bf16 %v7411_v46  ;;  %v15449_v46 = vld [vmem:[#allocation150_spill] sm:$0xff] }
 0x589   : > { %8492 = vmatprep.subr.bf16.mxu0 %v13597_v23  ;;  %v7418_v23 = vunpack.c.h.bf16 %v7410_v44 }
 0x5dc   : > { %v8155_v40 = vpop.f32.mrb[0].mxu1 }
 0x5dd   : > { %v8252_v16 = vadd.f32 %v8155_v40, %v7415_v48  ;;  %v8157_v32 = vpop.f32.mrb[1].mxu1 }
 0x5de   : > { %v8112_v56 = vpop.f32.mrb[0].mxu0  ;;  %v8253_v25 = vadd.f32 %v8157_v32, %v7416_v52  ;;  %v8159_v20 = vpop.f32.mrb[2].mxu1 }
 0x5df   : > { %v8250_v9 = vadd.f32 %v8112_v56, %v7413_v30  ;;  %v8114_v53 = vpop.f32.mrb[1].mxu0  ;;  %v8161_v4 = vpop.f32.mrb[3].mxu1  ;;  %v8256_v30 = vadd.f32 %v8159_v20, %v7419_v12 }
 0x5e0   : > { %v8251_v36 = vadd.f32 %v8114_v53, %v7414_v37  ;;  %v8116_v21 = vpop.f32.mrb[2].mxu0  ;;  %v7420_v37 = vunpack.c.h.bf16 %v7412_v41  ;;  %v10827_v53 = vmul.f32 -1.442695, %v8252_v16 }
 0x5e1   : > { %v10825_v29 = vmul.f32 -1.442695, %v8250_v9  ;;  %v8254_v8 = vadd.f32 %v8116_v21, %v7417_v15  ;;  %v8118_v0 = vpop.f32.mrb[3].mxu0  ;;  %v10830_v40 = vmul.f32 -1.442695, %v8256_v30  ;;  %v15450_v30 = vld [vmem:[#allocation149_spill] sm:$0xff] }
 0x5e2   : > { %v10826_v7 = vmul.f32 -1.442695, %v8251_v36  ;;  %v8255_v13 = vadd.f32 %v8118_v0, %v7418_v23  ;;  %v8257_v48 = vadd.f32 %v8161_v4, %v7420_v37 }
 0x5e3   : > { %11626 = vpow2.f32 %v10825_v29  ;;  %v10828_v45 = vmul.f32 -1.442695, %v8254_v8 }
 0x5e4   : > { %11628 = vpow2.f32 %v10826_v7  ;;  %v10829_v44 = vmul.f32 -1.442695, %v8255_v13 }
 0x5e5   : > { %11630 = vpow2.f32 %v10828_v45 }
 0x5e6   : > { %11632 = vpow2.f32 %v10829_v44 }
 0x5e7   : > { %11634 = vpow2.f32 %v10827_v53 }
 0x5e8   : > { %11636 = vtanh.f32 %v8253_v25 }
 0x5e9   : > { %11638 = vpow2.f32 %v10830_v40 }
 0x5ea   : > { %11640 = vtanh.f32 %v8257_v48 }
 0x5ed   : > { %v11627_v9 = vpop.eup %11626 }
 0x5ee   : > { %v11629_v21 = vpop.eup %11628  ;;  %v8276_v32 = vadd.f32 1.0, %v11627_v9 }
 0x5ef   : > { %v11631_v0 = vpop.eup %11630  ;;  %v8277_v36 = vadd.f32 1.0, %v11629_v21 }
 0x5f0   : > { %v11633_v29 = vpop.eup %11632  ;;  %11642 = vrcp.f32 %v8276_v32  ;;  %v8279_v8 = vadd.f32 1.0, %v11631_v0 }
 0x5f1   : > { %11644 = vrcp.f32 %v8277_v36  ;;  %v8280_v13 = vadd.f32 1.0, %v11633_v29  ;;  %v11635_v12 = vpop.eup %11634 }
 0x5f2   : > { %11646 = vrcp.f32 %v8279_v8  ;;  %v11637_v16 = vpop.eup %11636  ;;  %v8278_v25 = vadd.f32 1.0, %v11635_v12  ;;  %v7425_v12 = vld [vmem:[%s7423_s18 + $0x28] sm:$0xff] }
 0x5f3   : > { %11648 = vrcp.f32 %v8280_v13  ;;  %v11639_v20 = vpop.eup %11638  ;;  %v7424_v13 = vld [vmem:[%s7423_s18 + $0x20] sm:$0xff] }
 0x5f4   : > { %v11641_v4 = vpop.eup %11640  ;;  %v8281_v45 = vadd.f32 1.0, %v11639_v20  ;;  %11650 = vrcp.f32 %v8278_v25  ;;  %v7429_v20 = vunpack.c.l.bf16 %v7425_v12  ;;  %v7433_v25 = vunpack.c.h.bf16 %v7425_v12 }
 0x5fa   : > { %v11643_v41 = vpop.eup %11642 }
 0x5fb   : > { %v11645_v52 = vpop.eup %11644  ;;  %v8298_v23 = vmul.f32 %v11643_v41, %v11637_v16  ;;  %v7428_v16 = vunpack.c.l.bf16 %v7424_v13  ;;  %v7426_v41 = vld [vmem:[%s7423_s18 + $0x30] sm:$0xff] }
 0x5fc   : > { %v11647_v7 = vpop.eup %11646  ;;  %v8296_v56 = vmul.f32 %v15449_v46, %v11645_v52 }
 0x5fd   : > { %v11649_v15 = vpop.eup %11648  ;;  %v8299_v44 = vmul.f32 %v11647_v7, %v11641_v4  ;;  %v7432_v4 = vunpack.c.h.bf16 %v7424_v13 }
 0x5fe   : > { %v8297_v37 = vmul.f32 %v15450_v30, %v11649_v15  ;;  %v14008_v53 = vadd.f32 %v8298_v23, %v8296_v56  ;;  %v11651_v48 = vpop.eup %11650 }
 0x600   : > { %11652 = vtanh.f32 %v14008_v53  ;;  %v14011_v40 = vadd.f32 %v8299_v44, %v8297_v37 }
 0x601   : > { %11654 = vrcp.f32 %v8281_v45  ;;  %v7430_v45 = vunpack.c.l.bf16 %v7426_v41 }
 0x602   : > { %15451 = vst [vmem:[#allocation150_spill] sm:$0xff] %v14011_v40  ;;  %11656 = vtanh.f32 %v14011_v40 }
 0x60a   : > { %v11653_v9 = vpop.eup %11652 }
 0x60b   : > { %v11655_v21 = vpop.eup %11654  ;;  %v8304_v0 = vmul.f32 %v11653_v9, %v11651_v48 }
 0x60c   : > { %v11657_v32 = vpop.eup %11656 }
 0x60d   : > { %v8305_v36 = vmul.f32 %v11657_v32, %v11655_v21 }
 0x60f   : > { %v8362_v29 = vpack.c.bf16 %v8305_v36, %v8305_v36  ;;  %v14019_v8 = vpack.c.bf16 %v8305_v36, %v8304_v0  ;;  %v7427_v0 = vld [vmem:[%s7423_s18 + $0x38] sm:$0xff]  ;;  %v7434_v36 = vunpack.c.h.bf16 %v7426_v41 }
 0x611   : > { %8366 = vst [vmem:[%s14021_s15] sm:$0xf] %v8362_v29 }
 0x61c   : > { %v8241_v46 = vpop.f32.mrb[4].mxu1 }
 0x61d   : > { %v8243_v44 = vpop.f32.mrb[5].mxu1 }
 0x61e   : > { %v8198_v52 = vpop.f32.mrb[4].mxu0  ;;  %v8245_v9 = vpop.f32.mrb[6].mxu1 }
 0x61f   : > { %v8306_v23 = vadd.f32 %v8198_v52, %v7428_v16  ;;  %v8200_v7 = vpop.f32.mrb[5].mxu0  ;;  %v8247_v29 = vpop.f32.mrb[7].mxu1  ;;  %v8308_v16 = vadd.f32 %v8241_v46, %v7430_v45  ;;  %v7431_v52 = vunpack.c.l.bf16 %v7427_v0 }
 0x620   : > { %v8307_v56 = vadd.f32 %v8200_v7, %v7429_v20  ;;  %v8202_v15 = vpop.f32.mrb[6].mxu0  ;;  %v8312_v20 = vadd.f32 %v8245_v9, %v7434_v36  ;;  %v7435_v7 = vunpack.c.h.bf16 %v7427_v0 }
 0x621   : > { %v10831_v30 = vmul.f32 -1.442695, %v8306_v23  ;;  %v8310_v37 = vadd.f32 %v8202_v15, %v7432_v4  ;;  %v8204_v48 = vpop.f32.mrb[7].mxu0  ;;  %v10833_v40 = vmul.f32 -1.442695, %v8308_v16  ;;  %v8309_v23 = vadd.f32 %v8243_v44, %v7431_v52 }
 0x622   : > { %v10832_v21 = vmul.f32 -1.442695, %v8307_v56  ;;  %v8311_v32 = vadd.f32 %v8204_v48, %v7433_v25  ;;  %v10836_v4 = vmul.f32 -1.442695, %v8312_v20  ;;  %v8313_v15 = vadd.f32 %v8247_v29, %v7435_v7 }
 0x623   : > { %11658 = vpow2.f32 %v10831_v30  ;;  %v10834_v13 = vmul.f32 -1.442695, %v8310_v37 }
 0x624   : > { %11660 = vpow2.f32 %v10832_v21  ;;  %v10835_v12 = vmul.f32 -1.442695, %v8311_v32 }
 0x625   : > { %11662 = vpow2.f32 %v10834_v13 }
 0x626   : > { %11664 = vpow2.f32 %v10835_v12  ;;  %v15452_v12 = vld [vmem:[#allocation148_spill] sm:$0xff] }
 0x627   : > { %11666 = vpow2.f32 %v10833_v40 }
 0x628   : > { %11668 = vtanh.f32 %v8309_v23  ;;  %v15453_v23 = vld [vmem:[#allocation147_spill] sm:$0xff] }
 0x629   : > { %11670 = vpow2.f32 %v10836_v4 }
 0x62a   : > { %11672 = vtanh.f32 %v8313_v15 }
 0x62d   : > { %v11659_v56 = vpop.eup %11658 }
 0x62e   : > { %v11661_v25 = vpop.eup %11660  ;;  %v8332_v41 = vadd.f32 1.0, %v11659_v56 }
 0x62f   : > { %v11663_v30 = vpop.eup %11662  ;;  %v8333_v37 = vadd.f32 1.0, %v11661_v25 }
 0x630   : > { %v11665_v48 = vpop.eup %11664  ;;  %11674 = vrcp.f32 %v8332_v41  ;;  %v8335_v46 = vadd.f32 1.0, %v11663_v30 }
 0x631   : > { %11676 = vrcp.f32 %v8333_v37  ;;  %v8336_v45 = vadd.f32 1.0, %v11665_v48  ;;  %v11667_v9 = vpop.eup %11666 }
 0x632   : > { %11678 = vrcp.f32 %v8335_v46  ;;  %v11669_v44 = vpop.eup %11668  ;;  %v8334_v36 = vadd.f32 1.0, %v11667_v9 }
 0x633   : > { %11680 = vrcp.f32 %v8336_v45  ;;  %v11671_v21 = vpop.eup %11670 }
 0x634   : > { %v11673_v32 = vpop.eup %11672  ;;  %v8337_v20 = vadd.f32 1.0, %v11671_v21  ;;  %11682 = vrcp.f32 %v8334_v36  ;;  %v15455_v21 = vld [vmem:[#allocation218_spill] sm:$0xff] }
 0x635   : > { %v15459_v36 = vld [vmem:[#allocation222_spill] sm:$0xff] }
 0x63a   : > { %v11675_v40 = vpop.eup %11674 }
 0x63b   : > { %v11677_v0 = vpop.eup %11676  ;;  %v8354_v29 = vmul.f32 %v11675_v40, %v11669_v44  ;;  %v15454_v44 = vld [vmem:[#allocation216_spill] sm:$0xff]  ;;  %v15457_v40 = vld [vmem:[#allocation219_spill] sm:$0xff] }
 0x63c   : > { %v11679_v13 = vpop.eup %11678  ;;  %v8352_v16 = vmul.f32 %v15452_v12, %v11677_v0  ;;  %v15458_v0 = vld [vmem:[#allocation220_spill] sm:$0xff] }
 0x63d   : > { %v11681_v52 = vpop.eup %11680  ;;  %v8355_v7 = vmul.f32 %v11679_v13, %v11673_v32  ;;  %v15456_v32 = vld [vmem:[#allocation217_spill] sm:$0xff]  ;;  %v15461_v13 = vld [vmem:[#allocation223_spill] sm:$0xff]  ;;  %v15462_v12 = vld [vmem:[#allocation224_spill] sm:$0xff] }
 0x63e   : > { %v8353_v4 = vmul.f32 %v15453_v23, %v11681_v52  ;;  %v14028_v15 = vadd.f32 %v8354_v29, %v8352_v16  ;;  %v11683_v25 = vpop.eup %11682  ;;  %v15460_v29 = vld [vmem:[#allocation221_spill] sm:$0xff]  ;;  %v15463_v16 = vld [vmem:[#allocation226_spill] sm:$0xff] }
 0x63f   : > { %v15464_v52 = vld [vmem:[#allocation225_spill] sm:$0xff]  ;;  %v15467_v23 = vld [vmem:[#allocation230_spill] sm:$0xff] }
 0x640   : > { %11684 = vtanh.f32 %v14028_v15  ;;  %v14031_v56 = vadd.f32 %v8355_v7, %v8353_v4  ;;  %v15466_v7 = vld [vmem:[#allocation228_spill] sm:$0xff]  ;;  %v15468_v4 = vld [vmem:[#allocation229_spill] sm:$0xff] }
 0x641   : > { %11686 = vrcp.f32 %v8337_v20  ;;  %v15465_v20 = vld [vmem:[#allocation227_spill] sm:$0xff] }
 0x642   : > { %11688 = vtanh.f32 %v14031_v56 }
 0x64a   : > { %v11685_v41 = vpop.eup %11684 }
 0x64b   : > { %v11687_v30 = vpop.eup %11686  ;;  %v8360_v48 = vmul.f32 %v11685_v41, %v11683_v25  ;;  %v15469_v25 = vld [vmem:[#allocation231_spill] sm:$0xff]  ;;  %v15470_v41 = vld [vmem:[#allocation232_spill] sm:$0xff] }
 0x64c   : > { %v11689_v37 = vpop.eup %11688 }
 0x64d   : > { %v8361_v46 = vmul.f32 %v11689_v37, %v11687_v30  ;;  %v15471_v30 = vld [vmem:[#allocation234_spill] sm:$0xff]  ;;  %v15472_v37 = vld [vmem:[#allocation233_spill] sm:$0xff] }
 0x64f   : > { %v8367_v45 = vpack.c.bf16 %v8361_v46, %v8361_v46  ;;  %v8405_v9 = vpack.c.bf16 %v8361_v46, %v8360_v48  ;;  %v15473_v48 = vld [vmem:[#allocation235_spill] sm:$0xff]  ;;  %v15474_v46 = vld [vmem:[#allocation236_spill] sm:$0xff] }
 0x651   : > { %8438 = vmatprep.mubr.bf16.mxu0 %v8405_v9  ;;  %8481 = vmatprep.mubr.bf16.mxu1 %v8405_v9  ;;  %8371 = vst [vmem:[%s8370_s21 + $0x4] sm:$0xf] %v8367_v45  ;;  %v15475_v45 = vld [vmem:[#allocation238_spill] sm:$0xff] }
 0x652   : > { %8439 = vmatmul.mubr.bf16.vlgmr.msra.gmra.mrb[8].mxu0 %v14019_v8  ;;  %8482 = vmatmul.mubr.bf16.vlgmr.msra.gmra.mrb[8].mxu1 %v14019_v8 }
 0x653   : > { %8493 = vmatpush1.bf16.msra.mxu0 %v15454_v44  ;;  %8536 = vmatpush1.bf16.msra.mxu1 %v15455_v21 }
 0x654   : > { %8524 = vmatprep.mubr.bf16.mxu0 %v8405_v9  ;;  %8567 = vmatprep.mubr.bf16.mxu1 %v8405_v9  ;;  %v15476_v9 = vld [vmem:[#allocation237_spill] sm:$0xff] }
 0x655   : > { %8494 = vmatprep.subr.bf16.mxu0 %v15456_v32  ;;  %8537 = vmatprep.subr.bf16.mxu1 %v15457_v40 }
 0x657   : > { %8495 = vmatpush1.bf16.msra.mxu0 %v15458_v0  ;;  %8538 = vmatpush1.bf16.msra.mxu1 %v15459_v36 }
 0x658   : > { %8496 = vmatprep.subr.bf16.mxu0 %v15460_v29  ;;  %8539 = vmatprep.subr.bf16.mxu1 %v15461_v13 }
 0x65b   : > { %8497 = vmatpush1.bf16.msra.mxu0 %v15462_v12  ;;  %8540 = vmatpush1.bf16.msra.mxu1 %v15463_v16 }
 0x65c   : > { %8498 = vmatprep.subr.bf16.mxu0 %v15464_v52  ;;  %8541 = vmatprep.subr.bf16.mxu1 %v15465_v20 }
 0x65f   : > { %8499 = vmatpush1.bf16.msra.mxu0 %v15466_v7  ;;  %8542 = vmatpush1.bf16.msra.mxu1 %v15467_v23  ;;  %v15477_v7 = vld [vmem:[#allocation239_spill] sm:$0xff]  ;;  %v15478_v23 = vld [vmem:[#allocation240_spill] sm:$0xff] }
 0x660   : > { %8500 = vmatprep.subr.bf16.mxu0 %v15468_v4  ;;  %8543 = vmatprep.subr.bf16.mxu1 %v15469_v25  ;;  %v15479_v4 = vld [vmem:[#allocation242_spill] sm:$0xff]  ;;  %v15480_v25 = vld [vmem:[#allocation241_spill] sm:$0xff] }
 0x663   : > { %8501 = vmatpush1.bf16.msra.mxu0 %v15470_v41  ;;  %8544 = vmatpush1.bf16.msra.mxu1 %v15471_v30  ;;  %v15481_v41 = vld [vmem:[#allocation243_spill] sm:$0xff]  ;;  %v15482_v30 = vld [vmem:[#allocation244_spill] sm:$0xff] }
 0x664   : > { %8502 = vmatprep.subr.bf16.mxu0 %v15472_v37  ;;  %8545 = vmatprep.subr.bf16.mxu1 %v15473_v48  ;;  %v15483_v37 = vld [vmem:[#allocation246_spill] sm:$0xff]  ;;  %v15484_v48 = vld [vmem:[#allocation245_spill] sm:$0xff] }
 0x667   : > { %8503 = vmatpush1.bf16.msra.mxu0 %v15474_v46  ;;  %8546 = vmatpush1.bf16.msra.mxu1 %v15475_v45  ;;  %v15485_v46 = vld [vmem:[#allocation247_spill] sm:$0xff]  ;;  %v15486_v45 = vld [vmem:[#allocation248_spill] sm:$0xff] }
 0x668   : > { %8504 = vmatprep.subr.bf16.mxu0 %v15476_v9  ;;  %8547 = vmatprep.subr.bf16.mxu1 %v15477_v7  ;;  %v15487_v9 = vld [vmem:[#allocation250_spill] sm:$0xff]  ;;  %v15488_v7 = vld [vmem:[#allocation249_spill] sm:$0xff] }
 0x66b   : > { %8505 = vmatpush1.bf16.msra.mxu0 %v15478_v23  ;;  %8548 = vmatpush1.bf16.msra.mxu1 %v15479_v4  ;;  %v15489_v23 = vld [vmem:[#allocation251_spill] sm:$0xff]  ;;  %v15490_v4 = vld [vmem:[#allocation252_spill] sm:$0xff] }
 0x66c   : > { %8506 = vmatprep.subr.bf16.mxu0 %v15480_v25  ;;  %8549 = vmatprep.subr.bf16.mxu1 %v15481_v41  ;;  %v15491_v25 = vld [vmem:[#allocation254_spill] sm:$0xff]  ;;  %v15492_v41 = vld [vmem:[#allocation253_spill] sm:$0xff] }
 0x66f   : > { %8507 = vmatpush1.bf16.msra.mxu0 %v15482_v30  ;;  %8550 = vmatpush1.bf16.msra.mxu1 %v15483_v37  ;;  %v15493_v30 = vld [vmem:[#allocation255_spill] sm:$0xff]  ;;  %v15494_v37 = vld [vmem:[#allocation256_spill] sm:$0xff] }
 0x670   : > { %8508 = vmatprep.subr.bf16.mxu0 %v15484_v48  ;;  %8551 = vmatprep.subr.bf16.mxu1 %v15485_v46  ;;  %v15495_v48 = vld [vmem:[#allocation258_spill] sm:$0xff]  ;;  %v15496_v46 = vld [vmem:[#allocation257_spill] sm:$0xff] }
 0x673   : > { %8509 = vmatpush1.bf16.msra.mxu0 %v15486_v45  ;;  %8552 = vmatpush1.bf16.msra.mxu1 %v15487_v9  ;;  %v15497_v45 = vld [vmem:[#allocation259_spill] sm:$0xff]  ;;  %v15498_v9 = vld [vmem:[#allocation260_spill] sm:$0xff] }
 0x674   : > { %8510 = vmatprep.subr.bf16.mxu0 %v15488_v7  ;;  %8553 = vmatprep.subr.bf16.mxu1 %v15489_v23  ;;  %v15499_v7 = vld [vmem:[#allocation262_spill] sm:$0xff]  ;;  %v15500_v23 = vld [vmem:[#allocation261_spill] sm:$0xff] }
 0x677   : > { %8511 = vmatpush1.bf16.msra.mxu0 %v15490_v4  ;;  %8554 = vmatpush1.bf16.msra.mxu1 %v15491_v25  ;;  %v15501_v4 = vld [vmem:[#allocation263_spill] sm:$0xff]  ;;  %v15502_v25 = vld [vmem:[#allocation264_spill] sm:$0xff] }
 0x678   : > { %8512 = vmatprep.subr.bf16.mxu0 %v15492_v41  ;;  %8555 = vmatprep.subr.bf16.mxu1 %v15493_v30  ;;  %v15503_v41 = vld [vmem:[#allocation266_spill] sm:$0xff]  ;;  %v15504_v30 = vld [vmem:[#allocation265_spill] sm:$0xff] }
 0x67b   : > { %8513 = vmatpush1.bf16.msra.mxu0 %v15494_v37  ;;  %8556 = vmatpush1.bf16.msra.mxu1 %v15495_v48  ;;  %v15505_v37 = vld [vmem:[#allocation267_spill] sm:$0xff]  ;;  %v15506_v48 = vld [vmem:[#allocation268_spill] sm:$0xff] }
 0x67c   : > { %8514 = vmatprep.subr.bf16.mxu0 %v15496_v46  ;;  %8557 = vmatprep.subr.bf16.mxu1 %v15497_v45 }
 0x67f   : > { %8515 = vmatpush1.bf16.msra.mxu0 %v15498_v9  ;;  %8558 = vmatpush1.bf16.msra.mxu1 %v15499_v7 }
 0x680   : > { %8516 = vmatprep.subr.bf16.mxu0 %v15500_v23  ;;  %8559 = vmatprep.subr.bf16.mxu1 %v15501_v4 }
 0x683   : > { %8517 = vmatpush1.bf16.msra.mxu0 %v15502_v25  ;;  %8560 = vmatpush1.bf16.msra.mxu1 %v15503_v41 }
 0x684   : > { %8518 = vmatprep.subr.bf16.mxu0 %v15504_v30  ;;  %8561 = vmatprep.subr.bf16.mxu1 %v15505_v37 }
 0x687   : > { %8519 = vmatpush1.bf16.msra.mxu0 %v15506_v48  ;;  %8562 = vmatpush1.bf16.msra.mxu1 %v13890_v1 }
 0x688   : > { %8520 = vmatprep.subr.bf16.mxu0 %v13885_v61  ;;  %8563 = vmatprep.subr.bf16.mxu1 %v13895_v33 }
 0x68b   : > { %8521 = vmatpush1.bf16.msra.mxu0 %v13900_v28  ;;  %8564 = vmatpush1.bf16.msra.mxu1 %v13910_v24 }
 0x68c   : > { %8522 = vmatprep.subr.bf16.mxu0 %v13905_v39  ;;  %8565 = vmatprep.subr.bf16.mxu1 %v13915_v34 }
 0x68f   : > { %8523 = vmatpush1.bf16.msra.mxu0 %v13920_v17  ;;  %8566 = vmatpush1.bf16.msra.mxu1 %v13926_v31 }
 0x690   : > { %8734 = vmatprep.subr.bf16.mxu0 %v13281_v22  ;;  %8777 = vmatprep.subr.bf16.mxu1 %v13293_v43 }
 0x692   : > { %8525 = vmatmul.mubr.bf16.vlgmr.msra.gmra.mrb[12].mxu0 %v14019_v8  ;;  %8568 = vmatmul.mubr.bf16.vlgmr.msra.gmra.mrb[12].mxu1 %v14019_v8  ;;  %v15507_v8 = vld [vmem:[#allocation177_spill] sm:$0xff] }
 0x693   : > { %8735 = vmatpush1.bf16.msra.mxu0 %v13285_v59  ;;  %8778 = vmatpush1.bf16.msra.mxu1 %v13298_v18 }
 0x694   : > { %8736 = vmatprep.subr.bf16.mxu0 %v13289_v6  ;;  %8779 = vmatprep.subr.bf16.mxu1 %v13302_v27 }
 0x697   : > { %8737 = vmatpush1.bf16.msra.mxu0 %v13307_v57  ;;  %8780 = vmatpush1.bf16.msra.mxu1 %v13318_v55 }
 0x698   : > { %8738 = vmatprep.subr.bf16.mxu0 %v13313_v54  ;;  %8781 = vmatprep.subr.bf16.mxu1 %v13323_v38 }
 0x69b   : > { %8739 = vmatpush1.bf16.msra.mxu0 %v13328_v51  ;;  %8782 = vmatpush1.bf16.msra.mxu1 %v13338_v47 }
 0x69c   : > { %8740 = vmatprep.subr.bf16.mxu0 %v13333_v19  ;;  %8783 = vmatprep.subr.bf16.mxu1 %v13343_v63 }
 0x69f   : > { %8741 = vmatpush1.bf16.msra.mxu0 %v13348_v49  ;;  %8784 = vmatpush1.bf16.msra.mxu1 %v13358_v62 }
 0x6a0   : > { %8742 = vmatprep.subr.bf16.mxu0 %v13353_v3  ;;  %8785 = vmatprep.subr.bf16.mxu1 %v13363_v11  ;;  %v10844_v11 = vld [vmem:[%s14000_s8 + $0x48] sm:$0xff] }
 0x6a1   : > { %v8382_v62 = vunpack.c.l.bf16 %v10844_v11 }
 0x6a3   : > { %8743 = vmatpush1.bf16.msra.mxu0 %v13368_v2  ;;  %8786 = vmatpush1.bf16.msra.mxu1 %v13380_v35  ;;  %v15508_v2 = vld [vmem:[#allocation179_spill] sm:$0xff]  ;;  %v15509_v35 = vld [vmem:[#allocation180_spill] sm:$0xff] }
 0x6a4   : > { %8744 = vmatprep.subr.bf16.mxu0 %v13375_v58  ;;  %8787 = vmatprep.subr.bf16.mxu1 %v13385_v10  ;;  %v15510_v58 = vld [vmem:[#allocation182_spill] sm:$0xff]  ;;  %v15511_v10 = vld [vmem:[#allocation181_spill] sm:$0xff] }
 0x6a7   : > { %8745 = vmatpush1.bf16.msra.mxu0 %v13392_v26  ;;  %8788 = vmatpush1.bf16.msra.mxu1 %v13402_v60  ;;  %v15512_v26 = vld [vmem:[#allocation183_spill] sm:$0xff]  ;;  %v15513_v60 = vld [vmem:[#allocation184_spill] sm:$0xff] }
 0x6a8   : > { %8746 = vmatprep.subr.bf16.mxu0 %v13397_v14  ;;  %8789 = vmatprep.subr.bf16.mxu1 %v13407_v42  ;;  %v15514_v14 = vld [vmem:[#allocation186_spill] sm:$0xff]  ;;  %v15515_v42 = vld [vmem:[#allocation185_spill] sm:$0xff] }
 0x6ab   : > { %8747 = vmatpush1.bf16.msra.mxu0 %v13412_v50  ;;  %8790 = vmatpush1.bf16.msra.mxu1 %v13422_v5  ;;  %v15516_v50 = vld [vmem:[#allocation187_spill] sm:$0xff]  ;;  %v15517_v5 = vld [vmem:[#allocation188_spill] sm:$0xff] }
 0x6ac   : > { %8748 = vmatprep.subr.bf16.mxu0 %v15507_v8  ;;  %8791 = vmatprep.subr.bf16.mxu1 %v15508_v2  ;;  %v15518_v8 = vld [vmem:[#allocation190_spill] sm:$0xff]  ;;  %v15519_v2 = vld [vmem:[#allocation189_spill] sm:$0xff] }
 0x6af   : > { %8749 = vmatpush1.bf16.msra.mxu0 %v15509_v35  ;;  %8792 = vmatpush1.bf16.msra.mxu1 %v15510_v58  ;;  %v15520_v35 = vld [vmem:[#allocation191_spill] sm:$0xff]  ;;  %v15521_v58 = vld [vmem:[#allocation192_spill] sm:$0xff] }
 0x6b0   : > { %8750 = vmatprep.subr.bf16.mxu0 %v15511_v10  ;;  %8793 = vmatprep.subr.bf16.mxu1 %v15512_v26  ;;  %v15522_v10 = vld [vmem:[#allocation194_spill] sm:$0xff]  ;;  %v15523_v26 = vld [vmem:[#allocation193_spill] sm:$0xff] }
 0x6b3   : > { %8751 = vmatpush1.bf16.msra.mxu0 %v15513_v60  ;;  %8794 = vmatpush1.bf16.msra.mxu1 %v15514_v14  ;;  %v15524_v60 = vld [vmem:[#allocation195_spill] sm:$0xff]  ;;  %v15525_v14 = vld [vmem:[#allocation196_spill] sm:$0xff] }
 0x6b4   : > { %8752 = vmatprep.subr.bf16.mxu0 %v15515_v42  ;;  %8795 = vmatprep.subr.bf16.mxu1 %v15516_v50  ;;  %v15526_v42 = vld [vmem:[#allocation198_spill] sm:$0xff]  ;;  %v15527_v50 = vld [vmem:[#allocation197_spill] sm:$0xff] }
 0x6b7   : > { %8753 = vmatpush1.bf16.msra.mxu0 %v15517_v5  ;;  %8796 = vmatpush1.bf16.msra.mxu1 %v15518_v8  ;;  %v15528_v5 = vld [vmem:[#allocation199_spill] sm:$0xff]  ;;  %v15529_v8 = vld [vmem:[#allocation200_spill] sm:$0xff] }
 0x6b8   : > { %8754 = vmatprep.subr.bf16.mxu0 %v15519_v2  ;;  %8797 = vmatprep.subr.bf16.mxu1 %v15520_v35  ;;  %v15530_v2 = vld [vmem:[#allocation202_spill] sm:$0xff]  ;;  %v15543_v35 = vld [vmem:[#allocation213_spill] sm:$0xff] }
 0x6bb   : > { %8755 = vmatpush1.bf16.msra.mxu0 %v15521_v58  ;;  %8798 = vmatpush1.bf16.msra.mxu1 %v15522_v10  ;;  %v15531_v58 = vld [vmem:[#allocation201_spill] sm:$0xff]  ;;  %v15532_v10 = vld [vmem:[#allocation203_spill] sm:$0xff] }
 0x6bc   : > { %8756 = vmatprep.subr.bf16.mxu0 %v15523_v26  ;;  %8799 = vmatprep.subr.bf16.mxu1 %v15524_v60  ;;  %v15533_v60 = vld [vmem:[#allocation204_spill] sm:$0xff]  ;;  %v15540_v26 = vld [vmem:[#allocation211_spill] sm:$0xff] }
 0x6bf   : > { %8757 = vmatpush1.bf16.msra.mxu0 %v15525_v14  ;;  %8800 = vmatpush1.bf16.msra.mxu1 %v15526_v42  ;;  %v15534_v14 = vld [vmem:[#allocation206_spill] sm:$0xff]  ;;  %v15535_v42 = vld [vmem:[#allocation205_spill] sm:$0xff] }
 0x6c0   : > { %8758 = vmatprep.subr.bf16.mxu0 %v15527_v50  ;;  %8801 = vmatprep.subr.bf16.mxu1 %v15528_v5  ;;  %v15536_v50 = vld [vmem:[#allocation207_spill] sm:$0xff]  ;;  %v15537_v5 = vld [vmem:[#allocation208_spill] sm:$0xff] }
 0x6c3   : > { %8759 = vmatpush1.bf16.msra.mxu0 %v15529_v8  ;;  %8802 = vmatpush1.bf16.msra.mxu1 %v15530_v2  ;;  %v15538_v8 = vld [vmem:[#allocation210_spill] sm:$0xff]  ;;  %v15539_v2 = vld [vmem:[#allocation209_spill] sm:$0xff] }
 0x6c4   : > { %8760 = vmatprep.subr.bf16.mxu0 %v15531_v58  ;;  %8803 = vmatprep.subr.bf16.mxu1 %v15532_v10  ;;  %v15541_v58 = vld [vmem:[#allocation212_spill] sm:$0xff]  ;;  %v15542_v10 = vld [vmem:[#allocation214_spill] sm:$0xff] }
 0x6c7   : > { %8761 = vmatpush1.bf16.msra.mxu0 %v15533_v60  ;;  %8804 = vmatpush1.bf16.msra.mxu1 %v15534_v14  ;;  %v15544_v60 = vld [vmem:[#allocation215_spill] sm:$0xff]  ;;  %v10843_v14 = vld [vmem:[%s14000_s8 + $0x40] sm:$0xff] }
 0x6c8   : > { %8762 = vmatprep.subr.bf16.mxu0 %v15535_v42  ;;  %8805 = vmatprep.subr.bf16.mxu1 %v15536_v50  ;;  %v10845_v42 = vld [vmem:[%s14000_s8 + $0x50] sm:$0xff]  ;;  %v10846_v50 = vld [vmem:[%s14000_s8 + $0x58] sm:$0xff]  ;;  %v8381_v3 = vunpack.c.l.bf16 %v10843_v14  ;;  %v8385_v49 = vunpack.c.h.bf16 %v10843_v14 }
 0x6c9   : > { %v8387_v14 = vunpack.c.h.bf16 %v10845_v42 }
 0x6cb   : > { %8763 = vmatpush1.bf16.msra.mxu0 %v15537_v5  ;;  %8806 = vmatpush1.bf16.msra.mxu1 %v15538_v8  ;;  %v8383_v5 = vunpack.c.l.bf16 %v10845_v42  ;;  %v8384_v8 = vunpack.c.l.bf16 %v10846_v50 }
 0x6cc   : > { %8764 = vmatprep.subr.bf16.mxu0 %v15539_v2  ;;  %8807 = vmatprep.subr.bf16.mxu1 %v15540_v26  ;;  %v8386_v26 = vunpack.c.h.bf16 %v10844_v11 }
 0x6cf   : > { %8765 = vmatpush1.bf16.msra.mxu0 %v15541_v58  ;;  %8808 = vmatpush1.bf16.msra.mxu1 %v15542_v10 }
 0x6d0   : > { %8820 = vmatprep.subr.bf16.mxu0 %v15543_v35  ;;  %8863 = vmatprep.subr.bf16.mxu1 %v15544_v60 }
 0x725   : > { %v8440_v2 = vpop.f32.mrb[8].mxu0  ;;  %v8483_v63 = vpop.f32.mrb[8].mxu1 }
 0x726   : > { %v8578_v19 = vadd.f32 %v8440_v2, %v8381_v3  ;;  %v8580_v58 = vadd.f32 %v8483_v63, %v8383_v5  ;;  %v8442_v47 = vpop.f32.mrb[9].mxu0  ;;  %v8485_v10 = vpop.f32.mrb[9].mxu1  ;;  %v8388_v5 = vunpack.c.h.bf16 %v10846_v50 }
 0x727   : > { %v8579_v51 = vadd.f32 %v8442_v47, %v8382_v62  ;;  %v8581_v35 = vadd.f32 %v8485_v10, %v8384_v8  ;;  %v8444_v38 = vpop.f32.mrb[10].mxu0  ;;  %v8487_v60 = vpop.f32.mrb[10].mxu1 }
 0x728   : > { %v10849_v54 = vmul.f32 -1.442695, %v8578_v19  ;;  %v8582_v55 = vadd.f32 %v8444_v38, %v8385_v49  ;;  %v8446_v57 = vpop.f32.mrb[11].mxu0  ;;  %v8489_v27 = vpop.f32.mrb[11].mxu1  ;;  %v8584_v3 = vadd.f32 %v8487_v60, %v8387_v14  ;;  %v10851_v63 = vmul.f32 -1.442695, %v8580_v58 }
 0x729   : > { %v10850_v6 = vmul.f32 -1.442695, %v8579_v51  ;;  %v8583_v18 = vadd.f32 %v8446_v57, %v8386_v26  ;;  %v8585_v11 = vadd.f32 %v8489_v27, %v8388_v5  ;;  %v15545_v14 = vld [vmem:[#allocation150_spill] sm:$0xff] }
 0x72a   : > { %11690 = vpow2.f32 %v10849_v54  ;;  %v10852_v59 = vmul.f32 -1.442695, %v8582_v55  ;;  %v10854_v47 = vmul.f32 -1.442695, %v8584_v3 }
 0x72b   : > { %v10853_v43 = vmul.f32 -1.442695, %v8583_v18  ;;  %11692 = vpow2.f32 %v10850_v6 }
 0x72c   : > { %11694 = vpow2.f32 %v10852_v59 }
 0x72d   : > { %11696 = vpow2.f32 %v10853_v43 }
 0x72e   : > { %11698 = vtanh.f32 %v8581_v35 }
 0x72f   : > { %11700 = vpow2.f32 %v10851_v63 }
 0x730   : > { %11702 = vpow2.f32 %v10854_v47 }
 0x734   : > { %v11691_v62 = vpop.eup %11690 }
 0x735   : > { %v8604_v19 = vadd.f32 1.0, %v11691_v62  ;;  %v11693_v38 = vpop.eup %11692 }
 0x736   : > { %v11695_v51 = vpop.eup %11694  ;;  %v8605_v57 = vadd.f32 1.0, %v11693_v38 }
 0x737   : > { %11704 = vrcp.f32 %v8604_v19  ;;  %v8607_v54 = vadd.f32 1.0, %v11695_v51  ;;  %v11697_v18 = vpop.eup %11696 }
 0x738   : > { %11706 = vtanh.f32 %v8585_v11  ;;  %v8608_v59 = vadd.f32 1.0, %v11697_v18  ;;  %v11699_v6 = vpop.eup %11698 }
 0x739   : > { %11708 = vrcp.f32 %v8605_v57  ;;  %v11701_v43 = vpop.eup %11700  ;;  %v8392_v57 = vld [vmem:[%s8391_s23 + $0x20] sm:$0xff] }
 0x73a   : > { %11710 = vrcp.f32 %v8607_v54  ;;  %v11703_v55 = vpop.eup %11702  ;;  %v8606_v10 = vadd.f32 1.0, %v11701_v43  ;;  %v8393_v54 = vld [vmem:[%s8391_s23 + $0x28] sm:$0xff]  ;;  %v8396_v18 = vunpack.c.l.bf16 %v8392_v57 }
 0x73b   : > { %11712 = vrcp.f32 %v8608_v59  ;;  %v8609_v8 = vadd.f32 1.0, %v11703_v55  ;;  %v8397_v59 = vunpack.c.l.bf16 %v8393_v54 }
 0x73c   : > { %11714 = vrcp.f32 %v8606_v10 }
 0x741   : > { %v11705_v49 = vpop.eup %11704 }
 0x742   : > { %v11707_v2 = vpop.eup %11706  ;;  %v8626_v27 = vmul.f32 %v11705_v49, %v11699_v6  ;;  %v8400_v6 = vunpack.c.h.bf16 %v8392_v57  ;;  %v8401_v49 = vunpack.c.h.bf16 %v8393_v54 }
 0x743   : > { %v11709_v58 = vpop.eup %11708 }
 0x744   : > { %v11711_v35 = vpop.eup %11710  ;;  %v8624_v26 = vmul.f32 %v11709_v58, %v14008_v53 }
 0x745   : > { %v8627_v60 = vmul.f32 %v11711_v35, %v11707_v2  ;;  %v11713_v42 = vpop.eup %11712 }
 0x746   : > { %v14173_v50 = vadd.f32 %v8626_v27, %v8624_v26  ;;  %v8625_v3 = vmul.f32 %v11713_v42, %v15545_v14  ;;  %v11715_v63 = vpop.eup %11714  ;;  %v8394_v27 = vld [vmem:[%s8391_s23 + $0x30] sm:$0xff] }
 0x748   : > { %11716 = vtanh.f32 %v14173_v50  ;;  %v14177_v5 = vadd.f32 %v8627_v60, %v8625_v3 }
 0x749   : > { %11718 = vrcp.f32 %v8609_v8 }
 0x74a   : > { %11720 = vtanh.f32 %v14177_v5 }
 0x752   : > { %v11717_v47 = vpop.eup %11716 }
 0x753   : > { %v11719_v53 = vpop.eup %11718  ;;  %v8632_v11 = vmul.f32 %v11717_v47, %v11715_v63  ;;  %v8398_v63 = vunpack.c.l.bf16 %v8394_v27 }
 0x754   : > { %v11721_v62 = vpop.eup %11720 }
 0x755   : > { %v8633_v19 = vmul.f32 %v11721_v62, %v11719_v53  ;;  %v8395_v53 = vld [vmem:[%s8391_s23 + $0x38] sm:$0xff] }
 0x756   : > { %v8399_v57 = vunpack.c.l.bf16 %v8395_v53 }
 0x757   : > { %v8690_v38 = vpack.c.bf16 %v8633_v19, %v8633_v19  ;;  %v14181_v51 = vpack.c.bf16 %v8633_v19, %v8632_v11  ;;  %v8402_v19 = vunpack.c.h.bf16 %v8394_v27 }
 0x759   : > { %10863 = vst [vmem:[%s14021_s15 + $0x8] sm:$0xf] %v8690_v38 }
 0x765   : > { %v8526_v43 = vpop.f32.mrb[12].mxu0  ;;  %v8569_v55 = vpop.f32.mrb[12].mxu1 }
 0x766   : > { %v8634_v2 = vadd.f32 %v8526_v43, %v8396_v18  ;;  %v8528_v58 = vpop.f32.mrb[13].mxu0  ;;  %v8571_v35 = vpop.f32.mrb[13].mxu1  ;;  %v8636_v54 = vadd.f32 %v8569_v55, %v8398_v63  ;;  %v8403_v43 = vunpack.c.h.bf16 %v8395_v53 }
 0x767   : > { %v8635_v10 = vadd.f32 %v8528_v58, %v8397_v59  ;;  %v8530_v26 = vpop.f32.mrb[14].mxu0  ;;  %v8573_v60 = vpop.f32.mrb[14].mxu1  ;;  %v8637_v59 = vadd.f32 %v8571_v35, %v8399_v57 }
 0x768   : > { %v10855_v42 = vmul.f32 -1.442695, %v8634_v2  ;;  %v8638_v8 = vadd.f32 %v8530_v26, %v8400_v6  ;;  %v8532_v14 = vpop.f32.mrb[15].mxu0  ;;  %v8575_v3 = vpop.f32.mrb[15].mxu1  ;;  %v8640_v18 = vadd.f32 %v8573_v60, %v8402_v19  ;;  %v10857_v2 = vmul.f32 -1.442695, %v8636_v54 }
 0x769   : > { %v10856_v47 = vmul.f32 -1.442695, %v8635_v10  ;;  %v8639_v62 = vadd.f32 %v8532_v14, %v8401_v49  ;;  %v8641_v26 = vadd.f32 %v8575_v3, %v8403_v43 }
 0x76a   : > { %11722 = vpow2.f32 %v10855_v42  ;;  %v10858_v11 = vmul.f32 -1.442695, %v8638_v8  ;;  %v10860_v6 = vmul.f32 -1.442695, %v8640_v18 }
 0x76b   : > { %v10859_v38 = vmul.f32 -1.442695, %v8639_v62  ;;  %11724 = vpow2.f32 %v10856_v47 }
 0x76c   : > { %11726 = vpow2.f32 %v10858_v11 }
 0x76d   : > { %11728 = vpow2.f32 %v10859_v38 }
 0x76e   : > { %11730 = vtanh.f32 %v8637_v59 }
 0x76f   : > { %11732 = vpow2.f32 %v10857_v2 }
 0x770   : > { %11734 = vpow2.f32 %v10860_v6 }
 0x774   : > { %v11723_v58 = vpop.eup %11722 }
 0x775   : > { %v8660_v10 = vadd.f32 1.0, %v11723_v58  ;;  %v11725_v49 = vpop.eup %11724 }
 0x776   : > { %v11727_v42 = vpop.eup %11726  ;;  %v8661_v27 = vadd.f32 1.0, %v11725_v49 }
 0x777   : > { %11736 = vrcp.f32 %v8660_v10  ;;  %v8663_v8 = vadd.f32 1.0, %v11727_v42  ;;  %v11729_v55 = vpop.eup %11728 }
 0x778   : > { %11738 = vtanh.f32 %v8641_v26  ;;  %v8664_v60 = vadd.f32 1.0, %v11729_v55  ;;  %v11731_v35 = vpop.eup %11730  ;;  %v15548_v55 = vld [vmem:[#allocation229_spill] sm:$0xff] }
 0x779   : > { %11740 = vrcp.f32 %v8661_v27  ;;  %v11733_v14 = vpop.eup %11732 }
 0x77a   : > { %11742 = vrcp.f32 %v8663_v8  ;;  %v11735_v63 = vpop.eup %11734  ;;  %v8662_v19 = vadd.f32 1.0, %v11733_v14  ;;  %v15547_v8 = vld [vmem:[#allocation230_spill] sm:$0xff] }
 0x77b   : > { %11744 = vrcp.f32 %v8664_v60  ;;  %v8665_v59 = vadd.f32 1.0, %v11735_v63  ;;  %v15549_v60 = vld [vmem:[#allocation231_spill] sm:$0xff]  ;;  %v15551_v14 = vld [vmem:[#allocation234_spill] sm:$0xff]  ;;  %v15552_v63 = vld [vmem:[#allocation233_spill] sm:$0xff] }
 0x77c   : > { %11746 = vrcp.f32 %v8662_v19  ;;  %v15558_v19 = vld [vmem:[#allocation240_spill] sm:$0xff] }
 0x781   : > { %v11737_v47 = vpop.eup %11736 }
 0x782   : > { %v11739_v53 = vpop.eup %11738  ;;  %v8682_v3 = vmul.f32 %v11737_v47, %v11731_v35  ;;  %v15550_v35 = vld [vmem:[#allocation232_spill] sm:$0xff]  ;;  %v15553_v47 = vld [vmem:[#allocation235_spill] sm:$0xff] }
 0x783   : > { %v11741_v62 = vpop.eup %11740 }
 0x784   : > { %v11743_v11 = vpop.eup %11742  ;;  %v8680_v38 = vmul.f32 %v11741_v62, %v14028_v15  ;;  %v15556_v62 = vld [vmem:[#allocation237_spill] sm:$0xff] }
 0x785   : > { %v8683_v57 = vmul.f32 %v11743_v11, %v11739_v53  ;;  %v11745_v54 = vpop.eup %11744  ;;  %v15554_v53 = vld [vmem:[#allocation236_spill] sm:$0xff]  ;;  %v15557_v11 = vld [vmem:[#allocation239_spill] sm:$0xff] }
 0x786   : > { %v14187_v18 = vadd.f32 %v8682_v3, %v8680_v38  ;;  %v8681_v43 = vmul.f32 %v11745_v54, %v14031_v56  ;;  %v11747_v6 = vpop.eup %11746  ;;  %v15546_v56 = vld [vmem:[#allocation228_spill] sm:$0xff]  ;;  %v15555_v3 = vld [vmem:[#allocation238_spill] sm:$0xff]  ;;  %v15561_v54 = vld [vmem:[#allocation243_spill] sm:$0xff] }
 0x787   : > { %v15559_v38 = vld [vmem:[#allocation242_spill] sm:$0xff] }
 0x788   : > { %11748 = vtanh.f32 %v14187_v18  ;;  %v14191_v2 = vadd.f32 %v8683_v57, %v8681_v43  ;;  %v15560_v57 = vld [vmem:[#allocation241_spill] sm:$0xff]  ;;  %v15563_v43 = vld [vmem:[#allocation246_spill] sm:$0xff] }
 0x789   : > { %11750 = vrcp.f32 %v8665_v59  ;;  %v15562_v59 = vld [vmem:[#allocation244_spill] sm:$0xff] }
 0x78a   : > { %11752 = vtanh.f32 %v14191_v2 }
 0x792   : > { %v11749_v58 = vpop.eup %11748 }
 0x793   : > { %v11751_v26 = vpop.eup %11750  ;;  %v8688_v10 = vmul.f32 %v11749_v58, %v11747_v6  ;;  %v15564_v6 = vld [vmem:[#allocation245_spill] sm:$0xff]  ;;  %v15565_v58 = vld [vmem:[#allocation247_spill] sm:$0xff] }
 0x794   : > { %v11753_v15 = vpop.eup %11752 }
 0x795   : > { %v8689_v49 = vmul.f32 %v11753_v15, %v11751_v26  ;;  %v15566_v26 = vld [vmem:[#allocation248_spill] sm:$0xff]  ;;  %v15567_v15 = vld [vmem:[#allocation250_spill] sm:$0xff] }
 0x797   : > { %v8695_v42 = vpack.c.bf16 %v8689_v49, %v8689_v49  ;;  %v8733_v27 = vpack.c.bf16 %v8689_v49, %v8688_v10  ;;  %v15568_v10 = vld [vmem:[#allocation249_spill] sm:$0xff]  ;;  %v15569_v49 = vld [vmem:[#allocation251_spill] sm:$0xff] }
 0x799   : > { %8766 = vmatprep.mubr.bf16.mxu0 %v8733_v27  ;;  %8809 = vmatprep.mubr.bf16.mxu1 %v8733_v27  ;;  %8699 = vst [vmem:[%s8698_s7 + $0x4] sm:$0xf] %v8695_v42  ;;  %v15570_v42 = vld [vmem:[#allocation252_spill] sm:$0xff] }
 0x79a   : > { %8767 = vmatmul.mubr.bf16.vlgmr.msra.gmra.mrb[16].mxu0 %v14181_v51  ;;  %8810 = vmatmul.mubr.bf16.vlgmr.msra.gmra.mrb[16].mxu1 %v14181_v51 }
 0x79b   : > { %8821 = vmatpush1.bf16.msra.mxu0 %v15454_v44  ;;  %8864 = vmatpush1.bf16.msra.mxu1 %v15455_v21 }
 0x79c   : > { %8852 = vmatprep.mubr.bf16.mxu0 %v8733_v27  ;;  %8895 = vmatprep.mubr.bf16.mxu1 %v8733_v27  ;;  %v15571_v27 = vld [vmem:[#allocation254_spill] sm:$0xff] }
 0x79d   : > { %8822 = vmatprep.subr.bf16.mxu0 %v15456_v32  ;;  %8865 = vmatprep.subr.bf16.mxu1 %v15457_v40 }
 0x79f   : > { %8823 = vmatpush1.bf16.msra.mxu0 %v15458_v0  ;;  %8866 = vmatpush1.bf16.msra.mxu1 %v15459_v36 }
 0x7a0   : > { %8824 = vmatprep.subr.bf16.mxu0 %v15460_v29  ;;  %8867 = vmatprep.subr.bf16.mxu1 %v15461_v13 }
 0x7a3   : > { %8825 = vmatpush1.bf16.msra.mxu0 %v15462_v12  ;;  %8868 = vmatpush1.bf16.msra.mxu1 %v15463_v16 }
 0x7a4   : > { %8826 = vmatprep.subr.bf16.mxu0 %v15464_v52  ;;  %8869 = vmatprep.subr.bf16.mxu1 %v15465_v20 }
 0x7a7   : > { %8827 = vmatpush1.bf16.msra.mxu0 %v15546_v56  ;;  %8870 = vmatpush1.bf16.msra.mxu1 %v15547_v8 }
 0x7a8   : > { %8828 = vmatprep.subr.bf16.mxu0 %v15548_v55  ;;  %8871 = vmatprep.subr.bf16.mxu1 %v15549_v60 }
 0x7ab   : > { %8829 = vmatpush1.bf16.msra.mxu0 %v15550_v35  ;;  %8872 = vmatpush1.bf16.msra.mxu1 %v15551_v14 }
 0x7ac   : > { %8830 = vmatprep.subr.bf16.mxu0 %v15552_v63  ;;  %8873 = vmatprep.subr.bf16.mxu1 %v15553_v47 }
 0x7af   : > { %8831 = vmatpush1.bf16.msra.mxu0 %v15554_v53  ;;  %8874 = vmatpush1.bf16.msra.mxu1 %v15555_v3 }
 0x7b0   : > { %8832 = vmatprep.subr.bf16.mxu0 %v15556_v62  ;;  %8875 = vmatprep.subr.bf16.mxu1 %v15557_v11 }
 0x7b3   : > { %8833 = vmatpush1.bf16.msra.mxu0 %v15558_v19  ;;  %8876 = vmatpush1.bf16.msra.mxu1 %v15559_v38 }
 0x7b4   : > { %8834 = vmatprep.subr.bf16.mxu0 %v15560_v57  ;;  %8877 = vmatprep.subr.bf16.mxu1 %v15561_v54  ;;  %v15572_v54 = vld [vmem:[#allocation253_spill] sm:$0xff] }
 0x7b7   : > { %8835 = vmatpush1.bf16.msra.mxu0 %v15562_v59  ;;  %8878 = vmatpush1.bf16.msra.mxu1 %v15563_v43  ;;  %v15573_v59 = vld [vmem:[#allocation255_spill] sm:$0xff]  ;;  %v15574_v43 = vld [vmem:[#allocation256_spill] sm:$0xff] }
 0x7b8   : > { %8836 = vmatprep.subr.bf16.mxu0 %v15564_v6  ;;  %8879 = vmatprep.subr.bf16.mxu1 %v15565_v58  ;;  %v15575_v6 = vld [vmem:[#allocation258_spill] sm:$0xff] }
 0x7bb   : > { %8837 = vmatpush1.bf16.msra.mxu0 %v15566_v26  ;;  %8880 = vmatpush1.bf16.msra.mxu1 %v15567_v15 }
 0x7bc   : > { %8838 = vmatprep.subr.bf16.mxu0 %v15568_v10  ;;  %8881 = vmatprep.subr.bf16.mxu1 %v15569_v49 }
 0x7bf   : > { %8839 = vmatpush1.bf16.msra.mxu0 %v15570_v42  ;;  %8882 = vmatpush1.bf16.msra.mxu1 %v15571_v27 }
 0x7c0   : > { %8840 = vmatprep.subr.bf16.mxu0 %v15572_v54  ;;  %8883 = vmatprep.subr.bf16.mxu1 %v15573_v59 }
 0x7c3   : > { %8841 = vmatpush1.bf16.msra.mxu0 %v15574_v43  ;;  %8884 = vmatpush1.bf16.msra.mxu1 %v15575_v6 }
 0x7c4   : > { %8842 = vmatprep.subr.bf16.mxu0 %v15496_v46  ;;  %8885 = vmatprep.subr.bf16.mxu1 %v15497_v45 }
 0x7c7   : > { %8843 = vmatpush1.bf16.msra.mxu0 %v15498_v9  ;;  %8886 = vmatpush1.bf16.msra.mxu1 %v15499_v7 }
 0x7c8   : > { %8844 = vmatprep.subr.bf16.mxu0 %v15500_v23  ;;  %8887 = vmatprep.subr.bf16.mxu1 %v15501_v4 }
 0x7cb   : > { %8845 = vmatpush1.bf16.msra.mxu0 %v15502_v25  ;;  %8888 = vmatpush1.bf16.msra.mxu1 %v15503_v41 }
 0x7cc   : > { %8846 = vmatprep.subr.bf16.mxu0 %v15504_v30  ;;  %8889 = vmatprep.subr.bf16.mxu1 %v15505_v37 }
 0x7cf   : > { %8847 = vmatpush1.bf16.msra.mxu0 %v15506_v48  ;;  %8890 = vmatpush1.bf16.msra.mxu1 %v13890_v1  ;;  %v15576_v48 = vld [vmem:[#allocation153_spill] sm:$0xff]  ;;  %v10869_v1 = vld [vmem:[%s14000_s8 + $0x88] sm:$0xff] }
 0x7d0   : > { %8848 = vmatprep.subr.bf16.mxu0 %v13885_v61  ;;  %8891 = vmatprep.subr.bf16.mxu1 %v13895_v33  ;;  %v15577_v33 = vld [vmem:[#allocation151_spill] sm:$0xff]  ;;  %v15586_v61 = vld [vmem:[#allocation162_spill] sm:$0xff]  ;;  %v8710_v30 = vunpack.c.l.bf16 %v10869_v1 }
 0x7d3   : > { %8849 = vmatpush1.bf16.msra.mxu0 %v13900_v28  ;;  %8892 = vmatpush1.bf16.msra.mxu1 %v13910_v24  ;;  %v15578_v28 = vld [vmem:[#allocation154_spill] sm:$0xff]  ;;  %v15579_v24 = vld [vmem:[#allocation152_spill] sm:$0xff] }
 0x7d4   : > { %8850 = vmatprep.subr.bf16.mxu0 %v13905_v39  ;;  %8893 = vmatprep.subr.bf16.mxu1 %v13915_v34  ;;  %v15580_v39 = vld [vmem:[#allocation155_spill] sm:$0xff]  ;;  %v15581_v34 = vld [vmem:[#allocation156_spill] sm:$0xff] }
 0x7d7   : > { %8851 = vmatpush1.bf16.msra.mxu0 %v13920_v17  ;;  %8894 = vmatpush1.bf16.msra.mxu1 %v13926_v31  ;;  %v15582_v17 = vld [vmem:[#allocation158_spill] sm:$0xff]  ;;  %v15583_v31 = vld [vmem:[#allocation157_spill] sm:$0xff] }
 0x7d8   : > { %9062 = vmatprep.subr.bf16.mxu0 %v13281_v22  ;;  %9105 = vmatprep.subr.bf16.mxu1 %v15576_v48  ;;  %v15584_v22 = vld [vmem:[#allocation159_spill] sm:$0xff]  ;;  %v15585_v48 = vld [vmem:[#allocation160_spill] sm:$0xff] }
 0x7da   : > { %8853 = vmatmul.mubr.bf16.vlgmr.msra.gmra.mrb[20].mxu0 %v14181_v51  ;;  %8896 = vmatmul.mubr.bf16.vlgmr.msra.gmra.mrb[20].mxu1 %v14181_v51  ;;  %v15587_v51 = vld [vmem:[#allocation161_spill] sm:$0xff] }
 0x7db   : > { %9063 = vmatpush1.bf16.msra.mxu0 %v15577_v33  ;;  %9106 = vmatpush1.bf16.msra.mxu1 %v15578_v28  ;;  %v15588_v33 = vld [vmem:[#allocation163_spill] sm:$0xff]  ;;  %v15589_v28 = vld [vmem:[#allocation164_spill] sm:$0xff] }
 0x7dc   : > { %9064 = vmatprep.subr.bf16.mxu0 %v15579_v24  ;;  %9107 = vmatprep.subr.bf16.mxu1 %v15580_v39  ;;  %v15590_v24 = vld [vmem:[#allocation166_spill] sm:$0xff]  ;;  %v15591_v39 = vld [vmem:[#allocation165_spill] sm:$0xff] }
 0x7df   : > { %9065 = vmatpush1.bf16.msra.mxu0 %v15581_v34  ;;  %9108 = vmatpush1.bf16.msra.mxu1 %v15582_v17  ;;  %v15592_v34 = vld [vmem:[#allocation167_spill] sm:$0xff]  ;;  %v15593_v17 = vld [vmem:[#allocation168_spill] sm:$0xff] }
 0x7e0   : > { %9066 = vmatprep.subr.bf16.mxu0 %v15583_v31  ;;  %9109 = vmatprep.subr.bf16.mxu1 %v15584_v22  ;;  %v15594_v31 = vld [vmem:[#allocation170_spill] sm:$0xff]  ;;  %v15595_v22 = vld [vmem:[#allocation169_spill] sm:$0xff] }
 0x7e3   : > { %9067 = vmatpush1.bf16.msra.mxu0 %v15585_v48  ;;  %9110 = vmatpush1.bf16.msra.mxu1 %v15586_v61  ;;  %v15596_v48 = vld [vmem:[#allocation171_spill] sm:$0xff]  ;;  %v15597_v61 = vld [vmem:[#allocation172_spill] sm:$0xff] }
 0x7e4   : > { %9068 = vmatprep.subr.bf16.mxu0 %v15587_v51  ;;  %9111 = vmatprep.subr.bf16.mxu1 %v15588_v33  ;;  %v15598_v51 = vld [vmem:[#allocation174_spill] sm:$0xff]  ;;  %v15599_v33 = vld [vmem:[#allocation173_spill] sm:$0xff] }
 0x7e7   : > { %9069 = vmatpush1.bf16.msra.mxu0 %v15589_v28  ;;  %9112 = vmatpush1.bf16.msra.mxu1 %v15590_v24  ;;  %v15600_v28 = vld [vmem:[#allocation175_spill] sm:$0xff]  ;;  %v15601_v24 = vld [vmem:[#allocation176_spill] sm:$0xff] }
 0x7e8   : > { %9070 = vmatprep.subr.bf16.mxu0 %v15591_v39  ;;  %9113 = vmatprep.subr.bf16.mxu1 %v15592_v34  ;;  %v15602_v39 = vld [vmem:[#allocation178_spill] sm:$0xff]  ;;  %v15603_v34 = vld [vmem:[#allocation177_spill] sm:$0xff] }
 0x7eb   : > { %9071 = vmatpush1.bf16.msra.mxu0 %v15593_v17  ;;  %9114 = vmatpush1.bf16.msra.mxu1 %v15594_v31  ;;  %v15604_v17 = vld [vmem:[#allocation179_spill] sm:$0xff]  ;;  %v15605_v31 = vld [vmem:[#allocation180_spill] sm:$0xff] }
 0x7ec   : > { %9072 = vmatprep.subr.bf16.mxu0 %v15595_v22  ;;  %9115 = vmatprep.subr.bf16.mxu1 %v15596_v48  ;;  %v15606_v22 = vld [vmem:[#allocation182_spill] sm:$0xff]  ;;  %v15607_v48 = vld [vmem:[#allocation181_spill] sm:$0xff] }
 0x7ef   : > { %9073 = vmatpush1.bf16.msra.mxu0 %v15597_v61  ;;  %9116 = vmatpush1.bf16.msra.mxu1 %v15598_v51  ;;  %v15608_v61 = vld [vmem:[#allocation183_spill] sm:$0xff]  ;;  %v15609_v51 = vld [vmem:[#allocation184_spill] sm:$0xff] }
 0x7f0   : > { %9074 = vmatprep.subr.bf16.mxu0 %v15599_v33  ;;  %9117 = vmatprep.subr.bf16.mxu1 %v15600_v28  ;;  %v15610_v33 = vld [vmem:[#allocation186_spill] sm:$0xff]  ;;  %v15611_v28 = vld [vmem:[#allocation185_spill] sm:$0xff] }
 0x7f3   : > { %9075 = vmatpush1.bf16.msra.mxu0 %v15601_v24  ;;  %9118 = vmatpush1.bf16.msra.mxu1 %v15602_v39  ;;  %v15612_v24 = vld [vmem:[#allocation187_spill] sm:$0xff]  ;;  %v15613_v39 = vld [vmem:[#allocation188_spill] sm:$0xff] }
 0x7f4   : > { %9076 = vmatprep.subr.bf16.mxu0 %v15603_v34  ;;  %9119 = vmatprep.subr.bf16.mxu1 %v15604_v17  ;;  %v15614_v34 = vld [vmem:[#allocation190_spill] sm:$0xff]  ;;  %v15615_v17 = vld [vmem:[#allocation189_spill] sm:$0xff] }
 0x7f7   : > { %9077 = vmatpush1.bf16.msra.mxu0 %v15605_v31  ;;  %9120 = vmatpush1.bf16.msra.mxu1 %v15606_v22  ;;  %v15616_v31 = vld [vmem:[#allocation191_spill] sm:$0xff]  ;;  %v15617_v22 = vld [vmem:[#allocation192_spill] sm:$0xff] }
 0x7f8   : > { %9078 = vmatprep.subr.bf16.mxu0 %v15607_v48  ;;  %9121 = vmatprep.subr.bf16.mxu1 %v15608_v61  ;;  %v15618_v48 = vld [vmem:[#allocation194_spill] sm:$0xff]  ;;  %v15619_v61 = vld [vmem:[#allocation193_spill] sm:$0xff] }
 0x7fb   : > { %9079 = vmatpush1.bf16.msra.mxu0 %v15609_v51  ;;  %9122 = vmatpush1.bf16.msra.mxu1 %v15610_v33  ;;  %v15620_v51 = vld [vmem:[#allocation195_spill] sm:$0xff]  ;;  %v15621_v33 = vld [vmem:[#allocation196_spill] sm:$0xff] }
 0x7fc   : > { %9080 = vmatprep.subr.bf16.mxu0 %v15611_v28  ;;  %9123 = vmatprep.subr.bf16.mxu1 %v15612_v24  ;;  %v15622_v28 = vld [vmem:[#allocation198_spill] sm:$0xff]  ;;  %v15623_v24 = vld [vmem:[#allocation197_spill] sm:$0xff] }
 0x7ff   : > { %9081 = vmatpush1.bf16.msra.mxu0 %v15613_v39  ;;  %9124 = vmatpush1.bf16.msra.mxu1 %v15614_v34  ;;  %v15624_v39 = vld [vmem:[#allocation199_spill] sm:$0xff]  ;;  %v15625_v34 = vld [vmem:[#allocation200_spill] sm:$0xff] }
 0x800   : > { %9082 = vmatprep.subr.bf16.mxu0 %v15615_v17  ;;  %9125 = vmatprep.subr.bf16.mxu1 %v15616_v31  ;;  %v15626_v17 = vld [vmem:[#allocation202_spill] sm:$0xff]  ;;  %v15627_v31 = vld [vmem:[#allocation201_spill] sm:$0xff] }
 0x803   : > { %9083 = vmatpush1.bf16.msra.mxu0 %v15617_v22  ;;  %9126 = vmatpush1.bf16.msra.mxu1 %v15618_v48  ;;  %v15628_v22 = vld [vmem:[#allocation203_spill] sm:$0xff]  ;;  %v15629_v48 = vld [vmem:[#allocation204_spill] sm:$0xff] }
 0x804   : > { %9084 = vmatprep.subr.bf16.mxu0 %v15619_v61  ;;  %9127 = vmatprep.subr.bf16.mxu1 %v15620_v51  ;;  %v15630_v61 = vld [vmem:[#allocation206_spill] sm:$0xff]  ;;  %v15631_v51 = vld [vmem:[#allocation205_spill] sm:$0xff] }
 0x807   : > { %9085 = vmatpush1.bf16.msra.mxu0 %v15621_v33  ;;  %9128 = vmatpush1.bf16.msra.mxu1 %v15622_v28  ;;  %v15632_v33 = vld [vmem:[#allocation207_spill] sm:$0xff]  ;;  %v15633_v28 = vld [vmem:[#allocation208_spill] sm:$0xff] }
 0x808   : > { %9086 = vmatprep.subr.bf16.mxu0 %v15623_v24  ;;  %9129 = vmatprep.subr.bf16.mxu1 %v15624_v39  ;;  %v15634_v24 = vld [vmem:[#allocation210_spill] sm:$0xff]  ;;  %v15635_v39 = vld [vmem:[#allocation209_spill] sm:$0xff] }
 0x80b   : > { %9087 = vmatpush1.bf16.msra.mxu0 %v15625_v34  ;;  %9130 = vmatpush1.bf16.msra.mxu1 %v15626_v17  ;;  %v15636_v34 = vld [vmem:[#allocation211_spill] sm:$0xff]  ;;  %v15637_v17 = vld [vmem:[#allocation212_spill] sm:$0xff] }
 0x80c   : > { %9088 = vmatprep.subr.bf16.mxu0 %v15627_v31  ;;  %9131 = vmatprep.subr.bf16.mxu1 %v15628_v22  ;;  %v15638_v31 = vld [vmem:[#allocation214_spill] sm:$0xff]  ;;  %v15639_v22 = vld [vmem:[#allocation213_spill] sm:$0xff] }
 0x80f   : > { %9089 = vmatpush1.bf16.msra.mxu0 %v15629_v48  ;;  %9132 = vmatpush1.bf16.msra.mxu1 %v15630_v61  ;;  %v15640_v48 = vld [vmem:[#allocation215_spill] sm:$0xff]  ;;  %v10868_v61 = vld [vmem:[%s14000_s8 + $0x80] sm:$0xff] }
 0x810   : > { %9090 = vmatprep.subr.bf16.mxu0 %v15631_v51  ;;  %9133 = vmatprep.subr.bf16.mxu1 %v15632_v33  ;;  %v10870_v51 = vld [vmem:[%s14000_s8 + $0x90] sm:$0xff]  ;;  %v10871_v33 = vld [vmem:[%s14000_s8 + $0x98] sm:$0xff]  ;;  %v8709_v37 = vunpack.c.l.bf16 %v10868_v61  ;;  %v8713_v41 = vunpack.c.h.bf16 %v10868_v61 }
 0x811   : > { %v8715_v61 = vunpack.c.h.bf16 %v10870_v51 }
 0x813   : > { %9091 = vmatpush1.bf16.msra.mxu0 %v15633_v28  ;;  %9134 = vmatpush1.bf16.msra.mxu1 %v15634_v24  ;;  %v8711_v28 = vunpack.c.l.bf16 %v10870_v51  ;;  %v8712_v24 = vunpack.c.l.bf16 %v10871_v33 }
 0x814   : > { %9092 = vmatprep.subr.bf16.mxu0 %v15635_v39  ;;  %9135 = vmatprep.subr.bf16.mxu1 %v15636_v34  ;;  %v8714_v34 = vunpack.c.h.bf16 %v10869_v1 }
 0x817   : > { %9093 = vmatpush1.bf16.msra.mxu0 %v15637_v17  ;;  %9136 = vmatpush1.bf16.msra.mxu1 %v15638_v31 }
 0x818   : > { %9148 = vmatprep.subr.bf16.mxu0 %v15639_v22  ;;  %9191 = vmatprep.subr.bf16.mxu1 %v15640_v48 }
 0x86d   : > { %v8768_v39 = vpop.f32.mrb[16].mxu0  ;;  %v8811_v25 = vpop.f32.mrb[16].mxu1 }
 0x86e   : > { %v8906_v4 = vadd.f32 %v8768_v39, %v8709_v37  ;;  %v8908_v17 = vadd.f32 %v8811_v25, %v8711_v28  ;;  %v8770_v23 = vpop.f32.mrb[17].mxu0  ;;  %v8813_v31 = vpop.f32.mrb[17].mxu1  ;;  %v8716_v25 = vunpack.c.h.bf16 %v10871_v33 }
 0x86f   : > { %v8907_v7 = vadd.f32 %v8770_v23, %v8710_v30  ;;  %v8909_v22 = vadd.f32 %v8813_v31, %v8712_v24  ;;  %v8772_v9 = vpop.f32.mrb[18].mxu0  ;;  %v8815_v48 = vpop.f32.mrb[18].mxu1 }
 0x870   : > { %v10874_v45 = vmul.f32 -1.442695, %v8906_v4  ;;  %v8910_v46 = vadd.f32 %v8772_v9, %v8713_v41  ;;  %v8774_v6 = vpop.f32.mrb[19].mxu0  ;;  %v8817_v43 = vpop.f32.mrb[19].mxu1  ;;  %v8912_v1 = vadd.f32 %v8815_v48, %v8715_v61  ;;  %v10876_v37 = vmul.f32 -1.442695, %v8908_v17 }
 0x871   : > { %v10875_v59 = vmul.f32 -1.442695, %v8907_v7  ;;  %v8911_v54 = vadd.f32 %v8774_v6, %v8714_v34  ;;  %v8913_v28 = vadd.f32 %v8817_v43, %v8716_v25 }
 0x872   : > { %11754 = vpow2.f32 %v10874_v45  ;;  %v10877_v27 = vmul.f32 -1.442695, %v8910_v46  ;;  %v10879_v23 = vmul.f32 -1.442695, %v8912_v1 }
 0x873   : > { %v10878_v42 = vmul.f32 -1.442695, %v8911_v54  ;;  %11756 = vpow2.f32 %v10875_v59 }
 0x874   : > { %11758 = vpow2.f32 %v10877_v27 }
 0x875   : > { %11760 = vpow2.f32 %v10878_v42 }
 0x876   : > { %11762 = vtanh.f32 %v8909_v22 }
 0x877   : > { %11764 = vpow2.f32 %v10876_v37 }
 0x878   : > { %11766 = vpow2.f32 %v10879_v23 }
 0x87c   : > { %v11755_v30 = vpop.eup %11754 }
 0x87d   : > { %v8932_v4 = vadd.f32 1.0, %v11755_v30  ;;  %v11757_v41 = vpop.eup %11756 }
 0x87e   : > { %v11759_v7 = vpop.eup %11758  ;;  %v8933_v45 = vadd.f32 1.0, %v11757_v41 }
 0x87f   : > { %11768 = vrcp.f32 %v8932_v4  ;;  %v8935_v46 = vadd.f32 1.0, %v11759_v7  ;;  %v11761_v9 = vpop.eup %11760  ;;  %v8721_v7 = vld [vmem:[%s8719_s25 + $0x28] sm:$0xff] }
 0x880   : > { %11770 = vtanh.f32 %v8913_v28  ;;  %v8936_v54 = vadd.f32 1.0, %v11761_v9  ;;  %v11763_v59 = vpop.eup %11762 }
 0x881   : > { %11772 = vrcp.f32 %v8933_v45  ;;  %v11765_v6 = vpop.eup %11764 }
 0x882   : > { %11774 = vrcp.f32 %v8935_v46  ;;  %v11767_v42 = vpop.eup %11766  ;;  %v8934_v39 = vadd.f32 1.0, %v11765_v6  ;;  %v8725_v46 = vunpack.c.l.bf16 %v8721_v7  ;;  %v8729_v6 = vunpack.c.h.bf16 %v8721_v7 }
 0x883   : > { %11776 = vrcp.f32 %v8936_v54  ;;  %v8937_v48 = vadd.f32 1.0, %v11767_v42 }
 0x884   : > { %11778 = vrcp.f32 %v8934_v39 }
 0x889   : > { %v11769_v27 = vpop.eup %11768 }
 0x88a   : > { %v11771_v51 = vpop.eup %11770  ;;  %v8954_v43 = vmul.f32 %v11769_v27, %v11763_v59  ;;  %v8722_v27 = vld [vmem:[%s8719_s25 + $0x30] sm:$0xff] }
 0x88b   : > { %v11773_v33 = vpop.eup %11772 }
 0x88c   : > { %v11775_v24 = vpop.eup %11774  ;;  %v8952_v34 = vmul.f32 %v11773_v33, %v14173_v50 }
 0x88d   : > { %v8955_v17 = vmul.f32 %v11775_v24, %v11771_v51  ;;  %v11777_v31 = vpop.eup %11776 }
 0x88e   : > { %v14333_v22 = vadd.f32 %v8954_v43, %v8952_v34  ;;  %v8953_v61 = vmul.f32 %v11777_v31, %v14177_v5  ;;  %v11779_v25 = vpop.eup %11778  ;;  %v8720_v5 = vld [vmem:[%s8719_s25 + $0x20] sm:$0xff] }
 0x88f   : > { %v8724_v45 = vunpack.c.l.bf16 %v8720_v5  ;;  %v8728_v9 = vunpack.c.h.bf16 %v8720_v5 }
 0x890   : > { %11780 = vtanh.f32 %v14333_v22  ;;  %v14337_v1 = vadd.f32 %v8955_v17, %v8953_v61  ;;  %v8726_v61 = vunpack.c.l.bf16 %v8722_v27 }
 0x891   : > { %11782 = vrcp.f32 %v8937_v48 }
 0x892   : > { %11784 = vtanh.f32 %v14337_v1 }
 0x89a   : > { %v11781_v37 = vpop.eup %11780 }
 0x89b   : > { %v11783_v50 = vpop.eup %11782  ;;  %v8960_v30 = vmul.f32 %v11781_v37, %v11779_v25  ;;  %v8723_v37 = vld [vmem:[%s8719_s25 + $0x38] sm:$0xff] }
 0x89c   : > { %v11785_v23 = vpop.eup %11784 }
 0x89d   : > { %v8961_v28 = vmul.f32 %v11785_v23, %v11783_v50 }
 0x89f   : > { %v9018_v4 = vpack.c.bf16 %v8961_v28, %v8961_v28  ;;  %v14341_v41 = vpack.c.bf16 %v8961_v28, %v8960_v30  ;;  %v8730_v30 = vunpack.c.h.bf16 %v8722_v27 }
 0x8a1   : > { %10888 = vst [vmem:[%s14021_s15 + $0x10] sm:$0xf] %v9018_v4  ;;  %v8727_v4 = vunpack.c.l.bf16 %v8723_v37 }
 0x8ad   : > { %v8854_v54 = vpop.f32.mrb[20].mxu0  ;;  %v8897_v59 = vpop.f32.mrb[20].mxu1 }
 0x8ae   : > { %v8962_v42 = vadd.f32 %v8854_v54, %v8724_v45  ;;  %v8856_v51 = vpop.f32.mrb[21].mxu0  ;;  %v8899_v43 = vpop.f32.mrb[21].mxu1  ;;  %v8964_v5 = vadd.f32 %v8897_v59, %v8726_v61 }
 0x8af   : > { %v8963_v33 = vadd.f32 %v8856_v51, %v8725_v46  ;;  %v8858_v24 = vpop.f32.mrb[22].mxu0  ;;  %v8901_v39 = vpop.f32.mrb[22].mxu1  ;;  %v8965_v45 = vadd.f32 %v8899_v43, %v8727_v4  ;;  %v8731_v46 = vunpack.c.h.bf16 %v8723_v37 }
 0x8b0   : > { %v10880_v34 = vmul.f32 -1.442695, %v8962_v42  ;;  %v8966_v17 = vadd.f32 %v8858_v24, %v8728_v9  ;;  %v8860_v31 = vpop.f32.mrb[23].mxu0  ;;  %v8903_v48 = vpop.f32.mrb[23].mxu1  ;;  %v8968_v7 = vadd.f32 %v8901_v39, %v8730_v30  ;;  %v10882_v54 = vmul.f32 -1.442695, %v8964_v5 }
 0x8b1   : > { %v10881_v25 = vmul.f32 -1.442695, %v8963_v33  ;;  %v8967_v50 = vadd.f32 %v8860_v31, %v8729_v6  ;;  %v8969_v51 = vadd.f32 %v8903_v48, %v8731_v46 }
 0x8b2   : > { %11786 = vpow2.f32 %v10880_v34  ;;  %v10883_v23 = vmul.f32 -1.442695, %v8966_v17  ;;  %v10885_v9 = vmul.f32 -1.442695, %v8968_v7 }
 0x8b3   : > { %v10884_v28 = vmul.f32 -1.442695, %v8967_v50  ;;  %11788 = vpow2.f32 %v10881_v25 }
 0x8b4   : > { %11790 = vpow2.f32 %v10883_v23 }
 0x8b5   : > { %11792 = vpow2.f32 %v10884_v28 }
 0x8b6   : > { %11794 = vtanh.f32 %v8965_v45 }
 0x8b7   : > { %11796 = vpow2.f32 %v10882_v54 }
 0x8b8   : > { %11798 = vpow2.f32 %v10885_v9 }
 0x8bc   : > { %v11787_v42 = vpop.eup %11786 }
 0x8bd   : > { %v8988_v33 = vadd.f32 1.0, %v11787_v42  ;;  %v11789_v6 = vpop.eup %11788 }
 0x8be   : > { %v11791_v24 = vpop.eup %11790  ;;  %v8989_v27 = vadd.f32 1.0, %v11789_v6 }
 0x8bf   : > { %11800 = vrcp.f32 %v8988_v33  ;;  %v8991_v34 = vadd.f32 1.0, %v11791_v24  ;;  %v11793_v59 = vpop.eup %11792 }
 0x8c0   : > { %11802 = vtanh.f32 %v8969_v51  ;;  %v8992_v39 = vadd.f32 1.0, %v11793_v59  ;;  %v11795_v43 = vpop.eup %11794 }
 0x8c1   : > { %11804 = vrcp.f32 %v8989_v27  ;;  %v11797_v17 = vpop.eup %11796  ;;  %v10896_v27 = vld [vmem:[%s14000_s8 + $0xd8] sm:$0xff] }
 0x8c2   : > { %11806 = vrcp.f32 %v8991_v34  ;;  %v11799_v31 = vpop.eup %11798  ;;  %v8990_v23 = vadd.f32 1.0, %v11797_v17 }
 0x8c3   : > { %11808 = vrcp.f32 %v8992_v39  ;;  %v8993_v7 = vadd.f32 1.0, %v11799_v31 }
 0x8c4   : > { %11810 = vrcp.f32 %v8990_v23 }
 0x8c9   : > { %v11801_v61 = vpop.eup %11800 }
 0x8ca   : > { %v11803_v25 = vpop.eup %11802  ;;  %v9010_v48 = vmul.f32 %v11801_v61, %v11795_v43  ;;  %v9040_v43 = vunpack.c.l.bf16 %v10896_v27 }
 0x8cb   : > { %v11805_v37 = vpop.eup %11804 }
 0x8cc   : > { %v11807_v50 = vpop.eup %11806  ;;  %v9008_v30 = vmul.f32 %v11805_v37, %v14187_v18 }
 0x8cd   : > { %v9011_v28 = vmul.f32 %v11807_v50, %v11803_v25  ;;  %v11809_v4 = vpop.eup %11808 }
 0x8ce   : > { %v14347_v5 = vadd.f32 %v9010_v48, %v9008_v30  ;;  %v9009_v45 = vmul.f32 %v11809_v4, %v14191_v2  ;;  %v11811_v54 = vpop.eup %11810  ;;  %v15653_v2 = vld [vmem:[#allocation260_spill] sm:$0xff] }
 0x8d0   : > { %11812 = vtanh.f32 %v14347_v5  ;;  %v14351_v46 = vadd.f32 %v9011_v28, %v9009_v45 }
 0x8d1   : > { %11814 = vrcp.f32 %v8993_v7 }
 0x8d2   : > { %11816 = vtanh.f32 %v14351_v46 }
 0x8da   : > { %v11813_v9 = vpop.eup %11812 }
 0x8db   : > { %v11815_v42 = vpop.eup %11814  ;;  %v9016_v51 = vmul.f32 %v11813_v9, %v11811_v54 }
 0x8dc   : > { %v11817_v18 = vpop.eup %11816 }
 0x8dd   : > { %v9017_v33 = vmul.f32 %v11817_v18, %v11815_v42 }
 0x8df   : > { %v9023_v6 = vpack.c.bf16 %v9017_v33, %v9017_v33  ;;  %v9061_v24 = vpack.c.bf16 %v9017_v33, %v9016_v51 }
 0x8e1   : > { %9094 = vmatprep.mubr.bf16.mxu0 %v9061_v24  ;;  %9137 = vmatprep.mubr.bf16.mxu1 %v9061_v24  ;;  %9027 = vst [vmem:[%s9026_s27 + $0x4] sm:$0xf] %v9023_v6 }
 0x8e2   : > { %9095 = vmatmul.mubr.bf16.vlgmr.msra.gmra.mrb[24].mxu0 %v14341_v41  ;;  %9138 = vmatmul.mubr.bf16.vlgmr.msra.gmra.mrb[24].mxu1 %v14341_v41 }
 0x8e3   : > { %9149 = vmatpush1.bf16.msra.mxu0 %v15454_v44  ;;  %9192 = vmatpush1.bf16.msra.mxu1 %v15455_v21  ;;  %v15641_v44 = vld [vmem:[#allocation243_spill] sm:$0xff]  ;;  %v15642_v21 = vld [vmem:[#allocation244_spill] sm:$0xff] }
 0x8e4   : > { %9180 = vmatprep.mubr.bf16.mxu0 %v9061_v24  ;;  %9223 = vmatprep.mubr.bf16.mxu1 %v9061_v24 }
 0x8e5   : > { %9150 = vmatprep.subr.bf16.mxu0 %v15456_v32  ;;  %9193 = vmatprep.subr.bf16.mxu1 %v15457_v40  ;;  %v15643_v32 = vld [vmem:[#allocation246_spill] sm:$0xff]  ;;  %v15644_v40 = vld [vmem:[#allocation245_spill] sm:$0xff] }
 0x8e7   : > { %9151 = vmatpush1.bf16.msra.mxu0 %v15458_v0  ;;  %9194 = vmatpush1.bf16.msra.mxu1 %v15459_v36  ;;  %v15645_v0 = vld [vmem:[#allocation252_spill] sm:$0xff]  ;;  %v15646_v36 = vld [vmem:[#allocation254_spill] sm:$0xff] }
 0x8e8   : > { %9152 = vmatprep.subr.bf16.mxu0 %v15460_v29  ;;  %9195 = vmatprep.subr.bf16.mxu1 %v15461_v13  ;;  %v15647_v29 = vld [vmem:[#allocation253_spill] sm:$0xff]  ;;  %v15648_v13 = vld [vmem:[#allocation255_spill] sm:$0xff] }
 0x8eb   : > { %9153 = vmatpush1.bf16.msra.mxu0 %v15462_v12  ;;  %9196 = vmatpush1.bf16.msra.mxu1 %v15463_v16  ;;  %v15649_v12 = vld [vmem:[#allocation256_spill] sm:$0xff]  ;;  %v15650_v16 = vld [vmem:[#allocation258_spill] sm:$0xff] }
 0x8ec   : > { %9154 = vmatprep.subr.bf16.mxu0 %v15464_v52  ;;  %9197 = vmatprep.subr.bf16.mxu1 %v15465_v20  ;;  %v15651_v52 = vld [vmem:[#allocation257_spill] sm:$0xff]  ;;  %v15652_v20 = vld [vmem:[#allocation259_spill] sm:$0xff] }
 0x8ef   : > { %9155 = vmatpush1.bf16.msra.mxu0 %v15546_v56  ;;  %9198 = vmatpush1.bf16.msra.mxu1 %v15547_v8  ;;  %v15654_v56 = vld [vmem:[#allocation262_spill] sm:$0xff]  ;;  %v15655_v8 = vld [vmem:[#allocation261_spill] sm:$0xff] }
 0x8f0   : > { %9156 = vmatprep.subr.bf16.mxu0 %v15548_v55  ;;  %9199 = vmatprep.subr.bf16.mxu1 %v15549_v60  ;;  %v15656_v55 = vld [vmem:[#allocation263_spill] sm:$0xff]  ;;  %v15657_v60 = vld [vmem:[#allocation264_spill] sm:$0xff] }
 0x8f3   : > { %9157 = vmatpush1.bf16.msra.mxu0 %v15550_v35  ;;  %9200 = vmatpush1.bf16.msra.mxu1 %v15551_v14  ;;  %v15658_v35 = vld [vmem:[#allocation266_spill] sm:$0xff]  ;;  %v15659_v14 = vld [vmem:[#allocation265_spill] sm:$0xff] }
 0x8f4   : > { %9158 = vmatprep.subr.bf16.mxu0 %v15552_v63  ;;  %9201 = vmatprep.subr.bf16.mxu1 %v15553_v47  ;;  %v15660_v63 = vld [vmem:[#allocation267_spill] sm:$0xff]  ;;  %v15661_v47 = vld [vmem:[#allocation268_spill] sm:$0xff] }
 0x8f7   : > { %9159 = vmatpush1.bf16.msra.mxu0 %v15554_v53  ;;  %9202 = vmatpush1.bf16.msra.mxu1 %v15555_v3  ;;  %v15662_v53 = vld [vmem:[#allocation270_spill] sm:$0xff]  ;;  %v15663_v3 = vld [vmem:[#allocation269_spill] sm:$0xff] }
 0x8f8   : > { %9160 = vmatprep.subr.bf16.mxu0 %v15556_v62  ;;  %9203 = vmatprep.subr.bf16.mxu1 %v15557_v11  ;;  %v15664_v62 = vld [vmem:[#allocation271_spill] sm:$0xff]  ;;  %v15665_v11 = vld [vmem:[#allocation272_spill] sm:$0xff] }
 0x8fb   : > { %9161 = vmatpush1.bf16.msra.mxu0 %v15558_v19  ;;  %9204 = vmatpush1.bf16.msra.mxu1 %v15559_v38  ;;  %v15666_v19 = vld [vmem:[#allocation274_spill] sm:$0xff]  ;;  %v15667_v38 = vld [vmem:[#allocation273_spill] sm:$0xff] }
 0x8fc   : > { %9162 = vmatprep.subr.bf16.mxu0 %v15560_v57  ;;  %9205 = vmatprep.subr.bf16.mxu1 %v15641_v44  ;;  %v15668_v57 = vld [vmem:[#allocation275_spill] sm:$0xff]  ;;  %v9044_v44 = vunpack.c.h.bf16 %v10896_v27 }
 0x8ff   : > { %9163 = vmatpush1.bf16.msra.mxu0 %v15642_v21  ;;  %9206 = vmatpush1.bf16.msra.mxu1 %v15643_v32 }
 0x900   : > { %9164 = vmatprep.subr.bf16.mxu0 %v15644_v40  ;;  %9207 = vmatprep.subr.bf16.mxu1 %v15565_v58  ;;  %v15669_v58 = vld [vmem:[#allocation276_spill] sm:$0xff] }
 0x903   : > { %9165 = vmatpush1.bf16.msra.mxu0 %v15566_v26  ;;  %9208 = vmatpush1.bf16.msra.mxu1 %v15567_v15  ;;  %v15670_v26 = vld [vmem:[#allocation277_spill] sm:$0xff] }
 0x904   : > { %9166 = vmatprep.subr.bf16.mxu0 %v15568_v10  ;;  %9209 = vmatprep.subr.bf16.mxu1 %v15569_v49  ;;  %v10893_v15 = vld [vmem:[%s14000_s8 + $0xc0] sm:$0xff]  ;;  %v10895_v10 = vld [vmem:[%s14000_s8 + $0xd0] sm:$0xff]  ;;  %v10894_v49 = vld [vmem:[%s14000_s8 + $0xc8] sm:$0xff] }
 0x905   : > { %v9037_v34 = vunpack.c.l.bf16 %v10893_v15  ;;  %v9039_v59 = vunpack.c.l.bf16 %v10895_v10  ;;  %v9038_v39 = vunpack.c.l.bf16 %v10894_v49  ;;  %v9041_v17 = vunpack.c.h.bf16 %v10893_v15 }
 0x906   : > { %v9042_v25 = vunpack.c.h.bf16 %v10894_v49  ;;  %v9043_v33 = vunpack.c.h.bf16 %v10895_v10  ;;  %v9049_v49 = vld [vmem:[%s9047_s5 + $0x28] sm:$0xff] }
 0x907   : > { %9167 = vmatpush1.bf16.msra.mxu0 %v15645_v0  ;;  %9210 = vmatpush1.bf16.msra.mxu1 %v15646_v36 }
 0x908   : > { %9168 = vmatprep.subr.bf16.mxu0 %v15647_v29  ;;  %9211 = vmatprep.subr.bf16.mxu1 %v15648_v13 }
 0x90b   : > { %9169 = vmatpush1.bf16.msra.mxu0 %v15649_v12  ;;  %9212 = vmatpush1.bf16.msra.mxu1 %v15650_v16 }
 0x90c   : > { %9170 = vmatprep.subr.bf16.mxu0 %v15651_v52  ;;  %9213 = vmatprep.subr.bf16.mxu1 %v15652_v20 }
 0x90f   : > { %9171 = vmatpush1.bf16.msra.mxu0 %v15653_v2  ;;  %9214 = vmatpush1.bf16.msra.mxu1 %v15654_v56 }
 0x910   : > { %9172 = vmatprep.subr.bf16.mxu0 %v15655_v8  ;;  %9215 = vmatprep.subr.bf16.mxu1 %v15656_v55 }
 0x913   : > { %9173 = vmatpush1.bf16.msra.mxu0 %v15657_v60  ;;  %9216 = vmatpush1.bf16.msra.mxu1 %v15658_v35 }
 0x914   : > { %9174 = vmatprep.subr.bf16.mxu0 %v15659_v14  ;;  %9217 = vmatprep.subr.bf16.mxu1 %v15660_v63 }
 0x917   : > { %9175 = vmatpush1.bf16.msra.mxu0 %v15661_v47  ;;  %9218 = vmatpush1.bf16.msra.mxu1 %v15662_v53 }
 0x918   : > { %9176 = vmatprep.subr.bf16.mxu0 %v15663_v3  ;;  %9219 = vmatprep.subr.bf16.mxu1 %v15664_v62 }
 0x91b   : > { %9177 = vmatpush1.bf16.msra.mxu0 %v15665_v11  ;;  %9220 = vmatpush1.bf16.msra.mxu1 %v15666_v19 }
 0x91c   : > { %9178 = vmatprep.subr.bf16.mxu0 %v15667_v38  ;;  %9221 = vmatprep.subr.bf16.mxu1 %v15668_v57 }
 0x91f   : > { %9179 = vmatpush1.bf16.msra.mxu0 %v15669_v58  ;;  %9222 = vmatpush1.bf16.msra.mxu1 %v15670_v26 }
 0x922   : > { %9181 = vmatmul.mubr.bf16.vlgmr.msra.gmra.mrb[28].mxu0 %v14341_v41  ;;  %9224 = vmatmul.mubr.bf16.vlgmr.msra.gmra.mrb[28].mxu1 %v14341_v41 }
 0x9b5   : > { %v9096_v31 = vpop.f32.mrb[24].mxu0  ;;  %v9139_v61 = vpop.f32.mrb[24].mxu1 }
 0x9b6   : > { %v9234_v48 = vadd.f32 %v9096_v31, %v9037_v34  ;;  %v9236_v37 = vadd.f32 %v9139_v61, %v9039_v59  ;;  %v9098_v50 = vpop.f32.mrb[25].mxu0  ;;  %v9141_v23 = vpop.f32.mrb[25].mxu1  ;;  %v9053_v34 = vunpack.c.l.bf16 %v9049_v49  ;;  %v9050_v31 = vld [vmem:[%s9047_s5 + $0x30] sm:$0xff] }
 0x9b7   : > { %v9235_v30 = vadd.f32 %v9098_v50, %v9038_v39  ;;  %v9237_v28 = vadd.f32 %v9141_v23, %v9040_v43  ;;  %v9100_v4 = vpop.f32.mrb[26].mxu0  ;;  %v9143_v41 = vpop.f32.mrb[26].mxu1 }
 0x9b8   : > { %v10899_v7 = vmul.f32 -1.442695, %v9234_v48  ;;  %v9238_v45 = vadd.f32 %v9100_v4, %v9041_v17  ;;  %v9102_v54 = vpop.f32.mrb[27].mxu0  ;;  %v9145_v9 = vpop.f32.mrb[27].mxu1  ;;  %v9240_v24 = vadd.f32 %v9143_v41, %v9043_v33  ;;  %v10901_v21 = vmul.f32 -1.442695, %v9236_v37 }
 0x9b9   : > { %v10900_v42 = vmul.f32 -1.442695, %v9235_v30  ;;  %v9239_v18 = vadd.f32 %v9102_v54, %v9042_v25  ;;  %v9241_v0 = vadd.f32 %v9145_v9, %v9044_v44  ;;  %v9051_v54 = vld [vmem:[%s9047_s5 + $0x38] sm:$0xff] }
 0x9ba   : > { %11818 = vpow2.f32 %v10899_v7  ;;  %v10902_v51 = vmul.f32 -1.442695, %v9238_v45  ;;  %v10904_v32 = vmul.f32 -1.442695, %v9240_v24  ;;  %v9054_v7 = vunpack.c.l.bf16 %v9050_v31 }
 0x9bb   : > { %v10903_v6 = vmul.f32 -1.442695, %v9239_v18  ;;  %11820 = vpow2.f32 %v10900_v42  ;;  %v9058_v18 = vunpack.c.h.bf16 %v9050_v31  ;;  %v9055_v33 = vunpack.c.l.bf16 %v9051_v54 }
 0x9bc   : > { %11822 = vpow2.f32 %v10902_v51 }
 0x9bd   : > { %11824 = vpow2.f32 %v10903_v6 }
 0x9be   : > { %11826 = vtanh.f32 %v9237_v28 }
 0x9bf   : > { %11828 = vpow2.f32 %v10901_v21  ;;  %v9059_v21 = vunpack.c.h.bf16 %v9051_v54  ;;  %v11906_v54 = vld [vmem:[#allocation9 + $0x10] sm:$0xff] (%p7392_p0)  }
 0x9c0   : > { %11830 = vpow2.f32 %v10904_v32 }
 0x9c4   : > { %v11819_v40 = vpop.eup %11818 }
 0x9c5   : > { %v9260_v36 = vadd.f32 1.0, %v11819_v40  ;;  %v11821_v29 = vpop.eup %11820 }
 0x9c6   : > { %v11823_v13 = vpop.eup %11822  ;;  %v9261_v12 = vadd.f32 1.0, %v11821_v29 }
 0x9c7   : > { %11832 = vrcp.f32 %v9260_v36  ;;  %v9263_v16 = vadd.f32 1.0, %v11823_v13  ;;  %v11825_v52 = vpop.eup %11824 }
 0x9c8   : > { %11834 = vtanh.f32 %v9241_v0  ;;  %v9264_v20 = vadd.f32 1.0, %v11825_v52  ;;  %v11827_v2 = vpop.eup %11826 }
 0x9c9   : > { %11836 = vrcp.f32 %v9261_v12  ;;  %v11829_v56 = vpop.eup %11828 }
 0x9ca   : > { %11838 = vrcp.f32 %v9263_v16  ;;  %v11831_v8 = vpop.eup %11830  ;;  %v9262_v63 = vadd.f32 1.0, %v11829_v56 }
 0x9cb   : > { %11840 = vrcp.f32 %v9264_v20  ;;  %v9265_v11 = vadd.f32 1.0, %v11831_v8 }
 0x9cc   : > { %11842 = vrcp.f32 %v9262_v63 }
 0x9d1   : > { %v11833_v55 = vpop.eup %11832 }
 0x9d2   : > { %v11835_v60 = vpop.eup %11834  ;;  %v9282_v35 = vmul.f32 %v11833_v55, %v11827_v2 }
 0x9d3   : > { %v11837_v14 = vpop.eup %11836 }
 0x9d4   : > { %v11839_v47 = vpop.eup %11838  ;;  %v9280_v53 = vmul.f32 %v11837_v14, %v14333_v22 }
 0x9d5   : > { %v9283_v3 = vmul.f32 %v11839_v47, %v11835_v60  ;;  %v11841_v62 = vpop.eup %11840 }
 0x9d6   : > { %v14427_v61 = vadd.f32 %v9282_v35, %v9280_v53   ;;  %v9281_v19 = vmul.f32 %v11841_v62, %v14337_v1  ;;  %v11843_v38 = vpop.eup %11842  ;;  %v9048_v1 = vld [vmem:[%s9047_s5 + $0x20] sm:$0xff] }
 0x9d7   : > { %v9052_v27 = vunpack.c.l.bf16 %v9048_v1  ;;  %v9056_v59 = vunpack.c.h.bf16 %v9048_v1 }
 0x9d8   : > { %11844 = vtanh.f32 %v14427_v61  ;;  %v14431_v53 = vadd.f32 %v9283_v3, %v9281_v19   ;;  %v11891_v61 = vld [vmem:[#allocation12 + $0x20] sm:$0xff] (%p7392_p0)  }
 0x9d9   : > { %11846 = vrcp.f32 %v9265_v11 }
 0x9da   : > { %11848 = vtanh.f32 %v14431_v53  ;;  %v11898_v53 = vld [vmem:[#allocation9 + $0x48] sm:$0xff] (%p7392_p0)  }
 0x9e2   : > { %v11845_v22 = vpop.eup %11844 }
 0x9e3   : > { %v14434_v15 = vmul.f32 %v11845_v22, %v11843_v38   ;;  %v11847_v58 = vpop.eup %11846 }
 0x9e4   : > { %v11849_v26 = vpop.eup %11848 }
 0x9e5   : > { %v15671_v57 = vmov %v14434_v15  ;;  %v14436_v56 = vmul.f32 %v11849_v26, %v11847_v58   ;;  %v9057_v15 = vunpack.c.h.bf16 %v9049_v49 }
 0x9e7   : > { %v9346_v10 = vpack.c.bf16 %v14436_v56, %v14436_v56  ;;  %v11892_v56 = vld [vmem:[#allocation12 + $0x68] sm:$0xff] (%p7392_p0)  }
 0x9e9   : > { %10913 = vst [vmem:[%s14021_s15 + $0x18] sm:$0xf] %v9346_v10 }
 0x9f5   : > { %v9182_v39 = vpop.f32.mrb[28].mxu0  ;;  %v9225_v43 = vpop.f32.mrb[28].mxu1 }
 0x9f6   : > { %v9290_v17 = vadd.f32 %v9182_v39, %v9052_v27  ;;  %v9184_v25 = vpop.f32.mrb[29].mxu0  ;;  %v9227_v48 = vpop.f32.mrb[29].mxu1  ;;  %v9292_v6 = vadd.f32 %v9225_v43, %v9054_v7  ;;  %v11883_v43 = vld [vmem:[#allocation12] sm:$0xff] (%p7392_p0)   ;;  %v11900_v7 = vld [vmem:[#allocation12 + $0x78] sm:$0xff] (%p7392_p0)  }
 0x9f7   : > { %v9291_v37 = vadd.f32 %v9184_v25, %v9053_v34  ;;  %v9186_v50 = vpop.f32.mrb[30].mxu0  ;;  %v9229_v23 = vpop.f32.mrb[30].mxu1  ;;  %v9293_v44 = vadd.f32 %v9227_v48, %v9055_v33  ;;  %v11886_v25 = vld [vmem:[#allocation12 + $0x50] sm:$0xff] (%p7392_p0)  }
 0x9f8   : > { %v10905_v30 = vmul.f32 -1.442695, %v9290_v17  ;;  %v9294_v28 = vadd.f32 %v9186_v50, %v9056_v59  ;;  %v9188_v4 = vpop.f32.mrb[31].mxu0  ;;  %v9231_v41 = vpop.f32.mrb[31].mxu1  ;;  %v9296_v24 = vadd.f32 %v9229_v23, %v9058_v18  ;;  %v10907_v32 = vmul.f32 -1.442695, %v9292_v6 }
 0x9f9   : > { %v10906_v45 = vmul.f32 -1.442695, %v9291_v37  ;;  %v9295_v9 = vadd.f32 %v9188_v4, %v9057_v15  ;;  %v9297_v36 = vadd.f32 %v9231_v41, %v9059_v21  ;;  %v15673_v15 = vmov %v15671_v57  ;;  %v11885_v17 = vld [vmem:[#allocation12 + $0x8] sm:$0xff] (%p7392_p0)   ;;  %v11887_v48 = vld [vmem:[#allocation12 + $0x10] sm:$0xff] (%p7392_p0)   ;;  %v11888_v37 = vld [vmem:[#allocation12 + $0x58] sm:$0xff] (%p7392_p0)  }
 0x9fa   : > { %11850 = vpow2.f32 %v10905_v30  ;;  %v10908_v42 = vmul.f32 -1.442695, %v9294_v28  ;;  %v10910_v40 = vmul.f32 -1.442695, %v9296_v24  ;;  %v11884_v15 = vld [vmem:[#allocation12 + $0x48] sm:$0xff] (%p7392_p0)   ;;  %v11889_v50 = vld [vmem:[#allocation12 + $0x18] sm:$0xff] (%p7392_p0)  }
 0x9fb   : > { %v10909_v51 = vmul.f32 -1.442695, %v9295_v9  ;;  %11852 = vpow2.f32 %v10906_v45  ;;  %v11890_v30 = vld [vmem:[#allocation12 + $0x60] sm:$0xff] (%p7392_p0)   ;;  %v11897_v41 = vld [vmem:[#allocation12 + $0x30] sm:$0xff] (%p7392_p0)  }
 0x9fc   : > { %11854 = vpow2.f32 %v10908_v42  ;;  %v11894_v28 = vld [vmem:[#allocation9 + $0x40] sm:$0xff] (%p7392_p0)   ;;  %v11907_v9 = vld [vmem:[#allocation9 + $0x58] sm:$0xff] (%p7392_p0)   ;;  %v11914_v24 = vld [vmem:[#allocation9 + $0x68] sm:$0xff] (%p7392_p0)  }
 0x9fd   : > { %11856 = vpow2.f32 %v10909_v51  ;;  %v11895_v4 = vld [vmem:[#allocation9] sm:$0xff] (%p7392_p0)   ;;  %10976 = vmatprep.subr.bf16.mxu0 (%p7392_p0), %v11894_v28  ;;  %v11908_v42 = vld [vmem:[#allocation9 + $0x18] sm:$0xff] (%p7392_p0)   ;;  %v11915_v21 = vld [vmem:[#allocation9 + $0x28] sm:$0xff] (%p7392_p0)  }
 0x9fe   : > { %11858 = vtanh.f32 %v9293_v44  ;;  %10977 = vmatpush3.bf16.msra.mxu0 (%p7392_p0), %v11895_v4  ;;  %v11909_v18 = vld [vmem:[#allocation9 + $0x60] sm:$0xff] (%p7392_p0)  }
 0x9ff   : > { %11860 = vpow2.f32 %v10907_v32  ;;  %10978 = vmatprep.subr.bf16.mxu0 (%p7392_p0), %v11898_v53  ;;  %v11901_v51 = vld [vmem:[#allocation12 + $0x38] sm:$0xff] (%p7392_p0)   ;;  %v11916_v32 = vld [vmem:[#allocation9 + $0x70] sm:$0xff] (%p7392_p0)  }
 0xa00   : > { %11862 = vpow2.f32 %v10910_v40  ;;  %v11912_v6 = vld [vmem:[#allocation9 + $0x20] sm:$0xff] (%p7392_p0)   ;;  %v11919_v40 = vld [vmem:[#allocation9 + $0x30] sm:$0xff] (%p7392_p0)  }
 0xa04   : > { %v11851_v0 = vpop.eup %11850 }
 0xa05   : > { %v9316_v29 = vadd.f32 1.0, %v11851_v0  ;;  %v11853_v13 = vpop.eup %11852 }
 0xa06   : > { %v11855_v12 = vpop.eup %11854  ;;  %v9317_v16 = vadd.f32 1.0, %v11853_v13  ;;  %v11922_v13 = vld [vmem:[#allocation9 + $0x38] sm:$0xff] (%p7392_p0)  }
 0xa07   : > { %11864 = vrcp.f32 %v9316_v29  ;;  %v9319_v52 = vadd.f32 1.0, %v11855_v12  ;;  %v11857_v20 = vpop.eup %11856  ;;  %v9356_v12 = vpack.c.bf16 (%p7392_p0), %v15671_v57, %v15671_v57 }
 0xa08   : > { %11866 = vtanh.f32 %v9297_v36  ;;  %v9320_v2 = vadd.f32 1.0, %v11857_v20  ;;  %v11859_v8 = vpop.eup %11858  ;;  %v11921_v36 = vld [vmem:[#allocation9 + $0x78] sm:$0xff] (%p7392_p0)  }
 0xa09   : > { %11868 = vrcp.f32 %v9317_v16  ;;  %v11861_v55 = vpop.eup %11860 }
 0xa0a   : > { %11870 = vrcp.f32 %v9319_v52  ;;  %v11863_v60 = vpop.eup %11862  ;;  %v9318_v3 = vadd.f32 1.0, %v11861_v55 }
 0xa0b   : > { %11872 = vrcp.f32 %v9320_v2  ;;  %v9321_v22 = vadd.f32 1.0, %v11863_v60 }
 0xa0c   : > { %11874 = vrcp.f32 %v9318_v3 }
 0xa11   : > { %v11865_v35 = vpop.eup %11864 }
 0xa12   : > { %v11867_v14 = vpop.eup %11866  ;;  %v9338_v63 = vmul.f32 %v11865_v35, %v11859_v8  ;;  %v10933_v8 = vld [vmem:[#allocation14] ss:$0 sm:$0xff] (%p7392_p0) }
 0xa13   : > { %v11869_v47 = vpop.eup %11868 }
 0xa14   : > { %v11871_v62 = vpop.eup %11870  ;;  %v9336_v11 = vmul.f32 %v11869_v47, %v14347_v5 }
 0xa15   : > { %v9339_v19 = vmul.f32 %v11871_v62, %v11867_v14  ;;  %v11873_v38 = vpop.eup %11872 }
 0xa16   : > { %v9340_v39 = vadd.f32 %v9338_v63, %v9336_v11   ;;  %v9337_v58 = vmul.f32 %v11873_v38, %v14351_v46  ;;  %v11875_v26 = vpop.eup %11874  ;;  %v11882_v46 = vld [vmem:[#allocation12 + $0x40] sm:$0xff] (%p7392_p0)  }
 0xa17   :  { %10998 = vmatprep.subr.bf16.mxu1 (%p7392_p0), %v11882_v46 }
 0xa18   : > { %11876 = vtanh.f32 %v9340_v39  ;;  %v9341_v23 = vadd.f32 %v9339_v19, %v9337_v58   ;;  %10999 = vmatpush3.bf16.msra.mxu1 (%p7392_p0), %v11883_v43  ;;  %v11893_v39 = vld [vmem:[#allocation12 + $0x28] sm:$0xff] (%p7392_p0)  }
 0xa19   : > { %11878 = vrcp.f32 %v9321_v22  ;;  %11000 = vmatprep.subr.bf16.mxu1 (%p7392_p0), %v11884_v15 }
 0xa1a   : > { %11880 = vtanh.f32 %v9341_v23  ;;  %v11902_v23 = vld [vmem:[#allocation9 + $0x50] sm:$0xff] (%p7392_p0)  }
 0xa1c   :  { %11001 = vmatpush3.bf16.msra.mxu1 (%p7392_p0), %v11885_v17 }
 0xa1d   :  { %11002 = vmatprep.subr.bf16.mxu1 (%p7392_p0), %v11886_v25 }
 0xa20   :  { %11003 = vmatpush3.bf16.msra.mxu1 (%p7392_p0), %v11887_v48 }
 0xa21   :  { %11004 = vmatprep.subr.bf16.mxu1 (%p7392_p0), %v11888_v37 }
 0xa22   : > { %v11877_v10 = vpop.eup %11876 }
 0xa23   : > { %v9344_v1 = vmul.f32 %v11877_v10, %v11875_v26   ;;  %v11879_v49 = vpop.eup %11878  ;;  %7394 = sbr.rel (!%p7392_p0) target bundleno = 1211 (0x4bb), region = 115 }
 0xa24   : > { %v11881_v27 = vpop.eup %11880  ;;  %11005 = vmatpush3.bf16.msra.mxu1 (%p7392_p0), %v11889_v50 }
 0xa25   : > { %v9345_v31 = vmul.f32 %v11881_v27, %v11879_v49   ;;  %v15672_v34 = vmov %v9344_v1  ;;  %v9357_v59 = vpack.c.bf16 (%p7392_p0), %v9344_v1, %v9344_v1  ;;  %11006 = vmatprep.subr.bf16.mxu1 (%p7392_p0), %v11890_v30  ;;  %v10916_v1 = vld [vmem:[#allocation11] ss:$0 sm:$0xff] (%p7392_p0) }
 0xa26   :  { %v11899_v34 = vld [vmem:[#allocation9 + $0x8] sm:$0xff] (%p7392_p0)  }
 0xa27   : > { %v9351_v5 = vpack.c.bf16 %v9345_v31, %v9345_v31  ;;  %9525 = vmatprep.mubr.bf16.mxu0 (%p7392_p0), %v9357_v59  ;;  %v11896_v31 = vld [vmem:[#allocation12 + $0x70] sm:$0xff] (%p7392_p0)   ;;  %10979 = vmatpush3.bf16.msra.mxu0 (%p7392_p0), %v11899_v34 }
 0xa28   :  { %11007 = vmatpush3.bf16.msra.mxu1 (%p7392_p0), %v11891_v61  ;;  %10980 = vmatprep.subr.bf16.mxu0 (%p7392_p0), %v11902_v23 }
 0xa29   : > { %9355 = vst [vmem:[%s9354_s30 + $0x4] sm:$0xf] %v9351_v5  ;;  %11008 = vmatprep.subr.bf16.mxu1 (%p7392_p0), %v11892_v56 }
 0xa2b   :  { %10981 = vmatpush3.bf16.msra.mxu0 %v11906_v54 }
 0xa2c   :  { %11009 = vmatpush3.bf16.msra.mxu1 %v11893_v39  ;;  %10982 = vmatprep.subr.bf16.mxu0 %v11907_v9 }
 0xa2d   :  { %11010 = vmatprep.subr.bf16.mxu1 %v11896_v31 }
 0xa2f   :  { %10983 = vmatpush3.bf16.msra.mxu0 %v11908_v42 }
 0xa30   :  { %v11905_v45 = vld [vmem:[#allocation3 + $0x4] ss:$8 sps:$4 sm:$0xff]   ;;  %11011 = vmatpush3.bf16.msra.mxu1 %v11897_v41  ;;  %v11903_v33 = vld [vmem:[#allocation3] ss:$8 sps:$4 sm:$0xff]   ;;  %10984 = vmatprep.subr.bf16.mxu0 %v11909_v18  ;;  %v11910_v44 = vld [vmem:[#allocation3 + $0x14] ss:$8 sps:$4 sm:$0xff]  }
 0xa31   :  { %9749 = vmatprep.mubr.bf16.mxu1 %v11905_v45  ;;  %11012 = vmatprep.subr.bf16.mxu1 %v11900_v7  ;;  %v11913_v0 = vld [vmem:[#allocation3 + $0x10] ss:$8 sps:$4 sm:$0xff]   ;;  %v11917_v29 = vld [vmem:[#allocation3 + $0x24] ss:$8 sps:$4 sm:$0xff]   ;;  %v11920_v16 = vld [vmem:[#allocation3 + $0x20] ss:$8 sps:$4 sm:$0xff]  }
 0xa32   :  { %v11923_v52 = vld [vmem:[#allocation3 + $0x34] ss:$8 sps:$4 sm:$0xff]   ;;  %v11925_v20 = vld [vmem:[#allocation3 + $0x30] ss:$8 sps:$4 sm:$0xff]  }
 0xa33   :  { %10985 = vmatpush3.bf16.msra.mxu0 %v11912_v6 }
 0xa34   :  { %11013 = vmatpush3.bf16.msra.mxu1 %v11901_v51  ;;  %10986 = vmatprep.subr.bf16.mxu0 %v11914_v24 }
 0xa37   :  { %9750 = vmatmul.mubr.bf16.vlgmr.msra.gmra.mrb[0].mxu1 %v11903_v33  ;;  %10987 = vmatpush3.bf16.msra.mxu0 %v11915_v21 }
 0xa38   :  { %9757 = vmatprep.mubr.bf16.mxu1 %v11910_v44  ;;  %10988 = vmatprep.subr.bf16.mxu0 %v11916_v32 }
 0xa3b   :  { %10989 = vmatpush3.bf16.msra.mxu0 %v11919_v40 }
 0xa3c   :  { %10990 = vmatprep.subr.bf16.mxu0 %v11921_v36 }
 0xa3f   :  { %9758 = vmatmul.mubr.bf16.gmra.mrb[4].mxu1 %v11913_v0  ;;  %10991 = vmatpush3.bf16.msra.mxu0 %v11922_v13 }
 0xa40   :  { %9765 = vmatprep.mubr.bf16.mxu1 %v11917_v29 }
 0xa42   :  { %9526 = vmatmul.mubr.bf16.vlgmr.msra.gmra.mrb[0].mxu0 %v9356_v12 }
 0xa47   :  { %9766 = vmatmul.mubr.bf16.gmra.mrb[8].mxu1 %v11920_v16 }
 0xa48   :  { %9773 = vmatprep.mubr.bf16.mxu1 %v11923_v52 }
 0xa4f   :  { %9774 = vmatmul.mubr.bf16.gmra.mrb[12].mxu1 %v11925_v20 }
 0xb0a   :  { %v11014_v2 = vpop.f32.mrb[0].mxu1 }
 0xb0b   :  { %v11015_v55 = vpop.f32.mrb[1].mxu1 }
 0xb0c   :  { %v11016_v60 = vadd.f32 %v11015_v55, %v11014_v2  ;;  %v11017_v35 = vpop.f32.mrb[2].mxu1 }
 0xb0d   :  { %v11018_v14 = vpop.f32.mrb[3].mxu1 }
 0xb0e   :  { %v9752_v63 = vadd.f32 %v11016_v60, %v10933_v8  ;;  %v11019_v47 = vadd.f32 %v11018_v14, %v11017_v35 }
 0xb10   :  { %9783 = vst.msk [vmem:[%s14518_s10] sm:$0xff] %vm9782_vm0, %v9752_v63  ;;  %v9755_v57 = vadd.f32 %v11019_v47, %v10933_v8 }
 0xb12   :  { %9784 = vst.msk [vmem:[%s14518_s10 + $0x8] sm:$0xff] %vm9782_vm0, %v9755_v57  ;;  %v11020_v3 = vpop.f32.mrb[4].mxu1 }
 0xb13   :  { %v11021_v62 = vpop.f32.mrb[5].mxu1 }
 0xb14   :  { %v11022_v11 = vadd.f32 %v11021_v62, %v11020_v3  ;;  %v11023_v19 = vpop.f32.mrb[6].mxu1 }
 0xb15   :  { %v11024_v38 = vpop.f32.mrb[7].mxu1  ;;  %v10992_v10 = vpop.f32.mrb[0].mxu0 }
 0xb16   :  { %v9760_v22 = vadd.f32 %v11022_v11, %v10933_v8  ;;  %v11025_v58 = vadd.f32 %v11024_v38, %v11023_v19  ;;  %v10993_v49 = vpop.f32.mrb[1].mxu0 }
 0xb17   :  { %v10994_v5 = vadd.f32 %v10993_v49, %v10992_v10  ;;  %v10995_v46 = vpop.f32.mrb[2].mxu0 }
 0xb18   :  { %9785 = vst.msk [vmem:[%s14518_s10 + $0x10] sm:$0xff] %vm9782_vm0, %v9760_v22  ;;  %v9763_v26 = vadd.f32 %v11025_v58, %v10933_v8  ;;  %v10996_v43 = vpop.f32.mrb[3].mxu0 }
 0xb19   :  { %v9528_v25 = vadd.f32 %v10994_v5, %v10916_v1 }
 0xb1a   :  { %9786 = vst.msk [vmem:[%s14518_s10 + $0x18] sm:$0xff] %vm9782_vm0, %v9763_v26  ;;  %v11026_v27 = vpop.f32.mrb[8].mxu1 }
 0xb1b   :  { %v11027_v59 = vpop.f32.mrb[9].mxu1  ;;  %9533 = vst [vmem:[%s14517_s9] sm:$0xff] %v9528_v25 }
 0xb1c   :  { %v11028_v15 = vadd.f32 %v11027_v59, %v11026_v27  ;;  %v11029_v17 = vpop.f32.mrb[10].mxu1 }
 0xb1d   :  { %v11030_v48 = vpop.f32.mrb[11].mxu1 }
 0xb1e   :  { %v9768_v37 = vadd.f32 %v11028_v15, %v10933_v8  ;;  %v11031_v50 = vadd.f32 %v11030_v48, %v11029_v17 }
 0xb20   :  { %9787 = vst.msk [vmem:[%s14518_s10 + $0x20] sm:$0xff] %vm9782_vm0, %v9768_v37  ;;  %v9771_v30 = vadd.f32 %v11031_v50, %v10933_v8 }
 0xb22   :  { %9788 = vst.msk [vmem:[%s14518_s10 + $0x28] sm:$0xff] %vm9782_vm0, %v9771_v30  ;;  %v11032_v28 = vpop.f32.mrb[12].mxu1 }
 0xb23   :  { %v11033_v4 = vpop.f32.mrb[13].mxu1 }
 0xb24   :  { %v11034_v61 = vadd.f32 %v11033_v4, %v11032_v28  ;;  %v11035_v56 = vpop.f32.mrb[14].mxu1 }
 0xb25   :  { %v11036_v53 = vpop.f32.mrb[15].mxu1 }
 0xb26   :  { %v9776_v34 = vadd.f32 %v11034_v61, %v10933_v8  ;;  %v11037_v39 = vadd.f32 %v11036_v53, %v11035_v56 }
 0xb28   :  { %9789 = vst.msk [vmem:[%s14518_s10 + $0x30] sm:$0xff] %vm9782_vm0, %v9776_v34  ;;  %v9779_v31 = vadd.f32 %v11037_v39, %v10933_v8 }
 0xb2a   :  { %9790 = vst.msk [vmem:[%s14518_s10 + $0x38] sm:$0xff] %vm9782_vm0, %v9779_v31 }
 0xb2b   :  { %9799 = vsyncpa [#allocation5], 1 }
 0xb2c   :  { %9800 = vsyncpa [#allocation7], 1 }
 0xb2d   :  { %9801 = vsyncpa [#allocation10], 1 }
 0xb2e   :  { %9802 = vsyncpa [#allocation13], 1 }

</bundles_post_ra>
